<compile_context>
chip_gen: v6e
topology: v6e:2x2x1
jax: 0.10.0
libtpu: 0.0.40
codegen_flags: <defaults>
</compile_context>

<pallas_src>
import jax
import jax.numpy as jnp
from jax.experimental import pallas as pl
from jax.experimental.pallas import tpu as pltpu

HIDDEN = 768  # fixed by the module (nn.Linear(768, 768))


def _contrast_proj_kernel(x_ref, w1_ref, b1_ref, w2_ref, b2_ref, o_ref):
    # x_ref:  (tm, 768)   input token tile (pipelined)
    # w1_ref: (768, 768)  first linear weight (in, out)   -- resident, single-buffered
    # b1_ref: (1, 768)    first linear bias (f32)
    # w2_ref: (768, 768)  second linear weight (in, out)  -- resident, single-buffered
    # b2_ref: (1, 768)    second linear bias (f32)
    # o_ref:  (tm, 768)   output tile (lane-dense: 768 = 6*128)

    # Cast activations to the weight dtype so the MXU runs at that dtype's rate
    # (bf16 weights -> bf16 matmul even when tokens arrive as f32).
    x = x_ref[...].astype(w1_ref.dtype)

    # Linear 1: MXU matmul, f32 accumulation; bias + ReLU on the VPU in f32.
    h = jnp.dot(x, w1_ref[...], preferred_element_type=jnp.float32)
    h = jnp.maximum(h + b1_ref[...], 0.0)  # biases are already f32

    # Linear 2: operands in the weight dtype, f32 accumulation.
    h = h.astype(w2_ref.dtype)
    y = jnp.dot(h, w2_ref[...], preferred_element_type=jnp.float32)
    y = y + b2_ref[...]

    o_ref[...] = y.astype(o_ref.dtype)


def _pick_tm(M, compute_dtype):
    """Row tile: one full-extent block for small/medium M (no extra pipeline steps
    on single-TC parts); 512 (f32) / 1024 (bf16) rows for large M (multiple of 256
    to match the MXU, many grid steps for pipelining / megacore sharding)."""
    cap = 1024 if compute_dtype == jnp.bfloat16 else 512
    if M <= cap:
        return M  # full-extent row block is always a legal block shape
    return cap


def _build_specs(tm, resident_weights):
    """BlockSpecs; constant-index_map operands optionally single-buffered."""
    if resident_weights:
        const_kwargs = dict(pipeline_mode=pl.Buffered(1))
    else:
        const_kwargs = {}
    in_specs = [
        pl.BlockSpec((tm, HIDDEN), lambda i: (i, 0)),                          # x tile
        pl.BlockSpec((HIDDEN, HIDDEN), lambda i: (0, 0), **const_kwargs),      # w1
        pl.BlockSpec((1, HIDDEN), lambda i: (0, 0), **const_kwargs),           # b1
        pl.BlockSpec((HIDDEN, HIDDEN), lambda i: (0, 0), **const_kwargs),      # w2
        pl.BlockSpec((1, HIDDEN), lambda i: (0, 0), **const_kwargs),           # b2
    ]
    out_spec = pl.BlockSpec((tm, HIDDEN), lambda i: (i, 0))                    # lane-dense
    return in_specs, out_spec


def contrast_projection(tokens, w1, b1, w2, b2, *, tm=None, compute_dtype=None):
    """tokens: (..., 768). w1/w2: (768, 768) stored as (in, out). b1/b2: (768,).

    compute_dtype: dtype fed to the MXU (default: the weight dtype). Pass
    jnp.bfloat16 to run the matmuls at bf16 rate when the model tolerates it;
    accumulation is always f32.
    """
    orig_shape = tokens.shape
    x = tokens.reshape(-1, HIDDEN)
    M = x.shape[0]

    if compute_dtype is None:
        compute_dtype = w1.dtype

    # Pre-cast weights once in the wrapper (halves resident weight VMEM + one-time
    # DMA when compute_dtype is bf16); biases go in as f32 so the kernel epilogue
    # has no per-step cast.
    w1c = w1.astype(compute_dtype)
    w2c = w2.astype(compute_dtype)
    b1_2d = b1.reshape(1, HIDDEN).astype(jnp.float32)
    b2_2d = b2.reshape(1, HIDDEN).astype(jnp.float32)

    if tm is None:
        tm = _pick_tm(M, compute_dtype)

    # Partial last tile (M % tm != 0) is handled by Pallas boundary masking; rows
    # are independent so padded rows never contaminate valid output rows.
    grid = (pl.cdiv(M, tm),)

    def _call(resident):
        in_specs, out_spec = _build_specs(tm, resident)
        return pl.pallas_call(
            _contrast_proj_kernel,
            out_shape=jax.ShapeDtypeStruct((M, HIDDEN), tokens.dtype),
            grid=grid,
            in_specs=in_specs,
            out_specs=out_spec,
            compiler_params=pltpu.CompilerParams(
                dimension_semantics=("parallel",),
                # Worst case (f32, tm=512): ~6 MiB x/out double buffers +
                # 4.5 MiB single-buffered weights + ~3 MiB f32 h scratch.
                # 32 MiB covers this on every chip, incl. v7x's 64 MiB VMEM.
                vmem_limit_bytes=32 * 1024 * 1024,
            ),
        )(x, w1c, b1_2d, w2c, b2_2d)

    try:
        out = _call(resident=True)
    except Exception:
        # Fallback if this jax version rejects pipeline_mode=pl.Buffered(1):
        # default double-buffered specs (still correct, slightly more VMEM).
        out = _call(resident=False)

    return out.reshape(orig_shape)


def _init_params(key, dtype=jnp.float32):
    """Deterministic init mimicking nn.Linear defaults (uniform +/- 1/sqrt(fan_in))."""
    k1, k2, k3, k4 = jax.random.split(key, 4)
    bound = 1.0 / jnp.sqrt(jnp.float32(HIDDEN))
    # Stored as (in, out) = W.T relative to PyTorch's (out, in).
    w1 = jax.random.uniform(k1, (HIDDEN, HIDDEN), jnp.float32, -bound, bound).astype(dtype)
    b1 = jax.random.uniform(k2, (HIDDEN,), jnp.float32, -bound, bound).astype(dtype)
    w2 = jax.random.uniform(k3, (HIDDEN, HIDDEN), jnp.float32, -bound, bound).astype(dtype)
    b2 = jax.random.uniform(k4, (HIDDEN,), jnp.float32, -bound, bound).astype(dtype)
    return w1, b1, w2, b2


if __name__ == "__main__":
    key = jax.random.PRNGKey(0)
    k_in, k_par = jax.random.split(key)

    batch, seq = 2, 8
    tokens = jax.random.normal(k_in, (batch, seq, HIDDEN), jnp.float32)

    w1, b1, w2, b2 = _init_params(k_par)

    out = contrast_projection(tokens, w1, b1, w2, b2)
    out = jax.block_until_ready(out)

    # Reference check in plain JAX (same semantics as the PyTorch forward).
    ref = jnp.maximum(tokens @ w1 + b1, 0.0) @ w2 + b2
    assert out.shape == tokens.shape
    assert jnp.allclose(out, ref, atol=1e-4, rtol=1e-4)

    print("KERNEL_OK")
</pallas_src>

<mosaic_0001>
module attributes {stable_mosaic.version = 11 : i64} {
  func.func @_contrast_proj_kernel(%arg0: i32, %arg1: memref<16x768xf32, #tpu.memory_space<vmem>>, %arg2: memref<768x768xf32, #tpu.memory_space<vmem>>, %arg3: memref<1x768xf32, #tpu.memory_space<vmem>>, %arg4: memref<768x768xf32, #tpu.memory_space<vmem>>, %arg5: memref<1x768xf32, #tpu.memory_space<vmem>>, %arg6: memref<16x768xf32, #tpu.memory_space<vmem>>) attributes {dimension_semantics = [#tpu.dimension_semantics<parallel>], iteration_bounds = array<i64: 1>, scalar_prefetch = 0 : i64, scratch_operands = 0 : i64, tpu.core_type = #tpu.core_type<tc>, window_params = [{transform_indices = @transform_0, window_bounds = array<i64: 16, 768>}, {pipeline_mode = #tpu.pipeline_mode<synchronous>, transform_indices = @transform_1, window_bounds = array<i64: 768, 768>}, {pipeline_mode = #tpu.pipeline_mode<synchronous>, transform_indices = @transform_2, window_bounds = array<i64: 1, 768>}, {pipeline_mode = #tpu.pipeline_mode<synchronous>, transform_indices = @transform_3, window_bounds = array<i64: 768, 768>}, {pipeline_mode = #tpu.pipeline_mode<synchronous>, transform_indices = @transform_4, window_bounds = array<i64: 1, 768>}, {transform_indices = @transform_5, window_bounds = array<i64: 16, 768>}]} {
    %c0 = arith.constant 0 : index
    %c0_0 = arith.constant 0 : index
    %0 = vector.load %arg1[%c0, %c0_0] : memref<16x768xf32, #tpu.memory_space<vmem>>, vector<16x768xf32>
    %c0_1 = arith.constant 0 : index
    %c0_2 = arith.constant 0 : index
    %1 = vector.load %arg2[%c0_1, %c0_2] : memref<768x768xf32, #tpu.memory_space<vmem>>, vector<768x768xf32>
    %cst = arith.constant dense<0.000000e+00> : vector<16x768xf32>
    %2 = tpu.matmul %0, %1, %cst {dimension_numbers = #tpu.dot_dimension_numbers<[1], [0], [0], [1], [0, 0, 1, 1], [], []>} : vector<16x768xf32>, vector<768x768xf32>, vector<16x768xf32> -> vector<16x768xf32>
    %c0_3 = arith.constant 0 : index
    %c0_4 = arith.constant 0 : index
    %3 = vector.load %arg3[%c0_3, %c0_4] : memref<1x768xf32, #tpu.memory_space<vmem>>, vector<1x768xf32>
    %4 = vector.broadcast %3 : vector<1x768xf32> to vector<16x768xf32>
    %5 = arith.addf %2, %4 : vector<16x768xf32>
    %cst_5 = arith.constant 0.000000e+00 : f32
    %6 = vector.broadcast %cst_5 : f32 to vector<16x768xf32>
    %7 = arith.maximumf %5, %6 : vector<16x768xf32>
    %c0_6 = arith.constant 0 : index
    %c0_7 = arith.constant 0 : index
    %8 = vector.load %arg4[%c0_6, %c0_7] : memref<768x768xf32, #tpu.memory_space<vmem>>, vector<768x768xf32>
    %cst_8 = arith.constant dense<0.000000e+00> : vector<16x768xf32>
    %9 = tpu.matmul %7, %8, %cst_8 {dimension_numbers = #tpu.dot_dimension_numbers<[1], [0], [0], [1], [0, 0, 1, 1], [], []>} : vector<16x768xf32>, vector<768x768xf32>, vector<16x768xf32> -> vector<16x768xf32>
    %c0_9 = arith.constant 0 : index
    %c0_10 = arith.constant 0 : index
    %10 = vector.load %arg5[%c0_9, %c0_10] : memref<1x768xf32, #tpu.memory_space<vmem>>, vector<1x768xf32>
    %11 = vector.broadcast %10 : vector<1x768xf32> to vector<16x768xf32>
    %12 = arith.addf %9, %11 : vector<16x768xf32>
    %c0_11 = arith.constant 0 : index
    %c0_12 = arith.constant 0 : index
    %13 = vector.load %arg6[%c0_11, %c0_12] : memref<16x768xf32, #tpu.memory_space<vmem>>, vector<16x768xf32>
    tpu.vector_store %arg6[%c0_11, %c0_12], %12 {strides = array<i32>} : memref<16x768xf32, #tpu.memory_space<vmem>>, vector<16x768xf32>,
    return
  }
  func.func @transform_0(%arg0: i32) -> (i32, i32) {
    %c0_i32 = arith.constant 0 : i32
    %c0_i32_0 = arith.constant 0 : i32
    return %arg0, %c0_i32 : i32, i32
  }
  func.func @transform_1(%arg0: i32) -> (i32, i32) {
    %c0_i32 = arith.constant 0 : i32
    %c0_i32_0 = arith.constant 0 : i32
    %c0_i32_1 = arith.constant 0 : i32
    return %c0_i32, %c0_i32_0 : i32, i32
  }
  func.func @transform_2(%arg0: i32) -> (i32, i32) {
    %c0_i32 = arith.constant 0 : i32
    %c0_i32_0 = arith.constant 0 : i32
    %c0_i32_1 = arith.constant 0 : i32
    return %c0_i32, %c0_i32_0 : i32, i32
  }
  func.func @transform_3(%arg0: i32) -> (i32, i32) {
    %c0_i32 = arith.constant 0 : i32
    %c0_i32_0 = arith.constant 0 : i32
    %c0_i32_1 = arith.constant 0 : i32
    return %c0_i32, %c0_i32_0 : i32, i32
  }
  func.func @transform_4(%arg0: i32) -> (i32, i32) {
    %c0_i32 = arith.constant 0 : i32
    %c0_i32_0 = arith.constant 0 : i32
    %c0_i32_1 = arith.constant 0 : i32
    return %c0_i32, %c0_i32_0 : i32, i32
  }
  func.func @transform_5(%arg0: i32) -> (i32, i32) {
    %c0_i32 = arith.constant 0 : i32
    %c0_i32_0 = arith.constant 0 : i32
    return %arg0, %c0_i32 : i32, i32
  }
}

module attributes {stable_mosaic.version = 11 : i64} {
  func.func @_contrast_proj_kernel(%arg0: i32, %arg1: memref<16x768xf32, #tpu.memory_space<vmem>>, %arg2: memref<768x768xf32, #tpu.memory_space<vmem>>, %arg3: memref<1x768xf32, #tpu.memory_space<vmem>>, %arg4: memref<768x768xf32, #tpu.memory_space<vmem>>, %arg5: memref<1x768xf32, #tpu.memory_space<vmem>>, %arg6: memref<16x768xf32, #tpu.memory_space<vmem>>) attributes {dimension_semantics = [#tpu.dimension_semantics<parallel>], iteration_bounds = array<i64: 1>, scalar_prefetch = 0 : i64, scratch_operands = 0 : i64, tpu.core_type = #tpu.core_type<tc>, window_params = [{transform_indices = @transform_0, window_bounds = array<i64: 16, 768>}, {pipeline_mode = #tpu.pipeline_mode<synchronous>, transform_indices = @transform_1, window_bounds = array<i64: 768, 768>}, {pipeline_mode = #tpu.pipeline_mode<synchronous>, transform_indices = @transform_2, window_bounds = array<i64: 1, 768>}, {pipeline_mode = #tpu.pipeline_mode<synchronous>, transform_indices = @transform_3, window_bounds = array<i64: 768, 768>}, {pipeline_mode = #tpu.pipeline_mode<synchronous>, transform_indices = @transform_4, window_bounds = array<i64: 1, 768>}, {transform_indices = @transform_5, window_bounds = array<i64: 16, 768>}]} {
    %c0 = arith.constant 0 : index
    %c0_0 = arith.constant 0 : index
    %0 = vector.load %arg1[%c0, %c0_0] : memref<16x768xf32, #tpu.memory_space<vmem>>, vector<16x768xf32>
    %c0_1 = arith.constant 0 : index
    %c0_2 = arith.constant 0 : index
    %1 = vector.load %arg2[%c0_1, %c0_2] : memref<768x768xf32, #tpu.memory_space<vmem>>, vector<768x768xf32>
    %cst = arith.constant dense<0.000000e+00> : vector<16x768xf32>
    %2 = tpu.matmul %0, %1, %cst {dimension_numbers = #tpu.dot_dimension_numbers<[1], [0], [0], [1], [0, 0, 1, 1], [], []>} : vector<16x768xf32>, vector<768x768xf32>, vector<16x768xf32> -> vector<16x768xf32>
    %c0_3 = arith.constant 0 : index
    %c0_4 = arith.constant 0 : index
    %3 = vector.load %arg3[%c0_3, %c0_4] : memref<1x768xf32, #tpu.memory_space<vmem>>, vector<1x768xf32>
    %4 = vector.broadcast %3 : vector<1x768xf32> to vector<16x768xf32>
    %5 = arith.addf %2, %4 : vector<16x768xf32>
    %cst_5 = arith.constant 0.000000e+00 : f32
    %6 = vector.broadcast %cst_5 : f32 to vector<16x768xf32>
    %7 = arith.maximumf %5, %6 : vector<16x768xf32>
    %c0_6 = arith.constant 0 : index
    %c0_7 = arith.constant 0 : index
    %8 = vector.load %arg4[%c0_6, %c0_7] : memref<768x768xf32, #tpu.memory_space<vmem>>, vector<768x768xf32>
    %cst_8 = arith.constant dense<0.000000e+00> : vector<16x768xf32>
    %9 = tpu.matmul %7, %8, %cst_8 {dimension_numbers = #tpu.dot_dimension_numbers<[1], [0], [0], [1], [0, 0, 1, 1], [], []>} : vector<16x768xf32>, vector<768x768xf32>, vector<16x768xf32> -> vector<16x768xf32>
    %c0_9 = arith.constant 0 : index
    %c0_10 = arith.constant 0 : index
    %10 = vector.load %arg5[%c0_9, %c0_10] : memref<1x768xf32, #tpu.memory_space<vmem>>, vector<1x768xf32>
    %11 = vector.broadcast %10 : vector<1x768xf32> to vector<16x768xf32>
    %12 = arith.addf %9, %11 : vector<16x768xf32>
    %c0_11 = arith.constant 0 : index
    %c0_12 = arith.constant 0 : index
    %13 = vector.load %arg6[%c0_11, %c0_12] : memref<16x768xf32, #tpu.memory_space<vmem>>, vector<16x768xf32>
    tpu.vector_store %arg6[%c0_11, %c0_12], %12 {strides = array<i32>} : memref<16x768xf32, #tpu.memory_space<vmem>>, vector<16x768xf32>,
    return
  }
  func.func @transform_0(%arg0: i32) -> (i32, i32) {
    %c0_i32 = arith.constant 0 : i32
    %c0_i32_0 = arith.constant 0 : i32
    return %arg0, %c0_i32 : i32, i32
  }
  func.func @transform_1(%arg0: i32) -> (i32, i32) {
    %c0_i32 = arith.constant 0 : i32
    %c0_i32_0 = arith.constant 0 : i32
    %c0_i32_1 = arith.constant 0 : i32
    return %c0_i32, %c0_i32_0 : i32, i32
  }
  func.func @transform_2(%arg0: i32) -> (i32, i32) {
    %c0_i32 = arith.constant 0 : i32
    %c0_i32_0 = arith.constant 0 : i32
    %c0_i32_1 = arith.constant 0 : i32
    return %c0_i32, %c0_i32_0 : i32, i32
  }
  func.func @transform_3(%arg0: i32) -> (i32, i32) {
    %c0_i32 = arith.constant 0 : i32
    %c0_i32_0 = arith.constant 0 : i32
    %c0_i32_1 = arith.constant 0 : i32
    return %c0_i32, %c0_i32_0 : i32, i32
  }
  func.func @transform_4(%arg0: i32) -> (i32, i32) {
    %c0_i32 = arith.constant 0 : i32
    %c0_i32_0 = arith.constant 0 : i32
    %c0_i32_1 = arith.constant 0 : i32
    return %c0_i32, %c0_i32_0 : i32, i32
  }
  func.func @transform_5(%arg0: i32) -> (i32, i32) {
    %c0_i32 = arith.constant 0 : i32
    %c0_i32_0 = arith.constant 0 : i32
    return %arg0, %c0_i32 : i32, i32
  }
}

</mosaic_0001>

<bundles_post_ra>
// kernel: tpu_custom_call.1
= control target key start
LH: loop header
LB: loop body
LE: loop exit
PB: predicated region body
PF: predicated region fallthrough
CT: control target
= control target key end

     0   :  { %10 = vsyncpa [#allocation3], 0  ;;  %s3122_s0 = inlined_call_operand.hbm [shape: f32[16,768], index: 0, kind: input, shape index: {}]   ;;  %s3123_s1 = inlined_call_operand.hbm [shape: f32[768,768], index: 1, kind: input, shape index: {}]   ;;  %s3124_s2 = inlined_call_operand.hbm [shape: f32[1,768], index: 2, kind: input, shape index: {}]   ;;  %s3125_s3 = inlined_call_operand.hbm [shape: f32[768,768], index: 3, kind: input, shape index: {}]   ;;  %s3126_s4 = inlined_call_operand.hbm [shape: f32[1,768], index: 4, kind: input, shape index: {}]   ;;  %s3127_s5 = inlined_call_operand.hbm [shape: f32[16,768], index: 5, kind: output, shape index: {}]  }
   0x1   :  { %11 = vsyncpa [#allocation6], 0 }
   0x2   :  { %12 = vsyncpa [#allocation9], 0 }
   0x3   :  { %13 = vsyncpa [#allocation4], 0  ;;  %s2891_s18 = smov [#allocation5]   ;;  %s2892_s20 = smov [#allocation8]  }
   0x4   :  { %s31_s19 = sshll.u32 %s2891_s18, 4  ;;  %s53_s21 = sshll.u32 %s2892_s20, 4  ;;  %s32_s19 = int_to_ptr.vmem [resolvable:$true] %s31_s19  ;;  %s54_s21 = int_to_ptr.vmem [resolvable:$true] %s53_s21 }
   0x5   :  { %s2771_s22 = scalar_lea.vmem %s32_s19, 73728  ;;  %p2776_p1 = scmp.lt.s32.totalorder %s32_s19, %s32_s19 }
   0x6   :  { %p2772_p0 = scmp.ne.s32.totalorder %s32_s19, %s2771_s22  ;;  %p2777_p2 = scmp.lt.s32.totalorder %s2771_s22, %s2771_s22 }
   0x8   :  { %p2778_p3 = por %p2777_p2, %p2776_p1 }
   0xa   :  { %p2779_p4 = pnand %p2778_p3, %p2772_p0 }
   0xc   :  { %2782 = shalt.err (!%p2779_p4)
}
   0xd   :  { %s2893_s23 = smov 768   ;;  %s2894_s24 = smov 48  }
   0xe   :  { %37 = dma.hbm_to_vmem [thread:$0]  %s3123_s1, 73728, %s32_s19, [#allocation6], %s2893_s23, %s2893_s23, %s2894_s24  }
   0xf   :  { %s2791_s27 = scalar_lea.vmem %s54_s21, 73728  ;;  %p2796_p6 = scmp.lt.s32.totalorder %s54_s21, %s54_s21 }
  0x10   :  { %p2792_p5 = scmp.ne.s32.totalorder %s54_s21, %s2791_s27  ;;  %p2797_p7 = scmp.lt.s32.totalorder %s2791_s27, %s2791_s27 }
  0x12   :  { %p2798_p8 = por %p2797_p7, %p2796_p6 }
  0x14   :  { %p2799_p9 = pnand %p2798_p8, %p2792_p5 }
  0x16   :  { %2802 = shalt.err (!%p2799_p9)
}
  0x17   :  { %59 = dma.hbm_to_vmem [thread:$0]  %s3125_s3, 73728, %s54_s21, [#allocation9], %s2893_s23, %s2893_s23, %s2894_s24  }
  0x18   :  { %s2895_s30 = smov [#allocation2]   ;;  %s2896_s7 = smov [#allocation7]  }
  0x19   :  { %s19_s6 = sshll.u32 %s2895_s30, 4  ;;  %s44_s8 = sshll.u32 %s2896_s7, 4  ;;  %s20_s6 = int_to_ptr.vmem [resolvable:$true] %s19_s6  ;;  %s45_s8 = int_to_ptr.vmem [resolvable:$true] %s44_s8 }
  0x1a   :  { %s2811_s1 = scalar_lea.vmem %s20_s6, 1536  ;;  %p2816_p11 = scmp.lt.s32.totalorder %s20_s6, %s20_s6 }
  0x1b   :  { %p2812_p10 = scmp.ne.s32.totalorder %s20_s6, %s2811_s1  ;;  %p2817_p12 = scmp.lt.s32.totalorder %s2811_s1, %s2811_s1 }
  0x1d   :  { %p2818_p13 = por %p2817_p12, %p2816_p11 }
  0x1f   :  { %p2819_p0 = pnand %p2818_p13, %p2812_p10 }
  0x21   :  { %2822 = shalt.err (!%p2819_p0)
}
  0x22   :  { %25 = dma.hbm_to_vmem [thread:$0]  %s3122_s0, 1536, %s20_s6, [#allocation3], %s2893_s23, %s2893_s23, %s2894_s24  }
  0x23   :  { %s2831_s3 = scalar_lea.vmem %s45_s8, 96  ;;  %p2836_p2 = scmp.lt.s32.totalorder %s45_s8, %s45_s8 }
  0x24   :  { %p2832_p1 = scmp.ne.s32.totalorder %s45_s8, %s2831_s3  ;;  %p2837_p3 = scmp.lt.s32.totalorder %s2831_s3, %s2831_s3 }
  0x26   :  { %p2838_p4 = por %p2837_p3, %p2836_p2 }
  0x28   :  { %p2839_p5 = pnand %p2838_p4, %p2832_p1 }
  0x2a   :  { %2842 = shalt.err (!%p2839_p5)
}
  0x2b   :  { %47 = dma.hbm_to_vmem [thread:$0]  %s3124_s2, 96, %s45_s8, [#allocation6]  }
  0x2c   :  { %s2897_s13 = smov [#allocation10]  }
  0x2d   :  { %s66_s14 = sshll.u32 %s2897_s13, 4  ;;  %s67_s14 = int_to_ptr.vmem [resolvable:$true] %s66_s14 }
  0x2e   :  { %s2851_s15 = scalar_lea.vmem %s67_s14, 96  ;;  %p2856_p7 = scmp.lt.s32.totalorder %s67_s14, %s67_s14 }
  0x2f   :  { %p2852_p6 = scmp.ne.s32.totalorder %s67_s14, %s2851_s15  ;;  %p2857_p8 = scmp.lt.s32.totalorder %s2851_s15, %s2851_s15 }
  0x31   :  { %p2858_p9 = por %p2857_p8, %p2856_p7 }
  0x33   :  { %p2859_p10 = pnand %p2858_p9, %p2852_p6 }
  0x35   :  { %2862 = shalt.err (!%p2859_p10)
}
  0x36   :  { %69 = dma.hbm_to_vmem [thread:$0]  %s3126_s4, 96, %s67_s14, [#allocation9]  }
  0x37   :  { %2883 = dma.done.wait [#allocation3], 1536  }
  0x38   :  { %2884 = vsyncadd [#allocation3], 4294965760 }
  0x39   :  { %2885 = dma.done.wait [#allocation6], 73824  }
  0x3a   :  { %2886 = vsyncadd [#allocation6], 4294893472 }
  0x3b   :  { %2887 = dma.done.wait [#allocation9], 73824  }
  0x3c   :  { %2888 = vsyncadd [#allocation9], 4294893472  ;;  %v188_v0 = vld [vmem:[#allocation5 + $0x2d8] sm:$0xff]  ;;  %v187_v1 = vld [vmem:[#allocation5 + $0x2d0] sm:$0xff]  ;;  %s2898_s2 = smov [#allocation11]  }
  0x3d   :  { %v182_v2 = vld [vmem:[#allocation5 + $0x2a8] sm:$0xff]  ;;  %705 = vmatprep.subr.mxu0 %v188_v0  ;;  %v380_v3 = vld [vmem:[#allocation5 + $0x8d8] sm:$0xff]  ;;  %v181_v4 = vld [vmem:[#allocation5 + $0x2a0] sm:$0xff]  ;;  %s2728_s4 = sshll.u32 %s2898_s2, 4  ;;  %s2729_s4 = int_to_ptr.vmem [resolvable:$true] %s2728_s4 }
  0x3e   :  { %v379_v5 = vld [vmem:[#allocation5 + $0x8d0] sm:$0xff]  ;;  %706 = vmatpush1.msra.mxu0 %v187_v1  ;;  %782 = vmatprep.subr.mxu1 %v380_v3  ;;  %v176_v6 = vld [vmem:[#allocation5 + $0x278] sm:$0xff]  ;;  %v374_v7 = vld [vmem:[#allocation5 + $0x8a8] sm:$0xff]  ;;  %s2863_s17 = scalar_lea.vmem %s2729_s4, 1536  ;;  %p2868_p12 = scmp.lt.s32.totalorder %s2729_s4, %s2729_s4 }
  0x3f   :  { %707 = vmatprep.subr.mxu0 %v182_v2  ;;  %783 = vmatpush1.msra.mxu1 %v379_v5  ;;  %v175_v8 = vld [vmem:[#allocation5 + $0x270] sm:$0xff]  ;;  %v373_v9 = vld [vmem:[#allocation5 + $0x8a0] sm:$0xff]  ;;  %v368_v10 = vld [vmem:[#allocation5 + $0x878] sm:$0xff]  ;;  %p2864_p11 = scmp.ne.s32.totalorder %s2729_s4, %s2863_s17  ;;  %p2869_p13 = scmp.lt.s32.totalorder %s2863_s17, %s2863_s17 }
  0x40   :  { %708 = vmatpush1.msra.mxu0 %v181_v4  ;;  %784 = vmatprep.subr.mxu1 %v374_v7  ;;  %v170_v11 = vld [vmem:[#allocation5 + $0x248] sm:$0xff]  ;;  %v367_v12 = vld [vmem:[#allocation5 + $0x870] sm:$0xff]  ;;  %v169_v13 = vld [vmem:[#allocation5 + $0x240] sm:$0xff] }
  0x41   :  { %709 = vmatprep.subr.mxu0 %v176_v6  ;;  %785 = vmatpush1.msra.mxu1 %v373_v9  ;;  %v362_v14 = vld [vmem:[#allocation5 + $0x848] sm:$0xff]  ;;  %v164_v15 = vld [vmem:[#allocation5 + $0x218] sm:$0xff]  ;;  %v361_v16 = vld [vmem:[#allocation5 + $0x840] sm:$0xff]  ;;  %p2870_p0 = por %p2869_p13, %p2868_p12 }
  0x42   :  { %710 = vmatpush1.msra.mxu0 %v175_v8  ;;  %786 = vmatprep.subr.mxu1 %v368_v10  ;;  %v163_v17 = vld [vmem:[#allocation5 + $0x210] sm:$0xff]  ;;  %v356_v18 = vld [vmem:[#allocation5 + $0x818] sm:$0xff]  ;;  %v158_v19 = vld [vmem:[#allocation5 + $0x1e8] sm:$0xff] }
  0x43   :  { %711 = vmatprep.subr.mxu0 %v170_v11  ;;  %787 = vmatpush1.msra.mxu1 %v367_v12  ;;  %v355_v20 = vld [vmem:[#allocation5 + $0x810] sm:$0xff]  ;;  %v157_v21 = vld [vmem:[#allocation5 + $0x1e0] sm:$0xff]  ;;  %v350_v22 = vld [vmem:[#allocation5 + $0x7e8] sm:$0xff]  ;;  %p2871_p1 = pnand %p2870_p0, %p2864_p11 }
  0x44   :  { %712 = vmatpush1.msra.mxu0 %v169_v13  ;;  %788 = vmatprep.subr.mxu1 %v362_v14  ;;  %v152_v23 = vld [vmem:[#allocation5 + $0x1b8] sm:$0xff]  ;;  %v349_v24 = vld [vmem:[#allocation5 + $0x7e0] sm:$0xff]  ;;  %v151_v25 = vld [vmem:[#allocation5 + $0x1b0] sm:$0xff] }
  0x45   :  { %713 = vmatprep.subr.mxu0 %v164_v15  ;;  %789 = vmatpush1.msra.mxu1 %v361_v16  ;;  %v344_v26 = vld [vmem:[#allocation5 + $0x7b8] sm:$0xff]  ;;  %v146_v27 = vld [vmem:[#allocation5 + $0x188] sm:$0xff]  ;;  %v343_v28 = vld [vmem:[#allocation5 + $0x7b0] sm:$0xff] }
  0x46   :  { %714 = vmatpush1.msra.mxu0 %v163_v17  ;;  %790 = vmatprep.subr.mxu1 %v356_v18  ;;  %v145_v29 = vld [vmem:[#allocation5 + $0x180] sm:$0xff]  ;;  %v338_v30 = vld [vmem:[#allocation5 + $0x788] sm:$0xff]  ;;  %v140_v31 = vld [vmem:[#allocation5 + $0x158] sm:$0xff] }
  0x47   :  { %715 = vmatprep.subr.mxu0 %v158_v19  ;;  %791 = vmatpush1.msra.mxu1 %v355_v20  ;;  %v337_v32 = vld [vmem:[#allocation5 + $0x780] sm:$0xff]  ;;  %v139_v33 = vld [vmem:[#allocation5 + $0x150] sm:$0xff]  ;;  %v332_v34 = vld [vmem:[#allocation5 + $0x758] sm:$0xff] }
  0x48   :  { %716 = vmatpush1.msra.mxu0 %v157_v21  ;;  %792 = vmatprep.subr.mxu1 %v350_v22  ;;  %v134_v35 = vld [vmem:[#allocation5 + $0x128] sm:$0xff]  ;;  %v331_v36 = vld [vmem:[#allocation5 + $0x750] sm:$0xff]  ;;  %v133_v37 = vld [vmem:[#allocation5 + $0x120] sm:$0xff] }
  0x49   :  { %717 = vmatprep.subr.mxu0 %v152_v23  ;;  %793 = vmatpush1.msra.mxu1 %v349_v24  ;;  %v326_v38 = vld [vmem:[#allocation5 + $0x728] sm:$0xff]  ;;  %v128_v39 = vld [vmem:[#allocation5 + $0xf8] sm:$0xff]  ;;  %v325_v40 = vld [vmem:[#allocation5 + $0x720] sm:$0xff] }
  0x4a   :  { %718 = vmatpush1.msra.mxu0 %v151_v25  ;;  %794 = vmatprep.subr.mxu1 %v344_v26  ;;  %v127_v41 = vld [vmem:[#allocation5 + $0xf0] sm:$0xff]  ;;  %v320_v42 = vld [vmem:[#allocation5 + $0x6f8] sm:$0xff]  ;;  %v122_v43 = vld [vmem:[#allocation5 + $0xc8] sm:$0xff] }
  0x4b   :  { %719 = vmatprep.subr.mxu0 %v146_v27  ;;  %795 = vmatpush1.msra.mxu1 %v343_v28  ;;  %v319_v44 = vld [vmem:[#allocation5 + $0x6f0] sm:$0xff]  ;;  %v121_v45 = vld [vmem:[#allocation5 + $0xc0] sm:$0xff]  ;;  %v314_v46 = vld [vmem:[#allocation5 + $0x6c8] sm:$0xff] }
  0x4c   :  { %720 = vmatpush1.msra.mxu0 %v145_v29  ;;  %796 = vmatprep.subr.mxu1 %v338_v30  ;;  %v116_v47 = vld [vmem:[#allocation5 + $0x98] sm:$0xff]  ;;  %v313_v48 = vld [vmem:[#allocation5 + $0x6c0] sm:$0xff]  ;;  %v115_v49 = vld [vmem:[#allocation5 + $0x90] sm:$0xff] }
  0x4d   :  { %721 = vmatprep.subr.mxu0 %v140_v31  ;;  %797 = vmatpush1.msra.mxu1 %v337_v32  ;;  %v308_v50 = vld [vmem:[#allocation5 + $0x698] sm:$0xff]  ;;  %v110_v51 = vld [vmem:[#allocation5 + $0x68] sm:$0xff]  ;;  %v307_v52 = vld [vmem:[#allocation5 + $0x690] sm:$0xff] }
  0x4e   :  { %722 = vmatpush1.msra.mxu0 %v139_v33  ;;  %798 = vmatprep.subr.mxu1 %v332_v34  ;;  %v109_v53 = vld [vmem:[#allocation5 + $0x60] sm:$0xff]  ;;  %v302_v54 = vld [vmem:[#allocation5 + $0x668] sm:$0xff]  ;;  %v104_v55 = vld [vmem:[#allocation5 + $0x38] sm:$0xff] }
  0x4f   :  { %723 = vmatprep.subr.mxu0 %v134_v35  ;;  %799 = vmatpush1.msra.mxu1 %v331_v36  ;;  %v301_v56 = vld [vmem:[#allocation5 + $0x660] sm:$0xff]  ;;  %v103_v57 = vld [vmem:[#allocation5 + $0x30] sm:$0xff]  ;;  %v296_v58 = vld [vmem:[#allocation5 + $0x638] sm:$0xff] }
  0x50   :  { %724 = vmatpush1.msra.mxu0 %v133_v37  ;;  %800 = vmatprep.subr.mxu1 %v326_v38  ;;  %v98_v59 = vld [vmem:[#allocation5 + $0x8] sm:$0xff]  ;;  %v295_v60 = vld [vmem:[#allocation5 + $0x630] sm:$0xff]  ;;  %v97_v61 = vld [vmem:[#allocation5] sm:$0xff] }
  0x51   :  { %725 = vmatprep.subr.mxu0 %v128_v39  ;;  %801 = vmatpush1.msra.mxu1 %v325_v40  ;;  %v290_v62 = vld [vmem:[#allocation5 + $0x608] sm:$0xff]  ;;  %v284_v63 = vld [vmem:[#allocation5 + $0x5d8] sm:$0xff]  ;;  %v289_v0 = vld [vmem:[#allocation5 + $0x600] sm:$0xff] }
  0x52   :  { %726 = vmatpush1.msra.mxu0 %v127_v41  ;;  %802 = vmatprep.subr.mxu1 %v320_v42  ;;  %v283_v1 = vld [vmem:[#allocation5 + $0x5d0] sm:$0xff]  ;;  %v476_v2 = vld [vmem:[#allocation5 + $0xbd8] sm:$0xff]  ;;  %v278_v3 = vld [vmem:[#allocation5 + $0x5a8] sm:$0xff] }
  0x53   :  { %727 = vmatprep.subr.mxu0 %v122_v43  ;;  %803 = vmatpush1.msra.mxu1 %v319_v44  ;;  %v475_v4 = vld [vmem:[#allocation5 + $0xbd0] sm:$0xff]  ;;  %v277_v5 = vld [vmem:[#allocation5 + $0x5a0] sm:$0xff]  ;;  %v470_v6 = vld [vmem:[#allocation5 + $0xba8] sm:$0xff] }
  0x54   :  { %728 = vmatpush1.msra.mxu0 %v121_v45  ;;  %804 = vmatprep.subr.mxu1 %v314_v46  ;;  %v272_v7 = vld [vmem:[#allocation5 + $0x578] sm:$0xff]  ;;  %v469_v8 = vld [vmem:[#allocation5 + $0xba0] sm:$0xff]  ;;  %v271_v9 = vld [vmem:[#allocation5 + $0x570] sm:$0xff] }
  0x55   :  { %729 = vmatprep.subr.mxu0 %v116_v47  ;;  %805 = vmatpush1.msra.mxu1 %v313_v48  ;;  %v464_v10 = vld [vmem:[#allocation5 + $0xb78] sm:$0xff]  ;;  %v266_v11 = vld [vmem:[#allocation5 + $0x548] sm:$0xff]  ;;  %v463_v12 = vld [vmem:[#allocation5 + $0xb70] sm:$0xff] }
  0x56   :  { %730 = vmatpush1.msra.mxu0 %v115_v49  ;;  %806 = vmatprep.subr.mxu1 %v308_v50  ;;  %v265_v13 = vld [vmem:[#allocation5 + $0x540] sm:$0xff]  ;;  %v458_v14 = vld [vmem:[#allocation5 + $0xb48] sm:$0xff]  ;;  %v260_v15 = vld [vmem:[#allocation5 + $0x518] sm:$0xff] }
  0x57   :  { %731 = vmatprep.subr.mxu0 %v110_v51  ;;  %807 = vmatpush1.msra.mxu1 %v307_v52  ;;  %v457_v16 = vld [vmem:[#allocation5 + $0xb40] sm:$0xff]  ;;  %v259_v17 = vld [vmem:[#allocation5 + $0x510] sm:$0xff]  ;;  %v452_v18 = vld [vmem:[#allocation5 + $0xb18] sm:$0xff] }
  0x58   :  { %732 = vmatpush1.msra.mxu0 %v109_v53  ;;  %808 = vmatprep.subr.mxu1 %v302_v54  ;;  %v254_v19 = vld [vmem:[#allocation5 + $0x4e8] sm:$0xff]  ;;  %v451_v20 = vld [vmem:[#allocation5 + $0xb10] sm:$0xff]  ;;  %v253_v21 = vld [vmem:[#allocation5 + $0x4e0] sm:$0xff] }
  0x59   :  { %733 = vmatprep.subr.mxu0 %v104_v55  ;;  %809 = vmatpush1.msra.mxu1 %v301_v56  ;;  %v446_v22 = vld [vmem:[#allocation5 + $0xae8] sm:$0xff]  ;;  %v248_v23 = vld [vmem:[#allocation5 + $0x4b8] sm:$0xff]  ;;  %v445_v24 = vld [vmem:[#allocation5 + $0xae0] sm:$0xff] }
  0x5a   :  { %734 = vmatpush1.msra.mxu0 %v103_v57  ;;  %810 = vmatprep.subr.mxu1 %v296_v58  ;;  %v247_v25 = vld [vmem:[#allocation5 + $0x4b0] sm:$0xff]  ;;  %v440_v26 = vld [vmem:[#allocation5 + $0xab8] sm:$0xff]  ;;  %v242_v27 = vld [vmem:[#allocation5 + $0x488] sm:$0xff] }
  0x5b   :  { %735 = vmatprep.subr.mxu0 %v98_v59  ;;  %811 = vmatpush1.msra.mxu1 %v295_v60  ;;  %v439_v28 = vld [vmem:[#allocation5 + $0xab0] sm:$0xff]  ;;  %v241_v29 = vld [vmem:[#allocation5 + $0x480] sm:$0xff]  ;;  %v434_v30 = vld [vmem:[#allocation5 + $0xa88] sm:$0xff] }
  0x5c   :  { %736 = vmatpush1.msra.mxu0 %v97_v61  ;;  %812 = vmatprep.subr.mxu1 %v290_v62  ;;  %v236_v31 = vld [vmem:[#allocation5 + $0x458] sm:$0xff]  ;;  %v433_v32 = vld [vmem:[#allocation5 + $0xa80] sm:$0xff]  ;;  %v235_v33 = vld [vmem:[#allocation5 + $0x450] sm:$0xff] }
  0x5d   :  { %737 = vmatprep.subr.mxu0 %v284_v63  ;;  %813 = vmatpush1.msra.mxu1 %v289_v0  ;;  %v428_v34 = vld [vmem:[#allocation5 + $0xa58] sm:$0xff]  ;;  %v230_v35 = vld [vmem:[#allocation5 + $0x428] sm:$0xff]  ;;  %v427_v36 = vld [vmem:[#allocation5 + $0xa50] sm:$0xff] }
  0x5e   :  { %738 = vmatpush2.msra.mxu0 %v283_v1  ;;  %814 = vmatprep.subr.mxu1 %v476_v2  ;;  %v229_v37 = vld [vmem:[#allocation5 + $0x420] sm:$0xff]  ;;  %v422_v38 = vld [vmem:[#allocation5 + $0xa28] sm:$0xff]  ;;  %v224_v39 = vld [vmem:[#allocation5 + $0x3f8] sm:$0xff] }
  0x5f   :  { %739 = vmatprep.subr.mxu0 %v278_v3  ;;  %815 = vmatpush2.msra.mxu1 %v475_v4  ;;  %v421_v40 = vld [vmem:[#allocation5 + $0xa20] sm:$0xff]  ;;  %v223_v41 = vld [vmem:[#allocation5 + $0x3f0] sm:$0xff]  ;;  %v416_v42 = vld [vmem:[#allocation5 + $0x9f8] sm:$0xff] }
  0x60   :  { %740 = vmatpush2.msra.mxu0 %v277_v5  ;;  %816 = vmatprep.subr.mxu1 %v470_v6  ;;  %v218_v43 = vld [vmem:[#allocation5 + $0x3c8] sm:$0xff]  ;;  %v415_v44 = vld [vmem:[#allocation5 + $0x9f0] sm:$0xff]  ;;  %v217_v45 = vld [vmem:[#allocation5 + $0x3c0] sm:$0xff] }
  0x61   :  { %741 = vmatprep.subr.mxu0 %v272_v7  ;;  %817 = vmatpush2.msra.mxu1 %v469_v8  ;;  %v410_v46 = vld [vmem:[#allocation5 + $0x9c8] sm:$0xff]  ;;  %v212_v47 = vld [vmem:[#allocation5 + $0x398] sm:$0xff]  ;;  %v409_v48 = vld [vmem:[#allocation5 + $0x9c0] sm:$0xff] }
  0x62   :  { %742 = vmatpush2.msra.mxu0 %v271_v9  ;;  %818 = vmatprep.subr.mxu1 %v464_v10  ;;  %v211_v49 = vld [vmem:[#allocation5 + $0x390] sm:$0xff]  ;;  %v404_v50 = vld [vmem:[#allocation5 + $0x998] sm:$0xff]  ;;  %v206_v51 = vld [vmem:[#allocation5 + $0x368] sm:$0xff] }
  0x63   :  { %743 = vmatprep.subr.mxu0 %v266_v11  ;;  %819 = vmatpush2.msra.mxu1 %v463_v12  ;;  %v403_v52 = vld [vmem:[#allocation5 + $0x990] sm:$0xff]  ;;  %v205_v53 = vld [vmem:[#allocation5 + $0x360] sm:$0xff]  ;;  %v398_v54 = vld [vmem:[#allocation5 + $0x968] sm:$0xff] }
  0x64   :  { %744 = vmatpush2.msra.mxu0 %v265_v13  ;;  %820 = vmatprep.subr.mxu1 %v458_v14  ;;  %v200_v55 = vld [vmem:[#allocation5 + $0x338] sm:$0xff]  ;;  %v397_v56 = vld [vmem:[#allocation5 + $0x960] sm:$0xff]  ;;  %v199_v57 = vld [vmem:[#allocation5 + $0x330] sm:$0xff] }
  0x65   :  { %745 = vmatprep.subr.mxu0 %v260_v15  ;;  %821 = vmatpush2.msra.mxu1 %v457_v16  ;;  %v392_v58 = vld [vmem:[#allocation5 + $0x938] sm:$0xff]  ;;  %v194_v59 = vld [vmem:[#allocation5 + $0x308] sm:$0xff]  ;;  %v193_v61 = vld [vmem:[#allocation5 + $0x300] sm:$0xff] }
  0x66   :  { %746 = vmatpush2.msra.mxu0 %v259_v17  ;;  %822 = vmatprep.subr.mxu1 %v452_v18  ;;  %v2953_v60 = vld [vmem:[#allocation2 + $0x8] sm:$0xff]  ;;  %v391_v62 = vld [vmem:[#allocation5 + $0x930] sm:$0xff]  ;;  %v2955_v63 = vld [vmem:[#allocation2] sm:$0xff] }
  0x67   :  { %747 = vmatprep.subr.mxu0 %v254_v19  ;;  %823 = vmatpush2.msra.mxu1 %v451_v20  ;;  %v386_v0 = vld [vmem:[#allocation5 + $0x908] sm:$0xff]  ;;  %v572_v1 = vld [vmem:[#allocation5 + $0xed8] sm:$0xff]  ;;  %v385_v2 = vld [vmem:[#allocation5 + $0x900] sm:$0xff] }
  0x68   :  { %748 = vmatpush2.msra.mxu0 %v253_v21  ;;  %824 = vmatprep.subr.mxu1 %v446_v22  ;;  %v88_v3 = vld [vmem:[#allocation2 + $0x18] sm:$0xff]  ;;  %v571_v4 = vld [vmem:[#allocation5 + $0xed0] sm:$0xff]  ;;  %v566_v6 = vld [vmem:[#allocation5 + $0xea8] sm:$0xff] }
  0x69   :  { %749 = vmatprep.subr.mxu0 %v248_v23  ;;  %825 = vmatpush2.msra.mxu1 %v445_v24  ;;  %v87_v5 = vld [vmem:[#allocation2 + $0x10] sm:$0xff]  ;;  %v190_v7 = vld [vmem:[#allocation5 + $0x2e8] sm:$0xff]  ;;  %v565_v8 = vld [vmem:[#allocation5 + $0xea0] sm:$0xff] }
  0x6a   :  { %750 = vmatpush2.msra.mxu0 %v247_v25  ;;  %826 = vmatprep.subr.mxu1 %v440_v26  ;;  %v189_v9 = vld [vmem:[#allocation5 + $0x2e0] sm:$0xff]  ;;  %v560_v10 = vld [vmem:[#allocation5 + $0xe78] sm:$0xff]  ;;  %v559_v12 = vld [vmem:[#allocation5 + $0xe70] sm:$0xff] }
  0x6b   :  { %751 = vmatprep.subr.mxu0 %v242_v27  ;;  %827 = vmatpush2.msra.mxu1 %v439_v28  ;;  %v184_v11 = vld [vmem:[#allocation5 + $0x2b8] sm:$0xff]  ;;  %v183_v13 = vld [vmem:[#allocation5 + $0x2b0] sm:$0xff]  ;;  %v554_v14 = vld [vmem:[#allocation5 + $0xe48] sm:$0xff] }
  0x6c   :  { %752 = vmatpush2.msra.mxu0 %v241_v29  ;;  %828 = vmatprep.subr.mxu1 %v434_v30  ;;  %v178_v15 = vld [vmem:[#allocation5 + $0x288] sm:$0xff]  ;;  %v553_v16 = vld [vmem:[#allocation5 + $0xe40] sm:$0xff]  ;;  %v548_v18 = vld [vmem:[#allocation5 + $0xe18] sm:$0xff] }
  0x6d   :  { %753 = vmatprep.subr.mxu0 %v236_v31  ;;  %829 = vmatpush2.msra.mxu1 %v433_v32  ;;  %v177_v17 = vld [vmem:[#allocation5 + $0x280] sm:$0xff]  ;;  %v172_v19 = vld [vmem:[#allocation5 + $0x258] sm:$0xff]  ;;  %v547_v20 = vld [vmem:[#allocation5 + $0xe10] sm:$0xff] }
  0x6e   :  { %754 = vmatpush2.msra.mxu0 %v235_v33  ;;  %830 = vmatprep.subr.mxu1 %v428_v34  ;;  %v171_v21 = vld [vmem:[#allocation5 + $0x250] sm:$0xff]  ;;  %v542_v22 = vld [vmem:[#allocation5 + $0xde8] sm:$0xff]  ;;  %v541_v24 = vld [vmem:[#allocation5 + $0xde0] sm:$0xff] }
  0x6f   :  { %755 = vmatprep.subr.mxu0 %v230_v35  ;;  %831 = vmatpush2.msra.mxu1 %v427_v36  ;;  %v166_v23 = vld [vmem:[#allocation5 + $0x228] sm:$0xff]  ;;  %v165_v25 = vld [vmem:[#allocation5 + $0x220] sm:$0xff]  ;;  %v536_v26 = vld [vmem:[#allocation5 + $0xdb8] sm:$0xff] }
  0x70   :  { %756 = vmatpush2.msra.mxu0 %v229_v37  ;;  %832 = vmatprep.subr.mxu1 %v422_v38  ;;  %v160_v27 = vld [vmem:[#allocation5 + $0x1f8] sm:$0xff]  ;;  %v535_v28 = vld [vmem:[#allocation5 + $0xdb0] sm:$0xff]  ;;  %v530_v30 = vld [vmem:[#allocation5 + $0xd88] sm:$0xff] }
  0x71   :  { %757 = vmatprep.subr.mxu0 %v224_v39  ;;  %833 = vmatpush2.msra.mxu1 %v421_v40  ;;  %v159_v29 = vld [vmem:[#allocation5 + $0x1f0] sm:$0xff]  ;;  %v154_v31 = vld [vmem:[#allocation5 + $0x1c8] sm:$0xff]  ;;  %v529_v32 = vld [vmem:[#allocation5 + $0xd80] sm:$0xff] }
  0x72   :  { %758 = vmatpush2.msra.mxu0 %v223_v41  ;;  %834 = vmatprep.subr.mxu1 %v416_v42  ;;  %v153_v33 = vld [vmem:[#allocation5 + $0x1c0] sm:$0xff]  ;;  %v524_v34 = vld [vmem:[#allocation5 + $0xd58] sm:$0xff]  ;;  %v523_v36 = vld [vmem:[#allocation5 + $0xd50] sm:$0xff] }
  0x73   :  { %759 = vmatprep.subr.mxu0 %v218_v43  ;;  %835 = vmatpush2.msra.mxu1 %v415_v44  ;;  %v148_v35 = vld [vmem:[#allocation5 + $0x198] sm:$0xff]  ;;  %v147_v37 = vld [vmem:[#allocation5 + $0x190] sm:$0xff]  ;;  %v518_v38 = vld [vmem:[#allocation5 + $0xd28] sm:$0xff] }
  0x74   :  { %760 = vmatpush2.msra.mxu0 %v217_v45  ;;  %836 = vmatprep.subr.mxu1 %v410_v46  ;;  %v142_v39 = vld [vmem:[#allocation5 + $0x168] sm:$0xff]  ;;  %v517_v40 = vld [vmem:[#allocation5 + $0xd20] sm:$0xff]  ;;  %v512_v42 = vld [vmem:[#allocation5 + $0xcf8] sm:$0xff] }
  0x75   :  { %761 = vmatprep.subr.mxu0 %v212_v47  ;;  %837 = vmatpush2.msra.mxu1 %v409_v48  ;;  %v141_v41 = vld [vmem:[#allocation5 + $0x160] sm:$0xff]  ;;  %v136_v43 = vld [vmem:[#allocation5 + $0x138] sm:$0xff]  ;;  %v511_v44 = vld [vmem:[#allocation5 + $0xcf0] sm:$0xff] }
  0x76   :  { %762 = vmatpush2.msra.mxu0 %v211_v49  ;;  %838 = vmatprep.subr.mxu1 %v404_v50  ;;  %v135_v45 = vld [vmem:[#allocation5 + $0x130] sm:$0xff]  ;;  %v506_v46 = vld [vmem:[#allocation5 + $0xcc8] sm:$0xff]  ;;  %v505_v48 = vld [vmem:[#allocation5 + $0xcc0] sm:$0xff] }
  0x77   :  { %763 = vmatprep.subr.mxu0 %v206_v51  ;;  %839 = vmatpush2.msra.mxu1 %v403_v52  ;;  %v130_v47 = vld [vmem:[#allocation5 + $0x108] sm:$0xff]  ;;  %v129_v49 = vld [vmem:[#allocation5 + $0x100] sm:$0xff]  ;;  %v500_v50 = vld [vmem:[#allocation5 + $0xc98] sm:$0xff] }
  0x78   :  { %764 = vmatpush2.msra.mxu0 %v205_v53  ;;  %840 = vmatprep.subr.mxu1 %v398_v54  ;;  %v124_v51 = vld [vmem:[#allocation5 + $0xd8] sm:$0xff]  ;;  %v499_v52 = vld [vmem:[#allocation5 + $0xc90] sm:$0xff]  ;;  %v494_v54 = vld [vmem:[#allocation5 + $0xc68] sm:$0xff] }
  0x79   :  { %765 = vmatprep.subr.mxu0 %v200_v55  ;;  %841 = vmatpush2.msra.mxu1 %v397_v56  ;;  %v123_v53 = vld [vmem:[#allocation5 + $0xd0] sm:$0xff]  ;;  %v118_v55 = vld [vmem:[#allocation5 + $0xa8] sm:$0xff]  ;;  %v493_v56 = vld [vmem:[#allocation5 + $0xc60] sm:$0xff] }
  0x7a   :  { %766 = vmatpush2.msra.mxu0 %v199_v57  ;;  %842 = vmatprep.subr.mxu1 %v392_v58  ;;  %v117_v57 = vld [vmem:[#allocation5 + $0xa0] sm:$0xff]  ;;  %v488_v58 = vld [vmem:[#allocation5 + $0xc38] sm:$0xff] }
  0x7b   :  { %767 = vmatprep.subr.mxu0 %v194_v59  ;;  %769 = vmatprep.mubr.f32.mxu0 %v2953_v60  ;;  %v112_v59 = vld [vmem:[#allocation5 + $0x78] sm:$0xff] }
  0x7c   :  { %768 = vmatpush2.msra.mxu0 %v193_v61  ;;  %843 = vmatpush2.msra.mxu1 %v391_v62  ;;  %v487_v61 = vld [vmem:[#allocation5 + $0xc30] sm:$0xff] }
  0x7d   :  { %770 = vmatmul.mubr.f32.vlgmr.msra.gmra.mxu0 %v2955_v63  ;;  %844 = vmatprep.subr.mxu1 %v386_v0  ;;  %v111_v62 = vld [vmem:[#allocation5 + $0x70] sm:$0xff]  ;;  %v482_v0 = vld [vmem:[#allocation5 + $0xc08] sm:$0xff] }
  0x7e   :  { %859 = vmatprep.subr.mxu0 %v572_v1  ;;  %845 = vmatpush2.msra.mxu1 %v385_v2  ;;  %v106_v1 = vld [vmem:[#allocation5 + $0x48] sm:$0xff]  ;;  %v481_v2 = vld [vmem:[#allocation5 + $0xc00] sm:$0xff] }
  0x7f   :  { %846 = vmatprep.mubr.f32.mxu1 %v88_v3  ;;  %860 = vmatpush1.msra.mxu0 %v571_v4  ;;  %v105_v3 = vld [vmem:[#allocation5 + $0x40] sm:$0xff]  ;;  %v668_v4 = vld [vmem:[#allocation5 + $0x11d8] sm:$0xff] }
  0x80   :  { %847 = vmatmul.mubr.f32.vlgmr.msra.gmra.mxu1 %v87_v5  ;;  %861 = vmatprep.subr.mxu0 %v566_v6  ;;  %v100_v5 = vld [vmem:[#allocation5 + $0x18] sm:$0xff]  ;;  %v667_v6 = vld [vmem:[#allocation5 + $0x11d0] sm:$0xff] }
  0x81   :  { %936 = vmatprep.subr.mxu1 %v190_v7  ;;  %862 = vmatpush1.msra.mxu0 %v565_v8  ;;  %v99_v7 = vld [vmem:[#allocation5 + $0x10] sm:$0xff]  ;;  %v662_v8 = vld [vmem:[#allocation5 + $0x11a8] sm:$0xff] }
  0x82   :  { %937 = vmatpush1.msra.mxu1 %v189_v9  ;;  %863 = vmatprep.subr.mxu0 %v560_v10  ;;  %v286_v9 = vld [vmem:[#allocation5 + $0x5e8] sm:$0xff]  ;;  %v661_v10 = vld [vmem:[#allocation5 + $0x11a0] sm:$0xff] }
  0x83   :  { %938 = vmatprep.subr.mxu1 %v184_v11  ;;  %864 = vmatpush1.msra.mxu0 %v559_v12  ;;  %v285_v11 = vld [vmem:[#allocation5 + $0x5e0] sm:$0xff]  ;;  %v656_v12 = vld [vmem:[#allocation5 + $0x1178] sm:$0xff] }
  0x84   :  { %939 = vmatpush1.msra.mxu1 %v183_v13  ;;  %865 = vmatprep.subr.mxu0 %v554_v14  ;;  %v280_v13 = vld [vmem:[#allocation5 + $0x5b8] sm:$0xff]  ;;  %v655_v14 = vld [vmem:[#allocation5 + $0x1170] sm:$0xff] }
  0x85   :  { %940 = vmatprep.subr.mxu1 %v178_v15  ;;  %866 = vmatpush1.msra.mxu0 %v553_v16  ;;  %v279_v15 = vld [vmem:[#allocation5 + $0x5b0] sm:$0xff]  ;;  %v650_v16 = vld [vmem:[#allocation5 + $0x1148] sm:$0xff] }
  0x86   :  { %941 = vmatpush1.msra.mxu1 %v177_v17  ;;  %867 = vmatprep.subr.mxu0 %v548_v18  ;;  %v274_v17 = vld [vmem:[#allocation5 + $0x588] sm:$0xff]  ;;  %v649_v18 = vld [vmem:[#allocation5 + $0x1140] sm:$0xff] }
  0x87   :  { %942 = vmatprep.subr.mxu1 %v172_v19  ;;  %868 = vmatpush1.msra.mxu0 %v547_v20  ;;  %v273_v19 = vld [vmem:[#allocation5 + $0x580] sm:$0xff]  ;;  %v644_v20 = vld [vmem:[#allocation5 + $0x1118] sm:$0xff] }
  0x88   :  { %943 = vmatpush1.msra.mxu1 %v171_v21  ;;  %869 = vmatprep.subr.mxu0 %v542_v22  ;;  %v268_v21 = vld [vmem:[#allocation5 + $0x558] sm:$0xff]  ;;  %v643_v22 = vld [vmem:[#allocation5 + $0x1110] sm:$0xff] }
  0x89   :  { %944 = vmatprep.subr.mxu1 %v166_v23  ;;  %870 = vmatpush1.msra.mxu0 %v541_v24  ;;  %v267_v23 = vld [vmem:[#allocation5 + $0x550] sm:$0xff]  ;;  %v638_v24 = vld [vmem:[#allocation5 + $0x10e8] sm:$0xff] }
  0x8a   :  { %945 = vmatpush1.msra.mxu1 %v165_v25  ;;  %871 = vmatprep.subr.mxu0 %v536_v26  ;;  %v262_v25 = vld [vmem:[#allocation5 + $0x528] sm:$0xff]  ;;  %v637_v26 = vld [vmem:[#allocation5 + $0x10e0] sm:$0xff] }
  0x8b   :  { %946 = vmatprep.subr.mxu1 %v160_v27  ;;  %872 = vmatpush1.msra.mxu0 %v535_v28  ;;  %v261_v27 = vld [vmem:[#allocation5 + $0x520] sm:$0xff]  ;;  %v632_v28 = vld [vmem:[#allocation5 + $0x10b8] sm:$0xff] }
  0x8c   :  { %947 = vmatpush1.msra.mxu1 %v159_v29  ;;  %873 = vmatprep.subr.mxu0 %v530_v30  ;;  %v256_v29 = vld [vmem:[#allocation5 + $0x4f8] sm:$0xff]  ;;  %v631_v30 = vld [vmem:[#allocation5 + $0x10b0] sm:$0xff] }
  0x8d   :  { %948 = vmatprep.subr.mxu1 %v154_v31  ;;  %874 = vmatpush1.msra.mxu0 %v529_v32  ;;  %v255_v31 = vld [vmem:[#allocation5 + $0x4f0] sm:$0xff]  ;;  %v626_v32 = vld [vmem:[#allocation5 + $0x1088] sm:$0xff] }
  0x8e   :  { %949 = vmatpush1.msra.mxu1 %v153_v33  ;;  %875 = vmatprep.subr.mxu0 %v524_v34  ;;  %v250_v33 = vld [vmem:[#allocation5 + $0x4c8] sm:$0xff]  ;;  %v625_v34 = vld [vmem:[#allocation5 + $0x1080] sm:$0xff] }
  0x8f   :  { %950 = vmatprep.subr.mxu1 %v148_v35  ;;  %876 = vmatpush1.msra.mxu0 %v523_v36  ;;  %v249_v35 = vld [vmem:[#allocation5 + $0x4c0] sm:$0xff]  ;;  %v620_v36 = vld [vmem:[#allocation5 + $0x1058] sm:$0xff] }
  0x90   :  { %951 = vmatpush1.msra.mxu1 %v147_v37  ;;  %877 = vmatprep.subr.mxu0 %v518_v38  ;;  %v244_v37 = vld [vmem:[#allocation5 + $0x498] sm:$0xff]  ;;  %v619_v38 = vld [vmem:[#allocation5 + $0x1050] sm:$0xff] }
  0x91   :  { %952 = vmatprep.subr.mxu1 %v142_v39  ;;  %878 = vmatpush1.msra.mxu0 %v517_v40  ;;  %v243_v39 = vld [vmem:[#allocation5 + $0x490] sm:$0xff]  ;;  %v614_v40 = vld [vmem:[#allocation5 + $0x1028] sm:$0xff] }
  0x92   :  { %953 = vmatpush1.msra.mxu1 %v141_v41  ;;  %879 = vmatprep.subr.mxu0 %v512_v42  ;;  %v238_v41 = vld [vmem:[#allocation5 + $0x468] sm:$0xff]  ;;  %v613_v42 = vld [vmem:[#allocation5 + $0x1020] sm:$0xff] }
  0x93   :  { %954 = vmatprep.subr.mxu1 %v136_v43  ;;  %880 = vmatpush1.msra.mxu0 %v511_v44  ;;  %v237_v43 = vld [vmem:[#allocation5 + $0x460] sm:$0xff]  ;;  %v608_v44 = vld [vmem:[#allocation5 + $0xff8] sm:$0xff] }
  0x94   :  { %955 = vmatpush1.msra.mxu1 %v135_v45  ;;  %881 = vmatprep.subr.mxu0 %v506_v46  ;;  %v232_v45 = vld [vmem:[#allocation5 + $0x438] sm:$0xff]  ;;  %v607_v46 = vld [vmem:[#allocation5 + $0xff0] sm:$0xff] }
  0x95   :  { %956 = vmatprep.subr.mxu1 %v130_v47  ;;  %882 = vmatpush1.msra.mxu0 %v505_v48  ;;  %v231_v47 = vld [vmem:[#allocation5 + $0x430] sm:$0xff]  ;;  %v602_v48 = vld [vmem:[#allocation5 + $0xfc8] sm:$0xff] }
  0x96   :  { %957 = vmatpush1.msra.mxu1 %v129_v49  ;;  %883 = vmatprep.subr.mxu0 %v500_v50  ;;  %v226_v49 = vld [vmem:[#allocation5 + $0x408] sm:$0xff]  ;;  %v601_v50 = vld [vmem:[#allocation5 + $0xfc0] sm:$0xff] }
  0x97   :  { %958 = vmatprep.subr.mxu1 %v124_v51  ;;  %884 = vmatpush1.msra.mxu0 %v499_v52  ;;  %v225_v51 = vld [vmem:[#allocation5 + $0x400] sm:$0xff]  ;;  %v596_v52 = vld [vmem:[#allocation5 + $0xf98] sm:$0xff] }
  0x98   :  { %959 = vmatpush1.msra.mxu1 %v123_v53  ;;  %885 = vmatprep.subr.mxu0 %v494_v54  ;;  %v220_v53 = vld [vmem:[#allocation5 + $0x3d8] sm:$0xff]  ;;  %v595_v54 = vld [vmem:[#allocation5 + $0xf90] sm:$0xff] }
  0x99   :  { %960 = vmatprep.subr.mxu1 %v118_v55  ;;  %886 = vmatpush1.msra.mxu0 %v493_v56  ;;  %v219_v55 = vld [vmem:[#allocation5 + $0x3d0] sm:$0xff]  ;;  %v2959_v56 = vld [vmem:[#allocation2 + $0x38] sm:$0xff] }
  0x9a   :  { %961 = vmatpush1.msra.mxu1 %v117_v57  ;;  %887 = vmatprep.subr.mxu0 %v488_v58  ;;  %v590_v57 = vld [vmem:[#allocation5 + $0xf68] sm:$0xff] }
  0x9b   :  { %962 = vmatprep.subr.mxu1 %v112_v59  ;;  %888 = vmatpush1.msra.mxu0 %v487_v61  ;;  %v214_v58 = vld [vmem:[#allocation5 + $0x3a8] sm:$0xff]  ;;  %v2961_v59 = vld [vmem:[#allocation2 + $0x30] sm:$0xff]  ;;  %v213_v61 = vld [vmem:[#allocation5 + $0x3a0] sm:$0xff] }
  0x9c   :  { %963 = vmatpush1.msra.mxu1 %v111_v62  ;;  %889 = vmatprep.subr.mxu0 %v482_v0  ;;  %v589_v62 = vld [vmem:[#allocation5 + $0xf60] sm:$0xff]  ;;  %v2964_v0 = vld [vmem:[#allocation2 + $0x48] sm:$0xff] }
  0x9d   :  { %964 = vmatprep.subr.mxu1 %v106_v1  ;;  %890 = vmatpush1.msra.mxu0 %v481_v2  ;;  %v584_v1 = vld [vmem:[#allocation5 + $0xf38] sm:$0xff] }
  0x9e   :  { %965 = vmatpush1.msra.mxu1 %v105_v3  ;;  %891 = vmatprep.subr.mxu0 %v668_v4  ;;  %v208_v2 = vld [vmem:[#allocation5 + $0x378] sm:$0xff]  ;;  %v2967_v3 = vld [vmem:[#allocation2 + $0x40] sm:$0xff]  ;;  %v583_v4 = vld [vmem:[#allocation5 + $0xf30] sm:$0xff] }
  0x9f   :  { %966 = vmatprep.subr.mxu1 %v100_v5  ;;  %892 = vmatpush2.msra.mxu0 %v667_v6  ;;  %v207_v5 = vld [vmem:[#allocation5 + $0x370] sm:$0xff]  ;;  %v578_v6 = vld [vmem:[#allocation5 + $0xf08] sm:$0xff] }
  0xa0   :  { %967 = vmatpush1.msra.mxu1 %v99_v7  ;;  %893 = vmatprep.subr.mxu0 %v662_v8  ;;  %v202_v7 = vld [vmem:[#allocation5 + $0x348] sm:$0xff]  ;;  %v577_v8 = vld [vmem:[#allocation5 + $0xf00] sm:$0xff] }
  0xa1   :  { %968 = vmatprep.subr.mxu1 %v286_v9  ;;  %894 = vmatpush2.msra.mxu0 %v661_v10  ;;  %v2971_v9 = vld [vmem:[#allocation2 + $0x28] sm:$0xff]  ;;  %v201_v10 = vld [vmem:[#allocation5 + $0x340] sm:$0xff] }
  0xa2   :  { %969 = vmatpush2.msra.mxu1 %v285_v11  ;;  %895 = vmatprep.subr.mxu0 %v656_v12  ;;  %v2973_v11 = vld [vmem:[#allocation2 + $0x20] sm:$0xff]  ;;  %v196_v12 = vld [vmem:[#allocation5 + $0x318] sm:$0xff] }
  0xa3   :  { %970 = vmatprep.subr.mxu1 %v280_v13  ;;  %896 = vmatpush2.msra.mxu0 %v655_v14  ;;  %v382_v13 = vld [vmem:[#allocation5 + $0x8e8] sm:$0xff]  ;;  %v195_v14 = vld [vmem:[#allocation5 + $0x310] sm:$0xff] }
  0xa4   :  { %971 = vmatpush2.msra.mxu1 %v279_v15  ;;  %897 = vmatprep.subr.mxu0 %v650_v16  ;;  %v381_v15 = vld [vmem:[#allocation5 + $0x8e0] sm:$0xff]  ;;  %v376_v16 = vld [vmem:[#allocation5 + $0x8b8] sm:$0xff] }
  0xa5   :  { %972 = vmatprep.subr.mxu1 %v274_v17  ;;  %898 = vmatpush2.msra.mxu0 %v649_v18  ;;  %v574_v17 = vld [vmem:[#allocation5 + $0xee8] sm:$0xff]  ;;  %v2977_v18 = vld [vmem:[#allocation2 + $0x58] sm:$0xff] }
  0xa6   :  { %973 = vmatpush2.msra.mxu1 %v273_v19  ;;  %899 = vmatprep.subr.mxu0 %v644_v20  ;;  %v375_v19 = vld [vmem:[#allocation5 + $0x8b0] sm:$0xff]  ;;  %v573_v20 = vld [vmem:[#allocation5 + $0xee0] sm:$0xff] }
  0xa7   :  { %974 = vmatprep.subr.mxu1 %v268_v21  ;;  %900 = vmatpush2.msra.mxu0 %v643_v22  ;;  %v2980_v21 = vld [vmem:[#allocation2 + $0x50] sm:$0xff]  ;;  %v370_v22 = vld [vmem:[#allocation5 + $0x888] sm:$0xff] }
  0xa8   :  { %975 = vmatpush2.msra.mxu1 %v267_v23  ;;  %901 = vmatprep.subr.mxu0 %v638_v24  ;;  %v568_v23 = vld [vmem:[#allocation5 + $0xeb8] sm:$0xff]  ;;  %v369_v24 = vld [vmem:[#allocation5 + $0x880] sm:$0xff] }
  0xa9   :  { %976 = vmatprep.subr.mxu1 %v262_v25  ;;  %902 = vmatpush2.msra.mxu0 %v637_v26  ;;  %v567_v25 = vld [vmem:[#allocation5 + $0xeb0] sm:$0xff]  ;;  %v364_v26 = vld [vmem:[#allocation5 + $0x858] sm:$0xff] }
  0xaa   :  { %977 = vmatpush2.msra.mxu1 %v261_v27  ;;  %903 = vmatprep.subr.mxu0 %v632_v28  ;;  %v363_v27 = vld [vmem:[#allocation5 + $0x850] sm:$0xff]  ;;  %v561_v28 = vld [vmem:[#allocation5 + $0xe80] sm:$0xff] }
  0xab   :  { %978 = vmatprep.subr.mxu1 %v256_v29  ;;  %904 = vmatpush2.msra.mxu0 %v631_v30  ;;  %v358_v29 = vld [vmem:[#allocation5 + $0x828] sm:$0xff]  ;;  %v556_v30 = vld [vmem:[#allocation5 + $0xe58] sm:$0xff] }
  0xac   :  { %979 = vmatpush2.msra.mxu1 %v255_v31  ;;  %905 = vmatprep.subr.mxu0 %v626_v32  ;;  %v357_v31 = vld [vmem:[#allocation5 + $0x820] sm:$0xff]  ;;  %v352_v32 = vld [vmem:[#allocation5 + $0x7f8] sm:$0xff] }
  0xad   :  { %980 = vmatprep.subr.mxu1 %v250_v33  ;;  %906 = vmatpush2.msra.mxu0 %v625_v34  ;;  %v550_v33 = vld [vmem:[#allocation5 + $0xe28] sm:$0xff]  ;;  %v351_v34 = vld [vmem:[#allocation5 + $0x7f0] sm:$0xff] }
  0xae   :  { %981 = vmatpush2.msra.mxu1 %v249_v35  ;;  %907 = vmatprep.subr.mxu0 %v620_v36  ;;  %v549_v35 = vld [vmem:[#allocation5 + $0xe20] sm:$0xff]  ;;  %v346_v36 = vld [vmem:[#allocation5 + $0x7c8] sm:$0xff] }
  0xaf   :  { %982 = vmatprep.subr.mxu1 %v244_v37  ;;  %908 = vmatpush2.msra.mxu0 %v619_v38  ;;  %v544_v37 = vld [vmem:[#allocation5 + $0xdf8] sm:$0xff]  ;;  %v345_v38 = vld [vmem:[#allocation5 + $0x7c0] sm:$0xff] }
  0xb0   :  { %983 = vmatpush2.msra.mxu1 %v243_v39  ;;  %909 = vmatprep.subr.mxu0 %v614_v40  ;;  %v543_v39 = vld [vmem:[#allocation5 + $0xdf0] sm:$0xff]  ;;  %v340_v40 = vld [vmem:[#allocation5 + $0x798] sm:$0xff] }
  0xb1   :  { %984 = vmatprep.subr.mxu1 %v238_v41  ;;  %910 = vmatpush2.msra.mxu0 %v613_v42  ;;  %v538_v41 = vld [vmem:[#allocation5 + $0xdc8] sm:$0xff]  ;;  %v339_v42 = vld [vmem:[#allocation5 + $0x790] sm:$0xff] }
  0xb2   :  { %985 = vmatpush2.msra.mxu1 %v237_v43  ;;  %911 = vmatprep.subr.mxu0 %v608_v44  ;;  %v537_v43 = vld [vmem:[#allocation5 + $0xdc0] sm:$0xff]  ;;  %v334_v44 = vld [vmem:[#allocation5 + $0x768] sm:$0xff] }
  0xb3   :  { %986 = vmatprep.subr.mxu1 %v232_v45  ;;  %912 = vmatpush2.msra.mxu0 %v607_v46  ;;  %v532_v45 = vld [vmem:[#allocation5 + $0xd98] sm:$0xff]  ;;  %v333_v46 = vld [vmem:[#allocation5 + $0x760] sm:$0xff] }
  0xb4   :  { %987 = vmatpush2.msra.mxu1 %v231_v47  ;;  %913 = vmatprep.subr.mxu0 %v602_v48  ;;  %v531_v47 = vld [vmem:[#allocation5 + $0xd90] sm:$0xff]  ;;  %v328_v48 = vld [vmem:[#allocation5 + $0x738] sm:$0xff] }
  0xb5   :  { %988 = vmatprep.subr.mxu1 %v226_v49  ;;  %914 = vmatpush2.msra.mxu0 %v601_v50  ;;  %v526_v49 = vld [vmem:[#allocation5 + $0xd68] sm:$0xff]  ;;  %v327_v50 = vld [vmem:[#allocation5 + $0x730] sm:$0xff] }
  0xb6   :  { %989 = vmatpush2.msra.mxu1 %v225_v51  ;;  %915 = vmatprep.subr.mxu0 %v596_v52  ;;  %v525_v51 = vld [vmem:[#allocation5 + $0xd60] sm:$0xff]  ;;  %v322_v52 = vld [vmem:[#allocation5 + $0x708] sm:$0xff] }
  0xb7   :  { %990 = vmatprep.subr.mxu1 %v220_v53  ;;  %916 = vmatpush2.msra.mxu0 %v595_v54  ;;  %v520_v53 = vld [vmem:[#allocation5 + $0xd38] sm:$0xff]  ;;  %v321_v54 = vld [vmem:[#allocation5 + $0x700] sm:$0xff] }
  0xb8   :  { %991 = vmatpush2.msra.mxu1 %v219_v55  ;;  %775 = vmatprep.mubr.f32.mxu0 %v2959_v56  ;;  %v519_v55 = vld [vmem:[#allocation5 + $0xd30] sm:$0xff] }
  0xb9   :  { %917 = vmatprep.subr.mxu0 %v590_v57  ;;  %992 = vmatprep.subr.mxu1 %v214_v58  ;;  %v316_v57 = vld [vmem:[#allocation5 + $0x6d8] sm:$0xff]  ;;  %v514_v58 = vld [vmem:[#allocation5 + $0xd08] sm:$0xff] }
  0xba   :  { %776 = vmatmul.mubr.f32.gmra.mxu0 %v2961_v59  ;;  %993 = vmatpush2.msra.mxu1 %v213_v61  ;;  %v315_v61 = vld [vmem:[#allocation5 + $0x6d0] sm:$0xff] }
  0xbb   :  { %918 = vmatpush2.msra.mxu0 %v589_v62  ;;  %852 = vmatprep.mubr.f32.mxu1 %v2964_v0  ;;  %v513_v62 = vld [vmem:[#allocation5 + $0xd00] sm:$0xff] }
  0xbc   :  { %919 = vmatprep.subr.mxu0 %v584_v1  ;;  %994 = vmatprep.subr.mxu1 %v208_v2  ;;  %v310_v1 = vld [vmem:[#allocation5 + $0x6a8] sm:$0xff]  ;;  %v508_v2 = vld [vmem:[#allocation5 + $0xcd8] sm:$0xff] }
  0xbd   :  { %853 = vmatmul.mubr.f32.gmra.mxu1 %v2967_v3  ;;  %920 = vmatpush2.msra.mxu0 %v583_v4  ;;  %v309_v4 = vld [vmem:[#allocation5 + $0x6a0] sm:$0xff] }
  0xbe   :  { %995 = vmatpush2.msra.mxu1 %v207_v5  ;;  %921 = vmatprep.subr.mxu0 %v578_v6  ;;  %v507_v5 = vld [vmem:[#allocation5 + $0xcd0] sm:$0xff]  ;;  %v304_v6 = vld [vmem:[#allocation5 + $0x678] sm:$0xff] }
  0xbf   :  { %996 = vmatprep.subr.mxu1 %v202_v7  ;;  %922 = vmatpush2.msra.mxu0 %v577_v8  ;;  %v502_v7 = vld [vmem:[#allocation5 + $0xca8] sm:$0xff]  ;;  %v303_v8 = vld [vmem:[#allocation5 + $0x670] sm:$0xff] }
  0xc0   :  { %923 = vmatprep.mubr.f32.mxu0 %v2971_v9  ;;  %997 = vmatpush2.msra.mxu1 %v201_v10  ;;  %v501_v10 = vld [vmem:[#allocation5 + $0xca0] sm:$0xff] }
  0xc1   :  { %924 = vmatmul.mubr.f32.vlgmr.msra.gmra.mxu0 %v2973_v11  ;;  %998 = vmatprep.subr.mxu1 %v196_v12  ;;  %v298_v12 = vld [vmem:[#allocation5 + $0x648] sm:$0xff] }
  0xc2   :  { %1013 = vmatprep.subr.mxu0 %v382_v13  ;;  %999 = vmatpush2.msra.mxu1 %v195_v14  ;;  %v496_v13 = vld [vmem:[#allocation5 + $0xc78] sm:$0xff]  ;;  %v297_v14 = vld [vmem:[#allocation5 + $0x640] sm:$0xff] }
  0xc3   :  { %1014 = vmatpush1.msra.mxu0 %v381_v15  ;;  %1000 = vmatprep.mubr.f32.mxu1 %v2953_v60  ;;  %v562_v60 = vld [vmem:[#allocation5 + $0xe88] sm:$0xff]  ;;  %v495_v15 = vld [vmem:[#allocation5 + $0xc70] sm:$0xff] }
  0xc4   :  { %1015 = vmatprep.subr.mxu0 %v376_v16  ;;  %1090 = vmatprep.subr.mxu1 %v574_v17  ;;  %v292_v16 = vld [vmem:[#allocation5 + $0x618] sm:$0xff]  ;;  %v490_v17 = vld [vmem:[#allocation5 + $0xc48] sm:$0xff] }
  0xc5   :  { %929 = vmatprep.mubr.f32.mxu0 %v2977_v18  ;;  %1001 = vmatmul.mubr.f32.vlgmr.msra.gmra.mxu1 %v2955_v63  ;;  %v555_v63 = vld [vmem:[#allocation5 + $0xe50] sm:$0xff] }
  0xc6   :  { %1016 = vmatpush1.msra.mxu0 %v375_v19  ;;  %1091 = vmatpush1.msra.mxu1 %v573_v20  ;;  %v291_v19 = vld [vmem:[#allocation5 + $0x610] sm:$0xff]  ;;  %v489_v20 = vld [vmem:[#allocation5 + $0xc40] sm:$0xff] }
  0xc7   :  { %930 = vmatmul.mubr.f32.gmra.mxu0 %v2980_v21  ;;  %1017 = vmatprep.subr.mxu0 %v370_v22  ;;  %v478_v22 = vld [vmem:[#allocation5 + $0xbe8] sm:$0xff] }
  0xc8   :  { %1092 = vmatprep.subr.mxu1 %v568_v23  ;;  %1018 = vmatpush1.msra.mxu0 %v369_v24  ;;  %v484_v23 = vld [vmem:[#allocation5 + $0xc18] sm:$0xff]  ;;  %v477_v24 = vld [vmem:[#allocation5 + $0xbe0] sm:$0xff] }
  0xc9   :  { %1093 = vmatpush1.msra.mxu1 %v567_v25  ;;  %1019 = vmatprep.subr.mxu0 %v364_v26  ;;  %v483_v25 = vld [vmem:[#allocation5 + $0xc10] sm:$0xff]  ;;  %v472_v26 = vld [vmem:[#allocation5 + $0xbb8] sm:$0xff] }
  0xca   :  { %1094 = vmatprep.subr.mxu1 %v562_v60  ;;  %1020 = vmatpush1.msra.mxu0 %v363_v27  ;;  %v670_v60 = vld [vmem:[#allocation5 + $0x11e8] sm:$0xff]  ;;  %v471_v27 = vld [vmem:[#allocation5 + $0xbb0] sm:$0xff] }
  0xcb   :  { %1095 = vmatpush1.msra.mxu1 %v561_v28  ;;  %1021 = vmatprep.subr.mxu0 %v358_v29  ;;  %v669_v28 = vld [vmem:[#allocation5 + $0x11e0] sm:$0xff]  ;;  %v466_v29 = vld [vmem:[#allocation5 + $0xb88] sm:$0xff] }
  0xcc   :  { %1096 = vmatprep.subr.mxu1 %v556_v30  ;;  %1022 = vmatpush1.msra.mxu0 %v357_v31  ;;  %v664_v30 = vld [vmem:[#allocation5 + $0x11b8] sm:$0xff]  ;;  %v465_v31 = vld [vmem:[#allocation5 + $0xb80] sm:$0xff] }
  0xcd   :  { %1097 = vmatpush1.msra.mxu1 %v555_v63  ;;  %1023 = vmatprep.subr.mxu0 %v352_v32  ;;  %v663_v63 = vld [vmem:[#allocation5 + $0x11b0] sm:$0xff]  ;;  %v460_v32 = vld [vmem:[#allocation5 + $0xb58] sm:$0xff] }
  0xce   :  { %1098 = vmatprep.subr.mxu1 %v550_v33  ;;  %1024 = vmatpush1.msra.mxu0 %v351_v34  ;;  %v658_v33 = vld [vmem:[#allocation5 + $0x1188] sm:$0xff]  ;;  %v459_v34 = vld [vmem:[#allocation5 + $0xb50] sm:$0xff] }
  0xcf   :  { %1099 = vmatpush1.msra.mxu1 %v549_v35  ;;  %1025 = vmatprep.subr.mxu0 %v346_v36  ;;  %v657_v35 = vld [vmem:[#allocation5 + $0x1180] sm:$0xff]  ;;  %v454_v36 = vld [vmem:[#allocation5 + $0xb28] sm:$0xff] }
  0xd0   :  { %1100 = vmatprep.subr.mxu1 %v544_v37  ;;  %1026 = vmatpush1.msra.mxu0 %v345_v38  ;;  %v652_v37 = vld [vmem:[#allocation5 + $0x1158] sm:$0xff]  ;;  %v453_v38 = vld [vmem:[#allocation5 + $0xb20] sm:$0xff] }
  0xd1   :  { %1101 = vmatpush1.msra.mxu1 %v543_v39  ;;  %1027 = vmatprep.subr.mxu0 %v340_v40  ;;  %v651_v39 = vld [vmem:[#allocation5 + $0x1150] sm:$0xff]  ;;  %v448_v40 = vld [vmem:[#allocation5 + $0xaf8] sm:$0xff] }
  0xd2   :  { %1102 = vmatprep.subr.mxu1 %v538_v41  ;;  %1028 = vmatpush1.msra.mxu0 %v339_v42  ;;  %v646_v41 = vld [vmem:[#allocation5 + $0x1128] sm:$0xff]  ;;  %v447_v42 = vld [vmem:[#allocation5 + $0xaf0] sm:$0xff] }
  0xd3   :  { %1103 = vmatpush1.msra.mxu1 %v537_v43  ;;  %1029 = vmatprep.subr.mxu0 %v334_v44  ;;  %v645_v43 = vld [vmem:[#allocation5 + $0x1120] sm:$0xff]  ;;  %v442_v44 = vld [vmem:[#allocation5 + $0xac8] sm:$0xff] }
  0xd4   :  { %1104 = vmatprep.subr.mxu1 %v532_v45  ;;  %1030 = vmatpush1.msra.mxu0 %v333_v46  ;;  %v640_v45 = vld [vmem:[#allocation5 + $0x10f8] sm:$0xff]  ;;  %v441_v46 = vld [vmem:[#allocation5 + $0xac0] sm:$0xff] }
  0xd5   :  { %1105 = vmatpush1.msra.mxu1 %v531_v47  ;;  %1031 = vmatprep.subr.mxu0 %v328_v48  ;;  %v639_v47 = vld [vmem:[#allocation5 + $0x10f0] sm:$0xff]  ;;  %v436_v48 = vld [vmem:[#allocation5 + $0xa98] sm:$0xff] }
  0xd6   :  { %1106 = vmatprep.subr.mxu1 %v526_v49  ;;  %1032 = vmatpush1.msra.mxu0 %v327_v50  ;;  %v634_v49 = vld [vmem:[#allocation5 + $0x10c8] sm:$0xff]  ;;  %v435_v50 = vld [vmem:[#allocation5 + $0xa90] sm:$0xff] }
  0xd7   :  { %1107 = vmatpush1.msra.mxu1 %v525_v51  ;;  %1033 = vmatprep.subr.mxu0 %v322_v52  ;;  %v633_v51 = vld [vmem:[#allocation5 + $0x10c0] sm:$0xff]  ;;  %v430_v52 = vld [vmem:[#allocation5 + $0xa68] sm:$0xff] }
  0xd8   :  { %1108 = vmatprep.subr.mxu1 %v520_v53  ;;  %1034 = vmatpush1.msra.mxu0 %v321_v54  ;;  %v628_v53 = vld [vmem:[#allocation5 + $0x1098] sm:$0xff]  ;;  %v429_v54 = vld [vmem:[#allocation5 + $0xa60] sm:$0xff] }
  0xd9   :  { %1109 = vmatpush1.msra.mxu1 %v519_v55  ;;  %1035 = vmatprep.subr.mxu0 %v316_v57  ;;  %v627_v55 = vld [vmem:[#allocation5 + $0x1090] sm:$0xff]  ;;  %v424_v57 = vld [vmem:[#allocation5 + $0xa38] sm:$0xff] }
  0xda   :  { %1110 = vmatprep.subr.mxu1 %v514_v58  ;;  %1036 = vmatpush1.msra.mxu0 %v315_v61  ;;  %v622_v58 = vld [vmem:[#allocation5 + $0x1068] sm:$0xff]  ;;  %v423_v61 = vld [vmem:[#allocation5 + $0xa30] sm:$0xff] }
  0xdb   :  { %1111 = vmatpush1.msra.mxu1 %v513_v62  ;;  %1037 = vmatprep.subr.mxu0 %v310_v1  ;;  %v621_v62 = vld [vmem:[#allocation5 + $0x1060] sm:$0xff]  ;;  %v418_v1 = vld [vmem:[#allocation5 + $0xa08] sm:$0xff] }
  0xdc   :  { %1112 = vmatprep.subr.mxu1 %v508_v2  ;;  %1038 = vmatpush1.msra.mxu0 %v309_v4  ;;  %v616_v2 = vld [vmem:[#allocation5 + $0x1038] sm:$0xff]  ;;  %v417_v4 = vld [vmem:[#allocation5 + $0xa00] sm:$0xff] }
  0xdd   :  { %1113 = vmatpush1.msra.mxu1 %v507_v5  ;;  %1039 = vmatprep.subr.mxu0 %v304_v6  ;;  %v615_v5 = vld [vmem:[#allocation5 + $0x1030] sm:$0xff]  ;;  %v412_v6 = vld [vmem:[#allocation5 + $0x9d8] sm:$0xff] }
  0xde   :  { %1114 = vmatprep.subr.mxu1 %v502_v7  ;;  %1040 = vmatpush1.msra.mxu0 %v303_v8  ;;  %v610_v7 = vld [vmem:[#allocation5 + $0x1008] sm:$0xff]  ;;  %v411_v8 = vld [vmem:[#allocation5 + $0x9d0] sm:$0xff] }
  0xdf   :  { %1115 = vmatpush1.msra.mxu1 %v501_v10  ;;  %1041 = vmatprep.subr.mxu0 %v298_v12  ;;  %v609_v10 = vld [vmem:[#allocation5 + $0x1000] sm:$0xff]  ;;  %v406_v12 = vld [vmem:[#allocation5 + $0x9a8] sm:$0xff] }
  0xe0   :  { %1116 = vmatprep.subr.mxu1 %v496_v13  ;;  %1042 = vmatpush1.msra.mxu0 %v297_v14  ;;  %v604_v13 = vld [vmem:[#allocation5 + $0xfd8] sm:$0xff]  ;;  %v405_v14 = vld [vmem:[#allocation5 + $0x9a0] sm:$0xff] }
  0xe1   :  { %1117 = vmatpush1.msra.mxu1 %v495_v15  ;;  %1043 = vmatprep.subr.mxu0 %v292_v16  ;;  %v603_v15 = vld [vmem:[#allocation5 + $0xfd0] sm:$0xff]  ;;  %v400_v16 = vld [vmem:[#allocation5 + $0x978] sm:$0xff] }
  0xe2   :  { %1118 = vmatprep.subr.mxu1 %v490_v17  ;;  %1044 = vmatpush1.msra.mxu0 %v291_v19  ;;  %v598_v17 = vld [vmem:[#allocation5 + $0xfa8] sm:$0xff]  ;;  %v399_v19 = vld [vmem:[#allocation5 + $0x970] sm:$0xff] }
  0xe3   :  { %1119 = vmatpush1.msra.mxu1 %v489_v20  ;;  %1045 = vmatprep.subr.mxu0 %v478_v22  ;;  %v597_v20 = vld [vmem:[#allocation5 + $0xfa0] sm:$0xff]  ;;  %v394_v22 = vld [vmem:[#allocation5 + $0x948] sm:$0xff] }
  0xe4   :  { %1120 = vmatprep.subr.mxu1 %v484_v23  ;;  %1046 = vmatpush2.msra.mxu0 %v477_v24  ;;  %v592_v23 = vld [vmem:[#allocation5 + $0xf78] sm:$0xff]  ;;  %v393_v24 = vld [vmem:[#allocation5 + $0x940] sm:$0xff] }
  0xe5   :  { %1121 = vmatpush1.msra.mxu1 %v483_v25  ;;  %1047 = vmatprep.subr.mxu0 %v472_v26  ;;  %v591_v25 = vld [vmem:[#allocation5 + $0xf70] sm:$0xff]  ;;  %v388_v26 = vld [vmem:[#allocation5 + $0x918] sm:$0xff] }
  0xe6   :  { %1122 = vmatprep.subr.mxu1 %v670_v60  ;;  %1048 = vmatpush2.msra.mxu0 %v471_v27  ;;  %v586_v60 = vld [vmem:[#allocation5 + $0xf48] sm:$0xff]  ;;  %v387_v27 = vld [vmem:[#allocation5 + $0x910] sm:$0xff] }
  0xe7   :  { %1123 = vmatpush2.msra.mxu1 %v669_v28  ;;  %1049 = vmatprep.subr.mxu0 %v466_v29  ;;  %v585_v28 = vld [vmem:[#allocation5 + $0xf40] sm:$0xff]  ;;  %v580_v29 = vld [vmem:[#allocation5 + $0xf18] sm:$0xff] }
  0xe8   :  { %1124 = vmatprep.subr.mxu1 %v664_v30  ;;  %1050 = vmatpush2.msra.mxu0 %v465_v31  ;;  %v192_v30 = vld [vmem:[#allocation5 + $0x2f8] sm:$0xff]  ;;  %v579_v31 = vld [vmem:[#allocation5 + $0xf10] sm:$0xff] }
  0xe9   :  { %1125 = vmatpush2.msra.mxu1 %v663_v63  ;;  %1051 = vmatprep.subr.mxu0 %v460_v32  ;;  %v2987_v63 = vld [vmem:[#allocation2 + $0x18] sm:$0xff]  ;;  %v191_v32 = vld [vmem:[#allocation5 + $0x2f0] sm:$0xff] }
  0xea   :  { %1126 = vmatprep.subr.mxu1 %v658_v33  ;;  %1052 = vmatpush2.msra.mxu0 %v459_v34  ;;  %v186_v33 = vld [vmem:[#allocation5 + $0x2c8] sm:$0xff]  ;;  %v185_v34 = vld [vmem:[#allocation5 + $0x2c0] sm:$0xff] }
  0xeb   :  { %1127 = vmatpush2.msra.mxu1 %v657_v35  ;;  %1053 = vmatprep.subr.mxu0 %v454_v36  ;;  %v383_v35 = vld [vmem:[#allocation5 + $0x8f0] sm:$0xff]  ;;  %v180_v36 = vld [vmem:[#allocation5 + $0x298] sm:$0xff] }
  0xec   :  { %1128 = vmatprep.subr.mxu1 %v652_v37  ;;  %1054 = vmatpush2.msra.mxu0 %v453_v38  ;;  %v378_v37 = vld [vmem:[#allocation5 + $0x8c8] sm:$0xff]  ;;  %v179_v38 = vld [vmem:[#allocation5 + $0x290] sm:$0xff] }
  0xed   :  { %1129 = vmatpush2.msra.mxu1 %v651_v39  ;;  %1055 = vmatprep.subr.mxu0 %v448_v40  ;;  %v377_v39 = vld [vmem:[#allocation5 + $0x8c0] sm:$0xff]  ;;  %v174_v40 = vld [vmem:[#allocation5 + $0x268] sm:$0xff] }
  0xee   :  { %1130 = vmatprep.subr.mxu1 %v646_v41  ;;  %1056 = vmatpush2.msra.mxu0 %v447_v42  ;;  %v173_v41 = vld [vmem:[#allocation5 + $0x260] sm:$0xff]  ;;  %v168_v42 = vld [vmem:[#allocation5 + $0x238] sm:$0xff] }
  0xef   :  { %1131 = vmatpush2.msra.mxu1 %v645_v43  ;;  %1057 = vmatprep.subr.mxu0 %v442_v44  ;;  %v167_v43 = vld [vmem:[#allocation5 + $0x230] sm:$0xff]  ;;  %v365_v44 = vld [vmem:[#allocation5 + $0x860] sm:$0xff] }
  0xf0   :  { %1132 = vmatprep.subr.mxu1 %v640_v45  ;;  %1058 = vmatpush2.msra.mxu0 %v441_v46  ;;  %v360_v45 = vld [vmem:[#allocation5 + $0x838] sm:$0xff]  ;;  %v161_v46 = vld [vmem:[#allocation5 + $0x200] sm:$0xff] }
  0xf1   :  { %1133 = vmatpush2.msra.mxu1 %v639_v47  ;;  %1059 = vmatprep.subr.mxu0 %v436_v48  ;;  %v156_v47 = vld [vmem:[#allocation5 + $0x1d8] sm:$0xff]  ;;  %v354_v48 = vld [vmem:[#allocation5 + $0x808] sm:$0xff] }
  0xf2   :  { %1134 = vmatprep.subr.mxu1 %v634_v49  ;;  %1060 = vmatpush2.msra.mxu0 %v435_v50  ;;  %v155_v49 = vld [vmem:[#allocation5 + $0x1d0] sm:$0xff]  ;;  %v150_v50 = vld [vmem:[#allocation5 + $0x1a8] sm:$0xff] }
  0xf3   :  { %1135 = vmatpush2.msra.mxu1 %v633_v51  ;;  %1061 = vmatprep.subr.mxu0 %v430_v52  ;;  %v348_v51 = vld [vmem:[#allocation5 + $0x7d8] sm:$0xff]  ;;  %v149_v52 = vld [vmem:[#allocation5 + $0x1a0] sm:$0xff] }
  0xf4   :  { %1136 = vmatprep.subr.mxu1 %v628_v53  ;;  %1062 = vmatpush2.msra.mxu0 %v429_v54  ;;  %v347_v53 = vld [vmem:[#allocation5 + $0x7d0] sm:$0xff]  ;;  %v144_v54 = vld [vmem:[#allocation5 + $0x178] sm:$0xff] }
  0xf5   :  { %1137 = vmatpush2.msra.mxu1 %v627_v55  ;;  %1063 = vmatprep.subr.mxu0 %v424_v57  ;;  %v342_v55 = vld [vmem:[#allocation5 + $0x7a8] sm:$0xff]  ;;  %v143_v57 = vld [vmem:[#allocation5 + $0x170] sm:$0xff] }
  0xf6   :  { %1138 = vmatprep.subr.mxu1 %v622_v58  ;;  %1064 = vmatpush2.msra.mxu0 %v423_v61  ;;  %v341_v58 = vld [vmem:[#allocation5 + $0x7a0] sm:$0xff]  ;;  %v138_v61 = vld [vmem:[#allocation5 + $0x148] sm:$0xff] }
  0xf7   :  { %1139 = vmatpush2.msra.mxu1 %v621_v62  ;;  %1065 = vmatprep.subr.mxu0 %v418_v1  ;;  %v336_v62 = vld [vmem:[#allocation5 + $0x778] sm:$0xff]  ;;  %v137_v1 = vld [vmem:[#allocation5 + $0x140] sm:$0xff] }
  0xf8   :  { %1140 = vmatprep.subr.mxu1 %v616_v2  ;;  %1066 = vmatpush2.msra.mxu0 %v417_v4  ;;  %v335_v2 = vld [vmem:[#allocation5 + $0x770] sm:$0xff]  ;;  %v132_v4 = vld [vmem:[#allocation5 + $0x118] sm:$0xff] }
  0xf9   :  { %1141 = vmatpush2.msra.mxu1 %v615_v5  ;;  %1067 = vmatprep.subr.mxu0 %v412_v6  ;;  %v330_v5 = vld [vmem:[#allocation5 + $0x748] sm:$0xff]  ;;  %v131_v6 = vld [vmem:[#allocation5 + $0x110] sm:$0xff] }
  0xfa   :  { %1142 = vmatprep.subr.mxu1 %v610_v7  ;;  %1068 = vmatpush2.msra.mxu0 %v411_v8  ;;  %v329_v7 = vld [vmem:[#allocation5 + $0x740] sm:$0xff]  ;;  %v126_v8 = vld [vmem:[#allocation5 + $0xe8] sm:$0xff] }
  0xfb   :  { %1143 = vmatpush2.msra.mxu1 %v609_v10  ;;  %1069 = vmatprep.subr.mxu0 %v406_v12  ;;  %v324_v10 = vld [vmem:[#allocation5 + $0x718] sm:$0xff]  ;;  %v125_v12 = vld [vmem:[#allocation5 + $0xe0] sm:$0xff] }
  0xfc   :  { %1144 = vmatprep.subr.mxu1 %v604_v13  ;;  %1070 = vmatpush2.msra.mxu0 %v405_v14  ;;  %v323_v13 = vld [vmem:[#allocation5 + $0x710] sm:$0xff]  ;;  %v120_v14 = vld [vmem:[#allocation5 + $0xb8] sm:$0xff] }
  0xfd   :  { %1145 = vmatpush2.msra.mxu1 %v603_v15  ;;  %1071 = vmatprep.subr.mxu0 %v400_v16  ;;  %v318_v15 = vld [vmem:[#allocation5 + $0x6e8] sm:$0xff]  ;;  %v119_v16 = vld [vmem:[#allocation5 + $0xb0] sm:$0xff] }
  0xfe   :  { %1146 = vmatprep.subr.mxu1 %v598_v17  ;;  %1072 = vmatpush2.msra.mxu0 %v399_v19  ;;  %v317_v17 = vld [vmem:[#allocation5 + $0x6e0] sm:$0xff]  ;;  %v114_v19 = vld [vmem:[#allocation5 + $0x88] sm:$0xff] }
  0xff   :  { %1147 = vmatpush2.msra.mxu1 %v597_v20  ;;  %1073 = vmatprep.subr.mxu0 %v394_v22  ;;  %v312_v20 = vld [vmem:[#allocation5 + $0x6b8] sm:$0xff]  ;;  %v113_v22 = vld [vmem:[#allocation5 + $0x80] sm:$0xff] }
 0x100   :  { %1148 = vmatprep.subr.mxu1 %v592_v23  ;;  %1006 = vmatprep.mubr.f32.mxu1 %v2959_v56  ;;  %v2990_v56 = vld [vmem:[#allocation2 + $0x10] sm:$0xff] }
 0x101   :  { %1074 = vmatpush2.msra.mxu0 %v393_v24  ;;  %1149 = vmatpush2.msra.mxu1 %v591_v25  ;;  %v311_v23 = vld [vmem:[#allocation5 + $0x6b0] sm:$0xff]  ;;  %v108_v24 = vld [vmem:[#allocation5 + $0x58] sm:$0xff]  ;;  %v306_v25 = vld [vmem:[#allocation5 + $0x688] sm:$0xff] }
 0x102   :  { %1007 = vmatmul.mubr.f32.gmra.mxu1 %v2961_v59  ;;  %1075 = vmatprep.subr.mxu0 %v388_v26  ;;  %v384_v59 = vld [vmem:[#allocation5 + $0x8f8] sm:$0xff]  ;;  %v107_v26 = vld [vmem:[#allocation5 + $0x50] sm:$0xff] }
 0x103   :  { %1150 = vmatprep.subr.mxu1 %v586_v60  ;;  %1076 = vmatpush2.msra.mxu0 %v387_v27  ;;  %v305_v60 = vld [vmem:[#allocation5 + $0x680] sm:$0xff]  ;;  %v102_v27 = vld [vmem:[#allocation5 + $0x28] sm:$0xff] }
 0x104   :  { %1077 = vmatprep.mubr.f32.mxu0 %v2987_v63  ;;  %1151 = vmatpush2.msra.mxu1 %v585_v28  ;;  %v300_v28 = vld [vmem:[#allocation5 + $0x658] sm:$0xff] }
 0x105   :  { %1078 = vmatmul.mubr.f32.vlgmr.msra.gmra.mxu0 %v2990_v56  ;;  %1152 = vmatprep.subr.mxu1 %v580_v29  ;;  %v101_v29 = vld [vmem:[#allocation5 + $0x20] sm:$0xff] }
 0x106   :  { %1167 = vmatprep.subr.mxu0 %v192_v30  ;;  %1153 = vmatpush2.msra.mxu1 %v579_v31  ;;  %v299_v30 = vld [vmem:[#allocation5 + $0x650] sm:$0xff]  ;;  %v288_v31 = vld [vmem:[#allocation5 + $0x5f8] sm:$0xff] }
 0x107   :  { %1154 = vmatprep.mubr.f32.mxu1 %v2971_v9  ;;  %1168 = vmatpush1.msra.mxu0 %v191_v32  ;;  %v372_v9 = vld [vmem:[#allocation5 + $0x898] sm:$0xff]  ;;  %v294_v32 = vld [vmem:[#allocation5 + $0x628] sm:$0xff] }
 0x108   :  { %1155 = vmatmul.mubr.f32.vlgmr.msra.gmra.mxu1 %v2973_v11  ;;  %1169 = vmatprep.subr.mxu0 %v186_v33  ;;  %v371_v11 = vld [vmem:[#allocation5 + $0x890] sm:$0xff] }
 0x109   :  { %1244 = vmatprep.subr.mxu1 %v384_v59  ;;  %1083 = vmatprep.mubr.f32.mxu0 %v2964_v0  ;;  %v366_v0 = vld [vmem:[#allocation5 + $0x868] sm:$0xff]  ;;  %v287_v33 = vld [vmem:[#allocation5 + $0x5f0] sm:$0xff]  ;;  %v293_v59 = vld [vmem:[#allocation5 + $0x620] sm:$0xff] }
 0x10a   :  { %1170 = vmatpush1.msra.mxu0 %v185_v34  ;;  %1245 = vmatpush1.msra.mxu1 %v383_v35  ;;  %v282_v34 = vld [vmem:[#allocation5 + $0x5c8] sm:$0xff]  ;;  %v480_v35 = vld [vmem:[#allocation5 + $0xbf8] sm:$0xff] }
 0x10b   :  { %1084 = vmatmul.mubr.f32.gmra.mxu0 %v2967_v3  ;;  %1171 = vmatprep.subr.mxu0 %v180_v36  ;;  %v162_v3 = vld [vmem:[#allocation5 + $0x208] sm:$0xff]  ;;  %v281_v36 = vld [vmem:[#allocation5 + $0x5c0] sm:$0xff] }
 0x10c   :  { %1246 = vmatprep.subr.mxu1 %v378_v37  ;;  %1160 = vmatprep.mubr.f32.mxu1 %v2977_v18  ;;  %v359_v18 = vld [vmem:[#allocation5 + $0x830] sm:$0xff] }
 0x10d   :  { %1172 = vmatpush1.msra.mxu0 %v179_v38  ;;  %1247 = vmatpush1.msra.mxu1 %v377_v39  ;;  %v479_v37 = vld [vmem:[#allocation5 + $0xbf0] sm:$0xff]  ;;  %v276_v38 = vld [vmem:[#allocation5 + $0x598] sm:$0xff]  ;;  %v474_v39 = vld [vmem:[#allocation5 + $0xbc8] sm:$0xff] }
 0x10e   :  { %1161 = vmatmul.mubr.f32.gmra.mxu1 %v2980_v21  ;;  %1173 = vmatprep.subr.mxu0 %v174_v40  ;;  %v353_v21 = vld [vmem:[#allocation5 + $0x800] sm:$0xff]  ;;  %v275_v40 = vld [vmem:[#allocation5 + $0x590] sm:$0xff] }
 0x10f   :  { %1248 = vmatprep.subr.mxu1 %v372_v9  ;;  %1174 = vmatpush1.msra.mxu0 %v173_v41  ;;  %v473_v9 = vld [vmem:[#allocation5 + $0xbc0] sm:$0xff]  ;;  %v270_v41 = vld [vmem:[#allocation5 + $0x568] sm:$0xff] }
 0x110   :  { %1249 = vmatpush1.msra.mxu1 %v371_v11  ;;  %1175 = vmatprep.subr.mxu0 %v168_v42  ;;  %v468_v11 = vld [vmem:[#allocation5 + $0xb98] sm:$0xff]  ;;  %v269_v42 = vld [vmem:[#allocation5 + $0x560] sm:$0xff] }
 0x111   :  { %1250 = vmatprep.subr.mxu1 %v366_v0  ;;  %1176 = vmatpush1.msra.mxu0 %v167_v43  ;;  %v467_v0 = vld [vmem:[#allocation5 + $0xb90] sm:$0xff]  ;;  %v264_v43 = vld [vmem:[#allocation5 + $0x538] sm:$0xff] }
 0x112   :  { %1251 = vmatpush1.msra.mxu1 %v365_v44  ;;  %1177 = vmatprep.subr.mxu0 %v162_v3  ;;  %v462_v44 = vld [vmem:[#allocation5 + $0xb68] sm:$0xff]  ;;  %v263_v3 = vld [vmem:[#allocation5 + $0x530] sm:$0xff] }
 0x113   :  { %1252 = vmatprep.subr.mxu1 %v360_v45  ;;  %1178 = vmatpush1.msra.mxu0 %v161_v46  ;;  %v461_v45 = vld [vmem:[#allocation5 + $0xb60] sm:$0xff]  ;;  %v258_v46 = vld [vmem:[#allocation5 + $0x508] sm:$0xff] }
 0x114   :  { %1253 = vmatpush1.msra.mxu1 %v359_v18  ;;  %1179 = vmatprep.subr.mxu0 %v156_v47  ;;  %v456_v18 = vld [vmem:[#allocation5 + $0xb38] sm:$0xff]  ;;  %v257_v47 = vld [vmem:[#allocation5 + $0x500] sm:$0xff] }
 0x115   :  { %1254 = vmatprep.subr.mxu1 %v354_v48  ;;  %1180 = vmatpush1.msra.mxu0 %v155_v49  ;;  %v455_v48 = vld [vmem:[#allocation5 + $0xb30] sm:$0xff]  ;;  %v252_v49 = vld [vmem:[#allocation5 + $0x4d8] sm:$0xff] }
 0x116   :  { %1255 = vmatpush1.msra.mxu1 %v353_v21  ;;  %1181 = vmatprep.subr.mxu0 %v150_v50  ;;  %v450_v21 = vld [vmem:[#allocation5 + $0xb08] sm:$0xff]  ;;  %v251_v50 = vld [vmem:[#allocation5 + $0x4d0] sm:$0xff] }
 0x117   :  { %1256 = vmatprep.subr.mxu1 %v348_v51  ;;  %1182 = vmatpush1.msra.mxu0 %v149_v52  ;;  %v449_v51 = vld [vmem:[#allocation5 + $0xb00] sm:$0xff]  ;;  %v246_v52 = vld [vmem:[#allocation5 + $0x4a8] sm:$0xff] }
 0x118   :  { %1257 = vmatpush1.msra.mxu1 %v347_v53  ;;  %1183 = vmatprep.subr.mxu0 %v144_v54  ;;  %v444_v53 = vld [vmem:[#allocation5 + $0xad8] sm:$0xff]  ;;  %v245_v54 = vld [vmem:[#allocation5 + $0x4a0] sm:$0xff] }
 0x119   :  { %1258 = vmatprep.subr.mxu1 %v342_v55  ;;  %1184 = vmatpush1.msra.mxu0 %v143_v57  ;;  %v443_v55 = vld [vmem:[#allocation5 + $0xad0] sm:$0xff]  ;;  %v240_v57 = vld [vmem:[#allocation5 + $0x478] sm:$0xff] }
 0x11a   :  { %1259 = vmatpush1.msra.mxu1 %v341_v58  ;;  %1185 = vmatprep.subr.mxu0 %v138_v61  ;;  %v438_v58 = vld [vmem:[#allocation5 + $0xaa8] sm:$0xff]  ;;  %v239_v61 = vld [vmem:[#allocation5 + $0x470] sm:$0xff] }
 0x11b   :  { %1260 = vmatprep.subr.mxu1 %v336_v62  ;;  %1186 = vmatpush1.msra.mxu0 %v137_v1  ;;  %v437_v62 = vld [vmem:[#allocation5 + $0xaa0] sm:$0xff]  ;;  %v234_v1 = vld [vmem:[#allocation5 + $0x448] sm:$0xff] }
 0x11c   :  { %1261 = vmatpush1.msra.mxu1 %v335_v2  ;;  %1187 = vmatprep.subr.mxu0 %v132_v4  ;;  %v432_v2 = vld [vmem:[#allocation5 + $0xa78] sm:$0xff]  ;;  %v233_v4 = vld [vmem:[#allocation5 + $0x440] sm:$0xff] }
 0x11d   :  { %1262 = vmatprep.subr.mxu1 %v330_v5  ;;  %1188 = vmatpush1.msra.mxu0 %v131_v6  ;;  %v431_v5 = vld [vmem:[#allocation5 + $0xa70] sm:$0xff]  ;;  %v228_v6 = vld [vmem:[#allocation5 + $0x418] sm:$0xff] }
 0x11e   :  { %1263 = vmatpush1.msra.mxu1 %v329_v7  ;;  %1189 = vmatprep.subr.mxu0 %v126_v8  ;;  %v426_v7 = vld [vmem:[#allocation5 + $0xa48] sm:$0xff]  ;;  %v227_v8 = vld [vmem:[#allocation5 + $0x410] sm:$0xff] }
 0x11f   :  { %1264 = vmatprep.subr.mxu1 %v324_v10  ;;  %1190 = vmatpush1.msra.mxu0 %v125_v12  ;;  %v425_v10 = vld [vmem:[#allocation5 + $0xa40] sm:$0xff]  ;;  %v222_v12 = vld [vmem:[#allocation5 + $0x3e8] sm:$0xff] }
 0x120   :  { %1265 = vmatpush1.msra.mxu1 %v323_v13  ;;  %1191 = vmatprep.subr.mxu0 %v120_v14  ;;  %v420_v13 = vld [vmem:[#allocation5 + $0xa18] sm:$0xff]  ;;  %v221_v14 = vld [vmem:[#allocation5 + $0x3e0] sm:$0xff] }
 0x121   :  { %1266 = vmatprep.subr.mxu1 %v318_v15  ;;  %1192 = vmatpush1.msra.mxu0 %v119_v16  ;;  %v419_v15 = vld [vmem:[#allocation5 + $0xa10] sm:$0xff]  ;;  %v216_v16 = vld [vmem:[#allocation5 + $0x3b8] sm:$0xff] }
 0x122   :  { %1267 = vmatpush1.msra.mxu1 %v317_v17  ;;  %1193 = vmatprep.subr.mxu0 %v114_v19  ;;  %v414_v17 = vld [vmem:[#allocation5 + $0x9e8] sm:$0xff]  ;;  %v215_v19 = vld [vmem:[#allocation5 + $0x3b0] sm:$0xff] }
 0x123   :  { %1268 = vmatprep.subr.mxu1 %v312_v20  ;;  %1194 = vmatpush1.msra.mxu0 %v113_v22  ;;  %v413_v20 = vld [vmem:[#allocation5 + $0x9e0] sm:$0xff]  ;;  %v210_v22 = vld [vmem:[#allocation5 + $0x388] sm:$0xff] }
 0x124   :  { %1269 = vmatpush1.msra.mxu1 %v311_v23  ;;  %1195 = vmatprep.subr.mxu0 %v108_v24  ;;  %v408_v23 = vld [vmem:[#allocation5 + $0x9b8] sm:$0xff]  ;;  %v209_v24 = vld [vmem:[#allocation5 + $0x380] sm:$0xff] }
 0x125   :  { %1270 = vmatprep.subr.mxu1 %v306_v25  ;;  %1196 = vmatpush1.msra.mxu0 %v107_v26  ;;  %v407_v25 = vld [vmem:[#allocation5 + $0x9b0] sm:$0xff]  ;;  %v204_v26 = vld [vmem:[#allocation5 + $0x358] sm:$0xff] }
 0x126   :  { %1271 = vmatpush1.msra.mxu1 %v305_v60  ;;  %1197 = vmatprep.subr.mxu0 %v102_v27  ;;  %v402_v60 = vld [vmem:[#allocation5 + $0x988] sm:$0xff]  ;;  %v203_v27 = vld [vmem:[#allocation5 + $0x350] sm:$0xff] }
 0x127   :  { %1272 = vmatprep.subr.mxu1 %v300_v28  ;;  %1198 = vmatpush1.msra.mxu0 %v101_v29  ;;  %v401_v28 = vld [vmem:[#allocation5 + $0x980] sm:$0xff]  ;;  %v198_v29 = vld [vmem:[#allocation5 + $0x328] sm:$0xff] }
 0x128   :  { %1273 = vmatpush1.msra.mxu1 %v299_v30  ;;  %1199 = vmatprep.subr.mxu0 %v288_v31  ;;  %v396_v30 = vld [vmem:[#allocation5 + $0x958] sm:$0xff]  ;;  %v197_v31 = vld [vmem:[#allocation5 + $0x320] sm:$0xff] }
 0x129   :  { %1274 = vmatprep.subr.mxu1 %v294_v32  ;;  %1200 = vmatpush2.msra.mxu0 %v287_v33  ;;  %v395_v32 = vld [vmem:[#allocation5 + $0x950] sm:$0xff]  ;;  %v390_v33 = vld [vmem:[#allocation5 + $0x928] sm:$0xff] }
 0x12a   :  { %1275 = vmatpush1.msra.mxu1 %v293_v59  ;;  %1201 = vmatprep.subr.mxu0 %v282_v34  ;;  %v576_v59 = vld [vmem:[#allocation5 + $0xef8] sm:$0xff]  ;;  %v389_v34 = vld [vmem:[#allocation5 + $0x920] sm:$0xff] }
 0x12b   :  { %1276 = vmatprep.subr.mxu1 %v480_v35  ;;  %1202 = vmatpush2.msra.mxu0 %v281_v36  ;;  %v2752_v35 = vld [vmem:[#allocation2 + $0x8] sm:$0xff]  ;;  %v575_v36 = vld [vmem:[#allocation5 + $0xef0] sm:$0xff] }
 0x12c   :  { %1277 = vmatpush2.msra.mxu1 %v479_v37  ;;  %1203 = vmatprep.subr.mxu0 %v276_v38  ;;  %v2753_v37 = vld [vmem:[#allocation2] sm:$0xff]  ;;  %v570_v38 = vld [vmem:[#allocation5 + $0xec8] sm:$0xff] }
 0x12d   :  { %1278 = vmatprep.subr.mxu1 %v474_v39  ;;  %1204 = vmatpush2.msra.mxu0 %v275_v40  ;;  %v569_v39 = vld [vmem:[#allocation5 + $0xec0] sm:$0xff] }
 0x12e   :  { %1279 = vmatpush2.msra.mxu1 %v473_v9  ;;  %1205 = vmatprep.subr.mxu0 %v270_v41  ;;  %v1501_v40 = vld [vmem:[#allocation8 + $0x2d8] sm:$0xff]  ;;  %v1500_v41 = vld [vmem:[#allocation8 + $0x2d0] sm:$0xff] }
 0x12f   :  { %1280 = vmatprep.subr.mxu1 %v468_v11  ;;  %1206 = vmatpush2.msra.mxu0 %v269_v42  ;;  %v564_v9 = vld [vmem:[#allocation5 + $0xe98] sm:$0xff]  ;;  %v563_v11 = vld [vmem:[#allocation5 + $0xe90] sm:$0xff] }
 0x130   :  { %1281 = vmatpush2.msra.mxu1 %v467_v0  ;;  %1207 = vmatprep.subr.mxu0 %v264_v43  ;;  %v1495_v42 = vld [vmem:[#allocation8 + $0x2a8] sm:$0xff]  ;;  %v1494_v43 = vld [vmem:[#allocation8 + $0x2a0] sm:$0xff] }
 0x131   :  { %1282 = vmatprep.subr.mxu1 %v462_v44  ;;  %1208 = vmatpush2.msra.mxu0 %v263_v3  ;;  %v558_v0 = vld [vmem:[#allocation5 + $0xe68] sm:$0xff]  ;;  %v557_v44 = vld [vmem:[#allocation5 + $0xe60] sm:$0xff] }
 0x132   :  { %1283 = vmatpush2.msra.mxu1 %v461_v45  ;;  %1209 = vmatprep.subr.mxu0 %v258_v46  ;;  %v1489_v3 = vld [vmem:[#allocation8 + $0x278] sm:$0xff]  ;;  %v551_v46 = vld [vmem:[#allocation5 + $0xe30] sm:$0xff] }
 0x133   :  { %1284 = vmatprep.subr.mxu1 %v456_v18  ;;  %1210 = vmatpush2.msra.mxu0 %v257_v47  ;;  %v552_v45 = vld [vmem:[#allocation5 + $0xe38] sm:$0xff]  ;;  %v1483_v18 = vld [vmem:[#allocation8 + $0x248] sm:$0xff]  ;;  %v1482_v47 = vld [vmem:[#allocation8 + $0x240] sm:$0xff] }
 0x134   :  { %1285 = vmatpush2.msra.mxu1 %v455_v48  ;;  %1211 = vmatprep.subr.mxu0 %v252_v49  ;;  %v545_v48 = vld [vmem:[#allocation5 + $0xe00] sm:$0xff] }
 0x135   :  { %1286 = vmatprep.subr.mxu1 %v450_v21  ;;  %1212 = vmatpush2.msra.mxu0 %v251_v50  ;;  %v1477_v49 = vld [vmem:[#allocation8 + $0x218] sm:$0xff]  ;;  %v1476_v50 = vld [vmem:[#allocation8 + $0x210] sm:$0xff] }
 0x136   :  { %1287 = vmatpush2.msra.mxu1 %v449_v51  ;;  %1213 = vmatprep.subr.mxu0 %v246_v52  ;;  %v540_v21 = vld [vmem:[#allocation5 + $0xdd8] sm:$0xff]  ;;  %v539_v51 = vld [vmem:[#allocation5 + $0xdd0] sm:$0xff] }
 0x137   :  { %1288 = vmatprep.subr.mxu1 %v444_v53  ;;  %1214 = vmatpush2.msra.mxu0 %v245_v54  ;;  %v1471_v52 = vld [vmem:[#allocation8 + $0x1e8] sm:$0xff]  ;;  %v1470_v54 = vld [vmem:[#allocation8 + $0x1e0] sm:$0xff] }
 0x138   :  { %1289 = vmatpush2.msra.mxu1 %v443_v55  ;;  %1215 = vmatprep.subr.mxu0 %v240_v57  ;;  %v534_v53 = vld [vmem:[#allocation5 + $0xda8] sm:$0xff]  ;;  %v533_v55 = vld [vmem:[#allocation5 + $0xda0] sm:$0xff] }
 0x139   :  { %1290 = vmatprep.subr.mxu1 %v438_v58  ;;  %1216 = vmatpush2.msra.mxu0 %v239_v61  ;;  %v1465_v57 = vld [vmem:[#allocation8 + $0x1b8] sm:$0xff]  ;;  %v1464_v61 = vld [vmem:[#allocation8 + $0x1b0] sm:$0xff] }
 0x13a   :  { %1291 = vmatpush2.msra.mxu1 %v437_v62  ;;  %1217 = vmatprep.subr.mxu0 %v234_v1  ;;  %v528_v58 = vld [vmem:[#allocation5 + $0xd78] sm:$0xff]  ;;  %v527_v62 = vld [vmem:[#allocation5 + $0xd70] sm:$0xff] }
 0x13b   :  { %1292 = vmatprep.subr.mxu1 %v432_v2  ;;  %1218 = vmatpush2.msra.mxu0 %v233_v4  ;;  %v1459_v1 = vld [vmem:[#allocation8 + $0x188] sm:$0xff]  ;;  %v1458_v4 = vld [vmem:[#allocation8 + $0x180] sm:$0xff] }
 0x13c   :  { %1293 = vmatpush2.msra.mxu1 %v431_v5  ;;  %1219 = vmatprep.subr.mxu0 %v228_v6  ;;  %v522_v2 = vld [vmem:[#allocation5 + $0xd48] sm:$0xff]  ;;  %v521_v5 = vld [vmem:[#allocation5 + $0xd40] sm:$0xff] }
 0x13d   :  { %1294 = vmatprep.subr.mxu1 %v426_v7  ;;  %1220 = vmatpush2.msra.mxu0 %v227_v8  ;;  %v1453_v6 = vld [vmem:[#allocation8 + $0x158] sm:$0xff]  ;;  %v1452_v8 = vld [vmem:[#allocation8 + $0x150] sm:$0xff] }
 0x13e   :  { %1295 = vmatpush2.msra.mxu1 %v425_v10  ;;  %1221 = vmatprep.subr.mxu0 %v222_v12  ;;  %v516_v7 = vld [vmem:[#allocation5 + $0xd18] sm:$0xff]  ;;  %v515_v10 = vld [vmem:[#allocation5 + $0xd10] sm:$0xff] }
 0x13f   :  { %1296 = vmatprep.subr.mxu1 %v420_v13  ;;  %1222 = vmatpush2.msra.mxu0 %v221_v14  ;;  %v1447_v12 = vld [vmem:[#allocation8 + $0x128] sm:$0xff]  ;;  %v1446_v14 = vld [vmem:[#allocation8 + $0x120] sm:$0xff] }
 0x140   :  { %1297 = vmatpush2.msra.mxu1 %v419_v15  ;;  %1223 = vmatprep.subr.mxu0 %v216_v16  ;;  %v510_v13 = vld [vmem:[#allocation5 + $0xce8] sm:$0xff]  ;;  %v509_v15 = vld [vmem:[#allocation5 + $0xce0] sm:$0xff] }
 0x141   :  { %1298 = vmatprep.subr.mxu1 %v414_v17  ;;  %1224 = vmatpush2.msra.mxu0 %v215_v19  ;;  %v1441_v16 = vld [vmem:[#allocation8 + $0xf8] sm:$0xff]  ;;  %v1440_v19 = vld [vmem:[#allocation8 + $0xf0] sm:$0xff] }
 0x142   :  { %1299 = vmatpush2.msra.mxu1 %v413_v20  ;;  %1225 = vmatprep.subr.mxu0 %v210_v22  ;;  %v504_v17 = vld [vmem:[#allocation5 + $0xcb8] sm:$0xff]  ;;  %v503_v20 = vld [vmem:[#allocation5 + $0xcb0] sm:$0xff] }
 0x143   :  { %1300 = vmatprep.subr.mxu1 %v408_v23  ;;  %1226 = vmatpush2.msra.mxu0 %v209_v24  ;;  %v1435_v22 = vld [vmem:[#allocation8 + $0xc8] sm:$0xff]  ;;  %v1434_v24 = vld [vmem:[#allocation8 + $0xc0] sm:$0xff] }
 0x144   :  { %1301 = vmatpush2.msra.mxu1 %v407_v25  ;;  %1227 = vmatprep.subr.mxu0 %v204_v26  ;;  %v498_v23 = vld [vmem:[#allocation5 + $0xc88] sm:$0xff]  ;;  %v497_v25 = vld [vmem:[#allocation5 + $0xc80] sm:$0xff] }
 0x145   :  { %1302 = vmatprep.subr.mxu1 %v402_v60  ;;  %1228 = vmatpush2.msra.mxu0 %v203_v27  ;;  %v1429_v26 = vld [vmem:[#allocation8 + $0x98] sm:$0xff]  ;;  %v1428_v27 = vld [vmem:[#allocation8 + $0x90] sm:$0xff] }
 0x146   :  { %1303 = vmatpush2.msra.mxu1 %v401_v28  ;;  %1229 = vmatprep.subr.mxu0 %v198_v29  ;;  %v492_v60 = vld [vmem:[#allocation5 + $0xc58] sm:$0xff]  ;;  %v491_v28 = vld [vmem:[#allocation5 + $0xc50] sm:$0xff] }
 0x147   :  { %1304 = vmatprep.subr.mxu1 %v396_v30  ;;  %1230 = vmatpush2.msra.mxu0 %v197_v31  ;;  %v1423_v29 = vld [vmem:[#allocation8 + $0x68] sm:$0xff]  ;;  %v1422_v31 = vld [vmem:[#allocation8 + $0x60] sm:$0xff] }
 0x148   :  { %1231 = vmatprep.mubr.f32.mxu0 %v2752_v35  ;;  %1305 = vmatpush2.msra.mxu1 %v395_v32  ;;  %v486_v30 = vld [vmem:[#allocation5 + $0xc28] sm:$0xff]  ;;  %v485_v32 = vld [vmem:[#allocation5 + $0xc20] sm:$0xff]  ;;  %v671_v35 = vld [vmem:[#allocation5 + $0x11f0] sm:$0xff] }
 0x149   :  { %1232 = vmatmul.mubr.f32.vlgmr.msra.gmra.mxu0 %v2753_v37  ;;  %1306 = vmatprep.subr.mxu1 %v390_v33  ;;  %v1417_v33 = vld [vmem:[#allocation8 + $0x38] sm:$0xff]  ;;  %v666_v37 = vld [vmem:[#allocation5 + $0x11c8] sm:$0xff] }
 0x14a   :  { %1321 = vmatprep.subr.mxu0 %v576_v59  ;;  %1307 = vmatpush2.msra.mxu1 %v389_v34  ;;  %v672_v59 = vld [vmem:[#allocation5 + $0x11f8] sm:$0xff] }
 0x14b   :  { %1308 = vmatprep.mubr.f32.mxu1 %v2987_v63  ;;  %1322 = vmatpush1.msra.mxu0 %v575_v36  ;;  %v1488_v63 = vld [vmem:[#allocation8 + $0x270] sm:$0xff]  ;;  %v1411_v36 = vld [vmem:[#allocation8 + $0x8] sm:$0xff] }
 0x14c   :  { %1309 = vmatmul.mubr.f32.vlgmr.msra.gmra.mxu1 %v2990_v56  ;;  %1323 = vmatprep.subr.mxu0 %v570_v38  ;;  %v546_v56 = vld [vmem:[#allocation5 + $0xe08] sm:$0xff]  ;;  %v1416_v34 = vld [vmem:[#allocation8 + $0x30] sm:$0xff] }
 0x14d   :  { %1324 = vmatpush1.msra.mxu0 %v569_v39  ;;  %2018 = vmatprep.subr.mxu1 %v1501_v40  ;;  %v1410_v38 = vld [vmem:[#allocation8] sm:$0xff]  ;;  %v1597_v40 = vld [vmem:[#allocation8 + $0x5d8] sm:$0xff] }
 0x14e   :  { %1325 = vmatprep.subr.mxu0 %v564_v9  ;;  %2019 = vmatpush1.msra.mxu1 %v1500_v41  ;;  %v665_v39 = vld [vmem:[#allocation5 + $0x11c0] sm:$0xff]  ;;  %v660_v9 = vld [vmem:[#allocation5 + $0x1198] sm:$0xff] }
 0x14f   :  { %1326 = vmatpush1.msra.mxu0 %v563_v11  ;;  %2020 = vmatprep.subr.mxu1 %v1495_v42  ;;  %v1596_v41 = vld [vmem:[#allocation8 + $0x5d0] sm:$0xff]  ;;  %v1591_v42 = vld [vmem:[#allocation8 + $0x5a8] sm:$0xff] }
 0x150   :  { %1327 = vmatprep.subr.mxu0 %v558_v0  ;;  %2021 = vmatpush1.msra.mxu1 %v1494_v43  ;;  %v659_v11 = vld [vmem:[#allocation5 + $0x1190] sm:$0xff]  ;;  %v654_v0 = vld [vmem:[#allocation5 + $0x1168] sm:$0xff] }
 0x151   :  { %1328 = vmatpush1.msra.mxu0 %v557_v44  ;;  %2022 = vmatprep.subr.mxu1 %v1489_v3  ;;  %v1590_v43 = vld [vmem:[#allocation8 + $0x5a0] sm:$0xff]  ;;  %v675_v44 = vlaneseq }
 0x152   :  { %1329 = vmatprep.subr.mxu0 %v552_v45  ;;  %2023 = vmatpush1.msra.mxu1 %v1488_v63  ;;  %v653_v3 = vld [vmem:[#allocation5 + $0x1160] sm:$0xff]  ;;  %v648_v63 = vld [vmem:[#allocation5 + $0x1138] sm:$0xff] }
 0x153   :  { %1330 = vmatpush1.msra.mxu0 %v551_v46  ;;  %2024 = vmatprep.subr.mxu1 %v1483_v18  ;;  %v1585_v45 = vld [vmem:[#allocation8 + $0x578] sm:$0xff]  ;;  %v1584_v46 = vld [vmem:[#allocation8 + $0x570] sm:$0xff] }
 0x154   :  { %1331 = vmatprep.subr.mxu0 %v546_v56  ;;  %2025 = vmatpush1.msra.mxu1 %v1482_v47  ;;  %v647_v18 = vld [vmem:[#allocation5 + $0x1130] sm:$0xff]  ;;  %v642_v47 = vld [vmem:[#allocation5 + $0x1108] sm:$0xff] }
 0x155   :  { %1332 = vmatpush1.msra.mxu0 %v545_v48  ;;  %2026 = vmatprep.subr.mxu1 %v1477_v49  ;;  %v1579_v56 = vld [vmem:[#allocation8 + $0x548] sm:$0xff]  ;;  %v1578_v48 = vld [vmem:[#allocation8 + $0x540] sm:$0xff]  ;;  %v3001_v49 = vshrl.u32 %v675_v44, 7 }
 0x156   :  { %1333 = vmatprep.subr.mxu0 %v540_v21  ;;  %2027 = vmatpush1.msra.mxu1 %v1476_v50  ;;  %v641_v21 = vld [vmem:[#allocation5 + $0x1100] sm:$0xff] }
 0x157   :  { %1334 = vmatpush1.msra.mxu0 %v539_v51  ;;  %2028 = vmatprep.subr.mxu1 %v1471_v52  ;;  %v1573_v50 = vld [vmem:[#allocation8 + $0x518] sm:$0xff]  ;;  %v1572_v52 = vld [vmem:[#allocation8 + $0x510] sm:$0xff] }
 0x158   :  { %1335 = vmatprep.subr.mxu0 %v534_v53  ;;  %2029 = vmatpush1.msra.mxu1 %v1470_v54  ;;  %v636_v51 = vld [vmem:[#allocation5 + $0x10d8] sm:$0xff]  ;;  %v3003_v53 = vpop.f32.mrf.mxu0  ;;  %v635_v54 = vld [vmem:[#allocation5 + $0x10d0] sm:$0xff] }
 0x159   :  { %1336 = vmatpush1.msra.mxu0 %v533_v55  ;;  %2030 = vmatprep.subr.mxu1 %v1465_v57  ;;  %v1567_v55 = vld [vmem:[#allocation8 + $0x4e8] sm:$0xff] }
 0x15a   :  { %1337 = vmatprep.subr.mxu0 %v528_v58  ;;  %2031 = vmatpush1.msra.mxu1 %v1464_v61  ;;  %v630_v57 = vld [vmem:[#allocation5 + $0x10a8] sm:$0xff]  ;;  %v681_v61 = vsub.s32 1, %v3001_v49 }
 0x15b   :  { %1338 = vmatpush1.msra.mxu0 %v527_v62  ;;  %2032 = vmatprep.subr.mxu1 %v1459_v1  ;;  %v1566_v58 = vld [vmem:[#allocation8 + $0x4e0] sm:$0xff]  ;;  %v1561_v1 = vld [vmem:[#allocation8 + $0x4b8] sm:$0xff] }
 0x15c   :  { %1339 = vmatprep.subr.mxu0 %v522_v2  ;;  %2033 = vmatpush1.msra.mxu1 %v1458_v4  ;;  %v629_v62 = vld [vmem:[#allocation5 + $0x10a0] sm:$0xff]  ;;  %v624_v4 = vld [vmem:[#allocation5 + $0x1078] sm:$0xff] }
 0x15d   :  { %1340 = vmatpush1.msra.mxu0 %v521_v5  ;;  %2034 = vmatprep.subr.mxu1 %v1453_v6  ;;  %v3006_v2 = vld [vmem:[#allocation7] sm:$0x3f]  ;;  %v1560_v5 = vld [vmem:[#allocation8 + $0x4b0] sm:$0xff]  ;;  %v773_v6 = vpop.f32.mrf.mxu0 }
 0x15e   :  { %1341 = vmatprep.subr.mxu0 %v516_v7  ;;  %2035 = vmatpush1.msra.mxu1 %v1452_v8  ;;  %v623_v7 = vld [vmem:[#allocation5 + $0x1070] sm:$0xff] }
 0x15f   :  { %1342 = vmatpush1.msra.mxu0 %v515_v10  ;;  %2036 = vmatprep.subr.mxu1 %v1447_v12  ;;  %v1555_v8 = vld [vmem:[#allocation8 + $0x488] sm:$0xff]  ;;  %v1554_v12 = vld [vmem:[#allocation8 + $0x480] sm:$0xff] }
 0x160   :  { %1343 = vmatprep.subr.mxu0 %v510_v13  ;;  %2037 = vmatpush1.msra.mxu1 %v1446_v14  ;;  %v618_v10 = vld [vmem:[#allocation5 + $0x1048] sm:$0xff]  ;;  %v682_v13 = vrot.slane %v3006_v2, %v681_v61  ;;  %v617_v14 = vld [vmem:[#allocation5 + $0x1040] sm:$0xff] }
 0x161   :  { %1344 = vmatpush1.msra.mxu0 %v509_v15  ;;  %2038 = vmatprep.subr.mxu1 %v1441_v16  ;;  %v1549_v15 = vld [vmem:[#allocation8 + $0x458] sm:$0xff] }
 0x162   :  { %1345 = vmatprep.subr.mxu0 %v504_v17  ;;  %2039 = vmatpush1.msra.mxu1 %v1440_v19  ;;  %v3013_v17 = vpop.f32.mrf.mxu1  ;;  %v612_v19 = vld [vmem:[#allocation5 + $0x1018] sm:$0xff] }
 0x163   :  { %1346 = vmatpush1.msra.mxu0 %v503_v20  ;;  %2040 = vmatprep.subr.mxu1 %v1435_v22  ;;  %v611_v20 = vld [vmem:[#allocation5 + $0x1010] sm:$0xff] }
 0x164   :  { %1347 = vmatprep.subr.mxu0 %v498_v23  ;;  %2041 = vmatpush1.msra.mxu1 %v1434_v24  ;;  %v1548_v22 = vld [vmem:[#allocation8 + $0x450] sm:$0xff]  ;;  %v606_v23 = vld [vmem:[#allocation5 + $0xfe8] sm:$0xff] }
 0x165   :  { %1348 = vmatpush1.msra.mxu0 %v497_v25  ;;  %2042 = vmatprep.subr.mxu1 %v1429_v26  ;;  %v677_v25 = vsub.s32 0, %v3001_v49  ;;  %v774_v26 = vadd.f32 %v773_v6, %v682_v13 }
 0x166   :  { %1349 = vmatprep.subr.mxu0 %v492_v60  ;;  %2043 = vmatpush1.msra.mxu1 %v1428_v27  ;;  %v605_v60 = vld [vmem:[#allocation5 + $0xfe0] sm:$0xff]  ;;  %v2754_v27 = vld [vmem:[#allocation2 + $0x38] sm:$0xff] }
 0x167   :  { %1350 = vmatpush1.msra.mxu0 %v491_v28  ;;  %2044 = vmatprep.subr.mxu1 %v1423_v29  ;;  %v1543_v28 = vld [vmem:[#allocation8 + $0x428] sm:$0xff]  ;;  %v850_v29 = vpop.f32.mrf.mxu1 }
 0x168   :  { %1351 = vmatprep.subr.mxu0 %v486_v30  ;;  %2045 = vmatpush1.msra.mxu1 %v1422_v31  ;;  %v600_v30 = vld [vmem:[#allocation5 + $0xfb8] sm:$0xff]  ;;  %v599_v31 = vld [vmem:[#allocation5 + $0xfb0] sm:$0xff] }
 0x169   :  { %1352 = vmatpush1.msra.mxu0 %v485_v32  ;;  %2046 = vmatprep.subr.mxu1 %v1417_v33  ;;  %v2755_v32 = vld [vmem:[#allocation2 + $0x30] sm:$0xff]  ;;  %v1542_v33 = vld [vmem:[#allocation8 + $0x420] sm:$0xff] }
 0x16a   :  { %1353 = vmatprep.subr.mxu0 %v672_v59  ;;  %2047 = vmatpush1.msra.mxu1 %v1416_v34  ;;  %v594_v59 = vld [vmem:[#allocation5 + $0xf88] sm:$0xff] }
 0x16b   :  { %1354 = vmatpush2.msra.mxu0 %v671_v35  ;;  %2048 = vmatprep.subr.mxu1 %v1411_v36  ;;  %v678_v35 = vrot.slane %v3006_v2, %v677_v25  ;;  %v851_v36 = vadd.f32 %v850_v29, %v774_v26  ;;  %v1675_v26 = vld [vmem:[#allocation8 + $0x848] sm:$0xff]  ;;  %v1669_v29 = vld [vmem:[#allocation8 + $0x818] sm:$0xff] }
 0x16c   :  { %1355 = vmatprep.subr.mxu0 %v666_v37  ;;  %2049 = vmatpush1.msra.mxu1 %v1410_v38  ;;  %v2756_v37 = vld [vmem:[#allocation2 + $0x48] sm:$0xff]  ;;  %v593_v38 = vld [vmem:[#allocation5 + $0xf80] sm:$0xff] }
 0x16d   :  { %1356 = vmatpush2.msra.mxu0 %v665_v39  ;;  %2050 = vmatprep.subr.mxu1 %v1597_v40  ;;  %v1537_v39 = vld [vmem:[#allocation8 + $0x3f8] sm:$0xff] }
 0x16e   :  { %1357 = vmatprep.subr.mxu0 %v660_v9  ;;  %2051 = vmatpush2.msra.mxu1 %v1596_v41  ;;  %v588_v9 = vld [vmem:[#allocation5 + $0xf58] sm:$0xff] }
 0x16f   :  { %1358 = vmatpush2.msra.mxu0 %v659_v11  ;;  %2052 = vmatprep.subr.mxu1 %v1591_v42  ;;  %v1536_v41 = vld [vmem:[#allocation8 + $0x3f0] sm:$0xff]  ;;  %v2757_v42 = vld [vmem:[#allocation2 + $0x40] sm:$0xff] }
 0x170   :  { %1359 = vmatprep.subr.mxu0 %v654_v0  ;;  %2053 = vmatpush2.msra.mxu1 %v1590_v43  ;;  %v587_v0 = vld [vmem:[#allocation5 + $0xf50] sm:$0xff] }
 0x171   :  { %1360 = vmatpush2.msra.mxu0 %v653_v3  ;;  %2054 = vmatprep.subr.mxu1 %v1585_v45  ;;  %v1531_v43 = vld [vmem:[#allocation8 + $0x3c8] sm:$0xff] }
 0x172   :  { %1361 = vmatprep.subr.mxu0 %v648_v63  ;;  %2055 = vmatpush2.msra.mxu1 %v1584_v46  ;;  %v582_v45 = vld [vmem:[#allocation5 + $0xf28] sm:$0xff]  ;;  %v772_v63 = vadd.f32 %v3003_v53, %v678_v35 }
 0x173   :  { %1362 = vmatpush2.msra.mxu0 %v647_v18  ;;  %2056 = vmatprep.subr.mxu1 %v1579_v56  ;;  %v581_v18 = vld [vmem:[#allocation5 + $0xf20] sm:$0xff] }
 0x174   :  { %1363 = vmatprep.subr.mxu0 %v642_v47  ;;  %2057 = vmatpush2.msra.mxu1 %v1578_v48  ;;  %v1530_v56 = vld [vmem:[#allocation8 + $0x3c0] sm:$0xff]  ;;  %v1525_v47 = vld [vmem:[#allocation8 + $0x398] sm:$0xff] }
 0x175   :  { %1364 = vmatpush2.msra.mxu0 %v641_v21  ;;  %2058 = vmatprep.subr.mxu1 %v1573_v50  ;;  %v2758_v21 = vld [vmem:[#allocation2 + $0x28] sm:$0xff]  ;;  %v1524_v50 = vld [vmem:[#allocation8 + $0x390] sm:$0xff] }
 0x176   :  { %1365 = vmatprep.subr.mxu0 %v636_v51  ;;  %2059 = vmatpush2.msra.mxu1 %v1572_v52 }
 0x177   :  { %1366 = vmatpush2.msra.mxu0 %v635_v54  ;;  %2060 = vmatprep.subr.mxu1 %v1567_v55  ;;  %v1519_v54 = vld [vmem:[#allocation8 + $0x368] sm:$0xff]  ;;  %v849_v55 = vadd.f32 %v3013_v17, %v772_v63  ;;  %v1686_v17 = vld [vmem:[#allocation8 + $0x8a0] sm:$0xff] }
 0x178   :  { %1367 = vmatprep.subr.mxu0 %v630_v57  ;;  %2061 = vmatpush2.msra.mxu1 %v1566_v58  ;;  %v2759_v58 = vld [vmem:[#allocation2 + $0x20] sm:$0xff] }
 0x179   :  { %1368 = vmatpush2.msra.mxu0 %v629_v62  ;;  %2062 = vmatprep.subr.mxu1 %v1561_v1  ;;  %v1518_v62 = vld [vmem:[#allocation8 + $0x360] sm:$0xff]  ;;  %v1693_v1 = vld [vmem:[#allocation8 + $0x8d8] sm:$0xff] }
 0x17a   :  { %1369 = vmatprep.subr.mxu0 %v624_v4  ;;  %2063 = vmatpush2.msra.mxu1 %v1560_v5  ;;  %v3011_v16 = vpop.f32.mrf.mxu0  ;;  %v2760_v4 = vld [vmem:[#allocation2 + $0x58] sm:$0xff]  ;;  %v1638_v63 = vld [vmem:[#allocation8 + $0x720] sm:$0xff] }
 0x17b   :  { %1370 = vmatpush2.msra.mxu0 %v623_v7  ;;  %2064 = vmatprep.subr.mxu1 %v1555_v8  ;;  %v778_v57 = vadd.f32 %v3011_v16, %v678_v35  ;;  %v1513_v5 = vld [vmem:[#allocation8 + $0x338] sm:$0xff]  ;;  %v1512_v8 = vld [vmem:[#allocation8 + $0x330] sm:$0xff]  ;;  %v1506_v16 = vld [vmem:[#allocation8 + $0x300] sm:$0xff] }
 0x17c   :  { %1371 = vmatprep.subr.mxu0 %v618_v10  ;;  %2065 = vmatpush2.msra.mxu1 %v1554_v12  ;;  %v779_v24 = vpop.f32.mrf.mxu0  ;;  %v1692_v10 = vld [vmem:[#allocation8 + $0x8d0] sm:$0xff]  ;;  %v1507_v12 = vld [vmem:[#allocation8 + $0x308] sm:$0xff]  ;;  %v1873_v35 = vld [vmem:[#allocation8 + $0xe78] sm:$0xff] }
 0x17d   :  { %1372 = vmatpush2.msra.mxu0 %v617_v14  ;;  %2066 = vmatprep.subr.mxu1 %v1549_v15  ;;  %v854_v40 = vpop.f32.mrf.mxu1  ;;  %v780_v3 = vadd.f32 %v779_v24, %v682_v13  ;;  %v1687_v13 = vld [vmem:[#allocation8 + $0x8a8] sm:$0xff]  ;;  %v1680_v24 = vld [vmem:[#allocation8 + $0x870] sm:$0xff] }
 0x17e   :  { %1373 = vmatprep.subr.mxu0 %v612_v19  ;;  %1237 = vmatprep.mubr.f32.mxu0 %v2754_v27  ;;  %v855_v14 = vadd.f32 %v854_v40, %v778_v57  ;;  %v2761_v15 = vld [vmem:[#allocation2 + $0x50] sm:$0xff]  ;;  %v1674_v27 = vld [vmem:[#allocation8 + $0x840] sm:$0xff] }
 0x17f   :  { %1374 = vmatpush2.msra.mxu0 %v611_v20  ;;  %2067 = vmatpush2.msra.mxu1 %v1548_v22  ;;  %v856_v46 = vpop.f32.mrf.mxu1  ;;  %v1681_v20 = vld [vmem:[#allocation8 + $0x878] sm:$0xff]  ;;  %v1651_v40 = vld [vmem:[#allocation8 + $0x788] sm:$0xff]  ;;  %v1620_v57 = vld [vmem:[#allocation8 + $0x690] sm:$0xff] }
 0x180   :  { %1375 = vmatprep.subr.mxu0 %v606_v23  ;;  %1238 = vmatmul.mubr.f32.gmra.mxu0 %v2755_v32  ;;  %v857_v52 = vadd.f32 %v856_v46, %v780_v3  ;;  %v1879_v32 = vld [vmem:[#allocation8 + $0xea8] sm:$0xff]  ;;  %v1849_v46 = vld [vmem:[#allocation8 + $0xdb8] sm:$0xff] }
 0x181   :  { %1376 = vmatpush2.msra.mxu0 %v605_v60  ;;  %2068 = vmatprep.subr.mxu1 %v1543_v28  ;;  %v925_v34 = vpop.f32.mrf.mxu0  ;;  %v1885_v60 = vld [vmem:[#allocation8 + $0xed8] sm:$0xff]  ;;  %v1884_v28 = vld [vmem:[#allocation8 + $0xed0] sm:$0xff]  ;;  %v1639_v3 = vld [vmem:[#allocation8 + $0x728] sm:$0xff] }
 0x182   :  { %1377 = vmatprep.subr.mxu0 %v600_v30  ;;  %1314 = vmatprep.mubr.f32.mxu1 %v2756_v37  ;;  %v926_v7 = vadd.f32 %v925_v34, %v849_v55  ;;  %v1662_v34 = vld [vmem:[#allocation8 + $0x7e0] sm:$0xff]  ;;  %v1872_v37 = vld [vmem:[#allocation8 + $0xe70] sm:$0xff] }
 0x183   :  { %1378 = vmatpush2.msra.mxu0 %v599_v31  ;;  %2069 = vmatpush2.msra.mxu1 %v1542_v33  ;;  %v927_v11 = vpop.f32.mrf.mxu0  ;;  %v1668_v31 = vld [vmem:[#allocation8 + $0x810] sm:$0xff]  ;;  %v1663_v33 = vld [vmem:[#allocation8 + $0x7e8] sm:$0xff] }
 0x184   :  { %1379 = vmatprep.subr.mxu0 %v594_v59  ;;  %1315 = vmatmul.mubr.f32.gmra.mxu1 %v2757_v42  ;;  %v928_v44 = vadd.f32 %v927_v11, %v851_v36  ;;  %v3027_v22 = vmax.f32 %v926_v7, 0.0  ;;  %v1878_v59 = vld [vmem:[#allocation8 + $0xea0] sm:$0xff]  ;;  %v1657_v36 = vld [vmem:[#allocation8 + $0x7b8] sm:$0xff]  ;;  %v1836_v55 = vld [vmem:[#allocation8 + $0xd50] sm:$0xff] }
 0x185   :  { %1380 = vmatpush2.msra.mxu0 %v593_v38  ;;  %2070 = vmatprep.subr.mxu1 %v1537_v39  ;;  %v1656_v38 = vld [vmem:[#allocation8 + $0x7b0] sm:$0xff]  ;;  %v1867_v39 = vld [vmem:[#allocation8 + $0xe48] sm:$0xff]  ;;  %v1861_v11 = vld [vmem:[#allocation8 + $0xe18] sm:$0xff] }
 0x186   :  { %1381 = vmatprep.subr.mxu0 %v588_v9  ;;  %2071 = vmatpush2.msra.mxu1 %v1536_v41  ;;  %v3020_v51 = vmax.f32 %v928_v44, 0.0  ;;  %v1866_v9 = vld [vmem:[#allocation8 + $0xe40] sm:$0xff]  ;;  %v1645_v42 = vld [vmem:[#allocation8 + $0x758] sm:$0xff]  ;;  %v1855_v44 = vld [vmem:[#allocation8 + $0xde8] sm:$0xff] }
 0x187   :  { %1382 = vmatpush2.msra.mxu0 %v587_v0  ;;  %2072 = vmatprep.subr.mxu1 %v1531_v43  ;;  %v931_v48 = vpop.f32.mrf.mxu0  ;;  %v1650_v41 = vld [vmem:[#allocation8 + $0x780] sm:$0xff]  ;;  %v1860_v0 = vld [vmem:[#allocation8 + $0xe10] sm:$0xff] }
 0x188   :  { %1383 = vmatprep.subr.mxu0 %v582_v45  ;;  %1385 = vmatprep.mubr.f32.mxu0 %v2758_v21  ;;  %v932_v23 = vadd.f32 %v931_v48, %v855_v14  ;;  %v1644_v43 = vld [vmem:[#allocation8 + $0x750] sm:$0xff]  ;;  %v1854_v45 = vld [vmem:[#allocation8 + $0xde0] sm:$0xff]  ;;  %v1843_v48 = vld [vmem:[#allocation8 + $0xd88] sm:$0xff] }
 0x189   :  { %1384 = vmatpush2.msra.mxu0 %v581_v18  ;;  %2073 = vmatpush2.msra.mxu1 %v1530_v56  ;;  %v933_v53 = vpop.f32.mrf.mxu0  ;;  %v1633_v18 = vld [vmem:[#allocation8 + $0x6f8] sm:$0xff]  ;;  %v1848_v56 = vld [vmem:[#allocation8 + $0xdb0] sm:$0xff]  ;;  %v1627_v21 = vld [vmem:[#allocation8 + $0x6c8] sm:$0xff] }
 0x18a   :  { %1386 = vmatmul.mubr.f32.vlgmr.msra.gmra.mxu0 %v2759_v58  ;;  %2074 = vmatprep.subr.mxu1 %v1525_v47  ;;  %v934_v6 = vadd.f32 %v933_v53, %v857_v52  ;;  %v3031_v30 = vmax.f32 %v932_v23, 0.0  ;;  %v1632_v47 = vld [vmem:[#allocation8 + $0x6f0] sm:$0xff]  ;;  %v1626_v52 = vld [vmem:[#allocation8 + $0x6c0] sm:$0xff]  ;;  %v1621_v53 = vld [vmem:[#allocation8 + $0x698] sm:$0xff] }
 0x18b   :  { %2075 = vmatpush2.msra.mxu1 %v1524_v50  ;;  %1391 = vmatprep.mubr.f32.mxu0 %v2760_v4  ;;  %v1842_v50 = vld [vmem:[#allocation8 + $0xd80] sm:$0xff]  ;;  %v1831_v58 = vld [vmem:[#allocation8 + $0xd28] sm:$0xff]  ;;  %v1824_v7 = vld [vmem:[#allocation8 + $0xcf0] sm:$0xff] }
 0x18c   :  { %2076 = vmatprep.subr.mxu1 %v1519_v54  ;;  %2082 = vmatprep.mubr.f32.mxu1 %v3020_v51  ;;  %v3025_v19 = vmax.f32 %v934_v6, 0.0  ;;  %v1837_v54 = vld [vmem:[#allocation8 + $0xd58] sm:$0xff]  ;;  %v1614_v4 = vld [vmem:[#allocation8 + $0x660] sm:$0xff]  ;;  %v1807_v23 = vld [vmem:[#allocation8 + $0xc68] sm:$0xff] }
 0x18d   :  { %2077 = vmatpush2.msra.mxu1 %v1518_v62  ;;  %2095 = vmatprep.subr.mxu0 %v1693_v1  ;;  %v1615_v62 = vld [vmem:[#allocation8 + $0x668] sm:$0xff]  ;;  %v1830_v1 = vld [vmem:[#allocation8 + $0xd20] sm:$0xff]  ;;  %v1609_v6 = vld [vmem:[#allocation8 + $0x638] sm:$0xff] }
 0x18e   :  { %1392 = vmatmul.mubr.f32.gmra.mxu0 %v2761_v15  ;;  %2078 = vmatprep.subr.mxu1 %v1513_v5  ;;  %v1825_v5 = vld [vmem:[#allocation8 + $0xcf8] sm:$0xff]  ;;  %v1602_v14 = vld [vmem:[#allocation8 + $0x600] sm:$0xff] }
 0x18f   :  { %2079 = vmatpush2.msra.mxu1 %v1512_v8  ;;  %2096 = vmatpush1.msra.mxu0 %v1692_v10  ;;  %v1608_v8 = vld [vmem:[#allocation8 + $0x630] sm:$0xff]  ;;  %v1819_v10 = vld [vmem:[#allocation8 + $0xcc8] sm:$0xff]  ;;  %v1813_v15 = vld [vmem:[#allocation8 + $0xc98] sm:$0xff] }
 0x190   :  { %2080 = vmatprep.subr.mxu1 %v1507_v12  ;;  %2097 = vmatprep.subr.mxu0 %v1687_v13  ;;  %v1603_v12 = vld [vmem:[#allocation8 + $0x608] sm:$0xff]  ;;  %v1818_v13 = vld [vmem:[#allocation8 + $0xcc0] sm:$0xff] }
 0x191   :  { %2081 = vmatpush2.msra.mxu1 %v1506_v16  ;;  %2098 = vmatpush1.msra.mxu0 %v1686_v17  ;;  %v1789_v16 = vld [vmem:[#allocation8 + $0xbd8] sm:$0xff]  ;;  %v1812_v17 = vld [vmem:[#allocation8 + $0xc90] sm:$0xff] }
 0x192   :  { %2083 = vmatmul.mubr.f32.vlgmr.msra.gmra.mxu1 %v3027_v22  ;;  %2099 = vmatprep.subr.mxu0 %v1681_v20  ;;  %v1788_v20 = vld [vmem:[#allocation8 + $0xbd0] sm:$0xff] }
 0x193   :  { %2088 = vmatprep.mubr.f32.mxu1 %v3025_v19  ;;  %2100 = vmatpush1.msra.mxu0 %v1680_v24  ;;  %v1783_v24 = vld [vmem:[#allocation8 + $0xba8] sm:$0xff] }
 0x194   :  { %2101 = vmatprep.subr.mxu0 %v1675_v26  ;;  %2172 = vmatprep.subr.mxu1 %v1885_v60  ;;  %v1806_v26 = vld [vmem:[#allocation8 + $0xc60] sm:$0xff] }
 0x195   :  { %2102 = vmatpush1.msra.mxu0 %v1674_v27  ;;  %2173 = vmatpush1.msra.mxu1 %v1884_v28  ;;  %v1782_v60 = vld [vmem:[#allocation8 + $0xba0] sm:$0xff]  ;;  %v1801_v27 = vld [vmem:[#allocation8 + $0xc38] sm:$0xff] }
 0x196   :  { %2089 = vmatmul.mubr.f32.gmra.mxu1 %v3031_v30  ;;  %2103 = vmatprep.subr.mxu0 %v1669_v29  ;;  %v1777_v28 = vld [vmem:[#allocation8 + $0xb78] sm:$0xff]  ;;  %v1800_v29 = vld [vmem:[#allocation8 + $0xc30] sm:$0xff] }
 0x197   :  { %2104 = vmatpush1.msra.mxu0 %v1668_v31  ;;  %2174 = vmatprep.subr.mxu1 %v1879_v32  ;;  %v1776_v31 = vld [vmem:[#allocation8 + $0xb70] sm:$0xff]  ;;  %v1795_v32 = vld [vmem:[#allocation8 + $0xc08] sm:$0xff] }
 0x198   :  { %2105 = vmatprep.subr.mxu0 %v1663_v33  ;;  %2175 = vmatpush1.msra.mxu1 %v1878_v59  ;;  %v1771_v33 = vld [vmem:[#allocation8 + $0xb48] sm:$0xff]  ;;  %v1794_v59 = vld [vmem:[#allocation8 + $0xc00] sm:$0xff] }
 0x199   :  { %2106 = vmatpush1.msra.mxu0 %v1662_v34  ;;  %2176 = vmatprep.subr.mxu1 %v1873_v35  ;;  %v1770_v34 = vld [vmem:[#allocation8 + $0xb40] sm:$0xff]  ;;  %v1981_v35 = vld [vmem:[#allocation8 + $0x11d8] sm:$0xff] }
 0x19a   :  { %2107 = vmatprep.subr.mxu0 %v1657_v36  ;;  %2177 = vmatpush1.msra.mxu1 %v1872_v37  ;;  %v1765_v36 = vld [vmem:[#allocation8 + $0xb18] sm:$0xff]  ;;  %v1980_v37 = vld [vmem:[#allocation8 + $0x11d0] sm:$0xff] }
 0x19b   :  { %2108 = vmatpush1.msra.mxu0 %v1656_v38  ;;  %2178 = vmatprep.subr.mxu1 %v1867_v39  ;;  %v1764_v38 = vld [vmem:[#allocation8 + $0xb10] sm:$0xff]  ;;  %v1975_v39 = vld [vmem:[#allocation8 + $0x11a8] sm:$0xff] }
 0x19c   :  { %2109 = vmatprep.subr.mxu0 %v1651_v40  ;;  %2179 = vmatpush1.msra.mxu1 %v1866_v9  ;;  %v1759_v40 = vld [vmem:[#allocation8 + $0xae8] sm:$0xff]  ;;  %v1974_v9 = vld [vmem:[#allocation8 + $0x11a0] sm:$0xff] }
 0x19d   :  { %2110 = vmatpush1.msra.mxu0 %v1650_v41  ;;  %2180 = vmatprep.subr.mxu1 %v1861_v11  ;;  %v1758_v41 = vld [vmem:[#allocation8 + $0xae0] sm:$0xff]  ;;  %v1969_v11 = vld [vmem:[#allocation8 + $0x1178] sm:$0xff] }
 0x19e   :  { %2111 = vmatprep.subr.mxu0 %v1645_v42  ;;  %2181 = vmatpush1.msra.mxu1 %v1860_v0  ;;  %v1753_v42 = vld [vmem:[#allocation8 + $0xab8] sm:$0xff]  ;;  %v1968_v0 = vld [vmem:[#allocation8 + $0x1170] sm:$0xff] }
 0x19f   :  { %2112 = vmatpush1.msra.mxu0 %v1644_v43  ;;  %2182 = vmatprep.subr.mxu1 %v1855_v44  ;;  %v1752_v43 = vld [vmem:[#allocation8 + $0xab0] sm:$0xff]  ;;  %v1963_v44 = vld [vmem:[#allocation8 + $0x1148] sm:$0xff] }
 0x1a0   :  { %2113 = vmatprep.subr.mxu0 %v1639_v3  ;;  %2183 = vmatpush1.msra.mxu1 %v1854_v45  ;;  %v1747_v3 = vld [vmem:[#allocation8 + $0xa88] sm:$0xff]  ;;  %v1962_v45 = vld [vmem:[#allocation8 + $0x1140] sm:$0xff] }
 0x1a1   :  { %2114 = vmatpush1.msra.mxu0 %v1638_v63  ;;  %2184 = vmatprep.subr.mxu1 %v1849_v46  ;;  %v1746_v63 = vld [vmem:[#allocation8 + $0xa80] sm:$0xff]  ;;  %v685_v46 = vsub.s32 2, %v3001_v49 }
 0x1a2   :  { %2115 = vmatprep.subr.mxu0 %v1633_v18  ;;  %2185 = vmatpush1.msra.mxu1 %v1848_v56  ;;  %v1002_v18 = vpop.f32.mrf.mxu1  ;;  %v1957_v56 = vld [vmem:[#allocation8 + $0x1118] sm:$0xff] }
 0x1a3   :  { %2116 = vmatpush1.msra.mxu0 %v1632_v47  ;;  %2186 = vmatprep.subr.mxu1 %v1843_v48  ;;  %v1741_v47 = vld [vmem:[#allocation8 + $0xa58] sm:$0xff]  ;;  %v1956_v48 = vld [vmem:[#allocation8 + $0x1110] sm:$0xff] }
 0x1a4   :  { %2117 = vmatprep.subr.mxu0 %v1627_v21  ;;  %2187 = vmatpush1.msra.mxu1 %v1842_v50  ;;  %v1740_v21 = vld [vmem:[#allocation8 + $0xa50] sm:$0xff]  ;;  %v689_v50 = vsub.s32 3, %v3001_v49 }
 0x1a5   :  { %2118 = vmatpush1.msra.mxu0 %v1626_v52  ;;  %2188 = vmatprep.subr.mxu1 %v1837_v54  ;;  %v1951_v52 = vld [vmem:[#allocation8 + $0x10e8] sm:$0xff] }
 0x1a6   :  { %2119 = vmatprep.subr.mxu0 %v1621_v53  ;;  %2189 = vmatpush1.msra.mxu1 %v1836_v55  ;;  %v1735_v54 = vld [vmem:[#allocation8 + $0xa28] sm:$0xff]  ;;  %v1950_v53 = vld [vmem:[#allocation8 + $0x10e0] sm:$0xff]  ;;  %v686_v55 = vrot.slane %v3006_v2, %v685_v46 }
 0x1a7   :  { %2120 = vmatpush1.msra.mxu0 %v1620_v57  ;;  %2190 = vmatprep.subr.mxu1 %v1831_v58  ;;  %v1004_v57 = vpop.f32.mrf.mxu1  ;;  %v1734_v58 = vld [vmem:[#allocation8 + $0xa20] sm:$0xff] }
 0x1a8   :  { %2121 = vmatprep.subr.mxu0 %v1615_v62  ;;  %2191 = vmatpush1.msra.mxu1 %v1830_v1  ;;  %v1945_v62 = vld [vmem:[#allocation8 + $0x10b8] sm:$0xff] }
 0x1a9   :  { %2122 = vmatpush1.msra.mxu0 %v1614_v4  ;;  %2192 = vmatprep.subr.mxu1 %v1825_v5  ;;  %v1729_v1 = vld [vmem:[#allocation8 + $0x9f8] sm:$0xff]  ;;  %v1944_v4 = vld [vmem:[#allocation8 + $0x10b0] sm:$0xff]  ;;  %v690_v5 = vrot.slane %v3006_v2, %v689_v50 }
 0x1aa   :  { %2123 = vmatprep.subr.mxu0 %v1609_v6  ;;  %2193 = vmatpush1.msra.mxu1 %v1824_v7  ;;  %v1728_v6 = vld [vmem:[#allocation8 + $0x9f0] sm:$0xff]  ;;  %v1939_v7 = vld [vmem:[#allocation8 + $0x1088] sm:$0xff] }
 0x1ab   :  { %2124 = vmatpush1.msra.mxu0 %v1608_v8  ;;  %2194 = vmatprep.subr.mxu1 %v1819_v10  ;;  %v1723_v8 = vld [vmem:[#allocation8 + $0x9c8] sm:$0xff]  ;;  %v1938_v10 = vld [vmem:[#allocation8 + $0x1080] sm:$0xff] }
 0x1ac   :  { %2125 = vmatprep.subr.mxu0 %v1603_v12  ;;  %2195 = vmatpush1.msra.mxu1 %v1818_v13  ;;  %v1003_v12 = vadd.f32 %v1002_v18, %v686_v55  ;;  %v1903_v18 = vld [vmem:[#allocation8 + $0xf68] sm:$0xff] }
 0x1ad   :  { %2126 = vmatpush1.msra.mxu0 %v1602_v14  ;;  %2196 = vmatprep.subr.mxu1 %v1813_v15  ;;  %v1722_v14 = vld [vmem:[#allocation8 + $0x9c0] sm:$0xff]  ;;  %v1933_v15 = vld [vmem:[#allocation8 + $0x1058] sm:$0xff] }
 0x1ae   :  { %2127 = vmatprep.subr.mxu0 %v1789_v16  ;;  %2197 = vmatpush1.msra.mxu1 %v1812_v17  ;;  %v1717_v16 = vld [vmem:[#allocation8 + $0x998] sm:$0xff]  ;;  %v1932_v17 = vld [vmem:[#allocation8 + $0x1050] sm:$0xff] }
 0x1af   :  { %2128 = vmatpush2.msra.mxu0 %v1788_v20  ;;  %2198 = vmatprep.subr.mxu1 %v1807_v23  ;;  %v1005_v20 = vadd.f32 %v1004_v57, %v690_v5  ;;  %v1716_v23 = vld [vmem:[#allocation8 + $0x990] sm:$0xff] }
 0x1b0   :  { %2129 = vmatprep.subr.mxu0 %v1783_v24  ;;  %2199 = vmatpush1.msra.mxu1 %v1806_v26  ;;  %v1927_v24 = vld [vmem:[#allocation8 + $0x1028] sm:$0xff] }
 0x1b1   :  { %2130 = vmatpush2.msra.mxu0 %v1782_v60  ;;  %2200 = vmatprep.subr.mxu1 %v1801_v27  ;;  %v1711_v60 = vld [vmem:[#allocation8 + $0x968] sm:$0xff]  ;;  %v1926_v27 = vld [vmem:[#allocation8 + $0x1020] sm:$0xff] }
 0x1b2   :  { %2131 = vmatprep.subr.mxu0 %v1777_v28  ;;  %2201 = vmatpush1.msra.mxu1 %v1800_v29  ;;  %v1710_v29 = vld [vmem:[#allocation8 + $0x960] sm:$0xff] }
 0x1b3   :  { %2132 = vmatpush2.msra.mxu0 %v1776_v31  ;;  %2202 = vmatprep.subr.mxu1 %v1795_v32  ;;  %v1921_v31 = vld [vmem:[#allocation8 + $0xff8] sm:$0xff] }
 0x1b4   :  { %2133 = vmatprep.subr.mxu0 %v1771_v33  ;;  %2203 = vmatpush1.msra.mxu1 %v1794_v59  ;;  %v1705_v33 = vld [vmem:[#allocation8 + $0x938] sm:$0xff]  ;;  %v1920_v59 = vld [vmem:[#allocation8 + $0xff0] sm:$0xff] }
 0x1b5   :  { %2134 = vmatpush2.msra.mxu0 %v1770_v34  ;;  %2204 = vmatprep.subr.mxu1 %v1981_v35 }
 0x1b6   :  { %2135 = vmatprep.subr.mxu0 %v1765_v36  ;;  %2205 = vmatpush2.msra.mxu1 %v1980_v37  ;;  %v1704_v37 = vld [vmem:[#allocation8 + $0x930] sm:$0xff] }
 0x1b7   :  { %2136 = vmatpush2.msra.mxu0 %v1764_v38  ;;  %2206 = vmatprep.subr.mxu1 %v1975_v39  ;;  %v1915_v38 = vld [vmem:[#allocation8 + $0xfc8] sm:$0xff] }
 0x1b8   :  { %2137 = vmatprep.subr.mxu0 %v1759_v40  ;;  %2207 = vmatpush2.msra.mxu1 %v1974_v9  ;;  %v1699_v39 = vld [vmem:[#allocation8 + $0x908] sm:$0xff]  ;;  %v1914_v40 = vld [vmem:[#allocation8 + $0xfc0] sm:$0xff] }
 0x1b9   :  { %2138 = vmatpush2.msra.mxu0 %v1758_v41  ;;  %2208 = vmatprep.subr.mxu1 %v1969_v11 }
 0x1ba   :  { %2139 = vmatprep.subr.mxu0 %v1753_v42  ;;  %2209 = vmatpush2.msra.mxu1 %v1968_v0  ;;  %v1698_v42 = vld [vmem:[#allocation8 + $0x900] sm:$0xff]  ;;  %v1909_v0 = vld [vmem:[#allocation8 + $0xf98] sm:$0xff] }
 0x1bb   :  { %2140 = vmatpush2.msra.mxu0 %v1752_v43  ;;  %2210 = vmatprep.subr.mxu1 %v1963_v44 }
 0x1bc   :  { %2141 = vmatprep.subr.mxu0 %v1747_v3  ;;  %2211 = vmatpush2.msra.mxu1 %v1962_v45  ;;  %v1503_v3 = vld [vmem:[#allocation8 + $0x2e8] sm:$0xff]  ;;  %v1908_v45 = vld [vmem:[#allocation8 + $0xf90] sm:$0xff] }
 0x1bd   :  { %2142 = vmatpush2.msra.mxu0 %v1746_v63  ;;  %2212 = vmatprep.subr.mxu1 %v1957_v56 }
 0x1be   :  { %2143 = vmatprep.subr.mxu0 %v1741_v47  ;;  %2213 = vmatpush2.msra.mxu1 %v1956_v48  ;;  %v1902_v48 = vld [vmem:[#allocation8 + $0xf60] sm:$0xff] }
 0x1bf   :  { %2144 = vmatpush2.msra.mxu0 %v1740_v21  ;;  %2214 = vmatprep.subr.mxu1 %v1951_v52 }
 0x1c0   :  { %2145 = vmatprep.subr.mxu0 %v1735_v54  ;;  %2215 = vmatpush2.msra.mxu1 %v1950_v53  ;;  %v1502_v53 = vld [vmem:[#allocation8 + $0x2e0] sm:$0xff] }
 0x1c1   :  { %2146 = vmatpush2.msra.mxu0 %v1734_v58  ;;  %2216 = vmatprep.subr.mxu1 %v1945_v62  ;;  %v1497_v58 = vld [vmem:[#allocation8 + $0x2b8] sm:$0xff]  ;;  %v1896_v62 = vld [vmem:[#allocation8 + $0xf30] sm:$0xff] }
 0x1c2   :  { %2147 = vmatprep.subr.mxu0 %v1729_v1  ;;  %v1008_v13 = vpop.f32.mrf.mxu1  ;;  %2217 = vmatpush2.msra.mxu1 %v1944_v4  ;;  %v1496_v4 = vld [vmem:[#allocation8 + $0x2b0] sm:$0xff] }
 0x1c3   :  { %2148 = vmatpush2.msra.mxu0 %v1728_v6  ;;  %2218 = vmatprep.subr.mxu1 %v1939_v7  ;;  %v1009_v34 = vadd.f32 %v1008_v13, %v686_v55  ;;  %v1897_v55 = vld [vmem:[#allocation8 + $0xf38] sm:$0xff]  ;;  %v1491_v7 = vld [vmem:[#allocation8 + $0x288] sm:$0xff] }
 0x1c4   :  { %2149 = vmatprep.subr.mxu0 %v1723_v8  ;;  %v1010_v2 = vpop.f32.mrf.mxu1  ;;  %2219 = vmatpush2.msra.mxu1 %v1938_v10  ;;  %v1890_v8 = vld [vmem:[#allocation8 + $0xf00] sm:$0xff] }
 0x1c5   :  { %v1079_v26 = vpop.f32.mrf.mxu0  ;;  %2150 = vmatpush2.msra.mxu0 %v1722_v14  ;;  %2220 = vmatprep.subr.mxu1 %v1933_v15  ;;  %v1011_v9 = vadd.f32 %v1010_v2, %v690_v5  ;;  %v1891_v5 = vld [vmem:[#allocation8 + $0xf08] sm:$0xff]  ;;  %v1485_v14 = vld [vmem:[#allocation8 + $0x258] sm:$0xff]  ;;  %v1484_v15 = vld [vmem:[#allocation8 + $0x250] sm:$0xff] }
 0x1c6   :  { %v1080_v28 = vadd.f32 %v1079_v26, %v1003_v12  ;;  %2151 = vmatprep.subr.mxu0 %v1717_v16  ;;  %2221 = vmatpush2.msra.mxu1 %v1932_v17  ;;  %v1490_v12 = vld [vmem:[#allocation8 + $0x280] sm:$0xff]  ;;  %v1479_v16 = vld [vmem:[#allocation8 + $0x228] sm:$0xff]  ;;  %v1473_v2 = vld [vmem:[#allocation8 + $0x1f8] sm:$0xff] }
 0x1c7   :  { %v1081_v32 = vpop.f32.mrf.mxu0  ;;  %2152 = vmatpush2.msra.mxu0 %v1716_v23  ;;  %2222 = vmatprep.subr.mxu1 %v1927_v24  ;;  %v1695_v17 = vld [vmem:[#allocation8 + $0x8e8] sm:$0xff]  ;;  %v1472_v23 = vld [vmem:[#allocation8 + $0x1f0] sm:$0xff]  ;;  %v1466_v26 = vld [vmem:[#allocation8 + $0x1c0] sm:$0xff] }
 0x1c8   :  { %v1082_v35 = vadd.f32 %v1081_v32, %v1005_v20  ;;  %v1156_v36 = vpop.f32.mrf.mxu1  ;;  %2153 = vmatprep.subr.mxu0 %v1711_v60  ;;  %2223 = vmatpush2.msra.mxu1 %v1926_v27  ;;  %v1478_v20 = vld [vmem:[#allocation8 + $0x220] sm:$0xff]  ;;  %v1467_v24 = vld [vmem:[#allocation8 + $0x1c8] sm:$0xff]  ;;  %v1461_v60 = vld [vmem:[#allocation8 + $0x198] sm:$0xff] }
 0x1c9   :  { %2154 = vmatpush2.msra.mxu0 %v1710_v29  ;;  %2224 = vmatprep.subr.mxu1 %v1921_v31  ;;  %v1157_v41 = vadd.f32 %v1156_v36, %v1080_v28  ;;  %v1460_v27 = vld [vmem:[#allocation8 + $0x190] sm:$0xff]  ;;  %v1455_v28 = vld [vmem:[#allocation8 + $0x168] sm:$0xff]  ;;  %v1454_v29 = vld [vmem:[#allocation8 + $0x160] sm:$0xff] }
 0x1ca   :  { %v1158_v11 = vpop.f32.mrf.mxu1  ;;  %2155 = vmatprep.subr.mxu0 %v1705_v33  ;;  %2225 = vmatpush2.msra.mxu1 %v1920_v59  ;;  %v1449_v31 = vld [vmem:[#allocation8 + $0x138] sm:$0xff]  ;;  %v1448_v32 = vld [vmem:[#allocation8 + $0x130] sm:$0xff]  ;;  %v1443_v33 = vld [vmem:[#allocation8 + $0x108] sm:$0xff] }
 0x1cb   :  { %v1085_v43 = vpop.f32.mrf.mxu0  ;;  %v1159_v44 = vadd.f32 %v1158_v11, %v1082_v35  ;;  %2156 = vmatpush2.msra.mxu0 %v1704_v37  ;;  %2226 = vmatprep.subr.mxu1 %v1915_v38  ;;  %v3044_v21 = vmax.f32 %v1157_v41, 0.0  ;;  %v1442_v59 = vld [vmem:[#allocation8 + $0x100] sm:$0xff]  ;;  %v1436_v35 = vld [vmem:[#allocation8 + $0xd0] sm:$0xff]  ;;  %v1431_v36 = vld [vmem:[#allocation8 + $0xa8] sm:$0xff] }
 0x1cc   :  { %v1086_v63 = vadd.f32 %v1085_v43, %v1009_v34  ;;  %2157 = vmatprep.subr.mxu0 %v1699_v39  ;;  %2227 = vmatpush2.msra.mxu1 %v1914_v40  ;;  %v1437_v34 = vld [vmem:[#allocation8 + $0xd8] sm:$0xff]  ;;  %v1430_v37 = vld [vmem:[#allocation8 + $0xa0] sm:$0xff]  ;;  %v1424_v39 = vld [vmem:[#allocation8 + $0x70] sm:$0xff] }
 0x1cd   :  { %v3042_v56 = vmax.f32 %v1159_v44, 0.0  ;;  %v1087_v47 = vpop.f32.mrf.mxu0  ;;  %2158 = vmatpush2.msra.mxu0 %v1698_v42  ;;  %2228 = vmatprep.subr.mxu1 %v1909_v0  ;;  %v1425_v38 = vld [vmem:[#allocation8 + $0x78] sm:$0xff]  ;;  %v1419_v40 = vld [vmem:[#allocation8 + $0x48] sm:$0xff]  ;;  %v1412_v11 = vld [vmem:[#allocation8 + $0x10] sm:$0xff] }
 0x1ce   :  { %v1088_v52 = vadd.f32 %v1087_v47, %v1011_v9  ;;  %v1162_v54 = vpop.f32.mrf.mxu1  ;;  %2249 = vmatprep.subr.mxu0 %v1503_v3  ;;  %2229 = vmatpush2.msra.mxu1 %v1908_v45  ;;  %v1418_v9 = vld [vmem:[#allocation8 + $0x40] sm:$0xff]  ;;  %v1413_v41 = vld [vmem:[#allocation8 + $0x18] sm:$0xff]  ;;  %v1599_v42 = vld [vmem:[#allocation8 + $0x5e8] sm:$0xff] }
 0x1cf   :  { %v1163_v57 = vadd.f32 %v1162_v54, %v1086_v63  ;;  %2159 = vmatprep.mubr.f32.mxu0 %v3042_v56  ;;  %2230 = vmatprep.subr.mxu1 %v1903_v18  ;;  %v1598_v0 = vld [vmem:[#allocation8 + $0x5e0] sm:$0xff]  ;;  %v1593_v43 = vld [vmem:[#allocation8 + $0x5b8] sm:$0xff]  ;;  %v1592_v44 = vld [vmem:[#allocation8 + $0x5b0] sm:$0xff] }
 0x1d0   :  { %v1164_v1 = vpop.f32.mrf.mxu1  ;;  %2160 = vmatmul.mubr.f32.vlgmr.msra.gmra.mxu0 %v3044_v21  ;;  %2231 = vmatpush2.msra.mxu1 %v1902_v48  ;;  %v1587_v3 = vld [vmem:[#allocation8 + $0x588] sm:$0xff]  ;;  %v1586_v45 = vld [vmem:[#allocation8 + $0x580] sm:$0xff]  ;;  %v1581_v63 = vld [vmem:[#allocation8 + $0x558] sm:$0xff] }
 0x1d1   :  { %v1165_v6 = vadd.f32 %v1164_v1, %v1088_v52  ;;  %2250 = vmatpush1.msra.mxu0 %v1502_v53  ;;  %2232 = vmatprep.subr.mxu1 %v1897_v55  ;;  %v3048_v10 = vmax.f32 %v1163_v57, 0.0  ;;  %v1580_v18 = vld [vmem:[#allocation8 + $0x550] sm:$0xff]  ;;  %v1575_v47 = vld [vmem:[#allocation8 + $0x528] sm:$0xff]  ;;  %v1574_v48 = vld [vmem:[#allocation8 + $0x520] sm:$0xff] }
 0x1d2   :  { %2251 = vmatprep.subr.mxu0 %v1497_v58  ;;  %2233 = vmatpush2.msra.mxu1 %v1896_v62  ;;  %v1569_v52 = vld [vmem:[#allocation8 + $0x4f8] sm:$0xff]  ;;  %v1568_v54 = vld [vmem:[#allocation8 + $0x4f0] sm:$0xff]  ;;  %v1563_v53 = vld [vmem:[#allocation8 + $0x4c8] sm:$0xff] }
 0x1d3   :  { %v3050_v13 = vmax.f32 %v1165_v6, 0.0  ;;  %2252 = vmatpush1.msra.mxu0 %v1496_v4  ;;  %2234 = vmatprep.subr.mxu1 %v1891_v5  ;;  %v1562_v55 = vld [vmem:[#allocation8 + $0x4c0] sm:$0xff]  ;;  %v1557_v57 = vld [vmem:[#allocation8 + $0x498] sm:$0xff]  ;;  %v1556_v58 = vld [vmem:[#allocation8 + $0x490] sm:$0xff] }
 0x1d4   :  { %2253 = vmatprep.subr.mxu0 %v1491_v7  ;;  %2235 = vmatpush2.msra.mxu1 %v1890_v8  ;;  %v1551_v62 = vld [vmem:[#allocation8 + $0x468] sm:$0xff]  ;;  %v1550_v1 = vld [vmem:[#allocation8 + $0x460] sm:$0xff]  ;;  %v1545_v4 = vld [vmem:[#allocation8 + $0x438] sm:$0xff] }
 0x1d5   :  { %2165 = vmatprep.mubr.f32.mxu0 %v3050_v13  ;;  %2254 = vmatpush1.msra.mxu0 %v1490_v12  ;;  %v1544_v5 = vld [vmem:[#allocation8 + $0x430] sm:$0xff]  ;;  %v1539_v6 = vld [vmem:[#allocation8 + $0x408] sm:$0xff]  ;;  %v1538_v7 = vld [vmem:[#allocation8 + $0x400] sm:$0xff] }
 0x1d6   :  { %2166 = vmatmul.mubr.f32.gmra.mxu0 %v3048_v10  ;;  %2255 = vmatprep.subr.mxu0 %v1485_v14  ;;  %v1533_v8 = vld [vmem:[#allocation8 + $0x3d8] sm:$0xff]  ;;  %v1532_v12 = vld [vmem:[#allocation8 + $0x3d0] sm:$0xff]  ;;  %v1527_v14 = vld [vmem:[#allocation8 + $0x3a8] sm:$0xff] }
 0x1d7   :  { %2313 = vmatprep.mubr.f32.mxu0 %v3020_v51  ;;  %2256 = vmatpush1.msra.mxu0 %v1484_v15  ;;  %v1526_v15 = vld [vmem:[#allocation8 + $0x3a0] sm:$0xff] }
 0x1d8   :  { %2257 = vmatprep.subr.mxu0 %v1479_v16  ;;  %2326 = vmatprep.subr.mxu1 %v1695_v17  ;;  %v1521_v16 = vld [vmem:[#allocation8 + $0x378] sm:$0xff]  ;;  %v1520_v17 = vld [vmem:[#allocation8 + $0x370] sm:$0xff] }
 0x1d9   :  { %2258 = vmatpush1.msra.mxu0 %v1478_v20  ;;  %v1515_v20 = vld [vmem:[#allocation8 + $0x348] sm:$0xff] }
 0x1da   :  { %2259 = vmatprep.subr.mxu0 %v1473_v2  ;;  %v1514_v2 = vld [vmem:[#allocation8 + $0x340] sm:$0xff] }
 0x1db   :  { %2260 = vmatpush1.msra.mxu0 %v1472_v23  ;;  %v1509_v23 = vld [vmem:[#allocation8 + $0x318] sm:$0xff] }
 0x1dc   :  { %2261 = vmatprep.subr.mxu0 %v1467_v24  ;;  %v1508_v24 = vld [vmem:[#allocation8 + $0x310] sm:$0xff] }
 0x1dd   :  { %2262 = vmatpush1.msra.mxu0 %v1466_v26  ;;  %v1887_v26 = vld [vmem:[#allocation8 + $0xee8] sm:$0xff] }
 0x1de   :  { %2263 = vmatprep.subr.mxu0 %v1461_v60  ;;  %v1886_v60 = vld [vmem:[#allocation8 + $0xee0] sm:$0xff] }
 0x1df   :  { %2264 = vmatpush1.msra.mxu0 %v1460_v27  ;;  %v1881_v27 = vld [vmem:[#allocation8 + $0xeb8] sm:$0xff] }
 0x1e0   :  { %2265 = vmatprep.subr.mxu0 %v1455_v28  ;;  %v1880_v28 = vld [vmem:[#allocation8 + $0xeb0] sm:$0xff] }
 0x1e1   :  { %2266 = vmatpush1.msra.mxu0 %v1454_v29  ;;  %v1875_v29 = vld [vmem:[#allocation8 + $0xe88] sm:$0xff] }
 0x1e2   :  { %2267 = vmatprep.subr.mxu0 %v1449_v31  ;;  %v1874_v31 = vld [vmem:[#allocation8 + $0xe80] sm:$0xff] }
 0x1e3   :  { %2268 = vmatpush1.msra.mxu0 %v1448_v32  ;;  %v1869_v32 = vld [vmem:[#allocation8 + $0xe58] sm:$0xff] }
 0x1e4   :  { %2269 = vmatprep.subr.mxu0 %v1443_v33  ;;  %v1868_v33 = vld [vmem:[#allocation8 + $0xe50] sm:$0xff] }
 0x1e5   :  { %2270 = vmatpush1.msra.mxu0 %v1442_v59  ;;  %v1863_v59 = vld [vmem:[#allocation8 + $0xe28] sm:$0xff] }
 0x1e6   :  { %2271 = vmatprep.subr.mxu0 %v1437_v34  ;;  %v1862_v34 = vld [vmem:[#allocation8 + $0xe20] sm:$0xff] }
 0x1e7   :  { %2272 = vmatpush1.msra.mxu0 %v1436_v35  ;;  %v1857_v35 = vld [vmem:[#allocation8 + $0xdf8] sm:$0xff] }
 0x1e8   :  { %2273 = vmatprep.subr.mxu0 %v1431_v36  ;;  %v1856_v36 = vld [vmem:[#allocation8 + $0xdf0] sm:$0xff] }
 0x1e9   :  { %2274 = vmatpush1.msra.mxu0 %v1430_v37  ;;  %v1851_v37 = vld [vmem:[#allocation8 + $0xdc8] sm:$0xff] }
 0x1ea   :  { %2275 = vmatprep.subr.mxu0 %v1425_v38  ;;  %v1850_v38 = vld [vmem:[#allocation8 + $0xdc0] sm:$0xff] }
 0x1eb   :  { %2276 = vmatpush1.msra.mxu0 %v1424_v39  ;;  %v1845_v39 = vld [vmem:[#allocation8 + $0xd98] sm:$0xff] }
 0x1ec   :  { %2277 = vmatprep.subr.mxu0 %v1419_v40  ;;  %v1844_v40 = vld [vmem:[#allocation8 + $0xd90] sm:$0xff] }
 0x1ed   :  { %2278 = vmatpush1.msra.mxu0 %v1418_v9  ;;  %v1839_v9 = vld [vmem:[#allocation8 + $0xd68] sm:$0xff] }
 0x1ee   :  { %2279 = vmatprep.subr.mxu0 %v1413_v41  ;;  %v1838_v41 = vld [vmem:[#allocation8 + $0xd60] sm:$0xff] }
 0x1ef   :  { %2280 = vmatpush1.msra.mxu0 %v1412_v11  ;;  %v1833_v11 = vld [vmem:[#allocation8 + $0xd38] sm:$0xff] }
 0x1f0   :  { %2281 = vmatprep.subr.mxu0 %v1599_v42  ;;  %v1832_v42 = vld [vmem:[#allocation8 + $0xd30] sm:$0xff] }
 0x1f1   :  { %2282 = vmatpush2.msra.mxu0 %v1598_v0  ;;  %v1827_v0 = vld [vmem:[#allocation8 + $0xd08] sm:$0xff] }
 0x1f2   :  { %2283 = vmatprep.subr.mxu0 %v1593_v43  ;;  %v1826_v43 = vld [vmem:[#allocation8 + $0xd00] sm:$0xff] }
 0x1f3   :  { %2284 = vmatpush2.msra.mxu0 %v1592_v44  ;;  %v1821_v44 = vld [vmem:[#allocation8 + $0xcd8] sm:$0xff] }
 0x1f4   :  { %2285 = vmatprep.subr.mxu0 %v1587_v3  ;;  %v1820_v3 = vld [vmem:[#allocation8 + $0xcd0] sm:$0xff] }
 0x1f5   :  { %2286 = vmatpush2.msra.mxu0 %v1586_v45  ;;  %v1815_v45 = vld [vmem:[#allocation8 + $0xca8] sm:$0xff] }
 0x1f6   :  { %2287 = vmatprep.subr.mxu0 %v1581_v63  ;;  %v1814_v63 = vld [vmem:[#allocation8 + $0xca0] sm:$0xff] }
 0x1f7   :  { %2288 = vmatpush2.msra.mxu0 %v1580_v18  ;;  %v1809_v18 = vld [vmem:[#allocation8 + $0xc78] sm:$0xff] }
 0x1f8   :  { %2289 = vmatprep.subr.mxu0 %v1575_v47  ;;  %v1808_v47 = vld [vmem:[#allocation8 + $0xc70] sm:$0xff] }
 0x1f9   :  { %2290 = vmatpush2.msra.mxu0 %v1574_v48  ;;  %v1803_v48 = vld [vmem:[#allocation8 + $0xc48] sm:$0xff] }
 0x1fa   :  { %2291 = vmatprep.subr.mxu0 %v1569_v52  ;;  %v1802_v52 = vld [vmem:[#allocation8 + $0xc40] sm:$0xff] }
 0x1fb   :  { %2292 = vmatpush2.msra.mxu0 %v1568_v54  ;;  %v1797_v54 = vld [vmem:[#allocation8 + $0xc18] sm:$0xff] }
 0x1fc   :  { %2293 = vmatprep.subr.mxu0 %v1563_v53  ;;  %v1796_v53 = vld [vmem:[#allocation8 + $0xc10] sm:$0xff] }
 0x1fd   :  { %2294 = vmatpush2.msra.mxu0 %v1562_v55  ;;  %v1983_v55 = vld [vmem:[#allocation8 + $0x11e8] sm:$0xff] }
 0x1fe   :  { %2295 = vmatprep.subr.mxu0 %v1557_v57  ;;  %v1982_v57 = vld [vmem:[#allocation8 + $0x11e0] sm:$0xff] }
 0x1ff   :  { %2296 = vmatpush2.msra.mxu0 %v1556_v58  ;;  %v1977_v58 = vld [vmem:[#allocation8 + $0x11b8] sm:$0xff] }
 0x200   :  { %2297 = vmatprep.subr.mxu0 %v1551_v62  ;;  %v1976_v62 = vld [vmem:[#allocation8 + $0x11b0] sm:$0xff] }
 0x201   :  { %2298 = vmatpush2.msra.mxu0 %v1550_v1  ;;  %v1971_v1 = vld [vmem:[#allocation8 + $0x1188] sm:$0xff] }
 0x202   :  { %2299 = vmatprep.subr.mxu0 %v1545_v4  ;;  %v1970_v4 = vld [vmem:[#allocation8 + $0x1180] sm:$0xff] }
 0x203   :  { %2300 = vmatpush2.msra.mxu0 %v1544_v5  ;;  %v1965_v5 = vld [vmem:[#allocation8 + $0x1158] sm:$0xff] }
 0x204   :  { %2301 = vmatprep.subr.mxu0 %v1539_v6  ;;  %v1964_v6 = vld [vmem:[#allocation8 + $0x1150] sm:$0xff] }
 0x205   :  { %2302 = vmatpush2.msra.mxu0 %v1538_v7  ;;  %v1959_v7 = vld [vmem:[#allocation8 + $0x1128] sm:$0xff] }
 0x206   :  { %2303 = vmatprep.subr.mxu0 %v1533_v8  ;;  %v1958_v8 = vld [vmem:[#allocation8 + $0x1120] sm:$0xff] }
 0x207   :  { %2304 = vmatpush2.msra.mxu0 %v1532_v12  ;;  %v1953_v12 = vld [vmem:[#allocation8 + $0x10f8] sm:$0xff] }
 0x208   :  { %2305 = vmatprep.subr.mxu0 %v1527_v14  ;;  %v1952_v14 = vld [vmem:[#allocation8 + $0x10f0] sm:$0xff] }
 0x209   :  { %2306 = vmatpush2.msra.mxu0 %v1526_v15  ;;  %v1947_v15 = vld [vmem:[#allocation8 + $0x10c8] sm:$0xff] }
 0x20a   :  { %2307 = vmatprep.subr.mxu0 %v1521_v16  ;;  %v1946_v16 = vld [vmem:[#allocation8 + $0x10c0] sm:$0xff] }
 0x20b   :  { %2308 = vmatpush2.msra.mxu0 %v1520_v17  ;;  %v1941_v17 = vld [vmem:[#allocation8 + $0x1098] sm:$0xff] }
 0x20c   :  { %2309 = vmatprep.subr.mxu0 %v1515_v20  ;;  %v1940_v20 = vld [vmem:[#allocation8 + $0x1090] sm:$0xff] }
 0x20d   :  { %2310 = vmatpush2.msra.mxu0 %v1514_v2  ;;  %v1935_v2 = vld [vmem:[#allocation8 + $0x1068] sm:$0xff] }
 0x20e   :  { %2311 = vmatprep.subr.mxu0 %v1509_v23  ;;  %v693_v23 = vsub.s32 4, %v3001_v49 }
 0x20f   :  { %2312 = vmatpush2.msra.mxu0 %v1508_v24  ;;  %v1233_v24 = vpop.f32.mrf.mxu0 }
 0x210   :  { %2314 = vmatmul.mubr.f32.vlgmr.msra.gmra.mxu0 %v3027_v22  ;;  %2403 = vmatprep.subr.mxu0 %v1887_v26  ;;  %v1934_v26 = vld [vmem:[#allocation8 + $0x1060] sm:$0xff] }
 0x211   :  { %2319 = vmatprep.mubr.f32.mxu0 %v3025_v19  ;;  %2404 = vmatpush1.msra.mxu0 %v1886_v60  ;;  %v697_v60 = vsub.s32 5, %v3001_v49 }
 0x212   :  { %2405 = vmatprep.subr.mxu0 %v1881_v27  ;;  %v1929_v27 = vld [vmem:[#allocation8 + $0x1038] sm:$0xff] }
 0x213   :  { %2406 = vmatpush1.msra.mxu0 %v1880_v28  ;;  %v1928_v28 = vld [vmem:[#allocation8 + $0x1030] sm:$0xff] }
 0x214   :  { %2320 = vmatmul.mubr.f32.gmra.mxu0 %v3031_v30  ;;  %2407 = vmatprep.subr.mxu0 %v1875_v29  ;;  %v1923_v29 = vld [vmem:[#allocation8 + $0x1008] sm:$0xff] }
 0x215   :  { %2408 = vmatpush1.msra.mxu0 %v1874_v31  ;;  %v2762_v31 = vld [vmem:[#allocation7] sm:$0x3f] }
 0x216   :  { %2409 = vmatprep.subr.mxu0 %v1869_v32  ;;  %v694_v32 = vrot.slane %v2762_v31, %v693_v23 }
 0x217   :  { %2410 = vmatpush1.msra.mxu0 %v1868_v33  ;;  %v1235_v33 = vpop.f32.mrf.mxu0 }
 0x218   :  { %2411 = vmatprep.subr.mxu0 %v1863_v59  ;;  %v1310_v59 = vpop.f32.mrf.mxu1 }
 0x219   :  { %2412 = vmatpush1.msra.mxu0 %v1862_v34  ;;  %v1922_v34 = vld [vmem:[#allocation8 + $0x1000] sm:$0xff] }
 0x21a   :  { %2413 = vmatprep.subr.mxu0 %v1857_v35  ;;  %v698_v35 = vrot.slane %v2762_v31, %v697_v60  ;;  %v1682_v31 = vld [vmem:[#allocation8 + $0x880] sm:$0xff] }
 0x21b   :  { %2414 = vmatpush1.msra.mxu0 %v1856_v36  ;;  %v1917_v36 = vld [vmem:[#allocation8 + $0xfd8] sm:$0xff] }
 0x21c   :  { %2415 = vmatprep.subr.mxu0 %v1851_v37 }
 0x21d   :  { %2416 = vmatpush1.msra.mxu0 %v1850_v38  ;;  %v1916_v38 = vld [vmem:[#allocation8 + $0xfd0] sm:$0xff] }
 0x21e   :  { %2417 = vmatprep.subr.mxu0 %v1845_v39  ;;  %v1911_v39 = vld [vmem:[#allocation8 + $0xfa8] sm:$0xff] }
 0x21f   :  { %2418 = vmatpush1.msra.mxu0 %v1844_v40  ;;  %v1234_v40 = vadd.f32 %v1233_v24, %v694_v32  ;;  %v1688_v24 = vld [vmem:[#allocation8 + $0x8b0] sm:$0xff] }
 0x220   :  { %2419 = vmatprep.subr.mxu0 %v1839_v9  ;;  %v1312_v9 = vpop.f32.mrf.mxu1 }
 0x221   :  { %2420 = vmatpush1.msra.mxu0 %v1838_v41  ;;  %v1910_v41 = vld [vmem:[#allocation8 + $0xfa0] sm:$0xff] }
 0x222   :  { %2421 = vmatprep.subr.mxu0 %v1833_v11  ;;  %v1236_v11 = vadd.f32 %v1235_v33, %v698_v35  ;;  %v1685_v33 = vld [vmem:[#allocation8 + $0x898] sm:$0xff] }
 0x223   :  { %2422 = vmatpush1.msra.mxu0 %v1832_v42  ;;  %v1905_v42 = vld [vmem:[#allocation8 + $0xf78] sm:$0xff] }
 0x224   :  { %2423 = vmatprep.subr.mxu0 %v1827_v0 }
 0x225   :  { %2424 = vmatpush1.msra.mxu0 %v1826_v43 }
 0x226   :  { %2425 = vmatprep.subr.mxu0 %v1821_v44  ;;  %v1904_v44 = vld [vmem:[#allocation8 + $0xf70] sm:$0xff] }
 0x227   :  { %2426 = vmatpush1.msra.mxu0 %v1820_v3  ;;  %v1899_v3 = vld [vmem:[#allocation8 + $0xf48] sm:$0xff] }
 0x228   :  { %2427 = vmatprep.subr.mxu0 %v1815_v45  ;;  %v1311_v45 = vadd.f32 %v1310_v59, %v1234_v40  ;;  %v1676_v59 = vld [vmem:[#allocation8 + $0x850] sm:$0xff]  ;;  %v1673_v40 = vld [vmem:[#allocation8 + $0x838] sm:$0xff] }
 0x229   :  { %2428 = vmatpush1.msra.mxu0 %v1814_v63 }
 0x22a   :  { %2429 = vmatprep.subr.mxu0 %v1809_v18  ;;  %v1898_v18 = vld [vmem:[#allocation8 + $0xf40] sm:$0xff] }
 0x22b   :  { %2430 = vmatpush1.msra.mxu0 %v1808_v47  ;;  %v1313_v47 = vadd.f32 %v1312_v9, %v1236_v11  ;;  %v1664_v9 = vld [vmem:[#allocation8 + $0x7f0] sm:$0xff]  ;;  %v1659_v11 = vld [vmem:[#allocation8 + $0x7c8] sm:$0xff] }
 0x22c   :  { %2431 = vmatprep.subr.mxu0 %v1803_v48 }
 0x22d   :  { %2432 = vmatpush1.msra.mxu0 %v1802_v52 }
 0x22e   :  { %2433 = vmatprep.subr.mxu0 %v1797_v54  ;;  %v1893_v54 = vld [vmem:[#allocation8 + $0xf18] sm:$0xff] }
 0x22f   :  { %2434 = vmatpush1.msra.mxu0 %v1796_v53 }
 0x230   :  { %2435 = vmatprep.subr.mxu0 %v1983_v55 }
 0x231   :  { %2436 = vmatpush2.msra.mxu0 %v1982_v57 }
 0x232   :  { %2437 = vmatprep.subr.mxu0 %v1977_v58  ;;  %v1892_v58 = vld [vmem:[#allocation8 + $0xf10] sm:$0xff] }
 0x233   :  { %2438 = vmatpush2.msra.mxu0 %v1976_v62 }
 0x234   :  { %2439 = vmatprep.subr.mxu0 %v1971_v1  ;;  %v1697_v1 = vld [vmem:[#allocation8 + $0x8f8] sm:$0xff] }
 0x235   :  { %2440 = vmatpush2.msra.mxu0 %v1970_v4 }
 0x236   :  { %2441 = vmatprep.subr.mxu0 %v1965_v5 }
 0x237   :  { %2442 = vmatpush2.msra.mxu0 %v1964_v6 }
 0x238   :  { %2443 = vmatprep.subr.mxu0 %v1959_v7 }
 0x239   :  { %2444 = vmatpush2.msra.mxu0 %v1958_v8 }
 0x23a   :  { %2445 = vmatprep.subr.mxu0 %v1953_v12 }
 0x23b   :  { %2446 = vmatpush2.msra.mxu0 %v1952_v14  ;;  %v1694_v14 = vld [vmem:[#allocation8 + $0x8e0] sm:$0xff] }
 0x23c   :  { %2447 = vmatprep.subr.mxu0 %v1947_v15  ;;  %v1696_v15 = vld [vmem:[#allocation8 + $0x8f0] sm:$0xff] }
 0x23d   :  { %2448 = vmatpush2.msra.mxu0 %v1946_v16 }
 0x23e   :  { %2449 = vmatprep.subr.mxu0 %v1941_v17 }
 0x23f   :  { %2450 = vmatpush2.msra.mxu0 %v1940_v20  ;;  %v1689_v20 = vld [vmem:[#allocation8 + $0x8b8] sm:$0xff] }
 0x240   :  { %2451 = vmatprep.subr.mxu0 %v1935_v2  ;;  %v1239_v37 = vpop.f32.mrf.mxu0  ;;  %v1691_v2 = vld [vmem:[#allocation8 + $0x8c8] sm:$0xff] }
 0x241   :  { %2452 = vmatpush2.msra.mxu0 %v1934_v26  ;;  %v1240_v48 = vadd.f32 %v1239_v37, %v694_v32  ;;  %v1677_v32 = vld [vmem:[#allocation8 + $0x858] sm:$0xff]  ;;  %v1670_v37 = vld [vmem:[#allocation8 + $0x820] sm:$0xff] }
 0x242   :  { %2453 = vmatprep.subr.mxu0 %v1929_v27  ;;  %v1241_v0 = vpop.f32.mrf.mxu0  ;;  %v1683_v27 = vld [vmem:[#allocation8 + $0x888] sm:$0xff] }
 0x243   :  { %2454 = vmatpush2.msra.mxu0 %v1928_v28  ;;  %v1242_v52 = vadd.f32 %v1241_v0, %v698_v35  ;;  %v1690_v28 = vld [vmem:[#allocation8 + $0x8c0] sm:$0xff]  ;;  %v1671_v35 = vld [vmem:[#allocation8 + $0x828] sm:$0xff] }
 0x244   :  { %2455 = vmatprep.subr.mxu0 %v1923_v29  ;;  %v1316_v43 = vpop.f32.mrf.mxu1  ;;  %v1658_v0 = vld [vmem:[#allocation8 + $0x7c0] sm:$0xff] }
 0x245   :  { %2456 = vmatpush2.msra.mxu0 %v1922_v34  ;;  %v1317_v5 = vadd.f32 %v1316_v43, %v1240_v48  ;;  %v1684_v34 = vld [vmem:[#allocation8 + $0x890] sm:$0xff]  ;;  %v1666_v43 = vld [vmem:[#allocation8 + $0x800] sm:$0xff] }
 0x246   :  { %2457 = vmatprep.subr.mxu0 %v1917_v36  ;;  %v1318_v53 = vpop.f32.mrf.mxu1  ;;  %v1679_v36 = vld [vmem:[#allocation8 + $0x868] sm:$0xff]  ;;  %v1654_v48 = vld [vmem:[#allocation8 + $0x7a0] sm:$0xff] }
 0x247   :  { %2458 = vmatpush2.msra.mxu0 %v1916_v38  ;;  %v1319_v6 = vadd.f32 %v1318_v53, %v1242_v52  ;;  %v1678_v38 = vld [vmem:[#allocation8 + $0x860] sm:$0xff]  ;;  %v1641_v52 = vld [vmem:[#allocation8 + $0x738] sm:$0xff]  ;;  %v1640_v53 = vld [vmem:[#allocation8 + $0x730] sm:$0xff] }
 0x248   :  { %2459 = vmatprep.subr.mxu0 %v1911_v39  ;;  %v1665_v39 = vld [vmem:[#allocation8 + $0x7f8] sm:$0xff] }
 0x249   :  { %2460 = vmatpush2.msra.mxu0 %v1910_v41  ;;  %v1672_v41 = vld [vmem:[#allocation8 + $0x830] sm:$0xff] }
 0x24a   :  { %v1387_v63 = vpop.f32.mrf.mxu0  ;;  %2461 = vmatprep.subr.mxu0 %v1905_v42  ;;  %v1667_v42 = vld [vmem:[#allocation8 + $0x808] sm:$0xff] }
 0x24b   :  { %2462 = vmatpush2.msra.mxu0 %v1904_v44  ;;  %v1388_v55 = vadd.f32 %v1387_v63, %v1311_v45  ;;  %v1653_v44 = vld [vmem:[#allocation8 + $0x798] sm:$0xff]  ;;  %v1660_v45 = vld [vmem:[#allocation8 + $0x7d0] sm:$0xff]  ;;  %v1647_v63 = vld [vmem:[#allocation8 + $0x768] sm:$0xff] }
 0x24c   :  { %v1389_v57 = vpop.f32.mrf.mxu0  ;;  %2463 = vmatprep.subr.mxu0 %v1899_v3  ;;  %v1661_v3 = vld [vmem:[#allocation8 + $0x7d8] sm:$0xff] }
 0x24d   :  { %v1390_v62 = vadd.f32 %v1389_v57, %v1313_v47  ;;  %2464 = vmatpush2.msra.mxu0 %v1898_v18  ;;  %v3066_v8 = vmax.f32 %v1388_v55, 0.0  ;;  %v1655_v18 = vld [vmem:[#allocation8 + $0x7a8] sm:$0xff]  ;;  %v1646_v47 = vld [vmem:[#allocation8 + $0x760] sm:$0xff]  ;;  %v1648_v55 = vld [vmem:[#allocation8 + $0x770] sm:$0xff] }
 0x24e   :  { %v1393_v4 = vpop.f32.mrf.mxu0  ;;  %2465 = vmatprep.subr.mxu0 %v1893_v54  ;;  %v1649_v54 = vld [vmem:[#allocation8 + $0x778] sm:$0xff]  ;;  %v1635_v57 = vld [vmem:[#allocation8 + $0x708] sm:$0xff] }
 0x24f   :  { %v3064_v7 = vmax.f32 %v1390_v62, 0.0  ;;  %2466 = vmatpush2.msra.mxu0 %v1892_v58  ;;  %v1394_v16 = vadd.f32 %v1393_v4, %v1317_v5  ;;  %v1643_v58 = vld [vmem:[#allocation8 + $0x748] sm:$0xff]  ;;  %v1634_v62 = vld [vmem:[#allocation8 + $0x700] sm:$0xff]  ;;  %v1629_v4 = vld [vmem:[#allocation8 + $0x6d8] sm:$0xff] }
 0x250   :  { %v1395_v12 = vpop.f32.mrf.mxu0  ;;  %2557 = vmatprep.subr.mxu0 %v1697_v1  ;;  %v1642_v1 = vld [vmem:[#allocation8 + $0x740] sm:$0xff]  ;;  %v1637_v5 = vld [vmem:[#allocation8 + $0x718] sm:$0xff] }
 0x251   :  { %v1396_v17 = vadd.f32 %v1395_v12, %v1319_v6  ;;  %2236 = vmatprep.mubr.f32.mxu1 %v3064_v7  ;;  %2467 = vmatprep.mubr.f32.mxu0 %v3064_v7  ;;  %v3074_v29 = vmax.f32 %v1394_v16, 0.0  ;;  %v1628_v6 = vld [vmem:[#allocation8 + $0x6d0] sm:$0xff]  ;;  %v1622_v16 = vld [vmem:[#allocation8 + $0x6a0] sm:$0xff] }
 0x252   :  { %2237 = vmatmul.mubr.f32.vlgmr.msra.gmra.mxu1 %v3066_v8  ;;  %2468 = vmatmul.mubr.f32.vlgmr.msra.gmra.mxu0 %v3066_v8  ;;  %v1636_v12 = vld [vmem:[#allocation8 + $0x710] sm:$0xff] }
 0x253   :  { %v3072_v26 = vmax.f32 %v1396_v17, 0.0  ;;  %2327 = vmatpush1.msra.mxu1 %v1694_v14  ;;  %2558 = vmatpush1.msra.mxu0 %v1696_v15  ;;  %v1623_v14 = vld [vmem:[#allocation8 + $0x6a8] sm:$0xff]  ;;  %v1630_v17 = vld [vmem:[#allocation8 + $0x6e0] sm:$0xff] }
 0x254   :  { %2328 = vmatprep.subr.mxu1 %v1689_v20  ;;  %2559 = vmatprep.subr.mxu0 %v1691_v2  ;;  %v1631_v15 = vld [vmem:[#allocation8 + $0x6e8] sm:$0xff]  ;;  %v1617_v20 = vld [vmem:[#allocation8 + $0x678] sm:$0xff] }
 0x255   :  { %2329 = vmatpush1.msra.mxu1 %v1688_v24  ;;  %2242 = vmatprep.mubr.f32.mxu1 %v3072_v26  ;;  %v1625_v2 = vld [vmem:[#allocation8 + $0x6b8] sm:$0xff]  ;;  %v1616_v24 = vld [vmem:[#allocation8 + $0x670] sm:$0xff] }
 0x256   :  { %2330 = vmatprep.subr.mxu1 %v1683_v27  ;;  %2473 = vmatprep.mubr.f32.mxu0 %v3072_v26  ;;  %v1624_v27 = vld [vmem:[#allocation8 + $0x6b0] sm:$0xff] }
 0x257   :  { %2243 = vmatmul.mubr.f32.gmra.mxu1 %v3074_v29  ;;  %2560 = vmatpush1.msra.mxu0 %v1690_v28  ;;  %v1611_v28 = vld [vmem:[#allocation8 + $0x648] sm:$0xff] }
 0x258   :  { %2331 = vmatpush1.msra.mxu1 %v1682_v31  ;;  %2390 = vmatprep.mubr.f32.mxu1 %v3042_v56  ;;  %v1619_v31 = vld [vmem:[#allocation8 + $0x688] sm:$0xff] }
 0x259   :  { %2332 = vmatprep.subr.mxu1 %v1677_v32  ;;  %2474 = vmatmul.mubr.f32.gmra.mxu0 %v3074_v29  ;;  %v1610_v32 = vld [vmem:[#allocation8 + $0x640] sm:$0xff] }
 0x25a   :  { %2561 = vmatprep.subr.mxu0 %v1685_v33  ;;  %2333 = vmatpush1.msra.mxu1 %v1676_v59  ;;  %v1618_v33 = vld [vmem:[#allocation8 + $0x680] sm:$0xff]  ;;  %v1605_v59 = vld [vmem:[#allocation8 + $0x618] sm:$0xff] }
 0x25b   :  { %2562 = vmatpush1.msra.mxu0 %v1684_v34  ;;  %2621 = vmatprep.mubr.f32.mxu0 %v3042_v56  ;;  %v1652_v56 = vld [vmem:[#allocation8 + $0x790] sm:$0xff]  ;;  %v1613_v34 = vld [vmem:[#allocation8 + $0x658] sm:$0xff] }
 0x25c   :  { %2334 = vmatprep.subr.mxu1 %v1671_v35  ;;  %2563 = vmatprep.subr.mxu0 %v1679_v36  ;;  %v1604_v35 = vld [vmem:[#allocation8 + $0x610] sm:$0xff] }
 0x25d   :  { %2335 = vmatpush1.msra.mxu1 %v1670_v37  ;;  %2564 = vmatpush1.msra.mxu0 %v1678_v38  ;;  %v1612_v36 = vld [vmem:[#allocation8 + $0x650] sm:$0xff]  ;;  %v1791_v37 = vld [vmem:[#allocation8 + $0xbe8] sm:$0xff] }
 0x25e   :  { %2336 = vmatprep.subr.mxu1 %v1665_v39  ;;  %2565 = vmatprep.subr.mxu0 %v1673_v40  ;;  %v1607_v38 = vld [vmem:[#allocation8 + $0x628] sm:$0xff]  ;;  %v1790_v39 = vld [vmem:[#allocation8 + $0xbe0] sm:$0xff] }
 0x25f   :  { %2337 = vmatpush1.msra.mxu1 %v1664_v9  ;;  %2566 = vmatpush1.msra.mxu0 %v1672_v41  ;;  %v1606_v40 = vld [vmem:[#allocation8 + $0x620] sm:$0xff]  ;;  %v1785_v9 = vld [vmem:[#allocation8 + $0xbb8] sm:$0xff] }
 0x260   :  { %2338 = vmatprep.subr.mxu1 %v1659_v11  ;;  %2567 = vmatprep.subr.mxu0 %v1667_v42  ;;  %v1793_v41 = vld [vmem:[#allocation8 + $0xbf8] sm:$0xff]  ;;  %v1784_v11 = vld [vmem:[#allocation8 + $0xbb0] sm:$0xff] }
 0x261   :  { %2339 = vmatpush1.msra.mxu1 %v1658_v0  ;;  %2568 = vmatpush1.msra.mxu0 %v1666_v43  ;;  %v1792_v42 = vld [vmem:[#allocation8 + $0xbf0] sm:$0xff]  ;;  %v1779_v0 = vld [vmem:[#allocation8 + $0xb88] sm:$0xff] }
 0x262   :  { %2340 = vmatprep.subr.mxu1 %v1653_v44  ;;  %2569 = vmatprep.subr.mxu0 %v1661_v3  ;;  %v1787_v43 = vld [vmem:[#allocation8 + $0xbc8] sm:$0xff]  ;;  %v1778_v44 = vld [vmem:[#allocation8 + $0xb80] sm:$0xff] }
 0x263   :  { %2341 = vmatpush1.msra.mxu1 %v1652_v56  ;;  %2570 = vmatpush1.msra.mxu0 %v1660_v45  ;;  %v1786_v3 = vld [vmem:[#allocation8 + $0xbc0] sm:$0xff]  ;;  %v1773_v56 = vld [vmem:[#allocation8 + $0xb58] sm:$0xff] }
 0x264   :  { %2342 = vmatprep.subr.mxu1 %v1647_v63  ;;  %2571 = vmatprep.subr.mxu0 %v1655_v18  ;;  %v1781_v45 = vld [vmem:[#allocation8 + $0xb98] sm:$0xff]  ;;  %v1772_v63 = vld [vmem:[#allocation8 + $0xb50] sm:$0xff] }
 0x265   :  { %2343 = vmatpush1.msra.mxu1 %v1646_v47  ;;  %2572 = vmatpush1.msra.mxu0 %v1654_v48  ;;  %v1780_v18 = vld [vmem:[#allocation8 + $0xb90] sm:$0xff]  ;;  %v1767_v47 = vld [vmem:[#allocation8 + $0xb28] sm:$0xff] }
 0x266   :  { %2344 = vmatprep.subr.mxu1 %v1641_v52  ;;  %2573 = vmatprep.subr.mxu0 %v1649_v54  ;;  %v1775_v48 = vld [vmem:[#allocation8 + $0xb68] sm:$0xff]  ;;  %v1766_v52 = vld [vmem:[#allocation8 + $0xb20] sm:$0xff] }
 0x267   :  { %2345 = vmatpush1.msra.mxu1 %v1640_v53  ;;  %2574 = vmatpush1.msra.mxu0 %v1648_v55  ;;  %v1774_v54 = vld [vmem:[#allocation8 + $0xb60] sm:$0xff]  ;;  %v1761_v53 = vld [vmem:[#allocation8 + $0xaf8] sm:$0xff] }
 0x268   :  { %2346 = vmatprep.subr.mxu1 %v1635_v57  ;;  %2575 = vmatprep.subr.mxu0 %v1643_v58  ;;  %v1769_v55 = vld [vmem:[#allocation8 + $0xb38] sm:$0xff]  ;;  %v1760_v57 = vld [vmem:[#allocation8 + $0xaf0] sm:$0xff] }
 0x269   :  { %2347 = vmatpush1.msra.mxu1 %v1634_v62  ;;  %2576 = vmatpush1.msra.mxu0 %v1642_v1  ;;  %v1768_v58 = vld [vmem:[#allocation8 + $0xb30] sm:$0xff]  ;;  %v1755_v62 = vld [vmem:[#allocation8 + $0xac8] sm:$0xff] }
 0x26a   :  { %2348 = vmatprep.subr.mxu1 %v1629_v4  ;;  %2577 = vmatprep.subr.mxu0 %v1637_v5  ;;  %v1763_v1 = vld [vmem:[#allocation8 + $0xb08] sm:$0xff]  ;;  %v1754_v4 = vld [vmem:[#allocation8 + $0xac0] sm:$0xff] }
 0x26b   :  { %2349 = vmatpush1.msra.mxu1 %v1628_v6  ;;  %2578 = vmatpush1.msra.mxu0 %v1636_v12  ;;  %v1762_v5 = vld [vmem:[#allocation8 + $0xb00] sm:$0xff]  ;;  %v1749_v6 = vld [vmem:[#allocation8 + $0xa98] sm:$0xff] }
 0x26c   :  { %2350 = vmatprep.subr.mxu1 %v1623_v14  ;;  %2579 = vmatprep.subr.mxu0 %v1631_v15  ;;  %v1757_v12 = vld [vmem:[#allocation8 + $0xad8] sm:$0xff]  ;;  %v1748_v14 = vld [vmem:[#allocation8 + $0xa90] sm:$0xff] }
 0x26d   :  { %2351 = vmatpush1.msra.mxu1 %v1622_v16  ;;  %2580 = vmatpush1.msra.mxu0 %v1630_v17  ;;  %v1756_v15 = vld [vmem:[#allocation8 + $0xad0] sm:$0xff]  ;;  %v1743_v16 = vld [vmem:[#allocation8 + $0xa68] sm:$0xff] }
 0x26e   :  { %2352 = vmatprep.subr.mxu1 %v1617_v20  ;;  %2581 = vmatprep.subr.mxu0 %v1625_v2  ;;  %v1751_v17 = vld [vmem:[#allocation8 + $0xaa8] sm:$0xff]  ;;  %v1742_v20 = vld [vmem:[#allocation8 + $0xa60] sm:$0xff] }
 0x26f   :  { %2353 = vmatpush1.msra.mxu1 %v1616_v24  ;;  %2582 = vmatpush1.msra.mxu0 %v1624_v27  ;;  %v1750_v2 = vld [vmem:[#allocation8 + $0xaa0] sm:$0xff]  ;;  %v1737_v24 = vld [vmem:[#allocation8 + $0xa38] sm:$0xff] }
 0x270   :  { %2354 = vmatprep.subr.mxu1 %v1611_v28  ;;  %2583 = vmatprep.subr.mxu0 %v1619_v31  ;;  %v1745_v27 = vld [vmem:[#allocation8 + $0xa78] sm:$0xff]  ;;  %v1736_v28 = vld [vmem:[#allocation8 + $0xa30] sm:$0xff] }
 0x271   :  { %2355 = vmatpush1.msra.mxu1 %v1610_v32  ;;  %2584 = vmatpush1.msra.mxu0 %v1618_v33  ;;  %v1744_v31 = vld [vmem:[#allocation8 + $0xa70] sm:$0xff]  ;;  %v1731_v32 = vld [vmem:[#allocation8 + $0xa08] sm:$0xff] }
 0x272   :  { %2356 = vmatprep.subr.mxu1 %v1605_v59  ;;  %2585 = vmatprep.subr.mxu0 %v1613_v34  ;;  %v1739_v33 = vld [vmem:[#allocation8 + $0xa48] sm:$0xff]  ;;  %v1730_v59 = vld [vmem:[#allocation8 + $0xa00] sm:$0xff] }
 0x273   :  { %2357 = vmatpush1.msra.mxu1 %v1604_v35  ;;  %2586 = vmatpush1.msra.mxu0 %v1612_v36  ;;  %v1738_v34 = vld [vmem:[#allocation8 + $0xa40] sm:$0xff]  ;;  %v1725_v35 = vld [vmem:[#allocation8 + $0x9d8] sm:$0xff] }
 0x274   :  { %2358 = vmatprep.subr.mxu1 %v1791_v37  ;;  %2587 = vmatprep.subr.mxu0 %v1607_v38  ;;  %v1733_v36 = vld [vmem:[#allocation8 + $0xa18] sm:$0xff]  ;;  %v1724_v37 = vld [vmem:[#allocation8 + $0x9d0] sm:$0xff] }
 0x275   :  { %2359 = vmatpush2.msra.mxu1 %v1790_v39  ;;  %2588 = vmatpush1.msra.mxu0 %v1606_v40  ;;  %v1732_v38 = vld [vmem:[#allocation8 + $0xa10] sm:$0xff]  ;;  %v1719_v39 = vld [vmem:[#allocation8 + $0x9a8] sm:$0xff] }
 0x276   :  { %2360 = vmatprep.subr.mxu1 %v1785_v9  ;;  %2589 = vmatprep.subr.mxu0 %v1793_v41  ;;  %v1727_v40 = vld [vmem:[#allocation8 + $0x9e8] sm:$0xff]  ;;  %v1718_v9 = vld [vmem:[#allocation8 + $0x9a0] sm:$0xff] }
 0x277   :  { %2361 = vmatpush2.msra.mxu1 %v1784_v11  ;;  %2590 = vmatpush2.msra.mxu0 %v1792_v42  ;;  %v1726_v41 = vld [vmem:[#allocation8 + $0x9e0] sm:$0xff]  ;;  %v1713_v11 = vld [vmem:[#allocation8 + $0x978] sm:$0xff] }
 0x278   :  { %2362 = vmatprep.subr.mxu1 %v1779_v0  ;;  %2591 = vmatprep.subr.mxu0 %v1787_v43  ;;  %v1721_v42 = vld [vmem:[#allocation8 + $0x9b8] sm:$0xff]  ;;  %v1712_v0 = vld [vmem:[#allocation8 + $0x970] sm:$0xff] }
 0x279   :  { %2363 = vmatpush2.msra.mxu1 %v1778_v44  ;;  %2592 = vmatpush2.msra.mxu0 %v1786_v3  ;;  %v1720_v43 = vld [vmem:[#allocation8 + $0x9b0] sm:$0xff]  ;;  %v1707_v44 = vld [vmem:[#allocation8 + $0x948] sm:$0xff] }
 0x27a   :  { %2364 = vmatprep.subr.mxu1 %v1773_v56  ;;  %2593 = vmatprep.subr.mxu0 %v1781_v45  ;;  %v1715_v3 = vld [vmem:[#allocation8 + $0x988] sm:$0xff]  ;;  %v1706_v56 = vld [vmem:[#allocation8 + $0x940] sm:$0xff] }
 0x27b   :  { %2365 = vmatpush2.msra.mxu1 %v1772_v63  ;;  %2594 = vmatpush2.msra.mxu0 %v1780_v18  ;;  %v1714_v45 = vld [vmem:[#allocation8 + $0x980] sm:$0xff]  ;;  %v1701_v63 = vld [vmem:[#allocation8 + $0x918] sm:$0xff] }
 0x27c   :  { %2366 = vmatprep.subr.mxu1 %v1767_v47  ;;  %2595 = vmatprep.subr.mxu0 %v1775_v48  ;;  %v1709_v18 = vld [vmem:[#allocation8 + $0x958] sm:$0xff]  ;;  %v1700_v47 = vld [vmem:[#allocation8 + $0x910] sm:$0xff] }
 0x27d   :  { %2367 = vmatpush2.msra.mxu1 %v1766_v52  ;;  %2596 = vmatpush2.msra.mxu0 %v1774_v54  ;;  %v1708_v48 = vld [vmem:[#allocation8 + $0x950] sm:$0xff]  ;;  %v1505_v52 = vld [vmem:[#allocation8 + $0x2f8] sm:$0xff]  ;;  %v1703_v54 = vld [vmem:[#allocation8 + $0x928] sm:$0xff] }
 0x27e   :  { %2368 = vmatprep.subr.mxu1 %v1761_v53  ;;  %2597 = vmatprep.subr.mxu0 %v1769_v55  ;;  %v1504_v53 = vld [vmem:[#allocation8 + $0x2f0] sm:$0xff]  ;;  %v1702_v55 = vld [vmem:[#allocation8 + $0x920] sm:$0xff] }
 0x27f   :  { %2369 = vmatpush2.msra.mxu1 %v1760_v57  ;;  %2598 = vmatpush2.msra.mxu0 %v1768_v58  ;;  %v1499_v57 = vld [vmem:[#allocation8 + $0x2c8] sm:$0xff]  ;;  %v1498_v58 = vld [vmem:[#allocation8 + $0x2c0] sm:$0xff] }
 0x280   :  { %2370 = vmatprep.subr.mxu1 %v1755_v62  ;;  %2599 = vmatprep.subr.mxu0 %v1763_v1  ;;  %v1493_v62 = vld [vmem:[#allocation8 + $0x298] sm:$0xff]  ;;  %v1492_v1 = vld [vmem:[#allocation8 + $0x290] sm:$0xff] }
 0x281   :  { %2371 = vmatpush2.msra.mxu1 %v1754_v4  ;;  %2600 = vmatpush2.msra.mxu0 %v1762_v5  ;;  %v1487_v4 = vld [vmem:[#allocation8 + $0x268] sm:$0xff]  ;;  %v1486_v5 = vld [vmem:[#allocation8 + $0x260] sm:$0xff] }
 0x282   :  { %2372 = vmatprep.subr.mxu1 %v1749_v6  ;;  %2601 = vmatprep.subr.mxu0 %v1757_v12  ;;  %v1481_v6 = vld [vmem:[#allocation8 + $0x238] sm:$0xff]  ;;  %v1480_v12 = vld [vmem:[#allocation8 + $0x230] sm:$0xff] }
 0x283   :  { %2373 = vmatpush2.msra.mxu1 %v1748_v14  ;;  %2602 = vmatpush2.msra.mxu0 %v1756_v15  ;;  %v1475_v14 = vld [vmem:[#allocation8 + $0x208] sm:$0xff]  ;;  %v1469_v15 = vld [vmem:[#allocation8 + $0x1d8] sm:$0xff] }
 0x284   :  { %2374 = vmatprep.subr.mxu1 %v1743_v16  ;;  %2603 = vmatprep.subr.mxu0 %v1751_v17  ;;  %v1463_v16 = vld [vmem:[#allocation8 + $0x1a8] sm:$0xff]  ;;  %v1462_v17 = vld [vmem:[#allocation8 + $0x1a0] sm:$0xff] }
 0x285   :  { %2375 = vmatpush2.msra.mxu1 %v1742_v20  ;;  %2604 = vmatpush2.msra.mxu0 %v1750_v2  ;;  %v1457_v20 = vld [vmem:[#allocation8 + $0x178] sm:$0xff]  ;;  %v1451_v2 = vld [vmem:[#allocation8 + $0x148] sm:$0xff] }
 0x286   :  { %2376 = vmatprep.subr.mxu1 %v1737_v24  ;;  %2605 = vmatprep.subr.mxu0 %v1745_v27  ;;  %v1445_v24 = vld [vmem:[#allocation8 + $0x118] sm:$0xff]  ;;  %v1444_v27 = vld [vmem:[#allocation8 + $0x110] sm:$0xff] }
 0x287   :  { %2377 = vmatpush2.msra.mxu1 %v1736_v28  ;;  %2606 = vmatpush2.msra.mxu0 %v1744_v31  ;;  %v1439_v28 = vld [vmem:[#allocation8 + $0xe8] sm:$0xff]  ;;  %v1438_v31 = vld [vmem:[#allocation8 + $0xe0] sm:$0xff] }
 0x288   :  { %2378 = vmatprep.subr.mxu1 %v1731_v32  ;;  %2607 = vmatprep.subr.mxu0 %v1739_v33  ;;  %v1433_v32 = vld [vmem:[#allocation8 + $0xb8] sm:$0xff]  ;;  %v1432_v33 = vld [vmem:[#allocation8 + $0xb0] sm:$0xff] }
 0x289   :  { %2379 = vmatpush2.msra.mxu1 %v1730_v59  ;;  %2608 = vmatpush2.msra.mxu0 %v1738_v34  ;;  %v1427_v59 = vld [vmem:[#allocation8 + $0x88] sm:$0xff]  ;;  %v1426_v34 = vld [vmem:[#allocation8 + $0x80] sm:$0xff] }
 0x28a   :  { %2380 = vmatprep.subr.mxu1 %v1725_v35  ;;  %2609 = vmatprep.subr.mxu0 %v1733_v36  ;;  %v1421_v35 = vld [vmem:[#allocation8 + $0x58] sm:$0xff]  ;;  %v1420_v36 = vld [vmem:[#allocation8 + $0x50] sm:$0xff] }
 0x28b   :  { %2381 = vmatpush2.msra.mxu1 %v1724_v37  ;;  %2610 = vmatpush2.msra.mxu0 %v1732_v38  ;;  %v1415_v37 = vld [vmem:[#allocation8 + $0x28] sm:$0xff]  ;;  %v1414_v38 = vld [vmem:[#allocation8 + $0x20] sm:$0xff] }
 0x28c   :  { %2382 = vmatprep.subr.mxu1 %v1719_v39  ;;  %2611 = vmatprep.subr.mxu0 %v1727_v40  ;;  %v1601_v39 = vld [vmem:[#allocation8 + $0x5f8] sm:$0xff]  ;;  %v1600_v40 = vld [vmem:[#allocation8 + $0x5f0] sm:$0xff] }
 0x28d   :  { %2383 = vmatpush2.msra.mxu1 %v1718_v9  ;;  %2612 = vmatpush2.msra.mxu0 %v1726_v41  ;;  %v1595_v9 = vld [vmem:[#allocation8 + $0x5c8] sm:$0xff]  ;;  %v1594_v41 = vld [vmem:[#allocation8 + $0x5c0] sm:$0xff] }
 0x28e   :  { %2384 = vmatprep.subr.mxu1 %v1713_v11  ;;  %2613 = vmatprep.subr.mxu0 %v1721_v42  ;;  %v1589_v11 = vld [vmem:[#allocation8 + $0x598] sm:$0xff]  ;;  %v1588_v42 = vld [vmem:[#allocation8 + $0x590] sm:$0xff] }
 0x28f   :  { %2385 = vmatpush2.msra.mxu1 %v1712_v0  ;;  %2614 = vmatpush2.msra.mxu0 %v1720_v43  ;;  %v1583_v0 = vld [vmem:[#allocation8 + $0x568] sm:$0xff]  ;;  %v1582_v43 = vld [vmem:[#allocation8 + $0x560] sm:$0xff] }
 0x290   :  { %2386 = vmatprep.subr.mxu1 %v1707_v44  ;;  %2615 = vmatprep.subr.mxu0 %v1715_v3  ;;  %v1577_v44 = vld [vmem:[#allocation8 + $0x538] sm:$0xff]  ;;  %v1576_v3 = vld [vmem:[#allocation8 + $0x530] sm:$0xff] }
 0x291   :  { %2387 = vmatpush2.msra.mxu1 %v1706_v56  ;;  %2616 = vmatpush2.msra.mxu0 %v1714_v45  ;;  %v1571_v56 = vld [vmem:[#allocation8 + $0x508] sm:$0xff]  ;;  %v1570_v45 = vld [vmem:[#allocation8 + $0x500] sm:$0xff] }
 0x292   :  { %2388 = vmatprep.subr.mxu1 %v1701_v63  ;;  %2617 = vmatprep.subr.mxu0 %v1709_v18  ;;  %v1565_v63 = vld [vmem:[#allocation8 + $0x4d8] sm:$0xff]  ;;  %v1564_v18 = vld [vmem:[#allocation8 + $0x4d0] sm:$0xff] }
 0x293   :  { %2389 = vmatpush2.msra.mxu1 %v1700_v47  ;;  %2618 = vmatpush2.msra.mxu0 %v1708_v48  ;;  %v1559_v47 = vld [vmem:[#allocation8 + $0x4a8] sm:$0xff]  ;;  %v1558_v48 = vld [vmem:[#allocation8 + $0x4a0] sm:$0xff] }
 0x294   :  { %2391 = vmatmul.mubr.f32.vlgmr.msra.gmra.mxu1 %v3044_v21  ;;  %2480 = vmatprep.subr.mxu1 %v1505_v52  ;;  %v1553_v52 = vld [vmem:[#allocation8 + $0x478] sm:$0xff] }
 0x295   :  { %2619 = vmatprep.subr.mxu0 %v1703_v54  ;;  %2396 = vmatprep.mubr.f32.mxu1 %v3050_v13  ;;  %v1552_v54 = vld [vmem:[#allocation8 + $0x470] sm:$0xff] }
 0x296   :  { %2481 = vmatpush1.msra.mxu1 %v1504_v53  ;;  %2620 = vmatpush2.msra.mxu0 %v1702_v55  ;;  %v1547_v53 = vld [vmem:[#allocation8 + $0x448] sm:$0xff]  ;;  %v1546_v55 = vld [vmem:[#allocation8 + $0x440] sm:$0xff] }
 0x297   :  { %2482 = vmatprep.subr.mxu1 %v1499_v57  ;;  %2622 = vmatmul.mubr.f32.vlgmr.msra.gmra.mxu0 %v3044_v21  ;;  %v1474_v21 = vld [vmem:[#allocation8 + $0x200] sm:$0xff]  ;;  %v1541_v57 = vld [vmem:[#allocation8 + $0x418] sm:$0xff] }
 0x298   :  { %2483 = vmatpush1.msra.mxu1 %v1498_v58  ;;  %2627 = vmatprep.mubr.f32.mxu0 %v3050_v13  ;;  %v1468_v13 = vld [vmem:[#allocation8 + $0x1d0] sm:$0xff] }
 0x299   :  { %2397 = vmatmul.mubr.f32.gmra.mxu1 %v3048_v10  ;;  %2484 = vmatprep.subr.mxu1 %v1493_v62  ;;  %v1540_v58 = vld [vmem:[#allocation8 + $0x410] sm:$0xff]  ;;  %v1535_v62 = vld [vmem:[#allocation8 + $0x3e8] sm:$0xff] }
 0x29a   :  { %2485 = vmatpush1.msra.mxu1 %v1492_v1  ;;  %2544 = vmatprep.mubr.f32.mxu1 %v3020_v51  ;;  %v1456_v51 = vld [vmem:[#allocation8 + $0x170] sm:$0xff]  ;;  %v1534_v1 = vld [vmem:[#allocation8 + $0x3e0] sm:$0xff] }
 0x29b   :  { %2486 = vmatprep.subr.mxu1 %v1487_v4  ;;  %2628 = vmatmul.mubr.f32.gmra.mxu0 %v3048_v10  ;;  %v1450_v10 = vld [vmem:[#allocation8 + $0x140] sm:$0xff]  ;;  %v1529_v4 = vld [vmem:[#allocation8 + $0x3b8] sm:$0xff] }
 0x29c   :  { %2487 = vmatpush1.msra.mxu1 %v1486_v5  ;;  %v1528_v5 = vld [vmem:[#allocation8 + $0x3b0] sm:$0xff] }
 0x29d   :  { %2488 = vmatprep.subr.mxu1 %v1481_v6  ;;  %v1523_v6 = vld [vmem:[#allocation8 + $0x388] sm:$0xff] }
 0x29e   :  { %2489 = vmatpush1.msra.mxu1 %v1480_v12  ;;  %v1522_v12 = vld [vmem:[#allocation8 + $0x380] sm:$0xff] }
 0x29f   :  { %2490 = vmatprep.subr.mxu1 %v1475_v14  ;;  %v1517_v14 = vld [vmem:[#allocation8 + $0x358] sm:$0xff] }
 0x2a0   :  { %2491 = vmatpush1.msra.mxu1 %v1474_v21  ;;  %v1516_v21 = vld [vmem:[#allocation8 + $0x350] sm:$0xff] }
 0x2a1   :  { %2492 = vmatprep.subr.mxu1 %v1469_v15  ;;  %v1511_v15 = vld [vmem:[#allocation8 + $0x328] sm:$0xff] }
 0x2a2   :  { %2493 = vmatpush1.msra.mxu1 %v1468_v13  ;;  %v1510_v13 = vld [vmem:[#allocation8 + $0x320] sm:$0xff] }
 0x2a3   :  { %2494 = vmatprep.subr.mxu1 %v1463_v16  ;;  %v1889_v16 = vld [vmem:[#allocation8 + $0xef8] sm:$0xff] }
 0x2a4   :  { %2495 = vmatpush1.msra.mxu1 %v1462_v17  ;;  %v1888_v17 = vld [vmem:[#allocation8 + $0xef0] sm:$0xff] }
 0x2a5   :  { %2496 = vmatprep.subr.mxu1 %v1457_v20  ;;  %v1883_v20 = vld [vmem:[#allocation8 + $0xec8] sm:$0xff] }
 0x2a6   :  { %2497 = vmatpush1.msra.mxu1 %v1456_v51  ;;  %v1882_v51 = vld [vmem:[#allocation8 + $0xec0] sm:$0xff] }
 0x2a7   :  { %2498 = vmatprep.subr.mxu1 %v1451_v2  ;;  %v1877_v2 = vld [vmem:[#allocation8 + $0xe98] sm:$0xff] }
 0x2a8   :  { %2499 = vmatpush1.msra.mxu1 %v1450_v10  ;;  %v1876_v10 = vld [vmem:[#allocation8 + $0xe90] sm:$0xff] }
 0x2a9   :  { %2500 = vmatprep.subr.mxu1 %v1445_v24  ;;  %v1871_v24 = vld [vmem:[#allocation8 + $0xe68] sm:$0xff] }
 0x2aa   :  { %2501 = vmatpush1.msra.mxu1 %v1444_v27  ;;  %v1870_v27 = vld [vmem:[#allocation8 + $0xe60] sm:$0xff] }
 0x2ab   :  { %2502 = vmatprep.subr.mxu1 %v1439_v28  ;;  %v1865_v28 = vld [vmem:[#allocation8 + $0xe38] sm:$0xff] }
 0x2ac   :  { %2503 = vmatpush1.msra.mxu1 %v1438_v31  ;;  %v1859_v31 = vld [vmem:[#allocation8 + $0xe08] sm:$0xff] }
 0x2ad   :  { %2504 = vmatprep.subr.mxu1 %v1433_v32  ;;  %v1853_v32 = vld [vmem:[#allocation8 + $0xdd8] sm:$0xff] }
 0x2ae   :  { %2505 = vmatpush1.msra.mxu1 %v1432_v33  ;;  %v1852_v33 = vld [vmem:[#allocation8 + $0xdd0] sm:$0xff] }
 0x2af   :  { %2506 = vmatprep.subr.mxu1 %v1427_v59  ;;  %v1847_v59 = vld [vmem:[#allocation8 + $0xda8] sm:$0xff] }
 0x2b0   :  { %2507 = vmatpush1.msra.mxu1 %v1426_v34  ;;  %v1841_v34 = vld [vmem:[#allocation8 + $0xd78] sm:$0xff] }
 0x2b1   :  { %2508 = vmatprep.subr.mxu1 %v1421_v35  ;;  %v1840_v35 = vld [vmem:[#allocation8 + $0xd70] sm:$0xff] }
 0x2b2   :  { %2509 = vmatpush1.msra.mxu1 %v1420_v36  ;;  %v1834_v36 = vld [vmem:[#allocation8 + $0xd40] sm:$0xff] }
 0x2b3   :  { %2510 = vmatprep.subr.mxu1 %v1415_v37  ;;  %v1829_v37 = vld [vmem:[#allocation8 + $0xd18] sm:$0xff] }
 0x2b4   :  { %2511 = vmatpush1.msra.mxu1 %v1414_v38  ;;  %v1828_v38 = vld [vmem:[#allocation8 + $0xd10] sm:$0xff] }
 0x2b5   :  { %2512 = vmatprep.subr.mxu1 %v1601_v39  ;;  %v1823_v39 = vld [vmem:[#allocation8 + $0xce8] sm:$0xff] }
 0x2b6   :  { %2513 = vmatpush2.msra.mxu1 %v1600_v40  ;;  %v1822_v40 = vld [vmem:[#allocation8 + $0xce0] sm:$0xff] }
 0x2b7   :  { %2514 = vmatprep.subr.mxu1 %v1595_v9  ;;  %v1817_v9 = vld [vmem:[#allocation8 + $0xcb8] sm:$0xff] }
 0x2b8   :  { %2515 = vmatpush2.msra.mxu1 %v1594_v41  ;;  %v1816_v41 = vld [vmem:[#allocation8 + $0xcb0] sm:$0xff] }
 0x2b9   :  { %2516 = vmatprep.subr.mxu1 %v1589_v11  ;;  %v1811_v11 = vld [vmem:[#allocation8 + $0xc88] sm:$0xff] }
 0x2ba   :  { %2517 = vmatpush2.msra.mxu1 %v1588_v42  ;;  %v1810_v42 = vld [vmem:[#allocation8 + $0xc80] sm:$0xff] }
 0x2bb   :  { %2518 = vmatprep.subr.mxu1 %v1583_v0  ;;  %v1805_v0 = vld [vmem:[#allocation8 + $0xc58] sm:$0xff] }
 0x2bc   :  { %2519 = vmatpush2.msra.mxu1 %v1582_v43  ;;  %v1804_v43 = vld [vmem:[#allocation8 + $0xc50] sm:$0xff] }
 0x2bd   :  { %2520 = vmatprep.subr.mxu1 %v1577_v44  ;;  %v1799_v44 = vld [vmem:[#allocation8 + $0xc28] sm:$0xff] }
 0x2be   :  { %2521 = vmatpush2.msra.mxu1 %v1576_v3  ;;  %v1798_v3 = vld [vmem:[#allocation8 + $0xc20] sm:$0xff] }
 0x2bf   :  { %2522 = vmatprep.subr.mxu1 %v1571_v56  ;;  %v1985_v56 = vld [vmem:[#allocation8 + $0x11f8] sm:$0xff] }
 0x2c0   :  { %2523 = vmatpush2.msra.mxu1 %v1570_v45  ;;  %v1984_v45 = vld [vmem:[#allocation8 + $0x11f0] sm:$0xff] }
 0x2c1   :  { %2524 = vmatprep.subr.mxu1 %v1565_v63  ;;  %v1979_v63 = vld [vmem:[#allocation8 + $0x11c8] sm:$0xff] }
 0x2c2   :  { %2525 = vmatpush2.msra.mxu1 %v1564_v18  ;;  %v1978_v18 = vld [vmem:[#allocation8 + $0x11c0] sm:$0xff] }
 0x2c3   :  { %2526 = vmatprep.subr.mxu1 %v1559_v47  ;;  %v1973_v47 = vld [vmem:[#allocation8 + $0x1198] sm:$0xff] }
 0x2c4   :  { %2527 = vmatpush2.msra.mxu1 %v1558_v48  ;;  %v1972_v48 = vld [vmem:[#allocation8 + $0x1190] sm:$0xff] }
 0x2c5   :  { %2528 = vmatprep.subr.mxu1 %v1553_v52  ;;  %v1967_v52 = vld [vmem:[#allocation8 + $0x1168] sm:$0xff] }
 0x2c6   :  { %2529 = vmatpush2.msra.mxu1 %v1552_v54  ;;  %v1966_v54 = vld [vmem:[#allocation8 + $0x1160] sm:$0xff] }
 0x2c7   :  { %2530 = vmatprep.subr.mxu1 %v1547_v53  ;;  %v1961_v53 = vld [vmem:[#allocation8 + $0x1138] sm:$0xff] }
 0x2c8   :  { %2531 = vmatpush2.msra.mxu1 %v1546_v55  ;;  %v1960_v55 = vld [vmem:[#allocation8 + $0x1130] sm:$0xff] }
 0x2c9   :  { %2532 = vmatprep.subr.mxu1 %v1541_v57  ;;  %v1955_v57 = vld [vmem:[#allocation8 + $0x1108] sm:$0xff] }
 0x2ca   :  { %2533 = vmatpush2.msra.mxu1 %v1540_v58  ;;  %v1954_v58 = vld [vmem:[#allocation8 + $0x1100] sm:$0xff] }
 0x2cb   :  { %2534 = vmatprep.subr.mxu1 %v1535_v62  ;;  %v1949_v62 = vld [vmem:[#allocation8 + $0x10d8] sm:$0xff] }
 0x2cc   :  { %2535 = vmatpush2.msra.mxu1 %v1534_v1  ;;  %v1948_v1 = vld [vmem:[#allocation8 + $0x10d0] sm:$0xff] }
 0x2cd   :  { %2536 = vmatprep.subr.mxu1 %v1529_v4  ;;  %v1943_v4 = vld [vmem:[#allocation8 + $0x10a8] sm:$0xff] }
 0x2ce   :  { %2537 = vmatpush2.msra.mxu1 %v1528_v5  ;;  %v1942_v5 = vld [vmem:[#allocation8 + $0x10a0] sm:$0xff] }
 0x2cf   :  { %2538 = vmatprep.subr.mxu1 %v1523_v6  ;;  %v1937_v6 = vld [vmem:[#allocation8 + $0x1078] sm:$0xff] }
 0x2d0   :  { %2539 = vmatpush2.msra.mxu1 %v1522_v12  ;;  %v1936_v12 = vld [vmem:[#allocation8 + $0x1070] sm:$0xff] }
 0x2d1   :  { %2540 = vmatprep.subr.mxu1 %v1517_v14  ;;  %v2084_v14 = vpop.f32.mrf.mxu1 }
 0x2d2   :  { %2541 = vmatpush2.msra.mxu1 %v1516_v21  ;;  %v1931_v21 = vld [vmem:[#allocation8 + $0x1048] sm:$0xff] }
 0x2d3   :  { %2542 = vmatprep.subr.mxu1 %v1511_v15  ;;  %v1930_v15 = vld [vmem:[#allocation8 + $0x1040] sm:$0xff] }
 0x2d4   :  { %2543 = vmatpush2.msra.mxu1 %v1510_v13  ;;  %v1925_v13 = vld [vmem:[#allocation8 + $0x1018] sm:$0xff] }
 0x2d5   :  { %2545 = vmatmul.mubr.f32.vlgmr.msra.gmra.mxu1 %v3027_v22  ;;  %2634 = vmatprep.subr.mxu1 %v1889_v16  ;;  %v1864_v22 = vld [vmem:[#allocation8 + $0xe30] sm:$0xff] }
 0x2d6   :  { %2550 = vmatprep.mubr.f32.mxu1 %v3025_v19  ;;  %2635 = vmatpush1.msra.mxu1 %v1888_v17  ;;  %v1858_v19 = vld [vmem:[#allocation8 + $0xe00] sm:$0xff]  ;;  %v1924_v16 = vld [vmem:[#allocation8 + $0x1010] sm:$0xff] }
 0x2d7   :  { %2636 = vmatprep.subr.mxu1 %v1883_v20  ;;  %v3093_v17 = vld [vmem:[#allocation10] sm:$0x3f]  ;;  %v2086_v20 = vpop.f32.mrf.mxu1 }
 0x2d8   :  { %2637 = vmatpush1.msra.mxu1 %v1882_v51  ;;  %v1919_v51 = vld [vmem:[#allocation8 + $0xfe8] sm:$0xff] }
 0x2d9   :  { %2551 = vmatmul.mubr.f32.gmra.mxu1 %v3031_v30  ;;  %2638 = vmatprep.subr.mxu1 %v1877_v2  ;;  %v1846_v30 = vld [vmem:[#allocation8 + $0xda0] sm:$0xff]  ;;  %v2161_v2 = vpop.f32.mrf.mxu0 }
 0x2da   :  { %2639 = vmatpush1.msra.mxu1 %v1876_v10  ;;  %2698 = vmatprep.mubr.f32.mxu1 %v3064_v7  ;;  %v1835_v7 = vld [vmem:[#allocation8 + $0xd48] sm:$0xff]  ;;  %v1918_v10 = vld [vmem:[#allocation8 + $0xfe0] sm:$0xff] }
 0x2db   :  { %2640 = vmatprep.subr.mxu1 %v1871_v24  ;;  %v1913_v24 = vld [vmem:[#allocation8 + $0xfb8] sm:$0xff] }
 0x2dc   :  { %2641 = vmatpush1.msra.mxu1 %v1870_v27  ;;  %v1991_v27 = vrot.slane %v3093_v17, %v677_v25  ;;  %v1895_v25 = vld [vmem:[#allocation8 + $0xf28] sm:$0xff] }
 0x2dd   :  { %2642 = vmatprep.subr.mxu1 %v1865_v28  ;;  %v1912_v28 = vld [vmem:[#allocation8 + $0xfb0] sm:$0xff] }
 0x2de   :  { %2643 = vmatpush1.msra.mxu1 %v1864_v22  ;;  %v2090_v22 = vpop.f32.mrf.mxu1 }
 0x2df   :  { %2644 = vmatprep.subr.mxu1 %v1859_v31  ;;  %v1907_v31 = vld [vmem:[#allocation8 + $0xf88] sm:$0xff] }
 0x2e0   :  { %2645 = vmatpush1.msra.mxu1 %v1858_v19  ;;  %v1995_v19 = vrot.slane %v3093_v17, %v681_v61 }
 0x2e1   :  { %2646 = vmatprep.subr.mxu1 %v1853_v32  ;;  %v2163_v32 = vpop.f32.mrf.mxu0 }
 0x2e2   :  { %2647 = vmatpush1.msra.mxu1 %v1852_v33  ;;  %v1906_v33 = vld [vmem:[#allocation8 + $0xf80] sm:$0xff] }
 0x2e3   :  { %2648 = vmatprep.subr.mxu1 %v1847_v59  ;;  %v1901_v59 = vld [vmem:[#allocation8 + $0xf58] sm:$0xff] }
 0x2e4   :  { %2649 = vmatpush1.msra.mxu1 %v1846_v30  ;;  %v2085_v30 = vadd.f32 %v2084_v14, %v1991_v27 }
 0x2e5   :  { %2650 = vmatprep.subr.mxu1 %v1841_v34  ;;  %v1900_v34 = vld [vmem:[#allocation8 + $0xf50] sm:$0xff] }
 0x2e6   :  { %2651 = vmatpush1.msra.mxu1 %v1840_v35  ;;  %v2092_v35 = vpop.f32.mrf.mxu1 }
 0x2e7   :  { %2652 = vmatprep.subr.mxu1 %v1835_v7  ;;  %v2087_v7 = vadd.f32 %v2086_v20, %v1995_v19 }
 0x2e8   :  { %2653 = vmatpush1.msra.mxu1 %v1834_v36  ;;  %v2162_v36 = vadd.f32 %v2161_v2, %v2085_v30 }
 0x2e9   :  { %2654 = vmatprep.subr.mxu1 %v1829_v37  ;;  %v2167_v37 = vpop.f32.mrf.mxu0 }
 0x2ea   :  { %2655 = vmatpush1.msra.mxu1 %v1828_v38  ;;  %v1894_v38 = vld [vmem:[#allocation8 + $0xf20] sm:$0xff] }
 0x2eb   :  { %2656 = vmatprep.subr.mxu1 %v1823_v39 }
 0x2ec   :  { %2657 = vmatpush1.msra.mxu1 %v1822_v40  ;;  %v2164_v40 = vadd.f32 %v2163_v32, %v2087_v7 }
 0x2ed   :  { %2658 = vmatprep.subr.mxu1 %v1817_v9  ;;  %v2091_v9 = vadd.f32 %v2090_v22, %v1991_v27  ;;  %v2011_v27 = vrot.slane %v3093_v17, %v697_v60 }
 0x2ee   :  { %2659 = vmatpush1.msra.mxu1 %v1816_v41 }
 0x2ef   :  { %2660 = vmatprep.subr.mxu1 %v1811_v11  ;;  %v2169_v11 = vpop.f32.mrf.mxu0 }
 0x2f0   :  { %2661 = vmatpush1.msra.mxu1 %v1810_v42 }
 0x2f1   :  { %2662 = vmatprep.subr.mxu1 %v1805_v0  ;;  %v2093_v0 = vadd.f32 %v2092_v35, %v1995_v19 }
 0x2f2   :  { %2663 = vmatpush1.msra.mxu1 %v1804_v43  ;;  %v2168_v43 = vadd.f32 %v2167_v37, %v2091_v9 }
 0x2f3   :  { %2664 = vmatprep.subr.mxu1 %v1799_v44 }
 0x2f4   :  { %2665 = vmatpush1.msra.mxu1 %v1798_v3  ;;  %v2170_v3 = vadd.f32 %v2169_v11, %v2093_v0 }
 0x2f5   :  { %2666 = vmatprep.subr.mxu1 %v1985_v56 }
 0x2f6   :  { %2667 = vmatpush2.msra.mxu1 %v1984_v45 }
 0x2f7   :  { %2668 = vmatprep.subr.mxu1 %v1979_v63 }
 0x2f8   :  { %2669 = vmatpush2.msra.mxu1 %v1978_v18  ;;  %v2315_v18 = vpop.f32.mrf.mxu0 }
 0x2f9   :  { %2670 = vmatprep.subr.mxu1 %v1973_v47 }
 0x2fa   :  { %2671 = vmatpush2.msra.mxu1 %v1972_v48  ;;  %v2317_v47 = vpop.f32.mrf.mxu0 }
 0x2fb   :  { %2672 = vmatprep.subr.mxu1 %v1967_v52 }
 0x2fc   :  { %2673 = vmatpush2.msra.mxu1 %v1966_v54  ;;  %v2321_v48 = vpop.f32.mrf.mxu0 }
 0x2fd   :  { %2674 = vmatprep.subr.mxu1 %v1961_v53 }
 0x2fe   :  { %2675 = vmatpush2.msra.mxu1 %v1960_v55  ;;  %v2323_v52 = vpop.f32.mrf.mxu0 }
 0x2ff   :  { %2676 = vmatprep.subr.mxu1 %v1955_v57 }
 0x300   :  { %2677 = vmatpush2.msra.mxu1 %v1954_v58 }
 0x301   :  { %2678 = vmatprep.subr.mxu1 %v1949_v62 }
 0x302   :  { %2679 = vmatpush2.msra.mxu1 %v1948_v1 }
 0x303   :  { %2680 = vmatprep.subr.mxu1 %v1943_v4 }
 0x304   :  { %2681 = vmatpush2.msra.mxu1 %v1942_v5 }
 0x305   :  { %2682 = vmatprep.subr.mxu1 %v1937_v6 }
 0x306   :  { %2683 = vmatpush2.msra.mxu1 %v1936_v12 }
 0x307   :  { %2684 = vmatprep.subr.mxu1 %v1931_v21 }
 0x308   :  { %2685 = vmatpush2.msra.mxu1 %v1930_v15 }
 0x309   :  { %2686 = vmatprep.subr.mxu1 %v1925_v13 }
 0x30a   :  { %2687 = vmatpush2.msra.mxu1 %v1924_v16 }
 0x30b   :  { %2688 = vmatprep.subr.mxu1 %v1919_v51 }
 0x30c   :  { %2689 = vmatpush2.msra.mxu1 %v1918_v10  ;;  %v2007_v10 = vrot.slane %v3093_v17, %v693_v23 }
 0x30d   :  { %2690 = vmatprep.subr.mxu1 %v1913_v24 }
 0x30e   :  { %2691 = vmatpush2.msra.mxu1 %v1912_v28 }
 0x30f   :  { %2692 = vmatprep.subr.mxu1 %v1907_v31 }
 0x310   :  { %2693 = vmatpush2.msra.mxu1 %v1906_v33 }
 0x311   :  { %2694 = vmatprep.subr.mxu1 %v1901_v59 }
 0x312   :  { %2695 = vmatpush2.msra.mxu1 %v1900_v34  ;;  %v2238_v39 = vpop.f32.mrf.mxu1  ;;  %v2469_v54 = vpop.f32.mrf.mxu0 }
 0x313   :  { %2696 = vmatprep.subr.mxu1 %v1895_v25  ;;  %v2239_v61 = vadd.f32 %v2238_v39, %v2162_v36 }
 0x314   :  { %2697 = vmatpush2.msra.mxu1 %v1894_v38  ;;  %v2240_v41 = vpop.f32.mrf.mxu1  ;;  %v2471_v57 = vpop.f32.mrf.mxu0 }
 0x315   :  { %2699 = vmatmul.mubr.f32.vlgmr.msra.gmra.mxu1 %v3066_v8  ;;  %2711 = vst [vmem:[#allocation11] sm:$0xff] %v2239_v61  ;;  %v2241_v42 = vadd.f32 %v2240_v41, %v2164_v40  ;;  %v1999_v8 = vrot.slane %v3093_v17, %v685_v46 }
 0x316   :  { %2704 = vmatprep.mubr.f32.mxu1 %v3072_v26  ;;  %v2003_v26 = vrot.slane %v3093_v17, %v689_v50 }
 0x317   :  { %2712 = vst [vmem:[#allocation11 + $0x8] sm:$0xff] %v2241_v42  ;;  %v2244_v44 = vpop.f32.mrf.mxu1  ;;  %v2316_v53 = vadd.f32 %v2315_v18, %v1999_v8  ;;  %v2322_v5 = vadd.f32 %v2321_v48, %v1999_v8 }
 0x318   :  { %v2245_v56 = vadd.f32 %v2244_v44, %v2168_v43  ;;  %v2324_v46 = vadd.f32 %v2323_v52, %v2003_v26 }
 0x319   :  { %2705 = vmatmul.mubr.f32.gmra.mxu1 %v3074_v29  ;;  %v2246_v45 = vpop.f32.mrf.mxu1  ;;  %v2318_v29 = vadd.f32 %v2317_v47, %v2003_v26  ;;  %v2475_v6 = vpop.f32.mrf.mxu0 }
 0x31a   :  { %2717 = vst [vmem:[#allocation11 + $0x30] sm:$0xff] %v2245_v56  ;;  %v2247_v63 = vadd.f32 %v2246_v45, %v2170_v3 }
 0x31b   :  { %v2477_v16 = vpop.f32.mrf.mxu0 }
 0x31c   :  { %2718 = vst [vmem:[#allocation11 + $0x38] sm:$0xff] %v2247_v63 }
 0x354   :  { %v2392_v55 = vpop.f32.mrf.mxu1 }
 0x355   :  { %v2393_v58 = vadd.f32 %v2392_v55, %v2316_v53 }
 0x356   :  { %v2394_v62 = vpop.f32.mrf.mxu1 }
 0x357   :  { %v2470_v1 = vadd.f32 %v2469_v54, %v2393_v58  ;;  %v2395_v4 = vadd.f32 %v2394_v62, %v2318_v29  ;;  %v2623_v24 = vpop.f32.mrf.mxu0 }
 0x359   :  { %2713 = vst [vmem:[#allocation11 + $0x10] sm:$0xff] %v2470_v1  ;;  %v2472_v12 = vadd.f32 %v2471_v57, %v2395_v4  ;;  %v2398_v14 = vpop.f32.mrf.mxu1  ;;  %v2625_v31 = vpop.f32.mrf.mxu0 }
 0x35a   :  { %v2399_v21 = vadd.f32 %v2398_v14, %v2322_v5 }
 0x35b   :  { %2714 = vst [vmem:[#allocation11 + $0x18] sm:$0xff] %v2472_v12  ;;  %v2400_v15 = vpop.f32.mrf.mxu1  ;;  %v2629_v30 = vpop.f32.mrf.mxu0 }
 0x35c   :  { %v2476_v13 = vadd.f32 %v2475_v6, %v2399_v21  ;;  %v2401_v50 = vadd.f32 %v2400_v15, %v2324_v46 }
 0x35d   :  { %v2631_v38 = vpop.f32.mrf.mxu0 }
 0x35e   :  { %2719 = vst [vmem:[#allocation11 + $0x40] sm:$0xff] %v2476_v13  ;;  %v2478_v20 = vadd.f32 %v2477_v16, %v2401_v50 }
 0x360   :  { %2720 = vst [vmem:[#allocation11 + $0x48] sm:$0xff] %v2478_v20 }
 0x395   :  { %v2546_v51 = vpop.f32.mrf.mxu1 }
 0x396   :  { %v2547_v22 = vadd.f32 %v2546_v51, %v2007_v10 }
 0x397   :  { %v2548_v2 = vpop.f32.mrf.mxu1 }
 0x398   :  { %v2549_v19 = vadd.f32 %v2548_v2, %v2011_v27  ;;  %v2624_v59 = vadd.f32 %v2623_v24, %v2547_v22 }
 0x399   :  { %v2552_v28 = vpop.f32.mrf.mxu1 }
 0x39a   :  { %v2553_v33 = vadd.f32 %v2552_v28, %v2007_v10  ;;  %v2626_v7 = vadd.f32 %v2625_v31, %v2549_v19 }
 0x39b   :  { %v2554_v32 = vpop.f32.mrf.mxu1 }
 0x39c   :  { %v2555_v35 = vadd.f32 %v2554_v32, %v2011_v27  ;;  %v2630_v37 = vadd.f32 %v2629_v30, %v2553_v33 }
 0x39e   :  { %v2632_v17 = vadd.f32 %v2631_v38, %v2555_v35 }
 0x3d5   :  { %v2700_v34 = vpop.f32.mrf.mxu1 }
 0x3d6   :  { %v2701_v25 = vadd.f32 %v2700_v34, %v2624_v59 }
 0x3d7   :  { %v2702_v36 = vpop.f32.mrf.mxu1 }
 0x3d8   :  { %2715 = vst [vmem:[#allocation11 + $0x20] sm:$0xff] %v2701_v25  ;;  %v2703_v23 = vadd.f32 %v2702_v36, %v2626_v7 }
 0x3d9   :  { %v2706_v49 = vpop.f32.mrf.mxu1 }
 0x3da   :  { %2716 = vst [vmem:[#allocation11 + $0x28] sm:$0xff] %v2703_v23  ;;  %v2707_v60 = vadd.f32 %v2706_v49, %v2630_v37 }
 0x3db   :  { %v2708_v39 = vpop.f32.mrf.mxu1 }
 0x3dc   :  { %2721 = vst [vmem:[#allocation11 + $0x50] sm:$0xff] %v2707_v60  ;;  %v2709_v40 = vadd.f32 %v2708_v39, %v2632_v17 }
 0x3de   :  { %2722 = vst [vmem:[#allocation11 + $0x58] sm:$0xff] %v2709_v40 }
 0x3df   :  { %2874 = shalt.err (!%p2871_p1)
}
 0x3e0   :  { %2734 = dma.vmem_to_hbm [thread:$0]  %s2729_s4, 1536, %s3127_s5, [#allocation4], %s2893_s23, %s2893_s23, %s2894_s24  }
 0x3e1   :  { %2889 = dma.done.wait [#allocation4], 1536  }
 0x3e2   :  { %2890 = vsyncadd [#allocation4], 4294965760 }
 0x3e3   :  { %2738 = vsyncpa [#allocation3], 1 }
 0x3e4   :  { %2739 = vsyncpa [#allocation6], 1 }
 0x3e5   :  { %2740 = vsyncpa [#allocation9], 1 }
 0x3e6   :  { %2741 = vsyncpa [#allocation4], 1 }

// kernel: tpu_custom_call.1
= control target key start
LH: loop header
LB: loop body
LE: loop exit
PB: predicated region body
PF: predicated region fallthrough
CT: control target
= control target key end

     0   :  { %10 = vsyncpa [#allocation3], 0  ;;  %s3122_s0 = inlined_call_operand.hbm [shape: f32[16,768], index: 0, kind: input, shape index: {}]   ;;  %s3123_s1 = inlined_call_operand.hbm [shape: f32[768,768], index: 1, kind: input, shape index: {}]   ;;  %s3124_s2 = inlined_call_operand.hbm [shape: f32[1,768], index: 2, kind: input, shape index: {}]   ;;  %s3125_s3 = inlined_call_operand.hbm [shape: f32[768,768], index: 3, kind: input, shape index: {}]   ;;  %s3126_s4 = inlined_call_operand.hbm [shape: f32[1,768], index: 4, kind: input, shape index: {}]   ;;  %s3127_s5 = inlined_call_operand.hbm [shape: f32[16,768], index: 5, kind: output, shape index: {}]  }
   0x1   :  { %11 = vsyncpa [#allocation6], 0 }
   0x2   :  { %12 = vsyncpa [#allocation9], 0 }
   0x3   :  { %13 = vsyncpa [#allocation4], 0  ;;  %s2891_s18 = smov [#allocation5]   ;;  %s2892_s20 = smov [#allocation8]  }
   0x4   :  { %s31_s19 = sshll.u32 %s2891_s18, 4  ;;  %s53_s21 = sshll.u32 %s2892_s20, 4  ;;  %s32_s19 = int_to_ptr.vmem [resolvable:$true] %s31_s19  ;;  %s54_s21 = int_to_ptr.vmem [resolvable:$true] %s53_s21 }
   0x5   :  { %s2771_s22 = scalar_lea.vmem %s32_s19, 73728  ;;  %p2776_p1 = scmp.lt.s32.totalorder %s32_s19, %s32_s19 }
   0x6   :  { %p2772_p0 = scmp.ne.s32.totalorder %s32_s19, %s2771_s22  ;;  %p2777_p2 = scmp.lt.s32.totalorder %s2771_s22, %s2771_s22 }
   0x8   :  { %p2778_p3 = por %p2777_p2, %p2776_p1 }
   0xa   :  { %p2779_p4 = pnand %p2778_p3, %p2772_p0 }
   0xc   :  { %2782 = shalt.err (!%p2779_p4)
}
   0xd   :  { %s2893_s23 = smov 768   ;;  %s2894_s24 = smov 48  }
   0xe   :  { %37 = dma.hbm_to_vmem [thread:$0]  %s3123_s1, 73728, %s32_s19, [#allocation6], %s2893_s23, %s2893_s23, %s2894_s24  }
   0xf   :  { %s2791_s27 = scalar_lea.vmem %s54_s21, 73728  ;;  %p2796_p6 = scmp.lt.s32.totalorder %s54_s21, %s54_s21 }
  0x10   :  { %p2792_p5 = scmp.ne.s32.totalorder %s54_s21, %s2791_s27  ;;  %p2797_p7 = scmp.lt.s32.totalorder %s2791_s27, %s2791_s27 }
  0x12   :  { %p2798_p8 = por %p2797_p7, %p2796_p6 }
  0x14   :  { %p2799_p9 = pnand %p2798_p8, %p2792_p5 }
  0x16   :  { %2802 = shalt.err (!%p2799_p9)
}
  0x17   :  { %59 = dma.hbm_to_vmem [thread:$0]  %s3125_s3, 73728, %s54_s21, [#allocation9], %s2893_s23, %s2893_s23, %s2894_s24  }
  0x18   :  { %s2895_s30 = smov [#allocation2]   ;;  %s2896_s7 = smov [#allocation7]  }
  0x19   :  { %s19_s6 = sshll.u32 %s2895_s30, 4  ;;  %s44_s8 = sshll.u32 %s2896_s7, 4  ;;  %s20_s6 = int_to_ptr.vmem [resolvable:$true] %s19_s6  ;;  %s45_s8 = int_to_ptr.vmem [resolvable:$true] %s44_s8 }
  0x1a   :  { %s2811_s1 = scalar_lea.vmem %s20_s6, 1536  ;;  %p2816_p11 = scmp.lt.s32.totalorder %s20_s6, %s20_s6 }
  0x1b   :  { %p2812_p10 = scmp.ne.s32.totalorder %s20_s6, %s2811_s1  ;;  %p2817_p12 = scmp.lt.s32.totalorder %s2811_s1, %s2811_s1 }
  0x1d   :  { %p2818_p13 = por %p2817_p12, %p2816_p11 }
  0x1f   :  { %p2819_p0 = pnand %p2818_p13, %p2812_p10 }
  0x21   :  { %2822 = shalt.err (!%p2819_p0)
}
  0x22   :  { %25 = dma.hbm_to_vmem [thread:$0]  %s3122_s0, 1536, %s20_s6, [#allocation3], %s2893_s23, %s2893_s23, %s2894_s24  }
  0x23   :  { %s2831_s3 = scalar_lea.vmem %s45_s8, 96  ;;  %p2836_p2 = scmp.lt.s32.totalorder %s45_s8, %s45_s8 }
  0x24   :  { %p2832_p1 = scmp.ne.s32.totalorder %s45_s8, %s2831_s3  ;;  %p2837_p3 = scmp.lt.s32.totalorder %s2831_s3, %s2831_s3 }
  0x26   :  { %p2838_p4 = por %p2837_p3, %p2836_p2 }
  0x28   :  { %p2839_p5 = pnand %p2838_p4, %p2832_p1 }
  0x2a   :  { %2842 = shalt.err (!%p2839_p5)
}
  0x2b   :  { %47 = dma.hbm_to_vmem [thread:$0]  %s3124_s2, 96, %s45_s8, [#allocation6]  }
  0x2c   :  { %s2897_s13 = smov [#allocation10]  }
  0x2d   :  { %s66_s14 = sshll.u32 %s2897_s13, 4  ;;  %s67_s14 = int_to_ptr.vmem [resolvable:$true] %s66_s14 }
  0x2e   :  { %s2851_s15 = scalar_lea.vmem %s67_s14, 96  ;;  %p2856_p7 = scmp.lt.s32.totalorder %s67_s14, %s67_s14 }
  0x2f   :  { %p2852_p6 = scmp.ne.s32.totalorder %s67_s14, %s2851_s15  ;;  %p2857_p8 = scmp.lt.s32.totalorder %s2851_s15, %s2851_s15 }
  0x31   :  { %p2858_p9 = por %p2857_p8, %p2856_p7 }
  0x33   :  { %p2859_p10 = pnand %p2858_p9, %p2852_p6 }
  0x35   :  { %2862 = shalt.err (!%p2859_p10)
}
  0x36   :  { %69 = dma.hbm_to_vmem [thread:$0]  %s3126_s4, 96, %s67_s14, [#allocation9]  }
  0x37   :  { %2883 = dma.done.wait [#allocation3], 1536  }
  0x38   :  { %2884 = vsyncadd [#allocation3], 4294965760 }
  0x39   :  { %2885 = dma.done.wait [#allocation6], 73824  }
  0x3a   :  { %2886 = vsyncadd [#allocation6], 4294893472 }
  0x3b   :  { %2887 = dma.done.wait [#allocation9], 73824  }
  0x3c   :  { %2888 = vsyncadd [#allocation9], 4294893472  ;;  %v188_v0 = vld [vmem:[#allocation5 + $0x2d8] sm:$0xff]  ;;  %v187_v1 = vld [vmem:[#allocation5 + $0x2d0] sm:$0xff]  ;;  %s2898_s2 = smov [#allocation11]  }
  0x3d   :  { %v182_v2 = vld [vmem:[#allocation5 + $0x2a8] sm:$0xff]  ;;  %705 = vmatprep.subr.mxu0 %v188_v0  ;;  %v380_v3 = vld [vmem:[#allocation5 + $0x8d8] sm:$0xff]  ;;  %v181_v4 = vld [vmem:[#allocation5 + $0x2a0] sm:$0xff]  ;;  %s2728_s4 = sshll.u32 %s2898_s2, 4  ;;  %s2729_s4 = int_to_ptr.vmem [resolvable:$true] %s2728_s4 }
  0x3e   :  { %v379_v5 = vld [vmem:[#allocation5 + $0x8d0] sm:$0xff]  ;;  %706 = vmatpush1.msra.mxu0 %v187_v1  ;;  %782 = vmatprep.subr.mxu1 %v380_v3  ;;  %v176_v6 = vld [vmem:[#allocation5 + $0x278] sm:$0xff]  ;;  %v374_v7 = vld [vmem:[#allocation5 + $0x8a8] sm:$0xff]  ;;  %s2863_s17 = scalar_lea.vmem %s2729_s4, 1536  ;;  %p2868_p12 = scmp.lt.s32.totalorder %s2729_s4, %s2729_s4 }
  0x3f   :  { %707 = vmatprep.subr.mxu0 %v182_v2  ;;  %783 = vmatpush1.msra.mxu1 %v379_v5  ;;  %v175_v8 = vld [vmem:[#allocation5 + $0x270] sm:$0xff]  ;;  %v373_v9 = vld [vmem:[#allocation5 + $0x8a0] sm:$0xff]  ;;  %v368_v10 = vld [vmem:[#allocation5 + $0x878] sm:$0xff]  ;;  %p2864_p11 = scmp.ne.s32.totalorder %s2729_s4, %s2863_s17  ;;  %p2869_p13 = scmp.lt.s32.totalorder %s2863_s17, %s2863_s17 }
  0x40   :  { %708 = vmatpush1.msra.mxu0 %v181_v4  ;;  %784 = vmatprep.subr.mxu1 %v374_v7  ;;  %v170_v11 = vld [vmem:[#allocation5 + $0x248] sm:$0xff]  ;;  %v367_v12 = vld [vmem:[#allocation5 + $0x870] sm:$0xff]  ;;  %v169_v13 = vld [vmem:[#allocation5 + $0x240] sm:$0xff] }
  0x41   :  { %709 = vmatprep.subr.mxu0 %v176_v6  ;;  %785 = vmatpush1.msra.mxu1 %v373_v9  ;;  %v362_v14 = vld [vmem:[#allocation5 + $0x848] sm:$0xff]  ;;  %v164_v15 = vld [vmem:[#allocation5 + $0x218] sm:$0xff]  ;;  %v361_v16 = vld [vmem:[#allocation5 + $0x840] sm:$0xff]  ;;  %p2870_p0 = por %p2869_p13, %p2868_p12 }
  0x42   :  { %710 = vmatpush1.msra.mxu0 %v175_v8  ;;  %786 = vmatprep.subr.mxu1 %v368_v10  ;;  %v163_v17 = vld [vmem:[#allocation5 + $0x210] sm:$0xff]  ;;  %v356_v18 = vld [vmem:[#allocation5 + $0x818] sm:$0xff]  ;;  %v158_v19 = vld [vmem:[#allocation5 + $0x1e8] sm:$0xff] }
  0x43   :  { %711 = vmatprep.subr.mxu0 %v170_v11  ;;  %787 = vmatpush1.msra.mxu1 %v367_v12  ;;  %v355_v20 = vld [vmem:[#allocation5 + $0x810] sm:$0xff]  ;;  %v157_v21 = vld [vmem:[#allocation5 + $0x1e0] sm:$0xff]  ;;  %v350_v22 = vld [vmem:[#allocation5 + $0x7e8] sm:$0xff]  ;;  %p2871_p1 = pnand %p2870_p0, %p2864_p11 }
  0x44   :  { %712 = vmatpush1.msra.mxu0 %v169_v13  ;;  %788 = vmatprep.subr.mxu1 %v362_v14  ;;  %v152_v23 = vld [vmem:[#allocation5 + $0x1b8] sm:$0xff]  ;;  %v349_v24 = vld [vmem:[#allocation5 + $0x7e0] sm:$0xff]  ;;  %v151_v25 = vld [vmem:[#allocation5 + $0x1b0] sm:$0xff] }
  0x45   :  { %713 = vmatprep.subr.mxu0 %v164_v15  ;;  %789 = vmatpush1.msra.mxu1 %v361_v16  ;;  %v344_v26 = vld [vmem:[#allocation5 + $0x7b8] sm:$0xff]  ;;  %v146_v27 = vld [vmem:[#allocation5 + $0x188] sm:$0xff]  ;;  %v343_v28 = vld [vmem:[#allocation5 + $0x7b0] sm:$0xff] }
  0x46   :  { %714 = vmatpush1.msra.mxu0 %v163_v17  ;;  %790 = vmatprep.subr.mxu1 %v356_v18  ;;  %v145_v29 = vld [vmem:[#allocation5 + $0x180] sm:$0xff]  ;;  %v338_v30 = vld [vmem:[#allocation5 + $0x788] sm:$0xff]  ;;  %v140_v31 = vld [vmem:[#allocation5 + $0x158] sm:$0xff] }
  0x47   :  { %715 = vmatprep.subr.mxu0 %v158_v19  ;;  %791 = vmatpush1.msra.mxu1 %v355_v20  ;;  %v337_v32 = vld [vmem:[#allocation5 + $0x780] sm:$0xff]  ;;  %v139_v33 = vld [vmem:[#allocation5 + $0x150] sm:$0xff]  ;;  %v332_v34 = vld [vmem:[#allocation5 + $0x758] sm:$0xff] }
  0x48   :  { %716 = vmatpush1.msra.mxu0 %v157_v21  ;;  %792 = vmatprep.subr.mxu1 %v350_v22  ;;  %v134_v35 = vld [vmem:[#allocation5 + $0x128] sm:$0xff]  ;;  %v331_v36 = vld [vmem:[#allocation5 + $0x750] sm:$0xff]  ;;  %v133_v37 = vld [vmem:[#allocation5 + $0x120] sm:$0xff] }
  0x49   :  { %717 = vmatprep.subr.mxu0 %v152_v23  ;;  %793 = vmatpush1.msra.mxu1 %v349_v24  ;;  %v326_v38 = vld [vmem:[#allocation5 + $0x728] sm:$0xff]  ;;  %v128_v39 = vld [vmem:[#allocation5 + $0xf8] sm:$0xff]  ;;  %v325_v40 = vld [vmem:[#allocation5 + $0x720] sm:$0xff] }
  0x4a   :  { %718 = vmatpush1.msra.mxu0 %v151_v25  ;;  %794 = vmatprep.subr.mxu1 %v344_v26  ;;  %v127_v41 = vld [vmem:[#allocation5 + $0xf0] sm:$0xff]  ;;  %v320_v42 = vld [vmem:[#allocation5 + $0x6f8] sm:$0xff]  ;;  %v122_v43 = vld [vmem:[#allocation5 + $0xc8] sm:$0xff] }
  0x4b   :  { %719 = vmatprep.subr.mxu0 %v146_v27  ;;  %795 = vmatpush1.msra.mxu1 %v343_v28  ;;  %v319_v44 = vld [vmem:[#allocation5 + $0x6f0] sm:$0xff]  ;;  %v121_v45 = vld [vmem:[#allocation5 + $0xc0] sm:$0xff]  ;;  %v314_v46 = vld [vmem:[#allocation5 + $0x6c8] sm:$0xff] }
  0x4c   :  { %720 = vmatpush1.msra.mxu0 %v145_v29  ;;  %796 = vmatprep.subr.mxu1 %v338_v30  ;;  %v116_v47 = vld [vmem:[#allocation5 + $0x98] sm:$0xff]  ;;  %v313_v48 = vld [vmem:[#allocation5 + $0x6c0] sm:$0xff]  ;;  %v115_v49 = vld [vmem:[#allocation5 + $0x90] sm:$0xff] }
  0x4d   :  { %721 = vmatprep.subr.mxu0 %v140_v31  ;;  %797 = vmatpush1.msra.mxu1 %v337_v32  ;;  %v308_v50 = vld [vmem:[#allocation5 + $0x698] sm:$0xff]  ;;  %v110_v51 = vld [vmem:[#allocation5 + $0x68] sm:$0xff]  ;;  %v307_v52 = vld [vmem:[#allocation5 + $0x690] sm:$0xff] }
  0x4e   :  { %722 = vmatpush1.msra.mxu0 %v139_v33  ;;  %798 = vmatprep.subr.mxu1 %v332_v34  ;;  %v109_v53 = vld [vmem:[#allocation5 + $0x60] sm:$0xff]  ;;  %v302_v54 = vld [vmem:[#allocation5 + $0x668] sm:$0xff]  ;;  %v104_v55 = vld [vmem:[#allocation5 + $0x38] sm:$0xff] }
  0x4f   :  { %723 = vmatprep.subr.mxu0 %v134_v35  ;;  %799 = vmatpush1.msra.mxu1 %v331_v36  ;;  %v301_v56 = vld [vmem:[#allocation5 + $0x660] sm:$0xff]  ;;  %v103_v57 = vld [vmem:[#allocation5 + $0x30] sm:$0xff]  ;;  %v296_v58 = vld [vmem:[#allocation5 + $0x638] sm:$0xff] }
  0x50   :  { %724 = vmatpush1.msra.mxu0 %v133_v37  ;;  %800 = vmatprep.subr.mxu1 %v326_v38  ;;  %v98_v59 = vld [vmem:[#allocation5 + $0x8] sm:$0xff]  ;;  %v295_v60 = vld [vmem:[#allocation5 + $0x630] sm:$0xff]  ;;  %v97_v61 = vld [vmem:[#allocation5] sm:$0xff] }
  0x51   :  { %725 = vmatprep.subr.mxu0 %v128_v39  ;;  %801 = vmatpush1.msra.mxu1 %v325_v40  ;;  %v290_v62 = vld [vmem:[#allocation5 + $0x608] sm:$0xff]  ;;  %v284_v63 = vld [vmem:[#allocation5 + $0x5d8] sm:$0xff]  ;;  %v289_v0 = vld [vmem:[#allocation5 + $0x600] sm:$0xff] }
  0x52   :  { %726 = vmatpush1.msra.mxu0 %v127_v41  ;;  %802 = vmatprep.subr.mxu1 %v320_v42  ;;  %v283_v1 = vld [vmem:[#allocation5 + $0x5d0] sm:$0xff]  ;;  %v476_v2 = vld [vmem:[#allocation5 + $0xbd8] sm:$0xff]  ;;  %v278_v3 = vld [vmem:[#allocation5 + $0x5a8] sm:$0xff] }
  0x53   :  { %727 = vmatprep.subr.mxu0 %v122_v43  ;;  %803 = vmatpush1.msra.mxu1 %v319_v44  ;;  %v475_v4 = vld [vmem:[#allocation5 + $0xbd0] sm:$0xff]  ;;  %v277_v5 = vld [vmem:[#allocation5 + $0x5a0] sm:$0xff]  ;;  %v470_v6 = vld [vmem:[#allocation5 + $0xba8] sm:$0xff] }
  0x54   :  { %728 = vmatpush1.msra.mxu0 %v121_v45  ;;  %804 = vmatprep.subr.mxu1 %v314_v46  ;;  %v272_v7 = vld [vmem:[#allocation5 + $0x578] sm:$0xff]  ;;  %v469_v8 = vld [vmem:[#allocation5 + $0xba0] sm:$0xff]  ;;  %v271_v9 = vld [vmem:[#allocation5 + $0x570] sm:$0xff] }
  0x55   :  { %729 = vmatprep.subr.mxu0 %v116_v47  ;;  %805 = vmatpush1.msra.mxu1 %v313_v48  ;;  %v464_v10 = vld [vmem:[#allocation5 + $0xb78] sm:$0xff]  ;;  %v266_v11 = vld [vmem:[#allocation5 + $0x548] sm:$0xff]  ;;  %v463_v12 = vld [vmem:[#allocation5 + $0xb70] sm:$0xff] }
  0x56   :  { %730 = vmatpush1.msra.mxu0 %v115_v49  ;;  %806 = vmatprep.subr.mxu1 %v308_v50  ;;  %v265_v13 = vld [vmem:[#allocation5 + $0x540] sm:$0xff]  ;;  %v458_v14 = vld [vmem:[#allocation5 + $0xb48] sm:$0xff]  ;;  %v260_v15 = vld [vmem:[#allocation5 + $0x518] sm:$0xff] }
  0x57   :  { %731 = vmatprep.subr.mxu0 %v110_v51  ;;  %807 = vmatpush1.msra.mxu1 %v307_v52  ;;  %v457_v16 = vld [vmem:[#allocation5 + $0xb40] sm:$0xff]  ;;  %v259_v17 = vld [vmem:[#allocation5 + $0x510] sm:$0xff]  ;;  %v452_v18 = vld [vmem:[#allocation5 + $0xb18] sm:$0xff] }
  0x58   :  { %732 = vmatpush1.msra.mxu0 %v109_v53  ;;  %808 = vmatprep.subr.mxu1 %v302_v54  ;;  %v254_v19 = vld [vmem:[#allocation5 + $0x4e8] sm:$0xff]  ;;  %v451_v20 = vld [vmem:[#allocation5 + $0xb10] sm:$0xff]  ;;  %v253_v21 = vld [vmem:[#allocation5 + $0x4e0] sm:$0xff] }
  0x59   :  { %733 = vmatprep.subr.mxu0 %v104_v55  ;;  %809 = vmatpush1.msra.mxu1 %v301_v56  ;;  %v446_v22 = vld [vmem:[#allocation5 + $0xae8] sm:$0xff]  ;;  %v248_v23 = vld [vmem:[#allocation5 + $0x4b8] sm:$0xff]  ;;  %v445_v24 = vld [vmem:[#allocation5 + $0xae0] sm:$0xff] }
  0x5a   :  { %734 = vmatpush1.msra.mxu0 %v103_v57  ;;  %810 = vmatprep.subr.mxu1 %v296_v58  ;;  %v247_v25 = vld [vmem:[#allocation5 + $0x4b0] sm:$0xff]  ;;  %v440_v26 = vld [vmem:[#allocation5 + $0xab8] sm:$0xff]  ;;  %v242_v27 = vld [vmem:[#allocation5 + $0x488] sm:$0xff] }
  0x5b   :  { %735 = vmatprep.subr.mxu0 %v98_v59  ;;  %811 = vmatpush1.msra.mxu1 %v295_v60  ;;  %v439_v28 = vld [vmem:[#allocation5 + $0xab0] sm:$0xff]  ;;  %v241_v29 = vld [vmem:[#allocation5 + $0x480] sm:$0xff]  ;;  %v434_v30 = vld [vmem:[#allocation5 + $0xa88] sm:$0xff] }
  0x5c   :  { %736 = vmatpush1.msra.mxu0 %v97_v61  ;;  %812 = vmatprep.subr.mxu1 %v290_v62  ;;  %v236_v31 = vld [vmem:[#allocation5 + $0x458] sm:$0xff]  ;;  %v433_v32 = vld [vmem:[#allocation5 + $0xa80] sm:$0xff]  ;;  %v235_v33 = vld [vmem:[#allocation5 + $0x450] sm:$0xff] }
  0x5d   :  { %737 = vmatprep.subr.mxu0 %v284_v63  ;;  %813 = vmatpush1.msra.mxu1 %v289_v0  ;;  %v428_v34 = vld [vmem:[#allocation5 + $0xa58] sm:$0xff]  ;;  %v230_v35 = vld [vmem:[#allocation5 + $0x428] sm:$0xff]  ;;  %v427_v36 = vld [vmem:[#allocation5 + $0xa50] sm:$0xff] }
  0x5e   :  { %738 = vmatpush2.msra.mxu0 %v283_v1  ;;  %814 = vmatprep.subr.mxu1 %v476_v2  ;;  %v229_v37 = vld [vmem:[#allocation5 + $0x420] sm:$0xff]  ;;  %v422_v38 = vld [vmem:[#allocation5 + $0xa28] sm:$0xff]  ;;  %v224_v39 = vld [vmem:[#allocation5 + $0x3f8] sm:$0xff] }
  0x5f   :  { %739 = vmatprep.subr.mxu0 %v278_v3  ;;  %815 = vmatpush2.msra.mxu1 %v475_v4  ;;  %v421_v40 = vld [vmem:[#allocation5 + $0xa20] sm:$0xff]  ;;  %v223_v41 = vld [vmem:[#allocation5 + $0x3f0] sm:$0xff]  ;;  %v416_v42 = vld [vmem:[#allocation5 + $0x9f8] sm:$0xff] }
  0x60   :  { %740 = vmatpush2.msra.mxu0 %v277_v5  ;;  %816 = vmatprep.subr.mxu1 %v470_v6  ;;  %v218_v43 = vld [vmem:[#allocation5 + $0x3c8] sm:$0xff]  ;;  %v415_v44 = vld [vmem:[#allocation5 + $0x9f0] sm:$0xff]  ;;  %v217_v45 = vld [vmem:[#allocation5 + $0x3c0] sm:$0xff] }
  0x61   :  { %741 = vmatprep.subr.mxu0 %v272_v7  ;;  %817 = vmatpush2.msra.mxu1 %v469_v8  ;;  %v410_v46 = vld [vmem:[#allocation5 + $0x9c8] sm:$0xff]  ;;  %v212_v47 = vld [vmem:[#allocation5 + $0x398] sm:$0xff]  ;;  %v409_v48 = vld [vmem:[#allocation5 + $0x9c0] sm:$0xff] }
  0x62   :  { %742 = vmatpush2.msra.mxu0 %v271_v9  ;;  %818 = vmatprep.subr.mxu1 %v464_v10  ;;  %v211_v49 = vld [vmem:[#allocation5 + $0x390] sm:$0xff]  ;;  %v404_v50 = vld [vmem:[#allocation5 + $0x998] sm:$0xff]  ;;  %v206_v51 = vld [vmem:[#allocation5 + $0x368] sm:$0xff] }
  0x63   :  { %743 = vmatprep.subr.mxu0 %v266_v11  ;;  %819 = vmatpush2.msra.mxu1 %v463_v12  ;;  %v403_v52 = vld [vmem:[#allocation5 + $0x990] sm:$0xff]  ;;  %v205_v53 = vld [vmem:[#allocation5 + $0x360] sm:$0xff]  ;;  %v398_v54 = vld [vmem:[#allocation5 + $0x968] sm:$0xff] }
  0x64   :  { %744 = vmatpush2.msra.mxu0 %v265_v13  ;;  %820 = vmatprep.subr.mxu1 %v458_v14  ;;  %v200_v55 = vld [vmem:[#allocation5 + $0x338] sm:$0xff]  ;;  %v397_v56 = vld [vmem:[#allocation5 + $0x960] sm:$0xff]  ;;  %v199_v57 = vld [vmem:[#allocation5 + $0x330] sm:$0xff] }
  0x65   :  { %745 = vmatprep.subr.mxu0 %v260_v15  ;;  %821 = vmatpush2.msra.mxu1 %v457_v16  ;;  %v392_v58 = vld [vmem:[#allocation5 + $0x938] sm:$0xff]  ;;  %v194_v59 = vld [vmem:[#allocation5 + $0x308] sm:$0xff]  ;;  %v193_v61 = vld [vmem:[#allocation5 + $0x300] sm:$0xff] }
  0x66   :  { %746 = vmatpush2.msra.mxu0 %v259_v17  ;;  %822 = vmatprep.subr.mxu1 %v452_v18  ;;  %v2953_v60 = vld [vmem:[#allocation2 + $0x8] sm:$0xff]  ;;  %v391_v62 = vld [vmem:[#allocation5 + $0x930] sm:$0xff]  ;;  %v2955_v63 = vld [vmem:[#allocation2] sm:$0xff] }
  0x67   :  { %747 = vmatprep.subr.mxu0 %v254_v19  ;;  %823 = vmatpush2.msra.mxu1 %v451_v20  ;;  %v386_v0 = vld [vmem:[#allocation5 + $0x908] sm:$0xff]  ;;  %v572_v1 = vld [vmem:[#allocation5 + $0xed8] sm:$0xff]  ;;  %v385_v2 = vld [vmem:[#allocation5 + $0x900] sm:$0xff] }
  0x68   :  { %748 = vmatpush2.msra.mxu0 %v253_v21  ;;  %824 = vmatprep.subr.mxu1 %v446_v22  ;;  %v88_v3 = vld [vmem:[#allocation2 + $0x18] sm:$0xff]  ;;  %v571_v4 = vld [vmem:[#allocation5 + $0xed0] sm:$0xff]  ;;  %v566_v6 = vld [vmem:[#allocation5 + $0xea8] sm:$0xff] }
  0x69   :  { %749 = vmatprep.subr.mxu0 %v248_v23  ;;  %825 = vmatpush2.msra.mxu1 %v445_v24  ;;  %v87_v5 = vld [vmem:[#allocation2 + $0x10] sm:$0xff]  ;;  %v190_v7 = vld [vmem:[#allocation5 + $0x2e8] sm:$0xff]  ;;  %v565_v8 = vld [vmem:[#allocation5 + $0xea0] sm:$0xff] }
  0x6a   :  { %750 = vmatpush2.msra.mxu0 %v247_v25  ;;  %826 = vmatprep.subr.mxu1 %v440_v26  ;;  %v189_v9 = vld [vmem:[#allocation5 + $0x2e0] sm:$0xff]  ;;  %v560_v10 = vld [vmem:[#allocation5 + $0xe78] sm:$0xff]  ;;  %v559_v12 = vld [vmem:[#allocation5 + $0xe70] sm:$0xff] }
  0x6b   :  { %751 = vmatprep.subr.mxu0 %v242_v27  ;;  %827 = vmatpush2.msra.mxu1 %v439_v28  ;;  %v184_v11 = vld [vmem:[#allocation5 + $0x2b8] sm:$0xff]  ;;  %v183_v13 = vld [vmem:[#allocation5 + $0x2b0] sm:$0xff]  ;;  %v554_v14 = vld [vmem:[#allocation5 + $0xe48] sm:$0xff] }
  0x6c   :  { %752 = vmatpush2.msra.mxu0 %v241_v29  ;;  %828 = vmatprep.subr.mxu1 %v434_v30  ;;  %v178_v15 = vld [vmem:[#allocation5 + $0x288] sm:$0xff]  ;;  %v553_v16 = vld [vmem:[#allocation5 + $0xe40] sm:$0xff]  ;;  %v548_v18 = vld [vmem:[#allocation5 + $0xe18] sm:$0xff] }
  0x6d   :  { %753 = vmatprep.subr.mxu0 %v236_v31  ;;  %829 = vmatpush2.msra.mxu1 %v433_v32  ;;  %v177_v17 = vld [vmem:[#allocation5 + $0x280] sm:$0xff]  ;;  %v172_v19 = vld [vmem:[#allocation5 + $0x258] sm:$0xff]  ;;  %v547_v20 = vld [vmem:[#allocation5 + $0xe10] sm:$0xff] }
  0x6e   :  { %754 = vmatpush2.msra.mxu0 %v235_v33  ;;  %830 = vmatprep.subr.mxu1 %v428_v34  ;;  %v171_v21 = vld [vmem:[#allocation5 + $0x250] sm:$0xff]  ;;  %v542_v22 = vld [vmem:[#allocation5 + $0xde8] sm:$0xff]  ;;  %v541_v24 = vld [vmem:[#allocation5 + $0xde0] sm:$0xff] }
  0x6f   :  { %755 = vmatprep.subr.mxu0 %v230_v35  ;;  %831 = vmatpush2.msra.mxu1 %v427_v36  ;;  %v166_v23 = vld [vmem:[#allocation5 + $0x228] sm:$0xff]  ;;  %v165_v25 = vld [vmem:[#allocation5 + $0x220] sm:$0xff]  ;;  %v536_v26 = vld [vmem:[#allocation5 + $0xdb8] sm:$0xff] }
  0x70   :  { %756 = vmatpush2.msra.mxu0 %v229_v37  ;;  %832 = vmatprep.subr.mxu1 %v422_v38  ;;  %v160_v27 = vld [vmem:[#allocation5 + $0x1f8] sm:$0xff]  ;;  %v535_v28 = vld [vmem:[#allocation5 + $0xdb0] sm:$0xff]  ;;  %v530_v30 = vld [vmem:[#allocation5 + $0xd88] sm:$0xff] }
  0x71   :  { %757 = vmatprep.subr.mxu0 %v224_v39  ;;  %833 = vmatpush2.msra.mxu1 %v421_v40  ;;  %v159_v29 = vld [vmem:[#allocation5 + $0x1f0] sm:$0xff]  ;;  %v154_v31 = vld [vmem:[#allocation5 + $0x1c8] sm:$0xff]  ;;  %v529_v32 = vld [vmem:[#allocation5 + $0xd80] sm:$0xff] }
  0x72   :  { %758 = vmatpush2.msra.mxu0 %v223_v41  ;;  %834 = vmatprep.subr.mxu1 %v416_v42  ;;  %v153_v33 = vld [vmem:[#allocation5 + $0x1c0] sm:$0xff]  ;;  %v524_v34 = vld [vmem:[#allocation5 + $0xd58] sm:$0xff]  ;;  %v523_v36 = vld [vmem:[#allocation5 + $0xd50] sm:$0xff] }
  0x73   :  { %759 = vmatprep.subr.mxu0 %v218_v43  ;;  %835 = vmatpush2.msra.mxu1 %v415_v44  ;;  %v148_v35 = vld [vmem:[#allocation5 + $0x198] sm:$0xff]  ;;  %v147_v37 = vld [vmem:[#allocation5 + $0x190] sm:$0xff]  ;;  %v518_v38 = vld [vmem:[#allocation5 + $0xd28] sm:$0xff] }
  0x74   :  { %760 = vmatpush2.msra.mxu0 %v217_v45  ;;  %836 = vmatprep.subr.mxu1 %v410_v46  ;;  %v142_v39 = vld [vmem:[#allocation5 + $0x168] sm:$0xff]  ;;  %v517_v40 = vld [vmem:[#allocation5 + $0xd20] sm:$0xff]  ;;  %v512_v42 = vld [vmem:[#allocation5 + $0xcf8] sm:$0xff] }
  0x75   :  { %761 = vmatprep.subr.mxu0 %v212_v47  ;;  %837 = vmatpush2.msra.mxu1 %v409_v48  ;;  %v141_v41 = vld [vmem:[#allocation5 + $0x160] sm:$0xff]  ;;  %v136_v43 = vld [vmem:[#allocation5 + $0x138] sm:$0xff]  ;;  %v511_v44 = vld [vmem:[#allocation5 + $0xcf0] sm:$0xff] }
  0x76   :  { %762 = vmatpush2.msra.mxu0 %v211_v49  ;;  %838 = vmatprep.subr.mxu1 %v404_v50  ;;  %v135_v45 = vld [vmem:[#allocation5 + $0x130] sm:$0xff]  ;;  %v506_v46 = vld [vmem:[#allocation5 + $0xcc8] sm:$0xff]  ;;  %v505_v48 = vld [vmem:[#allocation5 + $0xcc0] sm:$0xff] }
  0x77   :  { %763 = vmatprep.subr.mxu0 %v206_v51  ;;  %839 = vmatpush2.msra.mxu1 %v403_v52  ;;  %v130_v47 = vld [vmem:[#allocation5 + $0x108] sm:$0xff]  ;;  %v129_v49 = vld [vmem:[#allocation5 + $0x100] sm:$0xff]  ;;  %v500_v50 = vld [vmem:[#allocation5 + $0xc98] sm:$0xff] }
  0x78   :  { %764 = vmatpush2.msra.mxu0 %v205_v53  ;;  %840 = vmatprep.subr.mxu1 %v398_v54  ;;  %v124_v51 = vld [vmem:[#allocation5 + $0xd8] sm:$0xff]  ;;  %v499_v52 = vld [vmem:[#allocation5 + $0xc90] sm:$0xff]  ;;  %v494_v54 = vld [vmem:[#allocation5 + $0xc68] sm:$0xff] }
  0x79   :  { %765 = vmatprep.subr.mxu0 %v200_v55  ;;  %841 = vmatpush2.msra.mxu1 %v397_v56  ;;  %v123_v53 = vld [vmem:[#allocation5 + $0xd0] sm:$0xff]  ;;  %v118_v55 = vld [vmem:[#allocation5 + $0xa8] sm:$0xff]  ;;  %v493_v56 = vld [vmem:[#allocation5 + $0xc60] sm:$0xff] }
  0x7a   :  { %766 = vmatpush2.msra.mxu0 %v199_v57  ;;  %842 = vmatprep.subr.mxu1 %v392_v58  ;;  %v117_v57 = vld [vmem:[#allocation5 + $0xa0] sm:$0xff]  ;;  %v488_v58 = vld [vmem:[#allocation5 + $0xc38] sm:$0xff] }
  0x7b   :  { %767 = vmatprep.subr.mxu0 %v194_v59  ;;  %769 = vmatprep.mubr.f32.mxu0 %v2953_v60  ;;  %v112_v59 = vld [vmem:[#allocation5 + $0x78] sm:$0xff] }
  0x7c   :  { %768 = vmatpush2.msra.mxu0 %v193_v61  ;;  %843 = vmatpush2.msra.mxu1 %v391_v62  ;;  %v487_v61 = vld [vmem:[#allocation5 + $0xc30] sm:$0xff] }
  0x7d   :  { %770 = vmatmul.mubr.f32.vlgmr.msra.gmra.mxu0 %v2955_v63  ;;  %844 = vmatprep.subr.mxu1 %v386_v0  ;;  %v111_v62 = vld [vmem:[#allocation5 + $0x70] sm:$0xff]  ;;  %v482_v0 = vld [vmem:[#allocation5 + $0xc08] sm:$0xff] }
  0x7e   :  { %859 = vmatprep.subr.mxu0 %v572_v1  ;;  %845 = vmatpush2.msra.mxu1 %v385_v2  ;;  %v106_v1 = vld [vmem:[#allocation5 + $0x48] sm:$0xff]  ;;  %v481_v2 = vld [vmem:[#allocation5 + $0xc00] sm:$0xff] }
  0x7f   :  { %846 = vmatprep.mubr.f32.mxu1 %v88_v3  ;;  %860 = vmatpush1.msra.mxu0 %v571_v4  ;;  %v105_v3 = vld [vmem:[#allocation5 + $0x40] sm:$0xff]  ;;  %v668_v4 = vld [vmem:[#allocation5 + $0x11d8] sm:$0xff] }
  0x80   :  { %847 = vmatmul.mubr.f32.vlgmr.msra.gmra.mxu1 %v87_v5  ;;  %861 = vmatprep.subr.mxu0 %v566_v6  ;;  %v100_v5 = vld [vmem:[#allocation5 + $0x18] sm:$0xff]  ;;  %v667_v6 = vld [vmem:[#allocation5 + $0x11d0] sm:$0xff] }
  0x81   :  { %936 = vmatprep.subr.mxu1 %v190_v7  ;;  %862 = vmatpush1.msra.mxu0 %v565_v8  ;;  %v99_v7 = vld [vmem:[#allocation5 + $0x10] sm:$0xff]  ;;  %v662_v8 = vld [vmem:[#allocation5 + $0x11a8] sm:$0xff] }
  0x82   :  { %937 = vmatpush1.msra.mxu1 %v189_v9  ;;  %863 = vmatprep.subr.mxu0 %v560_v10  ;;  %v286_v9 = vld [vmem:[#allocation5 + $0x5e8] sm:$0xff]  ;;  %v661_v10 = vld [vmem:[#allocation5 + $0x11a0] sm:$0xff] }
  0x83   :  { %938 = vmatprep.subr.mxu1 %v184_v11  ;;  %864 = vmatpush1.msra.mxu0 %v559_v12  ;;  %v285_v11 = vld [vmem:[#allocation5 + $0x5e0] sm:$0xff]  ;;  %v656_v12 = vld [vmem:[#allocation5 + $0x1178] sm:$0xff] }
  0x84   :  { %939 = vmatpush1.msra.mxu1 %v183_v13  ;;  %865 = vmatprep.subr.mxu0 %v554_v14  ;;  %v280_v13 = vld [vmem:[#allocation5 + $0x5b8] sm:$0xff]  ;;  %v655_v14 = vld [vmem:[#allocation5 + $0x1170] sm:$0xff] }
  0x85   :  { %940 = vmatprep.subr.mxu1 %v178_v15  ;;  %866 = vmatpush1.msra.mxu0 %v553_v16  ;;  %v279_v15 = vld [vmem:[#allocation5 + $0x5b0] sm:$0xff]  ;;  %v650_v16 = vld [vmem:[#allocation5 + $0x1148] sm:$0xff] }
  0x86   :  { %941 = vmatpush1.msra.mxu1 %v177_v17  ;;  %867 = vmatprep.subr.mxu0 %v548_v18  ;;  %v274_v17 = vld [vmem:[#allocation5 + $0x588] sm:$0xff]  ;;  %v649_v18 = vld [vmem:[#allocation5 + $0x1140] sm:$0xff] }
  0x87   :  { %942 = vmatprep.subr.mxu1 %v172_v19  ;;  %868 = vmatpush1.msra.mxu0 %v547_v20  ;;  %v273_v19 = vld [vmem:[#allocation5 + $0x580] sm:$0xff]  ;;  %v644_v20 = vld [vmem:[#allocation5 + $0x1118] sm:$0xff] }
  0x88   :  { %943 = vmatpush1.msra.mxu1 %v171_v21  ;;  %869 = vmatprep.subr.mxu0 %v542_v22  ;;  %v268_v21 = vld [vmem:[#allocation5 + $0x558] sm:$0xff]  ;;  %v643_v22 = vld [vmem:[#allocation5 + $0x1110] sm:$0xff] }
  0x89   :  { %944 = vmatprep.subr.mxu1 %v166_v23  ;;  %870 = vmatpush1.msra.mxu0 %v541_v24  ;;  %v267_v23 = vld [vmem:[#allocation5 + $0x550] sm:$0xff]  ;;  %v638_v24 = vld [vmem:[#allocation5 + $0x10e8] sm:$0xff] }
  0x8a   :  { %945 = vmatpush1.msra.mxu1 %v165_v25  ;;  %871 = vmatprep.subr.mxu0 %v536_v26  ;;  %v262_v25 = vld [vmem:[#allocation5 + $0x528] sm:$0xff]  ;;  %v637_v26 = vld [vmem:[#allocation5 + $0x10e0] sm:$0xff] }
  0x8b   :  { %946 = vmatprep.subr.mxu1 %v160_v27  ;;  %872 = vmatpush1.msra.mxu0 %v535_v28  ;;  %v261_v27 = vld [vmem:[#allocation5 + $0x520] sm:$0xff]  ;;  %v632_v28 = vld [vmem:[#allocation5 + $0x10b8] sm:$0xff] }
  0x8c   :  { %947 = vmatpush1.msra.mxu1 %v159_v29  ;;  %873 = vmatprep.subr.mxu0 %v530_v30  ;;  %v256_v29 = vld [vmem:[#allocation5 + $0x4f8] sm:$0xff]  ;;  %v631_v30 = vld [vmem:[#allocation5 + $0x10b0] sm:$0xff] }
  0x8d   :  { %948 = vmatprep.subr.mxu1 %v154_v31  ;;  %874 = vmatpush1.msra.mxu0 %v529_v32  ;;  %v255_v31 = vld [vmem:[#allocation5 + $0x4f0] sm:$0xff]  ;;  %v626_v32 = vld [vmem:[#allocation5 + $0x1088] sm:$0xff] }
  0x8e   :  { %949 = vmatpush1.msra.mxu1 %v153_v33  ;;  %875 = vmatprep.subr.mxu0 %v524_v34  ;;  %v250_v33 = vld [vmem:[#allocation5 + $0x4c8] sm:$0xff]  ;;  %v625_v34 = vld [vmem:[#allocation5 + $0x1080] sm:$0xff] }
  0x8f   :  { %950 = vmatprep.subr.mxu1 %v148_v35  ;;  %876 = vmatpush1.msra.mxu0 %v523_v36  ;;  %v249_v35 = vld [vmem:[#allocation5 + $0x4c0] sm:$0xff]  ;;  %v620_v36 = vld [vmem:[#allocation5 + $0x1058] sm:$0xff] }
  0x90   :  { %951 = vmatpush1.msra.mxu1 %v147_v37  ;;  %877 = vmatprep.subr.mxu0 %v518_v38  ;;  %v244_v37 = vld [vmem:[#allocation5 + $0x498] sm:$0xff]  ;;  %v619_v38 = vld [vmem:[#allocation5 + $0x1050] sm:$0xff] }
  0x91   :  { %952 = vmatprep.subr.mxu1 %v142_v39  ;;  %878 = vmatpush1.msra.mxu0 %v517_v40  ;;  %v243_v39 = vld [vmem:[#allocation5 + $0x490] sm:$0xff]  ;;  %v614_v40 = vld [vmem:[#allocation5 + $0x1028] sm:$0xff] }
  0x92   :  { %953 = vmatpush1.msra.mxu1 %v141_v41  ;;  %879 = vmatprep.subr.mxu0 %v512_v42  ;;  %v238_v41 = vld [vmem:[#allocation5 + $0x468] sm:$0xff]  ;;  %v613_v42 = vld [vmem:[#allocation5 + $0x1020] sm:$0xff] }
  0x93   :  { %954 = vmatprep.subr.mxu1 %v136_v43  ;;  %880 = vmatpush1.msra.mxu0 %v511_v44  ;;  %v237_v43 = vld [vmem:[#allocation5 + $0x460] sm:$0xff]  ;;  %v608_v44 = vld [vmem:[#allocation5 + $0xff8] sm:$0xff] }
  0x94   :  { %955 = vmatpush1.msra.mxu1 %v135_v45  ;;  %881 = vmatprep.subr.mxu0 %v506_v46  ;;  %v232_v45 = vld [vmem:[#allocation5 + $0x438] sm:$0xff]  ;;  %v607_v46 = vld [vmem:[#allocation5 + $0xff0] sm:$0xff] }
  0x95   :  { %956 = vmatprep.subr.mxu1 %v130_v47  ;;  %882 = vmatpush1.msra.mxu0 %v505_v48  ;;  %v231_v47 = vld [vmem:[#allocation5 + $0x430] sm:$0xff]  ;;  %v602_v48 = vld [vmem:[#allocation5 + $0xfc8] sm:$0xff] }
  0x96   :  { %957 = vmatpush1.msra.mxu1 %v129_v49  ;;  %883 = vmatprep.subr.mxu0 %v500_v50  ;;  %v226_v49 = vld [vmem:[#allocation5 + $0x408] sm:$0xff]  ;;  %v601_v50 = vld [vmem:[#allocation5 + $0xfc0] sm:$0xff] }
  0x97   :  { %958 = vmatprep.subr.mxu1 %v124_v51  ;;  %884 = vmatpush1.msra.mxu0 %v499_v52  ;;  %v225_v51 = vld [vmem:[#allocation5 + $0x400] sm:$0xff]  ;;  %v596_v52 = vld [vmem:[#allocation5 + $0xf98] sm:$0xff] }
  0x98   :  { %959 = vmatpush1.msra.mxu1 %v123_v53  ;;  %885 = vmatprep.subr.mxu0 %v494_v54  ;;  %v220_v53 = vld [vmem:[#allocation5 + $0x3d8] sm:$0xff]  ;;  %v595_v54 = vld [vmem:[#allocation5 + $0xf90] sm:$0xff] }
  0x99   :  { %960 = vmatprep.subr.mxu1 %v118_v55  ;;  %886 = vmatpush1.msra.mxu0 %v493_v56  ;;  %v219_v55 = vld [vmem:[#allocation5 + $0x3d0] sm:$0xff]  ;;  %v2959_v56 = vld [vmem:[#allocation2 + $0x38] sm:$0xff] }
  0x9a   :  { %961 = vmatpush1.msra.mxu1 %v117_v57  ;;  %887 = vmatprep.subr.mxu0 %v488_v58  ;;  %v590_v57 = vld [vmem:[#allocation5 + $0xf68] sm:$0xff] }
  0x9b   :  { %962 = vmatprep.subr.mxu1 %v112_v59  ;;  %888 = vmatpush1.msra.mxu0 %v487_v61  ;;  %v214_v58 = vld [vmem:[#allocation5 + $0x3a8] sm:$0xff]  ;;  %v2961_v59 = vld [vmem:[#allocation2 + $0x30] sm:$0xff]  ;;  %v213_v61 = vld [vmem:[#allocation5 + $0x3a0] sm:$0xff] }
  0x9c   :  { %963 = vmatpush1.msra.mxu1 %v111_v62  ;;  %889 = vmatprep.subr.mxu0 %v482_v0  ;;  %v589_v62 = vld [vmem:[#allocation5 + $0xf60] sm:$0xff]  ;;  %v2964_v0 = vld [vmem:[#allocation2 + $0x48] sm:$0xff] }
  0x9d   :  { %964 = vmatprep.subr.mxu1 %v106_v1  ;;  %890 = vmatpush1.msra.mxu0 %v481_v2  ;;  %v584_v1 = vld [vmem:[#allocation5 + $0xf38] sm:$0xff] }
  0x9e   :  { %965 = vmatpush1.msra.mxu1 %v105_v3  ;;  %891 = vmatprep.subr.mxu0 %v668_v4  ;;  %v208_v2 = vld [vmem:[#allocation5 + $0x378] sm:$0xff]  ;;  %v2967_v3 = vld [vmem:[#allocation2 + $0x40] sm:$0xff]  ;;  %v583_v4 = vld [vmem:[#allocation5 + $0xf30] sm:$0xff] }
  0x9f   :  { %966 = vmatprep.subr.mxu1 %v100_v5  ;;  %892 = vmatpush2.msra.mxu0 %v667_v6  ;;  %v207_v5 = vld [vmem:[#allocation5 + $0x370] sm:$0xff]  ;;  %v578_v6 = vld [vmem:[#allocation5 + $0xf08] sm:$0xff] }
  0xa0   :  { %967 = vmatpush1.msra.mxu1 %v99_v7  ;;  %893 = vmatprep.subr.mxu0 %v662_v8  ;;  %v202_v7 = vld [vmem:[#allocation5 + $0x348] sm:$0xff]  ;;  %v577_v8 = vld [vmem:[#allocation5 + $0xf00] sm:$0xff] }
  0xa1   :  { %968 = vmatprep.subr.mxu1 %v286_v9  ;;  %894 = vmatpush2.msra.mxu0 %v661_v10  ;;  %v2971_v9 = vld [vmem:[#allocation2 + $0x28] sm:$0xff]  ;;  %v201_v10 = vld [vmem:[#allocation5 + $0x340] sm:$0xff] }
  0xa2   :  { %969 = vmatpush2.msra.mxu1 %v285_v11  ;;  %895 = vmatprep.subr.mxu0 %v656_v12  ;;  %v2973_v11 = vld [vmem:[#allocation2 + $0x20] sm:$0xff]  ;;  %v196_v12 = vld [vmem:[#allocation5 + $0x318] sm:$0xff] }
  0xa3   :  { %970 = vmatprep.subr.mxu1 %v280_v13  ;;  %896 = vmatpush2.msra.mxu0 %v655_v14  ;;  %v382_v13 = vld [vmem:[#allocation5 + $0x8e8] sm:$0xff]  ;;  %v195_v14 = vld [vmem:[#allocation5 + $0x310] sm:$0xff] }
  0xa4   :  { %971 = vmatpush2.msra.mxu1 %v279_v15  ;;  %897 = vmatprep.subr.mxu0 %v650_v16  ;;  %v381_v15 = vld [vmem:[#allocation5 + $0x8e0] sm:$0xff]  ;;  %v376_v16 = vld [vmem:[#allocation5 + $0x8b8] sm:$0xff] }
  0xa5   :  { %972 = vmatprep.subr.mxu1 %v274_v17  ;;  %898 = vmatpush2.msra.mxu0 %v649_v18  ;;  %v574_v17 = vld [vmem:[#allocation5 + $0xee8] sm:$0xff]  ;;  %v2977_v18 = vld [vmem:[#allocation2 + $0x58] sm:$0xff] }
  0xa6   :  { %973 = vmatpush2.msra.mxu1 %v273_v19  ;;  %899 = vmatprep.subr.mxu0 %v644_v20  ;;  %v375_v19 = vld [vmem:[#allocation5 + $0x8b0] sm:$0xff]  ;;  %v573_v20 = vld [vmem:[#allocation5 + $0xee0] sm:$0xff] }
  0xa7   :  { %974 = vmatprep.subr.mxu1 %v268_v21  ;;  %900 = vmatpush2.msra.mxu0 %v643_v22  ;;  %v2980_v21 = vld [vmem:[#allocation2 + $0x50] sm:$0xff]  ;;  %v370_v22 = vld [vmem:[#allocation5 + $0x888] sm:$0xff] }
  0xa8   :  { %975 = vmatpush2.msra.mxu1 %v267_v23  ;;  %901 = vmatprep.subr.mxu0 %v638_v24  ;;  %v568_v23 = vld [vmem:[#allocation5 + $0xeb8] sm:$0xff]  ;;  %v369_v24 = vld [vmem:[#allocation5 + $0x880] sm:$0xff] }
  0xa9   :  { %976 = vmatprep.subr.mxu1 %v262_v25  ;;  %902 = vmatpush2.msra.mxu0 %v637_v26  ;;  %v567_v25 = vld [vmem:[#allocation5 + $0xeb0] sm:$0xff]  ;;  %v364_v26 = vld [vmem:[#allocation5 + $0x858] sm:$0xff] }
  0xaa   :  { %977 = vmatpush2.msra.mxu1 %v261_v27  ;;  %903 = vmatprep.subr.mxu0 %v632_v28  ;;  %v363_v27 = vld [vmem:[#allocation5 + $0x850] sm:$0xff]  ;;  %v561_v28 = vld [vmem:[#allocation5 + $0xe80] sm:$0xff] }
  0xab   :  { %978 = vmatprep.subr.mxu1 %v256_v29  ;;  %904 = vmatpush2.msra.mxu0 %v631_v30  ;;  %v358_v29 = vld [vmem:[#allocation5 + $0x828] sm:$0xff]  ;;  %v556_v30 = vld [vmem:[#allocation5 + $0xe58] sm:$0xff] }
  0xac   :  { %979 = vmatpush2.msra.mxu1 %v255_v31  ;;  %905 = vmatprep.subr.mxu0 %v626_v32  ;;  %v357_v31 = vld [vmem:[#allocation5 + $0x820] sm:$0xff]  ;;  %v352_v32 = vld [vmem:[#allocation5 + $0x7f8] sm:$0xff] }
  0xad   :  { %980 = vmatprep.subr.mxu1 %v250_v33  ;;  %906 = vmatpush2.msra.mxu0 %v625_v34  ;;  %v550_v33 = vld [vmem:[#allocation5 + $0xe28] sm:$0xff]  ;;  %v351_v34 = vld [vmem:[#allocation5 + $0x7f0] sm:$0xff] }
  0xae   :  { %981 = vmatpush2.msra.mxu1 %v249_v35  ;;  %907 = vmatprep.subr.mxu0 %v620_v36  ;;  %v549_v35 = vld [vmem:[#allocation5 + $0xe20] sm:$0xff]  ;;  %v346_v36 = vld [vmem:[#allocation5 + $0x7c8] sm:$0xff] }
  0xaf   :  { %982 = vmatprep.subr.mxu1 %v244_v37  ;;  %908 = vmatpush2.msra.mxu0 %v619_v38  ;;  %v544_v37 = vld [vmem:[#allocation5 + $0xdf8] sm:$0xff]  ;;  %v345_v38 = vld [vmem:[#allocation5 + $0x7c0] sm:$0xff] }
  0xb0   :  { %983 = vmatpush2.msra.mxu1 %v243_v39  ;;  %909 = vmatprep.subr.mxu0 %v614_v40  ;;  %v543_v39 = vld [vmem:[#allocation5 + $0xdf0] sm:$0xff]  ;;  %v340_v40 = vld [vmem:[#allocation5 + $0x798] sm:$0xff] }
  0xb1   :  { %984 = vmatprep.subr.mxu1 %v238_v41  ;;  %910 = vmatpush2.msra.mxu0 %v613_v42  ;;  %v538_v41 = vld [vmem:[#allocation5 + $0xdc8] sm:$0xff]  ;;  %v339_v42 = vld [vmem:[#allocation5 + $0x790] sm:$0xff] }
  0xb2   :  { %985 = vmatpush2.msra.mxu1 %v237_v43  ;;  %911 = vmatprep.subr.mxu0 %v608_v44  ;;  %v537_v43 = vld [vmem:[#allocation5 + $0xdc0] sm:$0xff]  ;;  %v334_v44 = vld [vmem:[#allocation5 + $0x768] sm:$0xff] }
  0xb3   :  { %986 = vmatprep.subr.mxu1 %v232_v45  ;;  %912 = vmatpush2.msra.mxu0 %v607_v46  ;;  %v532_v45 = vld [vmem:[#allocation5 + $0xd98] sm:$0xff]  ;;  %v333_v46 = vld [vmem:[#allocation5 + $0x760] sm:$0xff] }
  0xb4   :  { %987 = vmatpush2.msra.mxu1 %v231_v47  ;;  %913 = vmatprep.subr.mxu0 %v602_v48  ;;  %v531_v47 = vld [vmem:[#allocation5 + $0xd90] sm:$0xff]  ;;  %v328_v48 = vld [vmem:[#allocation5 + $0x738] sm:$0xff] }
  0xb5   :  { %988 = vmatprep.subr.mxu1 %v226_v49  ;;  %914 = vmatpush2.msra.mxu0 %v601_v50  ;;  %v526_v49 = vld [vmem:[#allocation5 + $0xd68] sm:$0xff]  ;;  %v327_v50 = vld [vmem:[#allocation5 + $0x730] sm:$0xff] }
  0xb6   :  { %989 = vmatpush2.msra.mxu1 %v225_v51  ;;  %915 = vmatprep.subr.mxu0 %v596_v52  ;;  %v525_v51 = vld [vmem:[#allocation5 + $0xd60] sm:$0xff]  ;;  %v322_v52 = vld [vmem:[#allocation5 + $0x708] sm:$0xff] }
  0xb7   :  { %990 = vmatprep.subr.mxu1 %v220_v53  ;;  %916 = vmatpush2.msra.mxu0 %v595_v54  ;;  %v520_v53 = vld [vmem:[#allocation5 + $0xd38] sm:$0xff]  ;;  %v321_v54 = vld [vmem:[#allocation5 + $0x700] sm:$0xff] }
  0xb8   :  { %991 = vmatpush2.msra.mxu1 %v219_v55  ;;  %775 = vmatprep.mubr.f32.mxu0 %v2959_v56  ;;  %v519_v55 = vld [vmem:[#allocation5 + $0xd30] sm:$0xff] }
  0xb9   :  { %917 = vmatprep.subr.mxu0 %v590_v57  ;;  %992 = vmatprep.subr.mxu1 %v214_v58  ;;  %v316_v57 = vld [vmem:[#allocation5 + $0x6d8] sm:$0xff]  ;;  %v514_v58 = vld [vmem:[#allocation5 + $0xd08] sm:$0xff] }
  0xba   :  { %776 = vmatmul.mubr.f32.gmra.mxu0 %v2961_v59  ;;  %993 = vmatpush2.msra.mxu1 %v213_v61  ;;  %v315_v61 = vld [vmem:[#allocation5 + $0x6d0] sm:$0xff] }
  0xbb   :  { %918 = vmatpush2.msra.mxu0 %v589_v62  ;;  %852 = vmatprep.mubr.f32.mxu1 %v2964_v0  ;;  %v513_v62 = vld [vmem:[#allocation5 + $0xd00] sm:$0xff] }
  0xbc   :  { %919 = vmatprep.subr.mxu0 %v584_v1  ;;  %994 = vmatprep.subr.mxu1 %v208_v2  ;;  %v310_v1 = vld [vmem:[#allocation5 + $0x6a8] sm:$0xff]  ;;  %v508_v2 = vld [vmem:[#allocation5 + $0xcd8] sm:$0xff] }
  0xbd   :  { %853 = vmatmul.mubr.f32.gmra.mxu1 %v2967_v3  ;;  %920 = vmatpush2.msra.mxu0 %v583_v4  ;;  %v309_v4 = vld [vmem:[#allocation5 + $0x6a0] sm:$0xff] }
  0xbe   :  { %995 = vmatpush2.msra.mxu1 %v207_v5  ;;  %921 = vmatprep.subr.mxu0 %v578_v6  ;;  %v507_v5 = vld [vmem:[#allocation5 + $0xcd0] sm:$0xff]  ;;  %v304_v6 = vld [vmem:[#allocation5 + $0x678] sm:$0xff] }
  0xbf   :  { %996 = vmatprep.subr.mxu1 %v202_v7  ;;  %922 = vmatpush2.msra.mxu0 %v577_v8  ;;  %v502_v7 = vld [vmem:[#allocation5 + $0xca8] sm:$0xff]  ;;  %v303_v8 = vld [vmem:[#allocation5 + $0x670] sm:$0xff] }
  0xc0   :  { %923 = vmatprep.mubr.f32.mxu0 %v2971_v9  ;;  %997 = vmatpush2.msra.mxu1 %v201_v10  ;;  %v501_v10 = vld [vmem:[#allocation5 + $0xca0] sm:$0xff] }
  0xc1   :  { %924 = vmatmul.mubr.f32.vlgmr.msra.gmra.mxu0 %v2973_v11  ;;  %998 = vmatprep.subr.mxu1 %v196_v12  ;;  %v298_v12 = vld [vmem:[#allocation5 + $0x648] sm:$0xff] }
  0xc2   :  { %1013 = vmatprep.subr.mxu0 %v382_v13  ;;  %999 = vmatpush2.msra.mxu1 %v195_v14  ;;  %v496_v13 = vld [vmem:[#allocation5 + $0xc78] sm:$0xff]  ;;  %v297_v14 = vld [vmem:[#allocation5 + $0x640] sm:$0xff] }
  0xc3   :  { %1014 = vmatpush1.msra.mxu0 %v381_v15  ;;  %1000 = vmatprep.mubr.f32.mxu1 %v2953_v60  ;;  %v562_v60 = vld [vmem:[#allocation5 + $0xe88] sm:$0xff]  ;;  %v495_v15 = vld [vmem:[#allocation5 + $0xc70] sm:$0xff] }
  0xc4   :  { %1015 = vmatprep.subr.mxu0 %v376_v16  ;;  %1090 = vmatprep.subr.mxu1 %v574_v17  ;;  %v292_v16 = vld [vmem:[#allocation5 + $0x618] sm:$0xff]  ;;  %v490_v17 = vld [vmem:[#allocation5 + $0xc48] sm:$0xff] }
  0xc5   :  { %929 = vmatprep.mubr.f32.mxu0 %v2977_v18  ;;  %1001 = vmatmul.mubr.f32.vlgmr.msra.gmra.mxu1 %v2955_v63  ;;  %v555_v63 = vld [vmem:[#allocation5 + $0xe50] sm:$0xff] }
  0xc6   :  { %1016 = vmatpush1.msra.mxu0 %v375_v19  ;;  %1091 = vmatpush1.msra.mxu1 %v573_v20  ;;  %v291_v19 = vld [vmem:[#allocation5 + $0x610] sm:$0xff]  ;;  %v489_v20 = vld [vmem:[#allocation5 + $0xc40] sm:$0xff] }
  0xc7   :  { %930 = vmatmul.mubr.f32.gmra.mxu0 %v2980_v21  ;;  %1017 = vmatprep.subr.mxu0 %v370_v22  ;;  %v478_v22 = vld [vmem:[#allocation5 + $0xbe8] sm:$0xff] }
  0xc8   :  { %1092 = vmatprep.subr.mxu1 %v568_v23  ;;  %1018 = vmatpush1.msra.mxu0 %v369_v24  ;;  %v484_v23 = vld [vmem:[#allocation5 + $0xc18] sm:$0xff]  ;;  %v477_v24 = vld [vmem:[#allocation5 + $0xbe0] sm:$0xff] }
  0xc9   :  { %1093 = vmatpush1.msra.mxu1 %v567_v25  ;;  %1019 = vmatprep.subr.mxu0 %v364_v26  ;;  %v483_v25 = vld [vmem:[#allocation5 + $0xc10] sm:$0xff]  ;;  %v472_v26 = vld [vmem:[#allocation5 + $0xbb8] sm:$0xff] }
  0xca   :  { %1094 = vmatprep.subr.mxu1 %v562_v60  ;;  %1020 = vmatpush1.msra.mxu0 %v363_v27  ;;  %v670_v60 = vld [vmem:[#allocation5 + $0x11e8] sm:$0xff]  ;;  %v471_v27 = vld [vmem:[#allocation5 + $0xbb0] sm:$0xff] }
  0xcb   :  { %1095 = vmatpush1.msra.mxu1 %v561_v28  ;;  %1021 = vmatprep.subr.mxu0 %v358_v29  ;;  %v669_v28 = vld [vmem:[#allocation5 + $0x11e0] sm:$0xff]  ;;  %v466_v29 = vld [vmem:[#allocation5 + $0xb88] sm:$0xff] }
  0xcc   :  { %1096 = vmatprep.subr.mxu1 %v556_v30  ;;  %1022 = vmatpush1.msra.mxu0 %v357_v31  ;;  %v664_v30 = vld [vmem:[#allocation5 + $0x11b8] sm:$0xff]  ;;  %v465_v31 = vld [vmem:[#allocation5 + $0xb80] sm:$0xff] }
  0xcd   :  { %1097 = vmatpush1.msra.mxu1 %v555_v63  ;;  %1023 = vmatprep.subr.mxu0 %v352_v32  ;;  %v663_v63 = vld [vmem:[#allocation5 + $0x11b0] sm:$0xff]  ;;  %v460_v32 = vld [vmem:[#allocation5 + $0xb58] sm:$0xff] }
  0xce   :  { %1098 = vmatprep.subr.mxu1 %v550_v33  ;;  %1024 = vmatpush1.msra.mxu0 %v351_v34  ;;  %v658_v33 = vld [vmem:[#allocation5 + $0x1188] sm:$0xff]  ;;  %v459_v34 = vld [vmem:[#allocation5 + $0xb50] sm:$0xff] }
  0xcf   :  { %1099 = vmatpush1.msra.mxu1 %v549_v35  ;;  %1025 = vmatprep.subr.mxu0 %v346_v36  ;;  %v657_v35 = vld [vmem:[#allocation5 + $0x1180] sm:$0xff]  ;;  %v454_v36 = vld [vmem:[#allocation5 + $0xb28] sm:$0xff] }
  0xd0   :  { %1100 = vmatprep.subr.mxu1 %v544_v37  ;;  %1026 = vmatpush1.msra.mxu0 %v345_v38  ;;  %v652_v37 = vld [vmem:[#allocation5 + $0x1158] sm:$0xff]  ;;  %v453_v38 = vld [vmem:[#allocation5 + $0xb20] sm:$0xff] }
  0xd1   :  { %1101 = vmatpush1.msra.mxu1 %v543_v39  ;;  %1027 = vmatprep.subr.mxu0 %v340_v40  ;;  %v651_v39 = vld [vmem:[#allocation5 + $0x1150] sm:$0xff]  ;;  %v448_v40 = vld [vmem:[#allocation5 + $0xaf8] sm:$0xff] }
  0xd2   :  { %1102 = vmatprep.subr.mxu1 %v538_v41  ;;  %1028 = vmatpush1.msra.mxu0 %v339_v42  ;;  %v646_v41 = vld [vmem:[#allocation5 + $0x1128] sm:$0xff]  ;;  %v447_v42 = vld [vmem:[#allocation5 + $0xaf0] sm:$0xff] }
  0xd3   :  { %1103 = vmatpush1.msra.mxu1 %v537_v43  ;;  %1029 = vmatprep.subr.mxu0 %v334_v44  ;;  %v645_v43 = vld [vmem:[#allocation5 + $0x1120] sm:$0xff]  ;;  %v442_v44 = vld [vmem:[#allocation5 + $0xac8] sm:$0xff] }
  0xd4   :  { %1104 = vmatprep.subr.mxu1 %v532_v45  ;;  %1030 = vmatpush1.msra.mxu0 %v333_v46  ;;  %v640_v45 = vld [vmem:[#allocation5 + $0x10f8] sm:$0xff]  ;;  %v441_v46 = vld [vmem:[#allocation5 + $0xac0] sm:$0xff] }
  0xd5   :  { %1105 = vmatpush1.msra.mxu1 %v531_v47  ;;  %1031 = vmatprep.subr.mxu0 %v328_v48  ;;  %v639_v47 = vld [vmem:[#allocation5 + $0x10f0] sm:$0xff]  ;;  %v436_v48 = vld [vmem:[#allocation5 + $0xa98] sm:$0xff] }
  0xd6   :  { %1106 = vmatprep.subr.mxu1 %v526_v49  ;;  %1032 = vmatpush1.msra.mxu0 %v327_v50  ;;  %v634_v49 = vld [vmem:[#allocation5 + $0x10c8] sm:$0xff]  ;;  %v435_v50 = vld [vmem:[#allocation5 + $0xa90] sm:$0xff] }
  0xd7   :  { %1107 = vmatpush1.msra.mxu1 %v525_v51  ;;  %1033 = vmatprep.subr.mxu0 %v322_v52  ;;  %v633_v51 = vld [vmem:[#allocation5 + $0x10c0] sm:$0xff]  ;;  %v430_v52 = vld [vmem:[#allocation5 + $0xa68] sm:$0xff] }
  0xd8   :  { %1108 = vmatprep.subr.mxu1 %v520_v53  ;;  %1034 = vmatpush1.msra.mxu0 %v321_v54  ;;  %v628_v53 = vld [vmem:[#allocation5 + $0x1098] sm:$0xff]  ;;  %v429_v54 = vld [vmem:[#allocation5 + $0xa60] sm:$0xff] }
  0xd9   :  { %1109 = vmatpush1.msra.mxu1 %v519_v55  ;;  %1035 = vmatprep.subr.mxu0 %v316_v57  ;;  %v627_v55 = vld [vmem:[#allocation5 + $0x1090] sm:$0xff]  ;;  %v424_v57 = vld [vmem:[#allocation5 + $0xa38] sm:$0xff] }
  0xda   :  { %1110 = vmatprep.subr.mxu1 %v514_v58  ;;  %1036 = vmatpush1.msra.mxu0 %v315_v61  ;;  %v622_v58 = vld [vmem:[#allocation5 + $0x1068] sm:$0xff]  ;;  %v423_v61 = vld [vmem:[#allocation5 + $0xa30] sm:$0xff] }
  0xdb   :  { %1111 = vmatpush1.msra.mxu1 %v513_v62  ;;  %1037 = vmatprep.subr.mxu0 %v310_v1  ;;  %v621_v62 = vld [vmem:[#allocation5 + $0x1060] sm:$0xff]  ;;  %v418_v1 = vld [vmem:[#allocation5 + $0xa08] sm:$0xff] }
  0xdc   :  { %1112 = vmatprep.subr.mxu1 %v508_v2  ;;  %1038 = vmatpush1.msra.mxu0 %v309_v4  ;;  %v616_v2 = vld [vmem:[#allocation5 + $0x1038] sm:$0xff]  ;;  %v417_v4 = vld [vmem:[#allocation5 + $0xa00] sm:$0xff] }
  0xdd   :  { %1113 = vmatpush1.msra.mxu1 %v507_v5  ;;  %1039 = vmatprep.subr.mxu0 %v304_v6  ;;  %v615_v5 = vld [vmem:[#allocation5 + $0x1030] sm:$0xff]  ;;  %v412_v6 = vld [vmem:[#allocation5 + $0x9d8] sm:$0xff] }
  0xde   :  { %1114 = vmatprep.subr.mxu1 %v502_v7  ;;  %1040 = vmatpush1.msra.mxu0 %v303_v8  ;;  %v610_v7 = vld [vmem:[#allocation5 + $0x1008] sm:$0xff]  ;;  %v411_v8 = vld [vmem:[#allocation5 + $0x9d0] sm:$0xff] }
  0xdf   :  { %1115 = vmatpush1.msra.mxu1 %v501_v10  ;;  %1041 = vmatprep.subr.mxu0 %v298_v12  ;;  %v609_v10 = vld [vmem:[#allocation5 + $0x1000] sm:$0xff]  ;;  %v406_v12 = vld [vmem:[#allocation5 + $0x9a8] sm:$0xff] }
  0xe0   :  { %1116 = vmatprep.subr.mxu1 %v496_v13  ;;  %1042 = vmatpush1.msra.mxu0 %v297_v14  ;;  %v604_v13 = vld [vmem:[#allocation5 + $0xfd8] sm:$0xff]  ;;  %v405_v14 = vld [vmem:[#allocation5 + $0x9a0] sm:$0xff] }
  0xe1   :  { %1117 = vmatpush1.msra.mxu1 %v495_v15  ;;  %1043 = vmatprep.subr.mxu0 %v292_v16  ;;  %v603_v15 = vld [vmem:[#allocation5 + $0xfd0] sm:$0xff]  ;;  %v400_v16 = vld [vmem:[#allocation5 + $0x978] sm:$0xff] }
  0xe2   :  { %1118 = vmatprep.subr.mxu1 %v490_v17  ;;  %1044 = vmatpush1.msra.mxu0 %v291_v19  ;;  %v598_v17 = vld [vmem:[#allocation5 + $0xfa8] sm:$0xff]  ;;  %v399_v19 = vld [vmem:[#allocation5 + $0x970] sm:$0xff] }
  0xe3   :  { %1119 = vmatpush1.msra.mxu1 %v489_v20  ;;  %1045 = vmatprep.subr.mxu0 %v478_v22  ;;  %v597_v20 = vld [vmem:[#allocation5 + $0xfa0] sm:$0xff]  ;;  %v394_v22 = vld [vmem:[#allocation5 + $0x948] sm:$0xff] }
  0xe4   :  { %1120 = vmatprep.subr.mxu1 %v484_v23  ;;  %1046 = vmatpush2.msra.mxu0 %v477_v24  ;;  %v592_v23 = vld [vmem:[#allocation5 + $0xf78] sm:$0xff]  ;;  %v393_v24 = vld [vmem:[#allocation5 + $0x940] sm:$0xff] }
  0xe5   :  { %1121 = vmatpush1.msra.mxu1 %v483_v25  ;;  %1047 = vmatprep.subr.mxu0 %v472_v26  ;;  %v591_v25 = vld [vmem:[#allocation5 + $0xf70] sm:$0xff]  ;;  %v388_v26 = vld [vmem:[#allocation5 + $0x918] sm:$0xff] }
  0xe6   :  { %1122 = vmatprep.subr.mxu1 %v670_v60  ;;  %1048 = vmatpush2.msra.mxu0 %v471_v27  ;;  %v586_v60 = vld [vmem:[#allocation5 + $0xf48] sm:$0xff]  ;;  %v387_v27 = vld [vmem:[#allocation5 + $0x910] sm:$0xff] }
  0xe7   :  { %1123 = vmatpush2.msra.mxu1 %v669_v28  ;;  %1049 = vmatprep.subr.mxu0 %v466_v29  ;;  %v585_v28 = vld [vmem:[#allocation5 + $0xf40] sm:$0xff]  ;;  %v580_v29 = vld [vmem:[#allocation5 + $0xf18] sm:$0xff] }
  0xe8   :  { %1124 = vmatprep.subr.mxu1 %v664_v30  ;;  %1050 = vmatpush2.msra.mxu0 %v465_v31  ;;  %v192_v30 = vld [vmem:[#allocation5 + $0x2f8] sm:$0xff]  ;;  %v579_v31 = vld [vmem:[#allocation5 + $0xf10] sm:$0xff] }
  0xe9   :  { %1125 = vmatpush2.msra.mxu1 %v663_v63  ;;  %1051 = vmatprep.subr.mxu0 %v460_v32  ;;  %v2987_v63 = vld [vmem:[#allocation2 + $0x18] sm:$0xff]  ;;  %v191_v32 = vld [vmem:[#allocation5 + $0x2f0] sm:$0xff] }
  0xea   :  { %1126 = vmatprep.subr.mxu1 %v658_v33  ;;  %1052 = vmatpush2.msra.mxu0 %v459_v34  ;;  %v186_v33 = vld [vmem:[#allocation5 + $0x2c8] sm:$0xff]  ;;  %v185_v34 = vld [vmem:[#allocation5 + $0x2c0] sm:$0xff] }
  0xeb   :  { %1127 = vmatpush2.msra.mxu1 %v657_v35  ;;  %1053 = vmatprep.subr.mxu0 %v454_v36  ;;  %v383_v35 = vld [vmem:[#allocation5 + $0x8f0] sm:$0xff]  ;;  %v180_v36 = vld [vmem:[#allocation5 + $0x298] sm:$0xff] }
  0xec   :  { %1128 = vmatprep.subr.mxu1 %v652_v37  ;;  %1054 = vmatpush2.msra.mxu0 %v453_v38  ;;  %v378_v37 = vld [vmem:[#allocation5 + $0x8c8] sm:$0xff]  ;;  %v179_v38 = vld [vmem:[#allocation5 + $0x290] sm:$0xff] }
  0xed   :  { %1129 = vmatpush2.msra.mxu1 %v651_v39  ;;  %1055 = vmatprep.subr.mxu0 %v448_v40  ;;  %v377_v39 = vld [vmem:[#allocation5 + $0x8c0] sm:$0xff]  ;;  %v174_v40 = vld [vmem:[#allocation5 + $0x268] sm:$0xff] }
  0xee   :  { %1130 = vmatprep.subr.mxu1 %v646_v41  ;;  %1056 = vmatpush2.msra.mxu0 %v447_v42  ;;  %v173_v41 = vld [vmem:[#allocation5 + $0x260] sm:$0xff]  ;;  %v168_v42 = vld [vmem:[#allocation5 + $0x238] sm:$0xff] }
  0xef   :  { %1131 = vmatpush2.msra.mxu1 %v645_v43  ;;  %1057 = vmatprep.subr.mxu0 %v442_v44  ;;  %v167_v43 = vld [vmem:[#allocation5 + $0x230] sm:$0xff]  ;;  %v365_v44 = vld [vmem:[#allocation5 + $0x860] sm:$0xff] }
  0xf0   :  { %1132 = vmatprep.subr.mxu1 %v640_v45  ;;  %1058 = vmatpush2.msra.mxu0 %v441_v46  ;;  %v360_v45 = vld [vmem:[#allocation5 + $0x838] sm:$0xff]  ;;  %v161_v46 = vld [vmem:[#allocation5 + $0x200] sm:$0xff] }
  0xf1   :  { %1133 = vmatpush2.msra.mxu1 %v639_v47  ;;  %1059 = vmatprep.subr.mxu0 %v436_v48  ;;  %v156_v47 = vld [vmem:[#allocation5 + $0x1d8] sm:$0xff]  ;;  %v354_v48 = vld [vmem:[#allocation5 + $0x808] sm:$0xff] }
  0xf2   :  { %1134 = vmatprep.subr.mxu1 %v634_v49  ;;  %1060 = vmatpush2.msra.mxu0 %v435_v50  ;;  %v155_v49 = vld [vmem:[#allocation5 + $0x1d0] sm:$0xff]  ;;  %v150_v50 = vld [vmem:[#allocation5 + $0x1a8] sm:$0xff] }
  0xf3   :  { %1135 = vmatpush2.msra.mxu1 %v633_v51  ;;  %1061 = vmatprep.subr.mxu0 %v430_v52  ;;  %v348_v51 = vld [vmem:[#allocation5 + $0x7d8] sm:$0xff]  ;;  %v149_v52 = vld [vmem:[#allocation5 + $0x1a0] sm:$0xff] }
  0xf4   :  { %1136 = vmatprep.subr.mxu1 %v628_v53  ;;  %1062 = vmatpush2.msra.mxu0 %v429_v54  ;;  %v347_v53 = vld [vmem:[#allocation5 + $0x7d0] sm:$0xff]  ;;  %v144_v54 = vld [vmem:[#allocation5 + $0x178] sm:$0xff] }
  0xf5   :  { %1137 = vmatpush2.msra.mxu1 %v627_v55  ;;  %1063 = vmatprep.subr.mxu0 %v424_v57  ;;  %v342_v55 = vld [vmem:[#allocation5 + $0x7a8] sm:$0xff]  ;;  %v143_v57 = vld [vmem:[#allocation5 + $0x170] sm:$0xff] }
  0xf6   :  { %1138 = vmatprep.subr.mxu1 %v622_v58  ;;  %1064 = vmatpush2.msra.mxu0 %v423_v61  ;;  %v341_v58 = vld [vmem:[#allocation5 + $0x7a0] sm:$0xff]  ;;  %v138_v61 = vld [vmem:[#allocation5 + $0x148] sm:$0xff] }
  0xf7   :  { %1139 = vmatpush2.msra.mxu1 %v621_v62  ;;  %1065 = vmatprep.subr.mxu0 %v418_v1  ;;  %v336_v62 = vld [vmem:[#allocation5 + $0x778] sm:$0xff]  ;;  %v137_v1 = vld [vmem:[#allocation5 + $0x140] sm:$0xff] }
  0xf8   :  { %1140 = vmatprep.subr.mxu1 %v616_v2  ;;  %1066 = vmatpush2.msra.mxu0 %v417_v4  ;;  %v335_v2 = vld [vmem:[#allocation5 + $0x770] sm:$0xff]  ;;  %v132_v4 = vld [vmem:[#allocation5 + $0x118] sm:$0xff] }
  0xf9   :  { %1141 = vmatpush2.msra.mxu1 %v615_v5  ;;  %1067 = vmatprep.subr.mxu0 %v412_v6  ;;  %v330_v5 = vld [vmem:[#allocation5 + $0x748] sm:$0xff]  ;;  %v131_v6 = vld [vmem:[#allocation5 + $0x110] sm:$0xff] }
  0xfa   :  { %1142 = vmatprep.subr.mxu1 %v610_v7  ;;  %1068 = vmatpush2.msra.mxu0 %v411_v8  ;;  %v329_v7 = vld [vmem:[#allocation5 + $0x740] sm:$0xff]  ;;  %v126_v8 = vld [vmem:[#allocation5 + $0xe8] sm:$0xff] }
  0xfb   :  { %1143 = vmatpush2.msra.mxu1 %v609_v10  ;;  %1069 = vmatprep.subr.mxu0 %v406_v12  ;;  %v324_v10 = vld [vmem:[#allocation5 + $0x718] sm:$0xff]  ;;  %v125_v12 = vld [vmem:[#allocation5 + $0xe0] sm:$0xff] }
  0xfc   :  { %1144 = vmatprep.subr.mxu1 %v604_v13  ;;  %1070 = vmatpush2.msra.mxu0 %v405_v14  ;;  %v323_v13 = vld [vmem:[#allocation5 + $0x710] sm:$0xff]  ;;  %v120_v14 = vld [vmem:[#allocation5 + $0xb8] sm:$0xff] }
  0xfd   :  { %1145 = vmatpush2.msra.mxu1 %v603_v15  ;;  %1071 = vmatprep.subr.mxu0 %v400_v16  ;;  %v318_v15 = vld [vmem:[#allocation5 + $0x6e8] sm:$0xff]  ;;  %v119_v16 = vld [vmem:[#allocation5 + $0xb0] sm:$0xff] }
  0xfe   :  { %1146 = vmatprep.subr.mxu1 %v598_v17  ;;  %1072 = vmatpush2.msra.mxu0 %v399_v19  ;;  %v317_v17 = vld [vmem:[#allocation5 + $0x6e0] sm:$0xff]  ;;  %v114_v19 = vld [vmem:[#allocation5 + $0x88] sm:$0xff] }
  0xff   :  { %1147 = vmatpush2.msra.mxu1 %v597_v20  ;;  %1073 = vmatprep.subr.mxu0 %v394_v22  ;;  %v312_v20 = vld [vmem:[#allocation5 + $0x6b8] sm:$0xff]  ;;  %v113_v22 = vld [vmem:[#allocation5 + $0x80] sm:$0xff] }
 0x100   :  { %1148 = vmatprep.subr.mxu1 %v592_v23  ;;  %1006 = vmatprep.mubr.f32.mxu1 %v2959_v56  ;;  %v2990_v56 = vld [vmem:[#allocation2 + $0x10] sm:$0xff] }
 0x101   :  { %1074 = vmatpush2.msra.mxu0 %v393_v24  ;;  %1149 = vmatpush2.msra.mxu1 %v591_v25  ;;  %v311_v23 = vld [vmem:[#allocation5 + $0x6b0] sm:$0xff]  ;;  %v108_v24 = vld [vmem:[#allocation5 + $0x58] sm:$0xff]  ;;  %v306_v25 = vld [vmem:[#allocation5 + $0x688] sm:$0xff] }
 0x102   :  { %1007 = vmatmul.mubr.f32.gmra.mxu1 %v2961_v59  ;;  %1075 = vmatprep.subr.mxu0 %v388_v26  ;;  %v384_v59 = vld [vmem:[#allocation5 + $0x8f8] sm:$0xff]  ;;  %v107_v26 = vld [vmem:[#allocation5 + $0x50] sm:$0xff] }
 0x103   :  { %1150 = vmatprep.subr.mxu1 %v586_v60  ;;  %1076 = vmatpush2.msra.mxu0 %v387_v27  ;;  %v305_v60 = vld [vmem:[#allocation5 + $0x680] sm:$0xff]  ;;  %v102_v27 = vld [vmem:[#allocation5 + $0x28] sm:$0xff] }
 0x104   :  { %1077 = vmatprep.mubr.f32.mxu0 %v2987_v63  ;;  %1151 = vmatpush2.msra.mxu1 %v585_v28  ;;  %v300_v28 = vld [vmem:[#allocation5 + $0x658] sm:$0xff] }
 0x105   :  { %1078 = vmatmul.mubr.f32.vlgmr.msra.gmra.mxu0 %v2990_v56  ;;  %1152 = vmatprep.subr.mxu1 %v580_v29  ;;  %v101_v29 = vld [vmem:[#allocation5 + $0x20] sm:$0xff] }
 0x106   :  { %1167 = vmatprep.subr.mxu0 %v192_v30  ;;  %1153 = vmatpush2.msra.mxu1 %v579_v31  ;;  %v299_v30 = vld [vmem:[#allocation5 + $0x650] sm:$0xff]  ;;  %v288_v31 = vld [vmem:[#allocation5 + $0x5f8] sm:$0xff] }
 0x107   :  { %1154 = vmatprep.mubr.f32.mxu1 %v2971_v9  ;;  %1168 = vmatpush1.msra.mxu0 %v191_v32  ;;  %v372_v9 = vld [vmem:[#allocation5 + $0x898] sm:$0xff]  ;;  %v294_v32 = vld [vmem:[#allocation5 + $0x628] sm:$0xff] }
 0x108   :  { %1155 = vmatmul.mubr.f32.vlgmr.msra.gmra.mxu1 %v2973_v11  ;;  %1169 = vmatprep.subr.mxu0 %v186_v33  ;;  %v371_v11 = vld [vmem:[#allocation5 + $0x890] sm:$0xff] }
 0x109   :  { %1244 = vmatprep.subr.mxu1 %v384_v59  ;;  %1083 = vmatprep.mubr.f32.mxu0 %v2964_v0  ;;  %v366_v0 = vld [vmem:[#allocation5 + $0x868] sm:$0xff]  ;;  %v287_v33 = vld [vmem:[#allocation5 + $0x5f0] sm:$0xff]  ;;  %v293_v59 = vld [vmem:[#allocation5 + $0x620] sm:$0xff] }
 0x10a   :  { %1170 = vmatpush1.msra.mxu0 %v185_v34  ;;  %1245 = vmatpush1.msra.mxu1 %v383_v35  ;;  %v282_v34 = vld [vmem:[#allocation5 + $0x5c8] sm:$0xff]  ;;  %v480_v35 = vld [vmem:[#allocation5 + $0xbf8] sm:$0xff] }
 0x10b   :  { %1084 = vmatmul.mubr.f32.gmra.mxu0 %v2967_v3  ;;  %1171 = vmatprep.subr.mxu0 %v180_v36  ;;  %v162_v3 = vld [vmem:[#allocation5 + $0x208] sm:$0xff]  ;;  %v281_v36 = vld [vmem:[#allocation5 + $0x5c0] sm:$0xff] }
 0x10c   :  { %1246 = vmatprep.subr.mxu1 %v378_v37  ;;  %1160 = vmatprep.mubr.f32.mxu1 %v2977_v18  ;;  %v359_v18 = vld [vmem:[#allocation5 + $0x830] sm:$0xff] }
 0x10d   :  { %1172 = vmatpush1.msra.mxu0 %v179_v38  ;;  %1247 = vmatpush1.msra.mxu1 %v377_v39  ;;  %v479_v37 = vld [vmem:[#allocation5 + $0xbf0] sm:$0xff]  ;;  %v276_v38 = vld [vmem:[#allocation5 + $0x598] sm:$0xff]  ;;  %v474_v39 = vld [vmem:[#allocation5 + $0xbc8] sm:$0xff] }
 0x10e   :  { %1161 = vmatmul.mubr.f32.gmra.mxu1 %v2980_v21  ;;  %1173 = vmatprep.subr.mxu0 %v174_v40  ;;  %v353_v21 = vld [vmem:[#allocation5 + $0x800] sm:$0xff]  ;;  %v275_v40 = vld [vmem:[#allocation5 + $0x590] sm:$0xff] }
 0x10f   :  { %1248 = vmatprep.subr.mxu1 %v372_v9  ;;  %1174 = vmatpush1.msra.mxu0 %v173_v41  ;;  %v473_v9 = vld [vmem:[#allocation5 + $0xbc0] sm:$0xff]  ;;  %v270_v41 = vld [vmem:[#allocation5 + $0x568] sm:$0xff] }
 0x110   :  { %1249 = vmatpush1.msra.mxu1 %v371_v11  ;;  %1175 = vmatprep.subr.mxu0 %v168_v42  ;;  %v468_v11 = vld [vmem:[#allocation5 + $0xb98] sm:$0xff]  ;;  %v269_v42 = vld [vmem:[#allocation5 + $0x560] sm:$0xff] }
 0x111   :  { %1250 = vmatprep.subr.mxu1 %v366_v0  ;;  %1176 = vmatpush1.msra.mxu0 %v167_v43  ;;  %v467_v0 = vld [vmem:[#allocation5 + $0xb90] sm:$0xff]  ;;  %v264_v43 = vld [vmem:[#allocation5 + $0x538] sm:$0xff] }
 0x112   :  { %1251 = vmatpush1.msra.mxu1 %v365_v44  ;;  %1177 = vmatprep.subr.mxu0 %v162_v3  ;;  %v462_v44 = vld [vmem:[#allocation5 + $0xb68] sm:$0xff]  ;;  %v263_v3 = vld [vmem:[#allocation5 + $0x530] sm:$0xff] }
 0x113   :  { %1252 = vmatprep.subr.mxu1 %v360_v45  ;;  %1178 = vmatpush1.msra.mxu0 %v161_v46  ;;  %v461_v45 = vld [vmem:[#allocation5 + $0xb60] sm:$0xff]  ;;  %v258_v46 = vld [vmem:[#allocation5 + $0x508] sm:$0xff] }
 0x114   :  { %1253 = vmatpush1.msra.mxu1 %v359_v18  ;;  %1179 = vmatprep.subr.mxu0 %v156_v47  ;;  %v456_v18 = vld [vmem:[#allocation5 + $0xb38] sm:$0xff]  ;;  %v257_v47 = vld [vmem:[#allocation5 + $0x500] sm:$0xff] }
 0x115   :  { %1254 = vmatprep.subr.mxu1 %v354_v48  ;;  %1180 = vmatpush1.msra.mxu0 %v155_v49  ;;  %v455_v48 = vld [vmem:[#allocation5 + $0xb30] sm:$0xff]  ;;  %v252_v49 = vld [vmem:[#allocation5 + $0x4d8] sm:$0xff] }
 0x116   :  { %1255 = vmatpush1.msra.mxu1 %v353_v21  ;;  %1181 = vmatprep.subr.mxu0 %v150_v50  ;;  %v450_v21 = vld [vmem:[#allocation5 + $0xb08] sm:$0xff]  ;;  %v251_v50 = vld [vmem:[#allocation5 + $0x4d0] sm:$0xff] }
 0x117   :  { %1256 = vmatprep.subr.mxu1 %v348_v51  ;;  %1182 = vmatpush1.msra.mxu0 %v149_v52  ;;  %v449_v51 = vld [vmem:[#allocation5 + $0xb00] sm:$0xff]  ;;  %v246_v52 = vld [vmem:[#allocation5 + $0x4a8] sm:$0xff] }
 0x118   :  { %1257 = vmatpush1.msra.mxu1 %v347_v53  ;;  %1183 = vmatprep.subr.mxu0 %v144_v54  ;;  %v444_v53 = vld [vmem:[#allocation5 + $0xad8] sm:$0xff]  ;;  %v245_v54 = vld [vmem:[#allocation5 + $0x4a0] sm:$0xff] }
 0x119   :  { %1258 = vmatprep.subr.mxu1 %v342_v55  ;;  %1184 = vmatpush1.msra.mxu0 %v143_v57  ;;  %v443_v55 = vld [vmem:[#allocation5 + $0xad0] sm:$0xff]  ;;  %v240_v57 = vld [vmem:[#allocation5 + $0x478] sm:$0xff] }
 0x11a   :  { %1259 = vmatpush1.msra.mxu1 %v341_v58  ;;  %1185 = vmatprep.subr.mxu0 %v138_v61  ;;  %v438_v58 = vld [vmem:[#allocation5 + $0xaa8] sm:$0xff]  ;;  %v239_v61 = vld [vmem:[#allocation5 + $0x470] sm:$0xff] }
 0x11b   :  { %1260 = vmatprep.subr.mxu1 %v336_v62  ;;  %1186 = vmatpush1.msra.mxu0 %v137_v1  ;;  %v437_v62 = vld [vmem:[#allocation5 + $0xaa0] sm:$0xff]  ;;  %v234_v1 = vld [vmem:[#allocation5 + $0x448] sm:$0xff] }
 0x11c   :  { %1261 = vmatpush1.msra.mxu1 %v335_v2  ;;  %1187 = vmatprep.subr.mxu0 %v132_v4  ;;  %v432_v2 = vld [vmem:[#allocation5 + $0xa78] sm:$0xff]  ;;  %v233_v4 = vld [vmem:[#allocation5 + $0x440] sm:$0xff] }
 0x11d   :  { %1262 = vmatprep.subr.mxu1 %v330_v5  ;;  %1188 = vmatpush1.msra.mxu0 %v131_v6  ;;  %v431_v5 = vld [vmem:[#allocation5 + $0xa70] sm:$0xff]  ;;  %v228_v6 = vld [vmem:[#allocation5 + $0x418] sm:$0xff] }
 0x11e   :  { %1263 = vmatpush1.msra.mxu1 %v329_v7  ;;  %1189 = vmatprep.subr.mxu0 %v126_v8  ;;  %v426_v7 = vld [vmem:[#allocation5 + $0xa48] sm:$0xff]  ;;  %v227_v8 = vld [vmem:[#allocation5 + $0x410] sm:$0xff] }
 0x11f   :  { %1264 = vmatprep.subr.mxu1 %v324_v10  ;;  %1190 = vmatpush1.msra.mxu0 %v125_v12  ;;  %v425_v10 = vld [vmem:[#allocation5 + $0xa40] sm:$0xff]  ;;  %v222_v12 = vld [vmem:[#allocation5 + $0x3e8] sm:$0xff] }
 0x120   :  { %1265 = vmatpush1.msra.mxu1 %v323_v13  ;;  %1191 = vmatprep.subr.mxu0 %v120_v14  ;;  %v420_v13 = vld [vmem:[#allocation5 + $0xa18] sm:$0xff]  ;;  %v221_v14 = vld [vmem:[#allocation5 + $0x3e0] sm:$0xff] }
 0x121   :  { %1266 = vmatprep.subr.mxu1 %v318_v15  ;;  %1192 = vmatpush1.msra.mxu0 %v119_v16  ;;  %v419_v15 = vld [vmem:[#allocation5 + $0xa10] sm:$0xff]  ;;  %v216_v16 = vld [vmem:[#allocation5 + $0x3b8] sm:$0xff] }
 0x122   :  { %1267 = vmatpush1.msra.mxu1 %v317_v17  ;;  %1193 = vmatprep.subr.mxu0 %v114_v19  ;;  %v414_v17 = vld [vmem:[#allocation5 + $0x9e8] sm:$0xff]  ;;  %v215_v19 = vld [vmem:[#allocation5 + $0x3b0] sm:$0xff] }
 0x123   :  { %1268 = vmatprep.subr.mxu1 %v312_v20  ;;  %1194 = vmatpush1.msra.mxu0 %v113_v22  ;;  %v413_v20 = vld [vmem:[#allocation5 + $0x9e0] sm:$0xff]  ;;  %v210_v22 = vld [vmem:[#allocation5 + $0x388] sm:$0xff] }
 0x124   :  { %1269 = vmatpush1.msra.mxu1 %v311_v23  ;;  %1195 = vmatprep.subr.mxu0 %v108_v24  ;;  %v408_v23 = vld [vmem:[#allocation5 + $0x9b8] sm:$0xff]  ;;  %v209_v24 = vld [vmem:[#allocation5 + $0x380] sm:$0xff] }
 0x125   :  { %1270 = vmatprep.subr.mxu1 %v306_v25  ;;  %1196 = vmatpush1.msra.mxu0 %v107_v26  ;;  %v407_v25 = vld [vmem:[#allocation5 + $0x9b0] sm:$0xff]  ;;  %v204_v26 = vld [vmem:[#allocation5 + $0x358] sm:$0xff] }
 0x126   :  { %1271 = vmatpush1.msra.mxu1 %v305_v60  ;;  %1197 = vmatprep.subr.mxu0 %v102_v27  ;;  %v402_v60 = vld [vmem:[#allocation5 + $0x988] sm:$0xff]  ;;  %v203_v27 = vld [vmem:[#allocation5 + $0x350] sm:$0xff] }
 0x127   :  { %1272 = vmatprep.subr.mxu1 %v300_v28  ;;  %1198 = vmatpush1.msra.mxu0 %v101_v29  ;;  %v401_v28 = vld [vmem:[#allocation5 + $0x980] sm:$0xff]  ;;  %v198_v29 = vld [vmem:[#allocation5 + $0x328] sm:$0xff] }
 0x128   :  { %1273 = vmatpush1.msra.mxu1 %v299_v30  ;;  %1199 = vmatprep.subr.mxu0 %v288_v31  ;;  %v396_v30 = vld [vmem:[#allocation5 + $0x958] sm:$0xff]  ;;  %v197_v31 = vld [vmem:[#allocation5 + $0x320] sm:$0xff] }
 0x129   :  { %1274 = vmatprep.subr.mxu1 %v294_v32  ;;  %1200 = vmatpush2.msra.mxu0 %v287_v33  ;;  %v395_v32 = vld [vmem:[#allocation5 + $0x950] sm:$0xff]  ;;  %v390_v33 = vld [vmem:[#allocation5 + $0x928] sm:$0xff] }
 0x12a   :  { %1275 = vmatpush1.msra.mxu1 %v293_v59  ;;  %1201 = vmatprep.subr.mxu0 %v282_v34  ;;  %v576_v59 = vld [vmem:[#allocation5 + $0xef8] sm:$0xff]  ;;  %v389_v34 = vld [vmem:[#allocation5 + $0x920] sm:$0xff] }
 0x12b   :  { %1276 = vmatprep.subr.mxu1 %v480_v35  ;;  %1202 = vmatpush2.msra.mxu0 %v281_v36  ;;  %v2752_v35 = vld [vmem:[#allocation2 + $0x8] sm:$0xff]  ;;  %v575_v36 = vld [vmem:[#allocation5 + $0xef0] sm:$0xff] }
 0x12c   :  { %1277 = vmatpush2.msra.mxu1 %v479_v37  ;;  %1203 = vmatprep.subr.mxu0 %v276_v38  ;;  %v2753_v37 = vld [vmem:[#allocation2] sm:$0xff]  ;;  %v570_v38 = vld [vmem:[#allocation5 + $0xec8] sm:$0xff] }
 0x12d   :  { %1278 = vmatprep.subr.mxu1 %v474_v39  ;;  %1204 = vmatpush2.msra.mxu0 %v275_v40  ;;  %v569_v39 = vld [vmem:[#allocation5 + $0xec0] sm:$0xff] }
 0x12e   :  { %1279 = vmatpush2.msra.mxu1 %v473_v9  ;;  %1205 = vmatprep.subr.mxu0 %v270_v41  ;;  %v1501_v40 = vld [vmem:[#allocation8 + $0x2d8] sm:$0xff]  ;;  %v1500_v41 = vld [vmem:[#allocation8 + $0x2d0] sm:$0xff] }
 0x12f   :  { %1280 = vmatprep.subr.mxu1 %v468_v11  ;;  %1206 = vmatpush2.msra.mxu0 %v269_v42  ;;  %v564_v9 = vld [vmem:[#allocation5 + $0xe98] sm:$0xff]  ;;  %v563_v11 = vld [vmem:[#allocation5 + $0xe90] sm:$0xff] }
 0x130   :  { %1281 = vmatpush2.msra.mxu1 %v467_v0  ;;  %1207 = vmatprep.subr.mxu0 %v264_v43  ;;  %v1495_v42 = vld [vmem:[#allocation8 + $0x2a8] sm:$0xff]  ;;  %v1494_v43 = vld [vmem:[#allocation8 + $0x2a0] sm:$0xff] }
 0x131   :  { %1282 = vmatprep.subr.mxu1 %v462_v44  ;;  %1208 = vmatpush2.msra.mxu0 %v263_v3  ;;  %v558_v0 = vld [vmem:[#allocation5 + $0xe68] sm:$0xff]  ;;  %v557_v44 = vld [vmem:[#allocation5 + $0xe60] sm:$0xff] }
 0x132   :  { %1283 = vmatpush2.msra.mxu1 %v461_v45  ;;  %1209 = vmatprep.subr.mxu0 %v258_v46  ;;  %v1489_v3 = vld [vmem:[#allocation8 + $0x278] sm:$0xff]  ;;  %v551_v46 = vld [vmem:[#allocation5 + $0xe30] sm:$0xff] }
 0x133   :  { %1284 = vmatprep.subr.mxu1 %v456_v18  ;;  %1210 = vmatpush2.msra.mxu0 %v257_v47  ;;  %v552_v45 = vld [vmem:[#allocation5 + $0xe38] sm:$0xff]  ;;  %v1483_v18 = vld [vmem:[#allocation8 + $0x248] sm:$0xff]  ;;  %v1482_v47 = vld [vmem:[#allocation8 + $0x240] sm:$0xff] }
 0x134   :  { %1285 = vmatpush2.msra.mxu1 %v455_v48  ;;  %1211 = vmatprep.subr.mxu0 %v252_v49  ;;  %v545_v48 = vld [vmem:[#allocation5 + $0xe00] sm:$0xff] }
 0x135   :  { %1286 = vmatprep.subr.mxu1 %v450_v21  ;;  %1212 = vmatpush2.msra.mxu0 %v251_v50  ;;  %v1477_v49 = vld [vmem:[#allocation8 + $0x218] sm:$0xff]  ;;  %v1476_v50 = vld [vmem:[#allocation8 + $0x210] sm:$0xff] }
 0x136   :  { %1287 = vmatpush2.msra.mxu1 %v449_v51  ;;  %1213 = vmatprep.subr.mxu0 %v246_v52  ;;  %v540_v21 = vld [vmem:[#allocation5 + $0xdd8] sm:$0xff]  ;;  %v539_v51 = vld [vmem:[#allocation5 + $0xdd0] sm:$0xff] }
 0x137   :  { %1288 = vmatprep.subr.mxu1 %v444_v53  ;;  %1214 = vmatpush2.msra.mxu0 %v245_v54  ;;  %v1471_v52 = vld [vmem:[#allocation8 + $0x1e8] sm:$0xff]  ;;  %v1470_v54 = vld [vmem:[#allocation8 + $0x1e0] sm:$0xff] }
 0x138   :  { %1289 = vmatpush2.msra.mxu1 %v443_v55  ;;  %1215 = vmatprep.subr.mxu0 %v240_v57  ;;  %v534_v53 = vld [vmem:[#allocation5 + $0xda8] sm:$0xff]  ;;  %v533_v55 = vld [vmem:[#allocation5 + $0xda0] sm:$0xff] }
 0x139   :  { %1290 = vmatprep.subr.mxu1 %v438_v58  ;;  %1216 = vmatpush2.msra.mxu0 %v239_v61  ;;  %v1465_v57 = vld [vmem:[#allocation8 + $0x1b8] sm:$0xff]  ;;  %v1464_v61 = vld [vmem:[#allocation8 + $0x1b0] sm:$0xff] }
 0x13a   :  { %1291 = vmatpush2.msra.mxu1 %v437_v62  ;;  %1217 = vmatprep.subr.mxu0 %v234_v1  ;;  %v528_v58 = vld [vmem:[#allocation5 + $0xd78] sm:$0xff]  ;;  %v527_v62 = vld [vmem:[#allocation5 + $0xd70] sm:$0xff] }
 0x13b   :  { %1292 = vmatprep.subr.mxu1 %v432_v2  ;;  %1218 = vmatpush2.msra.mxu0 %v233_v4  ;;  %v1459_v1 = vld [vmem:[#allocation8 + $0x188] sm:$0xff]  ;;  %v1458_v4 = vld [vmem:[#allocation8 + $0x180] sm:$0xff] }
 0x13c   :  { %1293 = vmatpush2.msra.mxu1 %v431_v5  ;;  %1219 = vmatprep.subr.mxu0 %v228_v6  ;;  %v522_v2 = vld [vmem:[#allocation5 + $0xd48] sm:$0xff]  ;;  %v521_v5 = vld [vmem:[#allocation5 + $0xd40] sm:$0xff] }
 0x13d   :  { %1294 = vmatprep.subr.mxu1 %v426_v7  ;;  %1220 = vmatpush2.msra.mxu0 %v227_v8  ;;  %v1453_v6 = vld [vmem:[#allocation8 + $0x158] sm:$0xff]  ;;  %v1452_v8 = vld [vmem:[#allocation8 + $0x150] sm:$0xff] }
 0x13e   :  { %1295 = vmatpush2.msra.mxu1 %v425_v10  ;;  %1221 = vmatprep.subr.mxu0 %v222_v12  ;;  %v516_v7 = vld [vmem:[#allocation5 + $0xd18] sm:$0xff]  ;;  %v515_v10 = vld [vmem:[#allocation5 + $0xd10] sm:$0xff] }
 0x13f   :  { %1296 = vmatprep.subr.mxu1 %v420_v13  ;;  %1222 = vmatpush2.msra.mxu0 %v221_v14  ;;  %v1447_v12 = vld [vmem:[#allocation8 + $0x128] sm:$0xff]  ;;  %v1446_v14 = vld [vmem:[#allocation8 + $0x120] sm:$0xff] }
 0x140   :  { %1297 = vmatpush2.msra.mxu1 %v419_v15  ;;  %1223 = vmatprep.subr.mxu0 %v216_v16  ;;  %v510_v13 = vld [vmem:[#allocation5 + $0xce8] sm:$0xff]  ;;  %v509_v15 = vld [vmem:[#allocation5 + $0xce0] sm:$0xff] }
 0x141   :  { %1298 = vmatprep.subr.mxu1 %v414_v17  ;;  %1224 = vmatpush2.msra.mxu0 %v215_v19  ;;  %v1441_v16 = vld [vmem:[#allocation8 + $0xf8] sm:$0xff]  ;;  %v1440_v19 = vld [vmem:[#allocation8 + $0xf0] sm:$0xff] }
 0x142   :  { %1299 = vmatpush2.msra.mxu1 %v413_v20  ;;  %1225 = vmatprep.subr.mxu0 %v210_v22  ;;  %v504_v17 = vld [vmem:[#allocation5 + $0xcb8] sm:$0xff]  ;;  %v503_v20 = vld [vmem:[#allocation5 + $0xcb0] sm:$0xff] }
 0x143   :  { %1300 = vmatprep.subr.mxu1 %v408_v23  ;;  %1226 = vmatpush2.msra.mxu0 %v209_v24  ;;  %v1435_v22 = vld [vmem:[#allocation8 + $0xc8] sm:$0xff]  ;;  %v1434_v24 = vld [vmem:[#allocation8 + $0xc0] sm:$0xff] }
 0x144   :  { %1301 = vmatpush2.msra.mxu1 %v407_v25  ;;  %1227 = vmatprep.subr.mxu0 %v204_v26  ;;  %v498_v23 = vld [vmem:[#allocation5 + $0xc88] sm:$0xff]  ;;  %v497_v25 = vld [vmem:[#allocation5 + $0xc80] sm:$0xff] }
 0x145   :  { %1302 = vmatprep.subr.mxu1 %v402_v60  ;;  %1228 = vmatpush2.msra.mxu0 %v203_v27  ;;  %v1429_v26 = vld [vmem:[#allocation8 + $0x98] sm:$0xff]  ;;  %v1428_v27 = vld [vmem:[#allocation8 + $0x90] sm:$0xff] }
 0x146   :  { %1303 = vmatpush2.msra.mxu1 %v401_v28  ;;  %1229 = vmatprep.subr.mxu0 %v198_v29  ;;  %v492_v60 = vld [vmem:[#allocation5 + $0xc58] sm:$0xff]  ;;  %v491_v28 = vld [vmem:[#allocation5 + $0xc50] sm:$0xff] }
 0x147   :  { %1304 = vmatprep.subr.mxu1 %v396_v30  ;;  %1230 = vmatpush2.msra.mxu0 %v197_v31  ;;  %v1423_v29 = vld [vmem:[#allocation8 + $0x68] sm:$0xff]  ;;  %v1422_v31 = vld [vmem:[#allocation8 + $0x60] sm:$0xff] }
 0x148   :  { %1231 = vmatprep.mubr.f32.mxu0 %v2752_v35  ;;  %1305 = vmatpush2.msra.mxu1 %v395_v32  ;;  %v486_v30 = vld [vmem:[#allocation5 + $0xc28] sm:$0xff]  ;;  %v485_v32 = vld [vmem:[#allocation5 + $0xc20] sm:$0xff]  ;;  %v671_v35 = vld [vmem:[#allocation5 + $0x11f0] sm:$0xff] }
 0x149   :  { %1232 = vmatmul.mubr.f32.vlgmr.msra.gmra.mxu0 %v2753_v37  ;;  %1306 = vmatprep.subr.mxu1 %v390_v33  ;;  %v1417_v33 = vld [vmem:[#allocation8 + $0x38] sm:$0xff]  ;;  %v666_v37 = vld [vmem:[#allocation5 + $0x11c8] sm:$0xff] }
 0x14a   :  { %1321 = vmatprep.subr.mxu0 %v576_v59  ;;  %1307 = vmatpush2.msra.mxu1 %v389_v34  ;;  %v672_v59 = vld [vmem:[#allocation5 + $0x11f8] sm:$0xff] }
 0x14b   :  { %1308 = vmatprep.mubr.f32.mxu1 %v2987_v63  ;;  %1322 = vmatpush1.msra.mxu0 %v575_v36  ;;  %v1488_v63 = vld [vmem:[#allocation8 + $0x270] sm:$0xff]  ;;  %v1411_v36 = vld [vmem:[#allocation8 + $0x8] sm:$0xff] }
 0x14c   :  { %1309 = vmatmul.mubr.f32.vlgmr.msra.gmra.mxu1 %v2990_v56  ;;  %1323 = vmatprep.subr.mxu0 %v570_v38  ;;  %v546_v56 = vld [vmem:[#allocation5 + $0xe08] sm:$0xff]  ;;  %v1416_v34 = vld [vmem:[#allocation8 + $0x30] sm:$0xff] }
 0x14d   :  { %1324 = vmatpush1.msra.mxu0 %v569_v39  ;;  %2018 = vmatprep.subr.mxu1 %v1501_v40  ;;  %v1410_v38 = vld [vmem:[#allocation8] sm:$0xff]  ;;  %v1597_v40 = vld [vmem:[#allocation8 + $0x5d8] sm:$0xff] }
 0x14e   :  { %1325 = vmatprep.subr.mxu0 %v564_v9  ;;  %2019 = vmatpush1.msra.mxu1 %v1500_v41  ;;  %v665_v39 = vld [vmem:[#allocation5 + $0x11c0] sm:$0xff]  ;;  %v660_v9 = vld [vmem:[#allocation5 + $0x1198] sm:$0xff] }
 0x14f   :  { %1326 = vmatpush1.msra.mxu0 %v563_v11  ;;  %2020 = vmatprep.subr.mxu1 %v1495_v42  ;;  %v1596_v41 = vld [vmem:[#allocation8 + $0x5d0] sm:$0xff]  ;;  %v1591_v42 = vld [vmem:[#allocation8 + $0x5a8] sm:$0xff] }
 0x150   :  { %1327 = vmatprep.subr.mxu0 %v558_v0  ;;  %2021 = vmatpush1.msra.mxu1 %v1494_v43  ;;  %v659_v11 = vld [vmem:[#allocation5 + $0x1190] sm:$0xff]  ;;  %v654_v0 = vld [vmem:[#allocation5 + $0x1168] sm:$0xff] }
 0x151   :  { %1328 = vmatpush1.msra.mxu0 %v557_v44  ;;  %2022 = vmatprep.subr.mxu1 %v1489_v3  ;;  %v1590_v43 = vld [vmem:[#allocation8 + $0x5a0] sm:$0xff]  ;;  %v675_v44 = vlaneseq }
 0x152   :  { %1329 = vmatprep.subr.mxu0 %v552_v45  ;;  %2023 = vmatpush1.msra.mxu1 %v1488_v63  ;;  %v653_v3 = vld [vmem:[#allocation5 + $0x1160] sm:$0xff]  ;;  %v648_v63 = vld [vmem:[#allocation5 + $0x1138] sm:$0xff] }
 0x153   :  { %1330 = vmatpush1.msra.mxu0 %v551_v46  ;;  %2024 = vmatprep.subr.mxu1 %v1483_v18  ;;  %v1585_v45 = vld [vmem:[#allocation8 + $0x578] sm:$0xff]  ;;  %v1584_v46 = vld [vmem:[#allocation8 + $0x570] sm:$0xff] }
 0x154   :  { %1331 = vmatprep.subr.mxu0 %v546_v56  ;;  %2025 = vmatpush1.msra.mxu1 %v1482_v47  ;;  %v647_v18 = vld [vmem:[#allocation5 + $0x1130] sm:$0xff]  ;;  %v642_v47 = vld [vmem:[#allocation5 + $0x1108] sm:$0xff] }
 0x155   :  { %1332 = vmatpush1.msra.mxu0 %v545_v48  ;;  %2026 = vmatprep.subr.mxu1 %v1477_v49  ;;  %v1579_v56 = vld [vmem:[#allocation8 + $0x548] sm:$0xff]  ;;  %v1578_v48 = vld [vmem:[#allocation8 + $0x540] sm:$0xff]  ;;  %v3001_v49 = vshrl.u32 %v675_v44, 7 }
 0x156   :  { %1333 = vmatprep.subr.mxu0 %v540_v21  ;;  %2027 = vmatpush1.msra.mxu1 %v1476_v50  ;;  %v641_v21 = vld [vmem:[#allocation5 + $0x1100] sm:$0xff] }
 0x157   :  { %1334 = vmatpush1.msra.mxu0 %v539_v51  ;;  %2028 = vmatprep.subr.mxu1 %v1471_v52  ;;  %v1573_v50 = vld [vmem:[#allocation8 + $0x518] sm:$0xff]  ;;  %v1572_v52 = vld [vmem:[#allocation8 + $0x510] sm:$0xff] }
 0x158   :  { %1335 = vmatprep.subr.mxu0 %v534_v53  ;;  %2029 = vmatpush1.msra.mxu1 %v1470_v54  ;;  %v636_v51 = vld [vmem:[#allocation5 + $0x10d8] sm:$0xff]  ;;  %v3003_v53 = vpop.f32.mrf.mxu0  ;;  %v635_v54 = vld [vmem:[#allocation5 + $0x10d0] sm:$0xff] }
 0x159   :  { %1336 = vmatpush1.msra.mxu0 %v533_v55  ;;  %2030 = vmatprep.subr.mxu1 %v1465_v57  ;;  %v1567_v55 = vld [vmem:[#allocation8 + $0x4e8] sm:$0xff] }
 0x15a   :  { %1337 = vmatprep.subr.mxu0 %v528_v58  ;;  %2031 = vmatpush1.msra.mxu1 %v1464_v61  ;;  %v630_v57 = vld [vmem:[#allocation5 + $0x10a8] sm:$0xff]  ;;  %v681_v61 = vsub.s32 1, %v3001_v49 }
 0x15b   :  { %1338 = vmatpush1.msra.mxu0 %v527_v62  ;;  %2032 = vmatprep.subr.mxu1 %v1459_v1  ;;  %v1566_v58 = vld [vmem:[#allocation8 + $0x4e0] sm:$0xff]  ;;  %v1561_v1 = vld [vmem:[#allocation8 + $0x4b8] sm:$0xff] }
 0x15c   :  { %1339 = vmatprep.subr.mxu0 %v522_v2  ;;  %2033 = vmatpush1.msra.mxu1 %v1458_v4  ;;  %v629_v62 = vld [vmem:[#allocation5 + $0x10a0] sm:$0xff]  ;;  %v624_v4 = vld [vmem:[#allocation5 + $0x1078] sm:$0xff] }
 0x15d   :  { %1340 = vmatpush1.msra.mxu0 %v521_v5  ;;  %2034 = vmatprep.subr.mxu1 %v1453_v6  ;;  %v3006_v2 = vld [vmem:[#allocation7] sm:$0x3f]  ;;  %v1560_v5 = vld [vmem:[#allocation8 + $0x4b0] sm:$0xff]  ;;  %v773_v6 = vpop.f32.mrf.mxu0 }
 0x15e   :  { %1341 = vmatprep.subr.mxu0 %v516_v7  ;;  %2035 = vmatpush1.msra.mxu1 %v1452_v8  ;;  %v623_v7 = vld [vmem:[#allocation5 + $0x1070] sm:$0xff] }
 0x15f   :  { %1342 = vmatpush1.msra.mxu0 %v515_v10  ;;  %2036 = vmatprep.subr.mxu1 %v1447_v12  ;;  %v1555_v8 = vld [vmem:[#allocation8 + $0x488] sm:$0xff]  ;;  %v1554_v12 = vld [vmem:[#allocation8 + $0x480] sm:$0xff] }
 0x160   :  { %1343 = vmatprep.subr.mxu0 %v510_v13  ;;  %2037 = vmatpush1.msra.mxu1 %v1446_v14  ;;  %v618_v10 = vld [vmem:[#allocation5 + $0x1048] sm:$0xff]  ;;  %v682_v13 = vrot.slane %v3006_v2, %v681_v61  ;;  %v617_v14 = vld [vmem:[#allocation5 + $0x1040] sm:$0xff] }
 0x161   :  { %1344 = vmatpush1.msra.mxu0 %v509_v15  ;;  %2038 = vmatprep.subr.mxu1 %v1441_v16  ;;  %v1549_v15 = vld [vmem:[#allocation8 + $0x458] sm:$0xff] }
 0x162   :  { %1345 = vmatprep.subr.mxu0 %v504_v17  ;;  %2039 = vmatpush1.msra.mxu1 %v1440_v19  ;;  %v3013_v17 = vpop.f32.mrf.mxu1  ;;  %v612_v19 = vld [vmem:[#allocation5 + $0x1018] sm:$0xff] }
 0x163   :  { %1346 = vmatpush1.msra.mxu0 %v503_v20  ;;  %2040 = vmatprep.subr.mxu1 %v1435_v22  ;;  %v611_v20 = vld [vmem:[#allocation5 + $0x1010] sm:$0xff] }
 0x164   :  { %1347 = vmatprep.subr.mxu0 %v498_v23  ;;  %2041 = vmatpush1.msra.mxu1 %v1434_v24  ;;  %v1548_v22 = vld [vmem:[#allocation8 + $0x450] sm:$0xff]  ;;  %v606_v23 = vld [vmem:[#allocation5 + $0xfe8] sm:$0xff] }
 0x165   :  { %1348 = vmatpush1.msra.mxu0 %v497_v25  ;;  %2042 = vmatprep.subr.mxu1 %v1429_v26  ;;  %v677_v25 = vsub.s32 0, %v3001_v49  ;;  %v774_v26 = vadd.f32 %v773_v6, %v682_v13 }
 0x166   :  { %1349 = vmatprep.subr.mxu0 %v492_v60  ;;  %2043 = vmatpush1.msra.mxu1 %v1428_v27  ;;  %v605_v60 = vld [vmem:[#allocation5 + $0xfe0] sm:$0xff]  ;;  %v2754_v27 = vld [vmem:[#allocation2 + $0x38] sm:$0xff] }
 0x167   :  { %1350 = vmatpush1.msra.mxu0 %v491_v28  ;;  %2044 = vmatprep.subr.mxu1 %v1423_v29  ;;  %v1543_v28 = vld [vmem:[#allocation8 + $0x428] sm:$0xff]  ;;  %v850_v29 = vpop.f32.mrf.mxu1 }
 0x168   :  { %1351 = vmatprep.subr.mxu0 %v486_v30  ;;  %2045 = vmatpush1.msra.mxu1 %v1422_v31  ;;  %v600_v30 = vld [vmem:[#allocation5 + $0xfb8] sm:$0xff]  ;;  %v599_v31 = vld [vmem:[#allocation5 + $0xfb0] sm:$0xff] }
 0x169   :  { %1352 = vmatpush1.msra.mxu0 %v485_v32  ;;  %2046 = vmatprep.subr.mxu1 %v1417_v33  ;;  %v2755_v32 = vld [vmem:[#allocation2 + $0x30] sm:$0xff]  ;;  %v1542_v33 = vld [vmem:[#allocation8 + $0x420] sm:$0xff] }
 0x16a   :  { %1353 = vmatprep.subr.mxu0 %v672_v59  ;;  %2047 = vmatpush1.msra.mxu1 %v1416_v34  ;;  %v594_v59 = vld [vmem:[#allocation5 + $0xf88] sm:$0xff] }
 0x16b   :  { %1354 = vmatpush2.msra.mxu0 %v671_v35  ;;  %2048 = vmatprep.subr.mxu1 %v1411_v36  ;;  %v678_v35 = vrot.slane %v3006_v2, %v677_v25  ;;  %v851_v36 = vadd.f32 %v850_v29, %v774_v26  ;;  %v1675_v26 = vld [vmem:[#allocation8 + $0x848] sm:$0xff]  ;;  %v1669_v29 = vld [vmem:[#allocation8 + $0x818] sm:$0xff] }
 0x16c   :  { %1355 = vmatprep.subr.mxu0 %v666_v37  ;;  %2049 = vmatpush1.msra.mxu1 %v1410_v38  ;;  %v2756_v37 = vld [vmem:[#allocation2 + $0x48] sm:$0xff]  ;;  %v593_v38 = vld [vmem:[#allocation5 + $0xf80] sm:$0xff] }
 0x16d   :  { %1356 = vmatpush2.msra.mxu0 %v665_v39  ;;  %2050 = vmatprep.subr.mxu1 %v1597_v40  ;;  %v1537_v39 = vld [vmem:[#allocation8 + $0x3f8] sm:$0xff] }
 0x16e   :  { %1357 = vmatprep.subr.mxu0 %v660_v9  ;;  %2051 = vmatpush2.msra.mxu1 %v1596_v41  ;;  %v588_v9 = vld [vmem:[#allocation5 + $0xf58] sm:$0xff] }
 0x16f   :  { %1358 = vmatpush2.msra.mxu0 %v659_v11  ;;  %2052 = vmatprep.subr.mxu1 %v1591_v42  ;;  %v1536_v41 = vld [vmem:[#allocation8 + $0x3f0] sm:$0xff]  ;;  %v2757_v42 = vld [vmem:[#allocation2 + $0x40] sm:$0xff] }
 0x170   :  { %1359 = vmatprep.subr.mxu0 %v654_v0  ;;  %2053 = vmatpush2.msra.mxu1 %v1590_v43  ;;  %v587_v0 = vld [vmem:[#allocation5 + $0xf50] sm:$0xff] }
 0x171   :  { %1360 = vmatpush2.msra.mxu0 %v653_v3  ;;  %2054 = vmatprep.subr.mxu1 %v1585_v45  ;;  %v1531_v43 = vld [vmem:[#allocation8 + $0x3c8] sm:$0xff] }
 0x172   :  { %1361 = vmatprep.subr.mxu0 %v648_v63  ;;  %2055 = vmatpush2.msra.mxu1 %v1584_v46  ;;  %v582_v45 = vld [vmem:[#allocation5 + $0xf28] sm:$0xff]  ;;  %v772_v63 = vadd.f32 %v3003_v53, %v678_v35 }
 0x173   :  { %1362 = vmatpush2.msra.mxu0 %v647_v18  ;;  %2056 = vmatprep.subr.mxu1 %v1579_v56  ;;  %v581_v18 = vld [vmem:[#allocation5 + $0xf20] sm:$0xff] }
 0x174   :  { %1363 = vmatprep.subr.mxu0 %v642_v47  ;;  %2057 = vmatpush2.msra.mxu1 %v1578_v48  ;;  %v1530_v56 = vld [vmem:[#allocation8 + $0x3c0] sm:$0xff]  ;;  %v1525_v47 = vld [vmem:[#allocation8 + $0x398] sm:$0xff] }
 0x175   :  { %1364 = vmatpush2.msra.mxu0 %v641_v21  ;;  %2058 = vmatprep.subr.mxu1 %v1573_v50  ;;  %v2758_v21 = vld [vmem:[#allocation2 + $0x28] sm:$0xff]  ;;  %v1524_v50 = vld [vmem:[#allocation8 + $0x390] sm:$0xff] }
 0x176   :  { %1365 = vmatprep.subr.mxu0 %v636_v51  ;;  %2059 = vmatpush2.msra.mxu1 %v1572_v52 }
 0x177   :  { %1366 = vmatpush2.msra.mxu0 %v635_v54  ;;  %2060 = vmatprep.subr.mxu1 %v1567_v55  ;;  %v1519_v54 = vld [vmem:[#allocation8 + $0x368] sm:$0xff]  ;;  %v849_v55 = vadd.f32 %v3013_v17, %v772_v63  ;;  %v1686_v17 = vld [vmem:[#allocation8 + $0x8a0] sm:$0xff] }
 0x178   :  { %1367 = vmatprep.subr.mxu0 %v630_v57  ;;  %2061 = vmatpush2.msra.mxu1 %v1566_v58  ;;  %v2759_v58 = vld [vmem:[#allocation2 + $0x20] sm:$0xff] }
 0x179   :  { %1368 = vmatpush2.msra.mxu0 %v629_v62  ;;  %2062 = vmatprep.subr.mxu1 %v1561_v1  ;;  %v1518_v62 = vld [vmem:[#allocation8 + $0x360] sm:$0xff]  ;;  %v1693_v1 = vld [vmem:[#allocation8 + $0x8d8] sm:$0xff] }
 0x17a   :  { %1369 = vmatprep.subr.mxu0 %v624_v4  ;;  %2063 = vmatpush2.msra.mxu1 %v1560_v5  ;;  %v3011_v16 = vpop.f32.mrf.mxu0  ;;  %v2760_v4 = vld [vmem:[#allocation2 + $0x58] sm:$0xff]  ;;  %v1638_v63 = vld [vmem:[#allocation8 + $0x720] sm:$0xff] }
 0x17b   :  { %1370 = vmatpush2.msra.mxu0 %v623_v7  ;;  %2064 = vmatprep.subr.mxu1 %v1555_v8  ;;  %v778_v57 = vadd.f32 %v3011_v16, %v678_v35  ;;  %v1513_v5 = vld [vmem:[#allocation8 + $0x338] sm:$0xff]  ;;  %v1512_v8 = vld [vmem:[#allocation8 + $0x330] sm:$0xff]  ;;  %v1506_v16 = vld [vmem:[#allocation8 + $0x300] sm:$0xff] }
 0x17c   :  { %1371 = vmatprep.subr.mxu0 %v618_v10  ;;  %2065 = vmatpush2.msra.mxu1 %v1554_v12  ;;  %v779_v24 = vpop.f32.mrf.mxu0  ;;  %v1692_v10 = vld [vmem:[#allocation8 + $0x8d0] sm:$0xff]  ;;  %v1507_v12 = vld [vmem:[#allocation8 + $0x308] sm:$0xff]  ;;  %v1873_v35 = vld [vmem:[#allocation8 + $0xe78] sm:$0xff] }
 0x17d   :  { %1372 = vmatpush2.msra.mxu0 %v617_v14  ;;  %2066 = vmatprep.subr.mxu1 %v1549_v15  ;;  %v854_v40 = vpop.f32.mrf.mxu1  ;;  %v780_v3 = vadd.f32 %v779_v24, %v682_v13  ;;  %v1687_v13 = vld [vmem:[#allocation8 + $0x8a8] sm:$0xff]  ;;  %v1680_v24 = vld [vmem:[#allocation8 + $0x870] sm:$0xff] }
 0x17e   :  { %1373 = vmatprep.subr.mxu0 %v612_v19  ;;  %1237 = vmatprep.mubr.f32.mxu0 %v2754_v27  ;;  %v855_v14 = vadd.f32 %v854_v40, %v778_v57  ;;  %v2761_v15 = vld [vmem:[#allocation2 + $0x50] sm:$0xff]  ;;  %v1674_v27 = vld [vmem:[#allocation8 + $0x840] sm:$0xff] }
 0x17f   :  { %1374 = vmatpush2.msra.mxu0 %v611_v20  ;;  %2067 = vmatpush2.msra.mxu1 %v1548_v22  ;;  %v856_v46 = vpop.f32.mrf.mxu1  ;;  %v1681_v20 = vld [vmem:[#allocation8 + $0x878] sm:$0xff]  ;;  %v1651_v40 = vld [vmem:[#allocation8 + $0x788] sm:$0xff]  ;;  %v1620_v57 = vld [vmem:[#allocation8 + $0x690] sm:$0xff] }
 0x180   :  { %1375 = vmatprep.subr.mxu0 %v606_v23  ;;  %1238 = vmatmul.mubr.f32.gmra.mxu0 %v2755_v32  ;;  %v857_v52 = vadd.f32 %v856_v46, %v780_v3  ;;  %v1879_v32 = vld [vmem:[#allocation8 + $0xea8] sm:$0xff]  ;;  %v1849_v46 = vld [vmem:[#allocation8 + $0xdb8] sm:$0xff] }
 0x181   :  { %1376 = vmatpush2.msra.mxu0 %v605_v60  ;;  %2068 = vmatprep.subr.mxu1 %v1543_v28  ;;  %v925_v34 = vpop.f32.mrf.mxu0  ;;  %v1885_v60 = vld [vmem:[#allocation8 + $0xed8] sm:$0xff]  ;;  %v1884_v28 = vld [vmem:[#allocation8 + $0xed0] sm:$0xff]  ;;  %v1639_v3 = vld [vmem:[#allocation8 + $0x728] sm:$0xff] }
 0x182   :  { %1377 = vmatprep.subr.mxu0 %v600_v30  ;;  %1314 = vmatprep.mubr.f32.mxu1 %v2756_v37  ;;  %v926_v7 = vadd.f32 %v925_v34, %v849_v55  ;;  %v1662_v34 = vld [vmem:[#allocation8 + $0x7e0] sm:$0xff]  ;;  %v1872_v37 = vld [vmem:[#allocation8 + $0xe70] sm:$0xff] }
 0x183   :  { %1378 = vmatpush2.msra.mxu0 %v599_v31  ;;  %2069 = vmatpush2.msra.mxu1 %v1542_v33  ;;  %v927_v11 = vpop.f32.mrf.mxu0  ;;  %v1668_v31 = vld [vmem:[#allocation8 + $0x810] sm:$0xff]  ;;  %v1663_v33 = vld [vmem:[#allocation8 + $0x7e8] sm:$0xff] }
 0x184   :  { %1379 = vmatprep.subr.mxu0 %v594_v59  ;;  %1315 = vmatmul.mubr.f32.gmra.mxu1 %v2757_v42  ;;  %v928_v44 = vadd.f32 %v927_v11, %v851_v36  ;;  %v3027_v22 = vmax.f32 %v926_v7, 0.0  ;;  %v1878_v59 = vld [vmem:[#allocation8 + $0xea0] sm:$0xff]  ;;  %v1657_v36 = vld [vmem:[#allocation8 + $0x7b8] sm:$0xff]  ;;  %v1836_v55 = vld [vmem:[#allocation8 + $0xd50] sm:$0xff] }
 0x185   :  { %1380 = vmatpush2.msra.mxu0 %v593_v38  ;;  %2070 = vmatprep.subr.mxu1 %v1537_v39  ;;  %v1656_v38 = vld [vmem:[#allocation8 + $0x7b0] sm:$0xff]  ;;  %v1867_v39 = vld [vmem:[#allocation8 + $0xe48] sm:$0xff]  ;;  %v1861_v11 = vld [vmem:[#allocation8 + $0xe18] sm:$0xff] }
 0x186   :  { %1381 = vmatprep.subr.mxu0 %v588_v9  ;;  %2071 = vmatpush2.msra.mxu1 %v1536_v41  ;;  %v3020_v51 = vmax.f32 %v928_v44, 0.0  ;;  %v1866_v9 = vld [vmem:[#allocation8 + $0xe40] sm:$0xff]  ;;  %v1645_v42 = vld [vmem:[#allocation8 + $0x758] sm:$0xff]  ;;  %v1855_v44 = vld [vmem:[#allocation8 + $0xde8] sm:$0xff] }
 0x187   :  { %1382 = vmatpush2.msra.mxu0 %v587_v0  ;;  %2072 = vmatprep.subr.mxu1 %v1531_v43  ;;  %v931_v48 = vpop.f32.mrf.mxu0  ;;  %v1650_v41 = vld [vmem:[#allocation8 + $0x780] sm:$0xff]  ;;  %v1860_v0 = vld [vmem:[#allocation8 + $0xe10] sm:$0xff] }
 0x188   :  { %1383 = vmatprep.subr.mxu0 %v582_v45  ;;  %1385 = vmatprep.mubr.f32.mxu0 %v2758_v21  ;;  %v932_v23 = vadd.f32 %v931_v48, %v855_v14  ;;  %v1644_v43 = vld [vmem:[#allocation8 + $0x750] sm:$0xff]  ;;  %v1854_v45 = vld [vmem:[#allocation8 + $0xde0] sm:$0xff]  ;;  %v1843_v48 = vld [vmem:[#allocation8 + $0xd88] sm:$0xff] }
 0x189   :  { %1384 = vmatpush2.msra.mxu0 %v581_v18  ;;  %2073 = vmatpush2.msra.mxu1 %v1530_v56  ;;  %v933_v53 = vpop.f32.mrf.mxu0  ;;  %v1633_v18 = vld [vmem:[#allocation8 + $0x6f8] sm:$0xff]  ;;  %v1848_v56 = vld [vmem:[#allocation8 + $0xdb0] sm:$0xff]  ;;  %v1627_v21 = vld [vmem:[#allocation8 + $0x6c8] sm:$0xff] }
 0x18a   :  { %1386 = vmatmul.mubr.f32.vlgmr.msra.gmra.mxu0 %v2759_v58  ;;  %2074 = vmatprep.subr.mxu1 %v1525_v47  ;;  %v934_v6 = vadd.f32 %v933_v53, %v857_v52  ;;  %v3031_v30 = vmax.f32 %v932_v23, 0.0  ;;  %v1632_v47 = vld [vmem:[#allocation8 + $0x6f0] sm:$0xff]  ;;  %v1626_v52 = vld [vmem:[#allocation8 + $0x6c0] sm:$0xff]  ;;  %v1621_v53 = vld [vmem:[#allocation8 + $0x698] sm:$0xff] }
 0x18b   :  { %2075 = vmatpush2.msra.mxu1 %v1524_v50  ;;  %1391 = vmatprep.mubr.f32.mxu0 %v2760_v4  ;;  %v1842_v50 = vld [vmem:[#allocation8 + $0xd80] sm:$0xff]  ;;  %v1831_v58 = vld [vmem:[#allocation8 + $0xd28] sm:$0xff]  ;;  %v1824_v7 = vld [vmem:[#allocation8 + $0xcf0] sm:$0xff] }
 0x18c   :  { %2076 = vmatprep.subr.mxu1 %v1519_v54  ;;  %2082 = vmatprep.mubr.f32.mxu1 %v3020_v51  ;;  %v3025_v19 = vmax.f32 %v934_v6, 0.0  ;;  %v1837_v54 = vld [vmem:[#allocation8 + $0xd58] sm:$0xff]  ;;  %v1614_v4 = vld [vmem:[#allocation8 + $0x660] sm:$0xff]  ;;  %v1807_v23 = vld [vmem:[#allocation8 + $0xc68] sm:$0xff] }
 0x18d   :  { %2077 = vmatpush2.msra.mxu1 %v1518_v62  ;;  %2095 = vmatprep.subr.mxu0 %v1693_v1  ;;  %v1615_v62 = vld [vmem:[#allocation8 + $0x668] sm:$0xff]  ;;  %v1830_v1 = vld [vmem:[#allocation8 + $0xd20] sm:$0xff]  ;;  %v1609_v6 = vld [vmem:[#allocation8 + $0x638] sm:$0xff] }
 0x18e   :  { %1392 = vmatmul.mubr.f32.gmra.mxu0 %v2761_v15  ;;  %2078 = vmatprep.subr.mxu1 %v1513_v5  ;;  %v1825_v5 = vld [vmem:[#allocation8 + $0xcf8] sm:$0xff]  ;;  %v1602_v14 = vld [vmem:[#allocation8 + $0x600] sm:$0xff] }
 0x18f   :  { %2079 = vmatpush2.msra.mxu1 %v1512_v8  ;;  %2096 = vmatpush1.msra.mxu0 %v1692_v10  ;;  %v1608_v8 = vld [vmem:[#allocation8 + $0x630] sm:$0xff]  ;;  %v1819_v10 = vld [vmem:[#allocation8 + $0xcc8] sm:$0xff]  ;;  %v1813_v15 = vld [vmem:[#allocation8 + $0xc98] sm:$0xff] }
 0x190   :  { %2080 = vmatprep.subr.mxu1 %v1507_v12  ;;  %2097 = vmatprep.subr.mxu0 %v1687_v13  ;;  %v1603_v12 = vld [vmem:[#allocation8 + $0x608] sm:$0xff]  ;;  %v1818_v13 = vld [vmem:[#allocation8 + $0xcc0] sm:$0xff] }
 0x191   :  { %2081 = vmatpush2.msra.mxu1 %v1506_v16  ;;  %2098 = vmatpush1.msra.mxu0 %v1686_v17  ;;  %v1789_v16 = vld [vmem:[#allocation8 + $0xbd8] sm:$0xff]  ;;  %v1812_v17 = vld [vmem:[#allocation8 + $0xc90] sm:$0xff] }
 0x192   :  { %2083 = vmatmul.mubr.f32.vlgmr.msra.gmra.mxu1 %v3027_v22  ;;  %2099 = vmatprep.subr.mxu0 %v1681_v20  ;;  %v1788_v20 = vld [vmem:[#allocation8 + $0xbd0] sm:$0xff] }
 0x193   :  { %2088 = vmatprep.mubr.f32.mxu1 %v3025_v19  ;;  %2100 = vmatpush1.msra.mxu0 %v1680_v24  ;;  %v1783_v24 = vld [vmem:[#allocation8 + $0xba8] sm:$0xff] }
 0x194   :  { %2101 = vmatprep.subr.mxu0 %v1675_v26  ;;  %2172 = vmatprep.subr.mxu1 %v1885_v60  ;;  %v1806_v26 = vld [vmem:[#allocation8 + $0xc60] sm:$0xff] }
 0x195   :  { %2102 = vmatpush1.msra.mxu0 %v1674_v27  ;;  %2173 = vmatpush1.msra.mxu1 %v1884_v28  ;;  %v1782_v60 = vld [vmem:[#allocation8 + $0xba0] sm:$0xff]  ;;  %v1801_v27 = vld [vmem:[#allocation8 + $0xc38] sm:$0xff] }
 0x196   :  { %2089 = vmatmul.mubr.f32.gmra.mxu1 %v3031_v30  ;;  %2103 = vmatprep.subr.mxu0 %v1669_v29  ;;  %v1777_v28 = vld [vmem:[#allocation8 + $0xb78] sm:$0xff]  ;;  %v1800_v29 = vld [vmem:[#allocation8 + $0xc30] sm:$0xff] }
 0x197   :  { %2104 = vmatpush1.msra.mxu0 %v1668_v31  ;;  %2174 = vmatprep.subr.mxu1 %v1879_v32  ;;  %v1776_v31 = vld [vmem:[#allocation8 + $0xb70] sm:$0xff]  ;;  %v1795_v32 = vld [vmem:[#allocation8 + $0xc08] sm:$0xff] }
 0x198   :  { %2105 = vmatprep.subr.mxu0 %v1663_v33  ;;  %2175 = vmatpush1.msra.mxu1 %v1878_v59  ;;  %v1771_v33 = vld [vmem:[#allocation8 + $0xb48] sm:$0xff]  ;;  %v1794_v59 = vld [vmem:[#allocation8 + $0xc00] sm:$0xff] }
 0x199   :  { %2106 = vmatpush1.msra.mxu0 %v1662_v34  ;;  %2176 = vmatprep.subr.mxu1 %v1873_v35  ;;  %v1770_v34 = vld [vmem:[#allocation8 + $0xb40] sm:$0xff]  ;;  %v1981_v35 = vld [vmem:[#allocation8 + $0x11d8] sm:$0xff] }
 0x19a   :  { %2107 = vmatprep.subr.mxu0 %v1657_v36  ;;  %2177 = vmatpush1.msra.mxu1 %v1872_v37  ;;  %v1765_v36 = vld [vmem:[#allocation8 + $0xb18] sm:$0xff]  ;;  %v1980_v37 = vld [vmem:[#allocation8 + $0x11d0] sm:$0xff] }
 0x19b   :  { %2108 = vmatpush1.msra.mxu0 %v1656_v38  ;;  %2178 = vmatprep.subr.mxu1 %v1867_v39  ;;  %v1764_v38 = vld [vmem:[#allocation8 + $0xb10] sm:$0xff]  ;;  %v1975_v39 = vld [vmem:[#allocation8 + $0x11a8] sm:$0xff] }
 0x19c   :  { %2109 = vmatprep.subr.mxu0 %v1651_v40  ;;  %2179 = vmatpush1.msra.mxu1 %v1866_v9  ;;  %v1759_v40 = vld [vmem:[#allocation8 + $0xae8] sm:$0xff]  ;;  %v1974_v9 = vld [vmem:[#allocation8 + $0x11a0] sm:$0xff] }
 0x19d   :  { %2110 = vmatpush1.msra.mxu0 %v1650_v41  ;;  %2180 = vmatprep.subr.mxu1 %v1861_v11  ;;  %v1758_v41 = vld [vmem:[#allocation8 + $0xae0] sm:$0xff]  ;;  %v1969_v11 = vld [vmem:[#allocation8 + $0x1178] sm:$0xff] }
 0x19e   :  { %2111 = vmatprep.subr.mxu0 %v1645_v42  ;;  %2181 = vmatpush1.msra.mxu1 %v1860_v0  ;;  %v1753_v42 = vld [vmem:[#allocation8 + $0xab8] sm:$0xff]  ;;  %v1968_v0 = vld [vmem:[#allocation8 + $0x1170] sm:$0xff] }
 0x19f   :  { %2112 = vmatpush1.msra.mxu0 %v1644_v43  ;;  %2182 = vmatprep.subr.mxu1 %v1855_v44  ;;  %v1752_v43 = vld [vmem:[#allocation8 + $0xab0] sm:$0xff]  ;;  %v1963_v44 = vld [vmem:[#allocation8 + $0x1148] sm:$0xff] }
 0x1a0   :  { %2113 = vmatprep.subr.mxu0 %v1639_v3  ;;  %2183 = vmatpush1.msra.mxu1 %v1854_v45  ;;  %v1747_v3 = vld [vmem:[#allocation8 + $0xa88] sm:$0xff]  ;;  %v1962_v45 = vld [vmem:[#allocation8 + $0x1140] sm:$0xff] }
 0x1a1   :  { %2114 = vmatpush1.msra.mxu0 %v1638_v63  ;;  %2184 = vmatprep.subr.mxu1 %v1849_v46  ;;  %v1746_v63 = vld [vmem:[#allocation8 + $0xa80] sm:$0xff]  ;;  %v685_v46 = vsub.s32 2, %v3001_v49 }
 0x1a2   :  { %2115 = vmatprep.subr.mxu0 %v1633_v18  ;;  %2185 = vmatpush1.msra.mxu1 %v1848_v56  ;;  %v1002_v18 = vpop.f32.mrf.mxu1  ;;  %v1957_v56 = vld [vmem:[#allocation8 + $0x1118] sm:$0xff] }
 0x1a3   :  { %2116 = vmatpush1.msra.mxu0 %v1632_v47  ;;  %2186 = vmatprep.subr.mxu1 %v1843_v48  ;;  %v1741_v47 = vld [vmem:[#allocation8 + $0xa58] sm:$0xff]  ;;  %v1956_v48 = vld [vmem:[#allocation8 + $0x1110] sm:$0xff] }
 0x1a4   :  { %2117 = vmatprep.subr.mxu0 %v1627_v21  ;;  %2187 = vmatpush1.msra.mxu1 %v1842_v50  ;;  %v1740_v21 = vld [vmem:[#allocation8 + $0xa50] sm:$0xff]  ;;  %v689_v50 = vsub.s32 3, %v3001_v49 }
 0x1a5   :  { %2118 = vmatpush1.msra.mxu0 %v1626_v52  ;;  %2188 = vmatprep.subr.mxu1 %v1837_v54  ;;  %v1951_v52 = vld [vmem:[#allocation8 + $0x10e8] sm:$0xff] }
 0x1a6   :  { %2119 = vmatprep.subr.mxu0 %v1621_v53  ;;  %2189 = vmatpush1.msra.mxu1 %v1836_v55  ;;  %v1735_v54 = vld [vmem:[#allocation8 + $0xa28] sm:$0xff]  ;;  %v1950_v53 = vld [vmem:[#allocation8 + $0x10e0] sm:$0xff]  ;;  %v686_v55 = vrot.slane %v3006_v2, %v685_v46 }
 0x1a7   :  { %2120 = vmatpush1.msra.mxu0 %v1620_v57  ;;  %2190 = vmatprep.subr.mxu1 %v1831_v58  ;;  %v1004_v57 = vpop.f32.mrf.mxu1  ;;  %v1734_v58 = vld [vmem:[#allocation8 + $0xa20] sm:$0xff] }
 0x1a8   :  { %2121 = vmatprep.subr.mxu0 %v1615_v62  ;;  %2191 = vmatpush1.msra.mxu1 %v1830_v1  ;;  %v1945_v62 = vld [vmem:[#allocation8 + $0x10b8] sm:$0xff] }
 0x1a9   :  { %2122 = vmatpush1.msra.mxu0 %v1614_v4  ;;  %2192 = vmatprep.subr.mxu1 %v1825_v5  ;;  %v1729_v1 = vld [vmem:[#allocation8 + $0x9f8] sm:$0xff]  ;;  %v1944_v4 = vld [vmem:[#allocation8 + $0x10b0] sm:$0xff]  ;;  %v690_v5 = vrot.slane %v3006_v2, %v689_v50 }
 0x1aa   :  { %2123 = vmatprep.subr.mxu0 %v1609_v6  ;;  %2193 = vmatpush1.msra.mxu1 %v1824_v7  ;;  %v1728_v6 = vld [vmem:[#allocation8 + $0x9f0] sm:$0xff]  ;;  %v1939_v7 = vld [vmem:[#allocation8 + $0x1088] sm:$0xff] }
 0x1ab   :  { %2124 = vmatpush1.msra.mxu0 %v1608_v8  ;;  %2194 = vmatprep.subr.mxu1 %v1819_v10  ;;  %v1723_v8 = vld [vmem:[#allocation8 + $0x9c8] sm:$0xff]  ;;  %v1938_v10 = vld [vmem:[#allocation8 + $0x1080] sm:$0xff] }
 0x1ac   :  { %2125 = vmatprep.subr.mxu0 %v1603_v12  ;;  %2195 = vmatpush1.msra.mxu1 %v1818_v13  ;;  %v1003_v12 = vadd.f32 %v1002_v18, %v686_v55  ;;  %v1903_v18 = vld [vmem:[#allocation8 + $0xf68] sm:$0xff] }
 0x1ad   :  { %2126 = vmatpush1.msra.mxu0 %v1602_v14  ;;  %2196 = vmatprep.subr.mxu1 %v1813_v15  ;;  %v1722_v14 = vld [vmem:[#allocation8 + $0x9c0] sm:$0xff]  ;;  %v1933_v15 = vld [vmem:[#allocation8 + $0x1058] sm:$0xff] }
 0x1ae   :  { %2127 = vmatprep.subr.mxu0 %v1789_v16  ;;  %2197 = vmatpush1.msra.mxu1 %v1812_v17  ;;  %v1717_v16 = vld [vmem:[#allocation8 + $0x998] sm:$0xff]  ;;  %v1932_v17 = vld [vmem:[#allocation8 + $0x1050] sm:$0xff] }
 0x1af   :  { %2128 = vmatpush2.msra.mxu0 %v1788_v20  ;;  %2198 = vmatprep.subr.mxu1 %v1807_v23  ;;  %v1005_v20 = vadd.f32 %v1004_v57, %v690_v5  ;;  %v1716_v23 = vld [vmem:[#allocation8 + $0x990] sm:$0xff] }
 0x1b0   :  { %2129 = vmatprep.subr.mxu0 %v1783_v24  ;;  %2199 = vmatpush1.msra.mxu1 %v1806_v26  ;;  %v1927_v24 = vld [vmem:[#allocation8 + $0x1028] sm:$0xff] }
 0x1b1   :  { %2130 = vmatpush2.msra.mxu0 %v1782_v60  ;;  %2200 = vmatprep.subr.mxu1 %v1801_v27  ;;  %v1711_v60 = vld [vmem:[#allocation8 + $0x968] sm:$0xff]  ;;  %v1926_v27 = vld [vmem:[#allocation8 + $0x1020] sm:$0xff] }
 0x1b2   :  { %2131 = vmatprep.subr.mxu0 %v1777_v28  ;;  %2201 = vmatpush1.msra.mxu1 %v1800_v29  ;;  %v1710_v29 = vld [vmem:[#allocation8 + $0x960] sm:$0xff] }
 0x1b3   :  { %2132 = vmatpush2.msra.mxu0 %v1776_v31  ;;  %2202 = vmatprep.subr.mxu1 %v1795_v32  ;;  %v1921_v31 = vld [vmem:[#allocation8 + $0xff8] sm:$0xff] }
 0x1b4   :  { %2133 = vmatprep.subr.mxu0 %v1771_v33  ;;  %2203 = vmatpush1.msra.mxu1 %v1794_v59  ;;  %v1705_v33 = vld [vmem:[#allocation8 + $0x938] sm:$0xff]  ;;  %v1920_v59 = vld [vmem:[#allocation8 + $0xff0] sm:$0xff] }
 0x1b5   :  { %2134 = vmatpush2.msra.mxu0 %v1770_v34  ;;  %2204 = vmatprep.subr.mxu1 %v1981_v35 }
 0x1b6   :  { %2135 = vmatprep.subr.mxu0 %v1765_v36  ;;  %2205 = vmatpush2.msra.mxu1 %v1980_v37  ;;  %v1704_v37 = vld [vmem:[#allocation8 + $0x930] sm:$0xff] }
 0x1b7   :  { %2136 = vmatpush2.msra.mxu0 %v1764_v38  ;;  %2206 = vmatprep.subr.mxu1 %v1975_v39  ;;  %v1915_v38 = vld [vmem:[#allocation8 + $0xfc8] sm:$0xff] }
 0x1b8   :  { %2137 = vmatprep.subr.mxu0 %v1759_v40  ;;  %2207 = vmatpush2.msra.mxu1 %v1974_v9  ;;  %v1699_v39 = vld [vmem:[#allocation8 + $0x908] sm:$0xff]  ;;  %v1914_v40 = vld [vmem:[#allocation8 + $0xfc0] sm:$0xff] }
 0x1b9   :  { %2138 = vmatpush2.msra.mxu0 %v1758_v41  ;;  %2208 = vmatprep.subr.mxu1 %v1969_v11 }
 0x1ba   :  { %2139 = vmatprep.subr.mxu0 %v1753_v42  ;;  %2209 = vmatpush2.msra.mxu1 %v1968_v0  ;;  %v1698_v42 = vld [vmem:[#allocation8 + $0x900] sm:$0xff]  ;;  %v1909_v0 = vld [vmem:[#allocation8 + $0xf98] sm:$0xff] }
 0x1bb   :  { %2140 = vmatpush2.msra.mxu0 %v1752_v43  ;;  %2210 = vmatprep.subr.mxu1 %v1963_v44 }
 0x1bc   :  { %2141 = vmatprep.subr.mxu0 %v1747_v3  ;;  %2211 = vmatpush2.msra.mxu1 %v1962_v45  ;;  %v1503_v3 = vld [vmem:[#allocation8 + $0x2e8] sm:$0xff]  ;;  %v1908_v45 = vld [vmem:[#allocation8 + $0xf90] sm:$0xff] }
 0x1bd   :  { %2142 = vmatpush2.msra.mxu0 %v1746_v63  ;;  %2212 = vmatprep.subr.mxu1 %v1957_v56 }
 0x1be   :  { %2143 = vmatprep.subr.mxu0 %v1741_v47  ;;  %2213 = vmatpush2.msra.mxu1 %v1956_v48  ;;  %v1902_v48 = vld [vmem:[#allocation8 + $0xf60] sm:$0xff] }
 0x1bf   :  { %2144 = vmatpush2.msra.mxu0 %v1740_v21  ;;  %2214 = vmatprep.subr.mxu1 %v1951_v52 }
 0x1c0   :  { %2145 = vmatprep.subr.mxu0 %v1735_v54  ;;  %2215 = vmatpush2.msra.mxu1 %v1950_v53  ;;  %v1502_v53 = vld [vmem:[#allocation8 + $0x2e0] sm:$0xff] }
 0x1c1   :  { %2146 = vmatpush2.msra.mxu0 %v1734_v58  ;;  %2216 = vmatprep.subr.mxu1 %v1945_v62  ;;  %v1497_v58 = vld [vmem:[#allocation8 + $0x2b8] sm:$0xff]  ;;  %v1896_v62 = vld [vmem:[#allocation8 + $0xf30] sm:$0xff] }
 0x1c2   :  { %2147 = vmatprep.subr.mxu0 %v1729_v1  ;;  %v1008_v13 = vpop.f32.mrf.mxu1  ;;  %2217 = vmatpush2.msra.mxu1 %v1944_v4  ;;  %v1496_v4 = vld [vmem:[#allocation8 + $0x2b0] sm:$0xff] }
 0x1c3   :  { %2148 = vmatpush2.msra.mxu0 %v1728_v6  ;;  %2218 = vmatprep.subr.mxu1 %v1939_v7  ;;  %v1009_v34 = vadd.f32 %v1008_v13, %v686_v55  ;;  %v1897_v55 = vld [vmem:[#allocation8 + $0xf38] sm:$0xff]  ;;  %v1491_v7 = vld [vmem:[#allocation8 + $0x288] sm:$0xff] }
 0x1c4   :  { %2149 = vmatprep.subr.mxu0 %v1723_v8  ;;  %v1010_v2 = vpop.f32.mrf.mxu1  ;;  %2219 = vmatpush2.msra.mxu1 %v1938_v10  ;;  %v1890_v8 = vld [vmem:[#allocation8 + $0xf00] sm:$0xff] }
 0x1c5   :  { %v1079_v26 = vpop.f32.mrf.mxu0  ;;  %2150 = vmatpush2.msra.mxu0 %v1722_v14  ;;  %2220 = vmatprep.subr.mxu1 %v1933_v15  ;;  %v1011_v9 = vadd.f32 %v1010_v2, %v690_v5  ;;  %v1891_v5 = vld [vmem:[#allocation8 + $0xf08] sm:$0xff]  ;;  %v1485_v14 = vld [vmem:[#allocation8 + $0x258] sm:$0xff]  ;;  %v1484_v15 = vld [vmem:[#allocation8 + $0x250] sm:$0xff] }
 0x1c6   :  { %v1080_v28 = vadd.f32 %v1079_v26, %v1003_v12  ;;  %2151 = vmatprep.subr.mxu0 %v1717_v16  ;;  %2221 = vmatpush2.msra.mxu1 %v1932_v17  ;;  %v1490_v12 = vld [vmem:[#allocation8 + $0x280] sm:$0xff]  ;;  %v1479_v16 = vld [vmem:[#allocation8 + $0x228] sm:$0xff]  ;;  %v1473_v2 = vld [vmem:[#allocation8 + $0x1f8] sm:$0xff] }
 0x1c7   :  { %v1081_v32 = vpop.f32.mrf.mxu0  ;;  %2152 = vmatpush2.msra.mxu0 %v1716_v23  ;;  %2222 = vmatprep.subr.mxu1 %v1927_v24  ;;  %v1695_v17 = vld [vmem:[#allocation8 + $0x8e8] sm:$0xff]  ;;  %v1472_v23 = vld [vmem:[#allocation8 + $0x1f0] sm:$0xff]  ;;  %v1466_v26 = vld [vmem:[#allocation8 + $0x1c0] sm:$0xff] }
 0x1c8   :  { %v1082_v35 = vadd.f32 %v1081_v32, %v1005_v20  ;;  %v1156_v36 = vpop.f32.mrf.mxu1  ;;  %2153 = vmatprep.subr.mxu0 %v1711_v60  ;;  %2223 = vmatpush2.msra.mxu1 %v1926_v27  ;;  %v1478_v20 = vld [vmem:[#allocation8 + $0x220] sm:$0xff]  ;;  %v1467_v24 = vld [vmem:[#allocation8 + $0x1c8] sm:$0xff]  ;;  %v1461_v60 = vld [vmem:[#allocation8 + $0x198] sm:$0xff] }
 0x1c9   :  { %2154 = vmatpush2.msra.mxu0 %v1710_v29  ;;  %2224 = vmatprep.subr.mxu1 %v1921_v31  ;;  %v1157_v41 = vadd.f32 %v1156_v36, %v1080_v28  ;;  %v1460_v27 = vld [vmem:[#allocation8 + $0x190] sm:$0xff]  ;;  %v1455_v28 = vld [vmem:[#allocation8 + $0x168] sm:$0xff]  ;;  %v1454_v29 = vld [vmem:[#allocation8 + $0x160] sm:$0xff] }
 0x1ca   :  { %v1158_v11 = vpop.f32.mrf.mxu1  ;;  %2155 = vmatprep.subr.mxu0 %v1705_v33  ;;  %2225 = vmatpush2.msra.mxu1 %v1920_v59  ;;  %v1449_v31 = vld [vmem:[#allocation8 + $0x138] sm:$0xff]  ;;  %v1448_v32 = vld [vmem:[#allocation8 + $0x130] sm:$0xff]  ;;  %v1443_v33 = vld [vmem:[#allocation8 + $0x108] sm:$0xff] }
 0x1cb   :  { %v1085_v43 = vpop.f32.mrf.mxu0  ;;  %v1159_v44 = vadd.f32 %v1158_v11, %v1082_v35  ;;  %2156 = vmatpush2.msra.mxu0 %v1704_v37  ;;  %2226 = vmatprep.subr.mxu1 %v1915_v38  ;;  %v3044_v21 = vmax.f32 %v1157_v41, 0.0  ;;  %v1442_v59 = vld [vmem:[#allocation8 + $0x100] sm:$0xff]  ;;  %v1436_v35 = vld [vmem:[#allocation8 + $0xd0] sm:$0xff]  ;;  %v1431_v36 = vld [vmem:[#allocation8 + $0xa8] sm:$0xff] }
 0x1cc   :  { %v1086_v63 = vadd.f32 %v1085_v43, %v1009_v34  ;;  %2157 = vmatprep.subr.mxu0 %v1699_v39  ;;  %2227 = vmatpush2.msra.mxu1 %v1914_v40  ;;  %v1437_v34 = vld [vmem:[#allocation8 + $0xd8] sm:$0xff]  ;;  %v1430_v37 = vld [vmem:[#allocation8 + $0xa0] sm:$0xff]  ;;  %v1424_v39 = vld [vmem:[#allocation8 + $0x70] sm:$0xff] }
 0x1cd   :  { %v3042_v56 = vmax.f32 %v1159_v44, 0.0  ;;  %v1087_v47 = vpop.f32.mrf.mxu0  ;;  %2158 = vmatpush2.msra.mxu0 %v1698_v42  ;;  %2228 = vmatprep.subr.mxu1 %v1909_v0  ;;  %v1425_v38 = vld [vmem:[#allocation8 + $0x78] sm:$0xff]  ;;  %v1419_v40 = vld [vmem:[#allocation8 + $0x48] sm:$0xff]  ;;  %v1412_v11 = vld [vmem:[#allocation8 + $0x10] sm:$0xff] }
 0x1ce   :  { %v1088_v52 = vadd.f32 %v1087_v47, %v1011_v9  ;;  %v1162_v54 = vpop.f32.mrf.mxu1  ;;  %2249 = vmatprep.subr.mxu0 %v1503_v3  ;;  %2229 = vmatpush2.msra.mxu1 %v1908_v45  ;;  %v1418_v9 = vld [vmem:[#allocation8 + $0x40] sm:$0xff]  ;;  %v1413_v41 = vld [vmem:[#allocation8 + $0x18] sm:$0xff]  ;;  %v1599_v42 = vld [vmem:[#allocation8 + $0x5e8] sm:$0xff] }
 0x1cf   :  { %v1163_v57 = vadd.f32 %v1162_v54, %v1086_v63  ;;  %2159 = vmatprep.mubr.f32.mxu0 %v3042_v56  ;;  %2230 = vmatprep.subr.mxu1 %v1903_v18  ;;  %v1598_v0 = vld [vmem:[#allocation8 + $0x5e0] sm:$0xff]  ;;  %v1593_v43 = vld [vmem:[#allocation8 + $0x5b8] sm:$0xff]  ;;  %v1592_v44 = vld [vmem:[#allocation8 + $0x5b0] sm:$0xff] }
 0x1d0   :  { %v1164_v1 = vpop.f32.mrf.mxu1  ;;  %2160 = vmatmul.mubr.f32.vlgmr.msra.gmra.mxu0 %v3044_v21  ;;  %2231 = vmatpush2.msra.mxu1 %v1902_v48  ;;  %v1587_v3 = vld [vmem:[#allocation8 + $0x588] sm:$0xff]  ;;  %v1586_v45 = vld [vmem:[#allocation8 + $0x580] sm:$0xff]  ;;  %v1581_v63 = vld [vmem:[#allocation8 + $0x558] sm:$0xff] }
 0x1d1   :  { %v1165_v6 = vadd.f32 %v1164_v1, %v1088_v52  ;;  %2250 = vmatpush1.msra.mxu0 %v1502_v53  ;;  %2232 = vmatprep.subr.mxu1 %v1897_v55  ;;  %v3048_v10 = vmax.f32 %v1163_v57, 0.0  ;;  %v1580_v18 = vld [vmem:[#allocation8 + $0x550] sm:$0xff]  ;;  %v1575_v47 = vld [vmem:[#allocation8 + $0x528] sm:$0xff]  ;;  %v1574_v48 = vld [vmem:[#allocation8 + $0x520] sm:$0xff] }
 0x1d2   :  { %2251 = vmatprep.subr.mxu0 %v1497_v58  ;;  %2233 = vmatpush2.msra.mxu1 %v1896_v62  ;;  %v1569_v52 = vld [vmem:[#allocation8 + $0x4f8] sm:$0xff]  ;;  %v1568_v54 = vld [vmem:[#allocation8 + $0x4f0] sm:$0xff]  ;;  %v1563_v53 = vld [vmem:[#allocation8 + $0x4c8] sm:$0xff] }
 0x1d3   :  { %v3050_v13 = vmax.f32 %v1165_v6, 0.0  ;;  %2252 = vmatpush1.msra.mxu0 %v1496_v4  ;;  %2234 = vmatprep.subr.mxu1 %v1891_v5  ;;  %v1562_v55 = vld [vmem:[#allocation8 + $0x4c0] sm:$0xff]  ;;  %v1557_v57 = vld [vmem:[#allocation8 + $0x498] sm:$0xff]  ;;  %v1556_v58 = vld [vmem:[#allocation8 + $0x490] sm:$0xff] }
 0x1d4   :  { %2253 = vmatprep.subr.mxu0 %v1491_v7  ;;  %2235 = vmatpush2.msra.mxu1 %v1890_v8  ;;  %v1551_v62 = vld [vmem:[#allocation8 + $0x468] sm:$0xff]  ;;  %v1550_v1 = vld [vmem:[#allocation8 + $0x460] sm:$0xff]  ;;  %v1545_v4 = vld [vmem:[#allocation8 + $0x438] sm:$0xff] }
 0x1d5   :  { %2165 = vmatprep.mubr.f32.mxu0 %v3050_v13  ;;  %2254 = vmatpush1.msra.mxu0 %v1490_v12  ;;  %v1544_v5 = vld [vmem:[#allocation8 + $0x430] sm:$0xff]  ;;  %v1539_v6 = vld [vmem:[#allocation8 + $0x408] sm:$0xff]  ;;  %v1538_v7 = vld [vmem:[#allocation8 + $0x400] sm:$0xff] }
 0x1d6   :  { %2166 = vmatmul.mubr.f32.gmra.mxu0 %v3048_v10  ;;  %2255 = vmatprep.subr.mxu0 %v1485_v14  ;;  %v1533_v8 = vld [vmem:[#allocation8 + $0x3d8] sm:$0xff]  ;;  %v1532_v12 = vld [vmem:[#allocation8 + $0x3d0] sm:$0xff]  ;;  %v1527_v14 = vld [vmem:[#allocation8 + $0x3a8] sm:$0xff] }
 0x1d7   :  { %2313 = vmatprep.mubr.f32.mxu0 %v3020_v51  ;;  %2256 = vmatpush1.msra.mxu0 %v1484_v15  ;;  %v1526_v15 = vld [vmem:[#allocation8 + $0x3a0] sm:$0xff] }
 0x1d8   :  { %2257 = vmatprep.subr.mxu0 %v1479_v16  ;;  %2326 = vmatprep.subr.mxu1 %v1695_v17  ;;  %v1521_v16 = vld [vmem:[#allocation8 + $0x378] sm:$0xff]  ;;  %v1520_v17 = vld [vmem:[#allocation8 + $0x370] sm:$0xff] }
 0x1d9   :  { %2258 = vmatpush1.msra.mxu0 %v1478_v20  ;;  %v1515_v20 = vld [vmem:[#allocation8 + $0x348] sm:$0xff] }
 0x1da   :  { %2259 = vmatprep.subr.mxu0 %v1473_v2  ;;  %v1514_v2 = vld [vmem:[#allocation8 + $0x340] sm:$0xff] }
 0x1db   :  { %2260 = vmatpush1.msra.mxu0 %v1472_v23  ;;  %v1509_v23 = vld [vmem:[#allocation8 + $0x318] sm:$0xff] }
 0x1dc   :  { %2261 = vmatprep.subr.mxu0 %v1467_v24  ;;  %v1508_v24 = vld [vmem:[#allocation8 + $0x310] sm:$0xff] }
 0x1dd   :  { %2262 = vmatpush1.msra.mxu0 %v1466_v26  ;;  %v1887_v26 = vld [vmem:[#allocation8 + $0xee8] sm:$0xff] }
 0x1de   :  { %2263 = vmatprep.subr.mxu0 %v1461_v60  ;;  %v1886_v60 = vld [vmem:[#allocation8 + $0xee0] sm:$0xff] }
 0x1df   :  { %2264 = vmatpush1.msra.mxu0 %v1460_v27  ;;  %v1881_v27 = vld [vmem:[#allocation8 + $0xeb8] sm:$0xff] }
 0x1e0   :  { %2265 = vmatprep.subr.mxu0 %v1455_v28  ;;  %v1880_v28 = vld [vmem:[#allocation8 + $0xeb0] sm:$0xff] }
 0x1e1   :  { %2266 = vmatpush1.msra.mxu0 %v1454_v29  ;;  %v1875_v29 = vld [vmem:[#allocation8 + $0xe88] sm:$0xff] }
 0x1e2   :  { %2267 = vmatprep.subr.mxu0 %v1449_v31  ;;  %v1874_v31 = vld [vmem:[#allocation8 + $0xe80] sm:$0xff] }
 0x1e3   :  { %2268 = vmatpush1.msra.mxu0 %v1448_v32  ;;  %v1869_v32 = vld [vmem:[#allocation8 + $0xe58] sm:$0xff] }
 0x1e4   :  { %2269 = vmatprep.subr.mxu0 %v1443_v33  ;;  %v1868_v33 = vld [vmem:[#allocation8 + $0xe50] sm:$0xff] }
 0x1e5   :  { %2270 = vmatpush1.msra.mxu0 %v1442_v59  ;;  %v1863_v59 = vld [vmem:[#allocation8 + $0xe28] sm:$0xff] }
 0x1e6   :  { %2271 = vmatprep.subr.mxu0 %v1437_v34  ;;  %v1862_v34 = vld [vmem:[#allocation8 + $0xe20] sm:$0xff] }
 0x1e7   :  { %2272 = vmatpush1.msra.mxu0 %v1436_v35  ;;  %v1857_v35 = vld [vmem:[#allocation8 + $0xdf8] sm:$0xff] }
 0x1e8   :  { %2273 = vmatprep.subr.mxu0 %v1431_v36  ;;  %v1856_v36 = vld [vmem:[#allocation8 + $0xdf0] sm:$0xff] }
 0x1e9   :  { %2274 = vmatpush1.msra.mxu0 %v1430_v37  ;;  %v1851_v37 = vld [vmem:[#allocation8 + $0xdc8] sm:$0xff] }
 0x1ea   :  { %2275 = vmatprep.subr.mxu0 %v1425_v38  ;;  %v1850_v38 = vld [vmem:[#allocation8 + $0xdc0] sm:$0xff] }
 0x1eb   :  { %2276 = vmatpush1.msra.mxu0 %v1424_v39  ;;  %v1845_v39 = vld [vmem:[#allocation8 + $0xd98] sm:$0xff] }
 0x1ec   :  { %2277 = vmatprep.subr.mxu0 %v1419_v40  ;;  %v1844_v40 = vld [vmem:[#allocation8 + $0xd90] sm:$0xff] }
 0x1ed   :  { %2278 = vmatpush1.msra.mxu0 %v1418_v9  ;;  %v1839_v9 = vld [vmem:[#allocation8 + $0xd68] sm:$0xff] }
 0x1ee   :  { %2279 = vmatprep.subr.mxu0 %v1413_v41  ;;  %v1838_v41 = vld [vmem:[#allocation8 + $0xd60] sm:$0xff] }
 0x1ef   :  { %2280 = vmatpush1.msra.mxu0 %v1412_v11  ;;  %v1833_v11 = vld [vmem:[#allocation8 + $0xd38] sm:$0xff] }
 0x1f0   :  { %2281 = vmatprep.subr.mxu0 %v1599_v42  ;;  %v1832_v42 = vld [vmem:[#allocation8 + $0xd30] sm:$0xff] }
 0x1f1   :  { %2282 = vmatpush2.msra.mxu0 %v1598_v0  ;;  %v1827_v0 = vld [vmem:[#allocation8 + $0xd08] sm:$0xff] }
 0x1f2   :  { %2283 = vmatprep.subr.mxu0 %v1593_v43  ;;  %v1826_v43 = vld [vmem:[#allocation8 + $0xd00] sm:$0xff] }
 0x1f3   :  { %2284 = vmatpush2.msra.mxu0 %v1592_v44  ;;  %v1821_v44 = vld [vmem:[#allocation8 + $0xcd8] sm:$0xff] }
 0x1f4   :  { %2285 = vmatprep.subr.mxu0 %v1587_v3  ;;  %v1820_v3 = vld [vmem:[#allocation8 + $0xcd0] sm:$0xff] }
 0x1f5   :  { %2286 = vmatpush2.msra.mxu0 %v1586_v45  ;;  %v1815_v45 = vld [vmem:[#allocation8 + $0xca8] sm:$0xff] }
 0x1f6   :  { %2287 = vmatprep.subr.mxu0 %v1581_v63  ;;  %v1814_v63 = vld [vmem:[#allocation8 + $0xca0] sm:$0xff] }
 0x1f7   :  { %2288 = vmatpush2.msra.mxu0 %v1580_v18  ;;  %v1809_v18 = vld [vmem:[#allocation8 + $0xc78] sm:$0xff] }
 0x1f8   :  { %2289 = vmatprep.subr.mxu0 %v1575_v47  ;;  %v1808_v47 = vld [vmem:[#allocation8 + $0xc70] sm:$0xff] }
 0x1f9   :  { %2290 = vmatpush2.msra.mxu0 %v1574_v48  ;;  %v1803_v48 = vld [vmem:[#allocation8 + $0xc48] sm:$0xff] }
 0x1fa   :  { %2291 = vmatprep.subr.mxu0 %v1569_v52  ;;  %v1802_v52 = vld [vmem:[#allocation8 + $0xc40] sm:$0xff] }
 0x1fb   :  { %2292 = vmatpush2.msra.mxu0 %v1568_v54  ;;  %v1797_v54 = vld [vmem:[#allocation8 + $0xc18] sm:$0xff] }
 0x1fc   :  { %2293 = vmatprep.subr.mxu0 %v1563_v53  ;;  %v1796_v53 = vld [vmem:[#allocation8 + $0xc10] sm:$0xff] }
 0x1fd   :  { %2294 = vmatpush2.msra.mxu0 %v1562_v55  ;;  %v1983_v55 = vld [vmem:[#allocation8 + $0x11e8] sm:$0xff] }
 0x1fe   :  { %2295 = vmatprep.subr.mxu0 %v1557_v57  ;;  %v1982_v57 = vld [vmem:[#allocation8 + $0x11e0] sm:$0xff] }
 0x1ff   :  { %2296 = vmatpush2.msra.mxu0 %v1556_v58  ;;  %v1977_v58 = vld [vmem:[#allocation8 + $0x11b8] sm:$0xff] }
 0x200   :  { %2297 = vmatprep.subr.mxu0 %v1551_v62  ;;  %v1976_v62 = vld [vmem:[#allocation8 + $0x11b0] sm:$0xff] }
 0x201   :  { %2298 = vmatpush2.msra.mxu0 %v1550_v1  ;;  %v1971_v1 = vld [vmem:[#allocation8 + $0x1188] sm:$0xff] }
 0x202   :  { %2299 = vmatprep.subr.mxu0 %v1545_v4  ;;  %v1970_v4 = vld [vmem:[#allocation8 + $0x1180] sm:$0xff] }
 0x203   :  { %2300 = vmatpush2.msra.mxu0 %v1544_v5  ;;  %v1965_v5 = vld [vmem:[#allocation8 + $0x1158] sm:$0xff] }
 0x204   :  { %2301 = vmatprep.subr.mxu0 %v1539_v6  ;;  %v1964_v6 = vld [vmem:[#allocation8 + $0x1150] sm:$0xff] }
 0x205   :  { %2302 = vmatpush2.msra.mxu0 %v1538_v7  ;;  %v1959_v7 = vld [vmem:[#allocation8 + $0x1128] sm:$0xff] }
 0x206   :  { %2303 = vmatprep.subr.mxu0 %v1533_v8  ;;  %v1958_v8 = vld [vmem:[#allocation8 + $0x1120] sm:$0xff] }
 0x207   :  { %2304 = vmatpush2.msra.mxu0 %v1532_v12  ;;  %v1953_v12 = vld [vmem:[#allocation8 + $0x10f8] sm:$0xff] }
 0x208   :  { %2305 = vmatprep.subr.mxu0 %v1527_v14  ;;  %v1952_v14 = vld [vmem:[#allocation8 + $0x10f0] sm:$0xff] }
 0x209   :  { %2306 = vmatpush2.msra.mxu0 %v1526_v15  ;;  %v1947_v15 = vld [vmem:[#allocation8 + $0x10c8] sm:$0xff] }
 0x20a   :  { %2307 = vmatprep.subr.mxu0 %v1521_v16  ;;  %v1946_v16 = vld [vmem:[#allocation8 + $0x10c0] sm:$0xff] }
 0x20b   :  { %2308 = vmatpush2.msra.mxu0 %v1520_v17  ;;  %v1941_v17 = vld [vmem:[#allocation8 + $0x1098] sm:$0xff] }
 0x20c   :  { %2309 = vmatprep.subr.mxu0 %v1515_v20  ;;  %v1940_v20 = vld [vmem:[#allocation8 + $0x1090] sm:$0xff] }
 0x20d   :  { %2310 = vmatpush2.msra.mxu0 %v1514_v2  ;;  %v1935_v2 = vld [vmem:[#allocation8 + $0x1068] sm:$0xff] }
 0x20e   :  { %2311 = vmatprep.subr.mxu0 %v1509_v23  ;;  %v693_v23 = vsub.s32 4, %v3001_v49 }
 0x20f   :  { %2312 = vmatpush2.msra.mxu0 %v1508_v24  ;;  %v1233_v24 = vpop.f32.mrf.mxu0 }
 0x210   :  { %2314 = vmatmul.mubr.f32.vlgmr.msra.gmra.mxu0 %v3027_v22  ;;  %2403 = vmatprep.subr.mxu0 %v1887_v26  ;;  %v1934_v26 = vld [vmem:[#allocation8 + $0x1060] sm:$0xff] }
 0x211   :  { %2319 = vmatprep.mubr.f32.mxu0 %v3025_v19  ;;  %2404 = vmatpush1.msra.mxu0 %v1886_v60  ;;  %v697_v60 = vsub.s32 5, %v3001_v49 }
 0x212   :  { %2405 = vmatprep.subr.mxu0 %v1881_v27  ;;  %v1929_v27 = vld [vmem:[#allocation8 + $0x1038] sm:$0xff] }
 0x213   :  { %2406 = vmatpush1.msra.mxu0 %v1880_v28  ;;  %v1928_v28 = vld [vmem:[#allocation8 + $0x1030] sm:$0xff] }
 0x214   :  { %2320 = vmatmul.mubr.f32.gmra.mxu0 %v3031_v30  ;;  %2407 = vmatprep.subr.mxu0 %v1875_v29  ;;  %v1923_v29 = vld [vmem:[#allocation8 + $0x1008] sm:$0xff] }
 0x215   :  { %2408 = vmatpush1.msra.mxu0 %v1874_v31  ;;  %v2762_v31 = vld [vmem:[#allocation7] sm:$0x3f] }
 0x216   :  { %2409 = vmatprep.subr.mxu0 %v1869_v32  ;;  %v694_v32 = vrot.slane %v2762_v31, %v693_v23 }
 0x217   :  { %2410 = vmatpush1.msra.mxu0 %v1868_v33  ;;  %v1235_v33 = vpop.f32.mrf.mxu0 }
 0x218   :  { %2411 = vmatprep.subr.mxu0 %v1863_v59  ;;  %v1310_v59 = vpop.f32.mrf.mxu1 }
 0x219   :  { %2412 = vmatpush1.msra.mxu0 %v1862_v34  ;;  %v1922_v34 = vld [vmem:[#allocation8 + $0x1000] sm:$0xff] }
 0x21a   :  { %2413 = vmatprep.subr.mxu0 %v1857_v35  ;;  %v698_v35 = vrot.slane %v2762_v31, %v697_v60  ;;  %v1682_v31 = vld [vmem:[#allocation8 + $0x880] sm:$0xff] }
 0x21b   :  { %2414 = vmatpush1.msra.mxu0 %v1856_v36  ;;  %v1917_v36 = vld [vmem:[#allocation8 + $0xfd8] sm:$0xff] }
 0x21c   :  { %2415 = vmatprep.subr.mxu0 %v1851_v37 }
 0x21d   :  { %2416 = vmatpush1.msra.mxu0 %v1850_v38  ;;  %v1916_v38 = vld [vmem:[#allocation8 + $0xfd0] sm:$0xff] }
 0x21e   :  { %2417 = vmatprep.subr.mxu0 %v1845_v39  ;;  %v1911_v39 = vld [vmem:[#allocation8 + $0xfa8] sm:$0xff] }
 0x21f   :  { %2418 = vmatpush1.msra.mxu0 %v1844_v40  ;;  %v1234_v40 = vadd.f32 %v1233_v24, %v694_v32  ;;  %v1688_v24 = vld [vmem:[#allocation8 + $0x8b0] sm:$0xff] }
 0x220   :  { %2419 = vmatprep.subr.mxu0 %v1839_v9  ;;  %v1312_v9 = vpop.f32.mrf.mxu1 }
 0x221   :  { %2420 = vmatpush1.msra.mxu0 %v1838_v41  ;;  %v1910_v41 = vld [vmem:[#allocation8 + $0xfa0] sm:$0xff] }
 0x222   :  { %2421 = vmatprep.subr.mxu0 %v1833_v11  ;;  %v1236_v11 = vadd.f32 %v1235_v33, %v698_v35  ;;  %v1685_v33 = vld [vmem:[#allocation8 + $0x898] sm:$0xff] }
 0x223   :  { %2422 = vmatpush1.msra.mxu0 %v1832_v42  ;;  %v1905_v42 = vld [vmem:[#allocation8 + $0xf78] sm:$0xff] }
 0x224   :  { %2423 = vmatprep.subr.mxu0 %v1827_v0 }
 0x225   :  { %2424 = vmatpush1.msra.mxu0 %v1826_v43 }
 0x226   :  { %2425 = vmatprep.subr.mxu0 %v1821_v44  ;;  %v1904_v44 = vld [vmem:[#allocation8 + $0xf70] sm:$0xff] }
 0x227   :  { %2426 = vmatpush1.msra.mxu0 %v1820_v3  ;;  %v1899_v3 = vld [vmem:[#allocation8 + $0xf48] sm:$0xff] }
 0x228   :  { %2427 = vmatprep.subr.mxu0 %v1815_v45  ;;  %v1311_v45 = vadd.f32 %v1310_v59, %v1234_v40  ;;  %v1676_v59 = vld [vmem:[#allocation8 + $0x850] sm:$0xff]  ;;  %v1673_v40 = vld [vmem:[#allocation8 + $0x838] sm:$0xff] }
 0x229   :  { %2428 = vmatpush1.msra.mxu0 %v1814_v63 }
 0x22a   :  { %2429 = vmatprep.subr.mxu0 %v1809_v18  ;;  %v1898_v18 = vld [vmem:[#allocation8 + $0xf40] sm:$0xff] }
 0x22b   :  { %2430 = vmatpush1.msra.mxu0 %v1808_v47  ;;  %v1313_v47 = vadd.f32 %v1312_v9, %v1236_v11  ;;  %v1664_v9 = vld [vmem:[#allocation8 + $0x7f0] sm:$0xff]  ;;  %v1659_v11 = vld [vmem:[#allocation8 + $0x7c8] sm:$0xff] }
 0x22c   :  { %2431 = vmatprep.subr.mxu0 %v1803_v48 }
 0x22d   :  { %2432 = vmatpush1.msra.mxu0 %v1802_v52 }
 0x22e   :  { %2433 = vmatprep.subr.mxu0 %v1797_v54  ;;  %v1893_v54 = vld [vmem:[#allocation8 + $0xf18] sm:$0xff] }
 0x22f   :  { %2434 = vmatpush1.msra.mxu0 %v1796_v53 }
 0x230   :  { %2435 = vmatprep.subr.mxu0 %v1983_v55 }
 0x231   :  { %2436 = vmatpush2.msra.mxu0 %v1982_v57 }
 0x232   :  { %2437 = vmatprep.subr.mxu0 %v1977_v58  ;;  %v1892_v58 = vld [vmem:[#allocation8 + $0xf10] sm:$0xff] }
 0x233   :  { %2438 = vmatpush2.msra.mxu0 %v1976_v62 }
 0x234   :  { %2439 = vmatprep.subr.mxu0 %v1971_v1  ;;  %v1697_v1 = vld [vmem:[#allocation8 + $0x8f8] sm:$0xff] }
 0x235   :  { %2440 = vmatpush2.msra.mxu0 %v1970_v4 }
 0x236   :  { %2441 = vmatprep.subr.mxu0 %v1965_v5 }
 0x237   :  { %2442 = vmatpush2.msra.mxu0 %v1964_v6 }
 0x238   :  { %2443 = vmatprep.subr.mxu0 %v1959_v7 }
 0x239   :  { %2444 = vmatpush2.msra.mxu0 %v1958_v8 }
 0x23a   :  { %2445 = vmatprep.subr.mxu0 %v1953_v12 }
 0x23b   :  { %2446 = vmatpush2.msra.mxu0 %v1952_v14  ;;  %v1694_v14 = vld [vmem:[#allocation8 + $0x8e0] sm:$0xff] }
 0x23c   :  { %2447 = vmatprep.subr.mxu0 %v1947_v15  ;;  %v1696_v15 = vld [vmem:[#allocation8 + $0x8f0] sm:$0xff] }
 0x23d   :  { %2448 = vmatpush2.msra.mxu0 %v1946_v16 }
 0x23e   :  { %2449 = vmatprep.subr.mxu0 %v1941_v17 }
 0x23f   :  { %2450 = vmatpush2.msra.mxu0 %v1940_v20  ;;  %v1689_v20 = vld [vmem:[#allocation8 + $0x8b8] sm:$0xff] }
 0x240   :  { %2451 = vmatprep.subr.mxu0 %v1935_v2  ;;  %v1239_v37 = vpop.f32.mrf.mxu0  ;;  %v1691_v2 = vld [vmem:[#allocation8 + $0x8c8] sm:$0xff] }
 0x241   :  { %2452 = vmatpush2.msra.mxu0 %v1934_v26  ;;  %v1240_v48 = vadd.f32 %v1239_v37, %v694_v32  ;;  %v1677_v32 = vld [vmem:[#allocation8 + $0x858] sm:$0xff]  ;;  %v1670_v37 = vld [vmem:[#allocation8 + $0x820] sm:$0xff] }
 0x242   :  { %2453 = vmatprep.subr.mxu0 %v1929_v27  ;;  %v1241_v0 = vpop.f32.mrf.mxu0  ;;  %v1683_v27 = vld [vmem:[#allocation8 + $0x888] sm:$0xff] }
 0x243   :  { %2454 = vmatpush2.msra.mxu0 %v1928_v28  ;;  %v1242_v52 = vadd.f32 %v1241_v0, %v698_v35  ;;  %v1690_v28 = vld [vmem:[#allocation8 + $0x8c0] sm:$0xff]  ;;  %v1671_v35 = vld [vmem:[#allocation8 + $0x828] sm:$0xff] }
 0x244   :  { %2455 = vmatprep.subr.mxu0 %v1923_v29  ;;  %v1316_v43 = vpop.f32.mrf.mxu1  ;;  %v1658_v0 = vld [vmem:[#allocation8 + $0x7c0] sm:$0xff] }
 0x245   :  { %2456 = vmatpush2.msra.mxu0 %v1922_v34  ;;  %v1317_v5 = vadd.f32 %v1316_v43, %v1240_v48  ;;  %v1684_v34 = vld [vmem:[#allocation8 + $0x890] sm:$0xff]  ;;  %v1666_v43 = vld [vmem:[#allocation8 + $0x800] sm:$0xff] }
 0x246   :  { %2457 = vmatprep.subr.mxu0 %v1917_v36  ;;  %v1318_v53 = vpop.f32.mrf.mxu1  ;;  %v1679_v36 = vld [vmem:[#allocation8 + $0x868] sm:$0xff]  ;;  %v1654_v48 = vld [vmem:[#allocation8 + $0x7a0] sm:$0xff] }
 0x247   :  { %2458 = vmatpush2.msra.mxu0 %v1916_v38  ;;  %v1319_v6 = vadd.f32 %v1318_v53, %v1242_v52  ;;  %v1678_v38 = vld [vmem:[#allocation8 + $0x860] sm:$0xff]  ;;  %v1641_v52 = vld [vmem:[#allocation8 + $0x738] sm:$0xff]  ;;  %v1640_v53 = vld [vmem:[#allocation8 + $0x730] sm:$0xff] }
 0x248   :  { %2459 = vmatprep.subr.mxu0 %v1911_v39  ;;  %v1665_v39 = vld [vmem:[#allocation8 + $0x7f8] sm:$0xff] }
 0x249   :  { %2460 = vmatpush2.msra.mxu0 %v1910_v41  ;;  %v1672_v41 = vld [vmem:[#allocation8 + $0x830] sm:$0xff] }
 0x24a   :  { %v1387_v63 = vpop.f32.mrf.mxu0  ;;  %2461 = vmatprep.subr.mxu0 %v1905_v42  ;;  %v1667_v42 = vld [vmem:[#allocation8 + $0x808] sm:$0xff] }
 0x24b   :  { %2462 = vmatpush2.msra.mxu0 %v1904_v44  ;;  %v1388_v55 = vadd.f32 %v1387_v63, %v1311_v45  ;;  %v1653_v44 = vld [vmem:[#allocation8 + $0x798] sm:$0xff]  ;;  %v1660_v45 = vld [vmem:[#allocation8 + $0x7d0] sm:$0xff]  ;;  %v1647_v63 = vld [vmem:[#allocation8 + $0x768] sm:$0xff] }
 0x24c   :  { %v1389_v57 = vpop.f32.mrf.mxu0  ;;  %2463 = vmatprep.subr.mxu0 %v1899_v3  ;;  %v1661_v3 = vld [vmem:[#allocation8 + $0x7d8] sm:$0xff] }
 0x24d   :  { %v1390_v62 = vadd.f32 %v1389_v57, %v1313_v47  ;;  %2464 = vmatpush2.msra.mxu0 %v1898_v18  ;;  %v3066_v8 = vmax.f32 %v1388_v55, 0.0  ;;  %v1655_v18 = vld [vmem:[#allocation8 + $0x7a8] sm:$0xff]  ;;  %v1646_v47 = vld [vmem:[#allocation8 + $0x760] sm:$0xff]  ;;  %v1648_v55 = vld [vmem:[#allocation8 + $0x770] sm:$0xff] }
 0x24e   :  { %v1393_v4 = vpop.f32.mrf.mxu0  ;;  %2465 = vmatprep.subr.mxu0 %v1893_v54  ;;  %v1649_v54 = vld [vmem:[#allocation8 + $0x778] sm:$0xff]  ;;  %v1635_v57 = vld [vmem:[#allocation8 + $0x708] sm:$0xff] }
 0x24f   :  { %v3064_v7 = vmax.f32 %v1390_v62, 0.0  ;;  %2466 = vmatpush2.msra.mxu0 %v1892_v58  ;;  %v1394_v16 = vadd.f32 %v1393_v4, %v1317_v5  ;;  %v1643_v58 = vld [vmem:[#allocation8 + $0x748] sm:$0xff]  ;;  %v1634_v62 = vld [vmem:[#allocation8 + $0x700] sm:$0xff]  ;;  %v1629_v4 = vld [vmem:[#allocation8 + $0x6d8] sm:$0xff] }
 0x250   :  { %v1395_v12 = vpop.f32.mrf.mxu0  ;;  %2557 = vmatprep.subr.mxu0 %v1697_v1  ;;  %v1642_v1 = vld [vmem:[#allocation8 + $0x740] sm:$0xff]  ;;  %v1637_v5 = vld [vmem:[#allocation8 + $0x718] sm:$0xff] }
 0x251   :  { %v1396_v17 = vadd.f32 %v1395_v12, %v1319_v6  ;;  %2236 = vmatprep.mubr.f32.mxu1 %v3064_v7  ;;  %2467 = vmatprep.mubr.f32.mxu0 %v3064_v7  ;;  %v3074_v29 = vmax.f32 %v1394_v16, 0.0  ;;  %v1628_v6 = vld [vmem:[#allocation8 + $0x6d0] sm:$0xff]  ;;  %v1622_v16 = vld [vmem:[#allocation8 + $0x6a0] sm:$0xff] }
 0x252   :  { %2237 = vmatmul.mubr.f32.vlgmr.msra.gmra.mxu1 %v3066_v8  ;;  %2468 = vmatmul.mubr.f32.vlgmr.msra.gmra.mxu0 %v3066_v8  ;;  %v1636_v12 = vld [vmem:[#allocation8 + $0x710] sm:$0xff] }
 0x253   :  { %v3072_v26 = vmax.f32 %v1396_v17, 0.0  ;;  %2327 = vmatpush1.msra.mxu1 %v1694_v14  ;;  %2558 = vmatpush1.msra.mxu0 %v1696_v15  ;;  %v1623_v14 = vld [vmem:[#allocation8 + $0x6a8] sm:$0xff]  ;;  %v1630_v17 = vld [vmem:[#allocation8 + $0x6e0] sm:$0xff] }
 0x254   :  { %2328 = vmatprep.subr.mxu1 %v1689_v20  ;;  %2559 = vmatprep.subr.mxu0 %v1691_v2  ;;  %v1631_v15 = vld [vmem:[#allocation8 + $0x6e8] sm:$0xff]  ;;  %v1617_v20 = vld [vmem:[#allocation8 + $0x678] sm:$0xff] }
 0x255   :  { %2329 = vmatpush1.msra.mxu1 %v1688_v24  ;;  %2242 = vmatprep.mubr.f32.mxu1 %v3072_v26  ;;  %v1625_v2 = vld [vmem:[#allocation8 + $0x6b8] sm:$0xff]  ;;  %v1616_v24 = vld [vmem:[#allocation8 + $0x670] sm:$0xff] }
 0x256   :  { %2330 = vmatprep.subr.mxu1 %v1683_v27  ;;  %2473 = vmatprep.mubr.f32.mxu0 %v3072_v26  ;;  %v1624_v27 = vld [vmem:[#allocation8 + $0x6b0] sm:$0xff] }
 0x257   :  { %2243 = vmatmul.mubr.f32.gmra.mxu1 %v3074_v29  ;;  %2560 = vmatpush1.msra.mxu0 %v1690_v28  ;;  %v1611_v28 = vld [vmem:[#allocation8 + $0x648] sm:$0xff] }
 0x258   :  { %2331 = vmatpush1.msra.mxu1 %v1682_v31  ;;  %2390 = vmatprep.mubr.f32.mxu1 %v3042_v56  ;;  %v1619_v31 = vld [vmem:[#allocation8 + $0x688] sm:$0xff] }
 0x259   :  { %2332 = vmatprep.subr.mxu1 %v1677_v32  ;;  %2474 = vmatmul.mubr.f32.gmra.mxu0 %v3074_v29  ;;  %v1610_v32 = vld [vmem:[#allocation8 + $0x640] sm:$0xff] }
 0x25a   :  { %2561 = vmatprep.subr.mxu0 %v1685_v33  ;;  %2333 = vmatpush1.msra.mxu1 %v1676_v59  ;;  %v1618_v33 = vld [vmem:[#allocation8 + $0x680] sm:$0xff]  ;;  %v1605_v59 = vld [vmem:[#allocation8 + $0x618] sm:$0xff] }
 0x25b   :  { %2562 = vmatpush1.msra.mxu0 %v1684_v34  ;;  %2621 = vmatprep.mubr.f32.mxu0 %v3042_v56  ;;  %v1652_v56 = vld [vmem:[#allocation8 + $0x790] sm:$0xff]  ;;  %v1613_v34 = vld [vmem:[#allocation8 + $0x658] sm:$0xff] }
 0x25c   :  { %2334 = vmatprep.subr.mxu1 %v1671_v35  ;;  %2563 = vmatprep.subr.mxu0 %v1679_v36  ;;  %v1604_v35 = vld [vmem:[#allocation8 + $0x610] sm:$0xff] }
 0x25d   :  { %2335 = vmatpush1.msra.mxu1 %v1670_v37  ;;  %2564 = vmatpush1.msra.mxu0 %v1678_v38  ;;  %v1612_v36 = vld [vmem:[#allocation8 + $0x650] sm:$0xff]  ;;  %v1791_v37 = vld [vmem:[#allocation8 + $0xbe8] sm:$0xff] }
 0x25e   :  { %2336 = vmatprep.subr.mxu1 %v1665_v39  ;;  %2565 = vmatprep.subr.mxu0 %v1673_v40  ;;  %v1607_v38 = vld [vmem:[#allocation8 + $0x628] sm:$0xff]  ;;  %v1790_v39 = vld [vmem:[#allocation8 + $0xbe0] sm:$0xff] }
 0x25f   :  { %2337 = vmatpush1.msra.mxu1 %v1664_v9  ;;  %2566 = vmatpush1.msra.mxu0 %v1672_v41  ;;  %v1606_v40 = vld [vmem:[#allocation8 + $0x620] sm:$0xff]  ;;  %v1785_v9 = vld [vmem:[#allocation8 + $0xbb8] sm:$0xff] }
 0x260   :  { %2338 = vmatprep.subr.mxu1 %v1659_v11  ;;  %2567 = vmatprep.subr.mxu0 %v1667_v42  ;;  %v1793_v41 = vld [vmem:[#allocation8 + $0xbf8] sm:$0xff]  ;;  %v1784_v11 = vld [vmem:[#allocation8 + $0xbb0] sm:$0xff] }
 0x261   :  { %2339 = vmatpush1.msra.mxu1 %v1658_v0  ;;  %2568 = vmatpush1.msra.mxu0 %v1666_v43  ;;  %v1792_v42 = vld [vmem:[#allocation8 + $0xbf0] sm:$0xff]  ;;  %v1779_v0 = vld [vmem:[#allocation8 + $0xb88] sm:$0xff] }
 0x262   :  { %2340 = vmatprep.subr.mxu1 %v1653_v44  ;;  %2569 = vmatprep.subr.mxu0 %v1661_v3  ;;  %v1787_v43 = vld [vmem:[#allocation8 + $0xbc8] sm:$0xff]  ;;  %v1778_v44 = vld [vmem:[#allocation8 + $0xb80] sm:$0xff] }
 0x263   :  { %2341 = vmatpush1.msra.mxu1 %v1652_v56  ;;  %2570 = vmatpush1.msra.mxu0 %v1660_v45  ;;  %v1786_v3 = vld [vmem:[#allocation8 + $0xbc0] sm:$0xff]  ;;  %v1773_v56 = vld [vmem:[#allocation8 + $0xb58] sm:$0xff] }
 0x264   :  { %2342 = vmatprep.subr.mxu1 %v1647_v63  ;;  %2571 = vmatprep.subr.mxu0 %v1655_v18  ;;  %v1781_v45 = vld [vmem:[#allocation8 + $0xb98] sm:$0xff]  ;;  %v1772_v63 = vld [vmem:[#allocation8 + $0xb50] sm:$0xff] }
 0x265   :  { %2343 = vmatpush1.msra.mxu1 %v1646_v47  ;;  %2572 = vmatpush1.msra.mxu0 %v1654_v48  ;;  %v1780_v18 = vld [vmem:[#allocation8 + $0xb90] sm:$0xff]  ;;  %v1767_v47 = vld [vmem:[#allocation8 + $0xb28] sm:$0xff] }
 0x266   :  { %2344 = vmatprep.subr.mxu1 %v1641_v52  ;;  %2573 = vmatprep.subr.mxu0 %v1649_v54  ;;  %v1775_v48 = vld [vmem:[#allocation8 + $0xb68] sm:$0xff]  ;;  %v1766_v52 = vld [vmem:[#allocation8 + $0xb20] sm:$0xff] }
 0x267   :  { %2345 = vmatpush1.msra.mxu1 %v1640_v53  ;;  %2574 = vmatpush1.msra.mxu0 %v1648_v55  ;;  %v1774_v54 = vld [vmem:[#allocation8 + $0xb60] sm:$0xff]  ;;  %v1761_v53 = vld [vmem:[#allocation8 + $0xaf8] sm:$0xff] }
 0x268   :  { %2346 = vmatprep.subr.mxu1 %v1635_v57  ;;  %2575 = vmatprep.subr.mxu0 %v1643_v58  ;;  %v1769_v55 = vld [vmem:[#allocation8 + $0xb38] sm:$0xff]  ;;  %v1760_v57 = vld [vmem:[#allocation8 + $0xaf0] sm:$0xff] }
 0x269   :  { %2347 = vmatpush1.msra.mxu1 %v1634_v62  ;;  %2576 = vmatpush1.msra.mxu0 %v1642_v1  ;;  %v1768_v58 = vld [vmem:[#allocation8 + $0xb30] sm:$0xff]  ;;  %v1755_v62 = vld [vmem:[#allocation8 + $0xac8] sm:$0xff] }
 0x26a   :  { %2348 = vmatprep.subr.mxu1 %v1629_v4  ;;  %2577 = vmatprep.subr.mxu0 %v1637_v5  ;;  %v1763_v1 = vld [vmem:[#allocation8 + $0xb08] sm:$0xff]  ;;  %v1754_v4 = vld [vmem:[#allocation8 + $0xac0] sm:$0xff] }
 0x26b   :  { %2349 = vmatpush1.msra.mxu1 %v1628_v6  ;;  %2578 = vmatpush1.msra.mxu0 %v1636_v12  ;;  %v1762_v5 = vld [vmem:[#allocation8 + $0xb00] sm:$0xff]  ;;  %v1749_v6 = vld [vmem:[#allocation8 + $0xa98] sm:$0xff] }
 0x26c   :  { %2350 = vmatprep.subr.mxu1 %v1623_v14  ;;  %2579 = vmatprep.subr.mxu0 %v1631_v15  ;;  %v1757_v12 = vld [vmem:[#allocation8 + $0xad8] sm:$0xff]  ;;  %v1748_v14 = vld [vmem:[#allocation8 + $0xa90] sm:$0xff] }
 0x26d   :  { %2351 = vmatpush1.msra.mxu1 %v1622_v16  ;;  %2580 = vmatpush1.msra.mxu0 %v1630_v17  ;;  %v1756_v15 = vld [vmem:[#allocation8 + $0xad0] sm:$0xff]  ;;  %v1743_v16 = vld [vmem:[#allocation8 + $0xa68] sm:$0xff] }
 0x26e   :  { %2352 = vmatprep.subr.mxu1 %v1617_v20  ;;  %2581 = vmatprep.subr.mxu0 %v1625_v2  ;;  %v1751_v17 = vld [vmem:[#allocation8 + $0xaa8] sm:$0xff]  ;;  %v1742_v20 = vld [vmem:[#allocation8 + $0xa60] sm:$0xff] }
 0x26f   :  { %2353 = vmatpush1.msra.mxu1 %v1616_v24  ;;  %2582 = vmatpush1.msra.mxu0 %v1624_v27  ;;  %v1750_v2 = vld [vmem:[#allocation8 + $0xaa0] sm:$0xff]  ;;  %v1737_v24 = vld [vmem:[#allocation8 + $0xa38] sm:$0xff] }
 0x270   :  { %2354 = vmatprep.subr.mxu1 %v1611_v28  ;;  %2583 = vmatprep.subr.mxu0 %v1619_v31  ;;  %v1745_v27 = vld [vmem:[#allocation8 + $0xa78] sm:$0xff]  ;;  %v1736_v28 = vld [vmem:[#allocation8 + $0xa30] sm:$0xff] }
 0x271   :  { %2355 = vmatpush1.msra.mxu1 %v1610_v32  ;;  %2584 = vmatpush1.msra.mxu0 %v1618_v33  ;;  %v1744_v31 = vld [vmem:[#allocation8 + $0xa70] sm:$0xff]  ;;  %v1731_v32 = vld [vmem:[#allocation8 + $0xa08] sm:$0xff] }
 0x272   :  { %2356 = vmatprep.subr.mxu1 %v1605_v59  ;;  %2585 = vmatprep.subr.mxu0 %v1613_v34  ;;  %v1739_v33 = vld [vmem:[#allocation8 + $0xa48] sm:$0xff]  ;;  %v1730_v59 = vld [vmem:[#allocation8 + $0xa00] sm:$0xff] }
 0x273   :  { %2357 = vmatpush1.msra.mxu1 %v1604_v35  ;;  %2586 = vmatpush1.msra.mxu0 %v1612_v36  ;;  %v1738_v34 = vld [vmem:[#allocation8 + $0xa40] sm:$0xff]  ;;  %v1725_v35 = vld [vmem:[#allocation8 + $0x9d8] sm:$0xff] }
 0x274   :  { %2358 = vmatprep.subr.mxu1 %v1791_v37  ;;  %2587 = vmatprep.subr.mxu0 %v1607_v38  ;;  %v1733_v36 = vld [vmem:[#allocation8 + $0xa18] sm:$0xff]  ;;  %v1724_v37 = vld [vmem:[#allocation8 + $0x9d0] sm:$0xff] }
 0x275   :  { %2359 = vmatpush2.msra.mxu1 %v1790_v39  ;;  %2588 = vmatpush1.msra.mxu0 %v1606_v40  ;;  %v1732_v38 = vld [vmem:[#allocation8 + $0xa10] sm:$0xff]  ;;  %v1719_v39 = vld [vmem:[#allocation8 + $0x9a8] sm:$0xff] }
 0x276   :  { %2360 = vmatprep.subr.mxu1 %v1785_v9  ;;  %2589 = vmatprep.subr.mxu0 %v1793_v41  ;;  %v1727_v40 = vld [vmem:[#allocation8 + $0x9e8] sm:$0xff]  ;;  %v1718_v9 = vld [vmem:[#allocation8 + $0x9a0] sm:$0xff] }
 0x277   :  { %2361 = vmatpush2.msra.mxu1 %v1784_v11  ;;  %2590 = vmatpush2.msra.mxu0 %v1792_v42  ;;  %v1726_v41 = vld [vmem:[#allocation8 + $0x9e0] sm:$0xff]  ;;  %v1713_v11 = vld [vmem:[#allocation8 + $0x978] sm:$0xff] }
 0x278   :  { %2362 = vmatprep.subr.mxu1 %v1779_v0  ;;  %2591 = vmatprep.subr.mxu0 %v1787_v43  ;;  %v1721_v42 = vld [vmem:[#allocation8 + $0x9b8] sm:$0xff]  ;;  %v1712_v0 = vld [vmem:[#allocation8 + $0x970] sm:$0xff] }
 0x279   :  { %2363 = vmatpush2.msra.mxu1 %v1778_v44  ;;  %2592 = vmatpush2.msra.mxu0 %v1786_v3  ;;  %v1720_v43 = vld [vmem:[#allocation8 + $0x9b0] sm:$0xff]  ;;  %v1707_v44 = vld [vmem:[#allocation8 + $0x948] sm:$0xff] }
 0x27a   :  { %2364 = vmatprep.subr.mxu1 %v1773_v56  ;;  %2593 = vmatprep.subr.mxu0 %v1781_v45  ;;  %v1715_v3 = vld [vmem:[#allocation8 + $0x988] sm:$0xff]  ;;  %v1706_v56 = vld [vmem:[#allocation8 + $0x940] sm:$0xff] }
 0x27b   :  { %2365 = vmatpush2.msra.mxu1 %v1772_v63  ;;  %2594 = vmatpush2.msra.mxu0 %v1780_v18  ;;  %v1714_v45 = vld [vmem:[#allocation8 + $0x980] sm:$0xff]  ;;  %v1701_v63 = vld [vmem:[#allocation8 + $0x918] sm:$0xff] }
 0x27c   :  { %2366 = vmatprep.subr.mxu1 %v1767_v47  ;;  %2595 = vmatprep.subr.mxu0 %v1775_v48  ;;  %v1709_v18 = vld [vmem:[#allocation8 + $0x958] sm:$0xff]  ;;  %v1700_v47 = vld [vmem:[#allocation8 + $0x910] sm:$0xff] }
 0x27d   :  { %2367 = vmatpush2.msra.mxu1 %v1766_v52  ;;  %2596 = vmatpush2.msra.mxu0 %v1774_v54  ;;  %v1708_v48 = vld [vmem:[#allocation8 + $0x950] sm:$0xff]  ;;  %v1505_v52 = vld [vmem:[#allocation8 + $0x2f8] sm:$0xff]  ;;  %v1703_v54 = vld [vmem:[#allocation8 + $0x928] sm:$0xff] }
 0x27e   :  { %2368 = vmatprep.subr.mxu1 %v1761_v53  ;;  %2597 = vmatprep.subr.mxu0 %v1769_v55  ;;  %v1504_v53 = vld [vmem:[#allocation8 + $0x2f0] sm:$0xff]  ;;  %v1702_v55 = vld [vmem:[#allocation8 + $0x920] sm:$0xff] }
 0x27f   :  { %2369 = vmatpush2.msra.mxu1 %v1760_v57  ;;  %2598 = vmatpush2.msra.mxu0 %v1768_v58  ;;  %v1499_v57 = vld [vmem:[#allocation8 + $0x2c8] sm:$0xff]  ;;  %v1498_v58 = vld [vmem:[#allocation8 + $0x2c0] sm:$0xff] }
 0x280   :  { %2370 = vmatprep.subr.mxu1 %v1755_v62  ;;  %2599 = vmatprep.subr.mxu0 %v1763_v1  ;;  %v1493_v62 = vld [vmem:[#allocation8 + $0x298] sm:$0xff]  ;;  %v1492_v1 = vld [vmem:[#allocation8 + $0x290] sm:$0xff] }
 0x281   :  { %2371 = vmatpush2.msra.mxu1 %v1754_v4  ;;  %2600 = vmatpush2.msra.mxu0 %v1762_v5  ;;  %v1487_v4 = vld [vmem:[#allocation8 + $0x268] sm:$0xff]  ;;  %v1486_v5 = vld [vmem:[#allocation8 + $0x260] sm:$0xff] }
 0x282   :  { %2372 = vmatprep.subr.mxu1 %v1749_v6  ;;  %2601 = vmatprep.subr.mxu0 %v1757_v12  ;;  %v1481_v6 = vld [vmem:[#allocation8 + $0x238] sm:$0xff]  ;;  %v1480_v12 = vld [vmem:[#allocation8 + $0x230] sm:$0xff] }
 0x283   :  { %2373 = vmatpush2.msra.mxu1 %v1748_v14  ;;  %2602 = vmatpush2.msra.mxu0 %v1756_v15  ;;  %v1475_v14 = vld [vmem:[#allocation8 + $0x208] sm:$0xff]  ;;  %v1469_v15 = vld [vmem:[#allocation8 + $0x1d8] sm:$0xff] }
 0x284   :  { %2374 = vmatprep.subr.mxu1 %v1743_v16  ;;  %2603 = vmatprep.subr.mxu0 %v1751_v17  ;;  %v1463_v16 = vld [vmem:[#allocation8 + $0x1a8] sm:$0xff]  ;;  %v1462_v17 = vld [vmem:[#allocation8 + $0x1a0] sm:$0xff] }
 0x285   :  { %2375 = vmatpush2.msra.mxu1 %v1742_v20  ;;  %2604 = vmatpush2.msra.mxu0 %v1750_v2  ;;  %v1457_v20 = vld [vmem:[#allocation8 + $0x178] sm:$0xff]  ;;  %v1451_v2 = vld [vmem:[#allocation8 + $0x148] sm:$0xff] }
 0x286   :  { %2376 = vmatprep.subr.mxu1 %v1737_v24  ;;  %2605 = vmatprep.subr.mxu0 %v1745_v27  ;;  %v1445_v24 = vld [vmem:[#allocation8 + $0x118] sm:$0xff]  ;;  %v1444_v27 = vld [vmem:[#allocation8 + $0x110] sm:$0xff] }
 0x287   :  { %2377 = vmatpush2.msra.mxu1 %v1736_v28  ;;  %2606 = vmatpush2.msra.mxu0 %v1744_v31  ;;  %v1439_v28 = vld [vmem:[#allocation8 + $0xe8] sm:$0xff]  ;;  %v1438_v31 = vld [vmem:[#allocation8 + $0xe0] sm:$0xff] }
 0x288   :  { %2378 = vmatprep.subr.mxu1 %v1731_v32  ;;  %2607 = vmatprep.subr.mxu0 %v1739_v33  ;;  %v1433_v32 = vld [vmem:[#allocation8 + $0xb8] sm:$0xff]  ;;  %v1432_v33 = vld [vmem:[#allocation8 + $0xb0] sm:$0xff] }
 0x289   :  { %2379 = vmatpush2.msra.mxu1 %v1730_v59  ;;  %2608 = vmatpush2.msra.mxu0 %v1738_v34  ;;  %v1427_v59 = vld [vmem:[#allocation8 + $0x88] sm:$0xff]  ;;  %v1426_v34 = vld [vmem:[#allocation8 + $0x80] sm:$0xff] }
 0x28a   :  { %2380 = vmatprep.subr.mxu1 %v1725_v35  ;;  %2609 = vmatprep.subr.mxu0 %v1733_v36  ;;  %v1421_v35 = vld [vmem:[#allocation8 + $0x58] sm:$0xff]  ;;  %v1420_v36 = vld [vmem:[#allocation8 + $0x50] sm:$0xff] }
 0x28b   :  { %2381 = vmatpush2.msra.mxu1 %v1724_v37  ;;  %2610 = vmatpush2.msra.mxu0 %v1732_v38  ;;  %v1415_v37 = vld [vmem:[#allocation8 + $0x28] sm:$0xff]  ;;  %v1414_v38 = vld [vmem:[#allocation8 + $0x20] sm:$0xff] }
 0x28c   :  { %2382 = vmatprep.subr.mxu1 %v1719_v39  ;;  %2611 = vmatprep.subr.mxu0 %v1727_v40  ;;  %v1601_v39 = vld [vmem:[#allocation8 + $0x5f8] sm:$0xff]  ;;  %v1600_v40 = vld [vmem:[#allocation8 + $0x5f0] sm:$0xff] }
 0x28d   :  { %2383 = vmatpush2.msra.mxu1 %v1718_v9  ;;  %2612 = vmatpush2.msra.mxu0 %v1726_v41  ;;  %v1595_v9 = vld [vmem:[#allocation8 + $0x5c8] sm:$0xff]  ;;  %v1594_v41 = vld [vmem:[#allocation8 + $0x5c0] sm:$0xff] }
 0x28e   :  { %2384 = vmatprep.subr.mxu1 %v1713_v11  ;;  %2613 = vmatprep.subr.mxu0 %v1721_v42  ;;  %v1589_v11 = vld [vmem:[#allocation8 + $0x598] sm:$0xff]  ;;  %v1588_v42 = vld [vmem:[#allocation8 + $0x590] sm:$0xff] }
 0x28f   :  { %2385 = vmatpush2.msra.mxu1 %v1712_v0  ;;  %2614 = vmatpush2.msra.mxu0 %v1720_v43  ;;  %v1583_v0 = vld [vmem:[#allocation8 + $0x568] sm:$0xff]  ;;  %v1582_v43 = vld [vmem:[#allocation8 + $0x560] sm:$0xff] }
 0x290   :  { %2386 = vmatprep.subr.mxu1 %v1707_v44  ;;  %2615 = vmatprep.subr.mxu0 %v1715_v3  ;;  %v1577_v44 = vld [vmem:[#allocation8 + $0x538] sm:$0xff]  ;;  %v1576_v3 = vld [vmem:[#allocation8 + $0x530] sm:$0xff] }
 0x291   :  { %2387 = vmatpush2.msra.mxu1 %v1706_v56  ;;  %2616 = vmatpush2.msra.mxu0 %v1714_v45  ;;  %v1571_v56 = vld [vmem:[#allocation8 + $0x508] sm:$0xff]  ;;  %v1570_v45 = vld [vmem:[#allocation8 + $0x500] sm:$0xff] }
 0x292   :  { %2388 = vmatprep.subr.mxu1 %v1701_v63  ;;  %2617 = vmatprep.subr.mxu0 %v1709_v18  ;;  %v1565_v63 = vld [vmem:[#allocation8 + $0x4d8] sm:$0xff]  ;;  %v1564_v18 = vld [vmem:[#allocation8 + $0x4d0] sm:$0xff] }
 0x293   :  { %2389 = vmatpush2.msra.mxu1 %v1700_v47  ;;  %2618 = vmatpush2.msra.mxu0 %v1708_v48  ;;  %v1559_v47 = vld [vmem:[#allocation8 + $0x4a8] sm:$0xff]  ;;  %v1558_v48 = vld [vmem:[#allocation8 + $0x4a0] sm:$0xff] }
 0x294   :  { %2391 = vmatmul.mubr.f32.vlgmr.msra.gmra.mxu1 %v3044_v21  ;;  %2480 = vmatprep.subr.mxu1 %v1505_v52  ;;  %v1553_v52 = vld [vmem:[#allocation8 + $0x478] sm:$0xff] }
 0x295   :  { %2619 = vmatprep.subr.mxu0 %v1703_v54  ;;  %2396 = vmatprep.mubr.f32.mxu1 %v3050_v13  ;;  %v1552_v54 = vld [vmem:[#allocation8 + $0x470] sm:$0xff] }
 0x296   :  { %2481 = vmatpush1.msra.mxu1 %v1504_v53  ;;  %2620 = vmatpush2.msra.mxu0 %v1702_v55  ;;  %v1547_v53 = vld [vmem:[#allocation8 + $0x448] sm:$0xff]  ;;  %v1546_v55 = vld [vmem:[#allocation8 + $0x440] sm:$0xff] }
 0x297   :  { %2482 = vmatprep.subr.mxu1 %v1499_v57  ;;  %2622 = vmatmul.mubr.f32.vlgmr.msra.gmra.mxu0 %v3044_v21  ;;  %v1474_v21 = vld [vmem:[#allocation8 + $0x200] sm:$0xff]  ;;  %v1541_v57 = vld [vmem:[#allocation8 + $0x418] sm:$0xff] }
 0x298   :  { %2483 = vmatpush1.msra.mxu1 %v1498_v58  ;;  %2627 = vmatprep.mubr.f32.mxu0 %v3050_v13  ;;  %v1468_v13 = vld [vmem:[#allocation8 + $0x1d0] sm:$0xff] }
 0x299   :  { %2397 = vmatmul.mubr.f32.gmra.mxu1 %v3048_v10  ;;  %2484 = vmatprep.subr.mxu1 %v1493_v62  ;;  %v1540_v58 = vld [vmem:[#allocation8 + $0x410] sm:$0xff]  ;;  %v1535_v62 = vld [vmem:[#allocation8 + $0x3e8] sm:$0xff] }
 0x29a   :  { %2485 = vmatpush1.msra.mxu1 %v1492_v1  ;;  %2544 = vmatprep.mubr.f32.mxu1 %v3020_v51  ;;  %v1456_v51 = vld [vmem:[#allocation8 + $0x170] sm:$0xff]  ;;  %v1534_v1 = vld [vmem:[#allocation8 + $0x3e0] sm:$0xff] }
 0x29b   :  { %2486 = vmatprep.subr.mxu1 %v1487_v4  ;;  %2628 = vmatmul.mubr.f32.gmra.mxu0 %v3048_v10  ;;  %v1450_v10 = vld [vmem:[#allocation8 + $0x140] sm:$0xff]  ;;  %v1529_v4 = vld [vmem:[#allocation8 + $0x3b8] sm:$0xff] }
 0x29c   :  { %2487 = vmatpush1.msra.mxu1 %v1486_v5  ;;  %v1528_v5 = vld [vmem:[#allocation8 + $0x3b0] sm:$0xff] }
 0x29d   :  { %2488 = vmatprep.subr.mxu1 %v1481_v6  ;;  %v1523_v6 = vld [vmem:[#allocation8 + $0x388] sm:$0xff] }
 0x29e   :  { %2489 = vmatpush1.msra.mxu1 %v1480_v12  ;;  %v1522_v12 = vld [vmem:[#allocation8 + $0x380] sm:$0xff] }
 0x29f   :  { %2490 = vmatprep.subr.mxu1 %v1475_v14  ;;  %v1517_v14 = vld [vmem:[#allocation8 + $0x358] sm:$0xff] }
 0x2a0   :  { %2491 = vmatpush1.msra.mxu1 %v1474_v21  ;;  %v1516_v21 = vld [vmem:[#allocation8 + $0x350] sm:$0xff] }
 0x2a1   :  { %2492 = vmatprep.subr.mxu1 %v1469_v15  ;;  %v1511_v15 = vld [vmem:[#allocation8 + $0x328] sm:$0xff] }
 0x2a2   :  { %2493 = vmatpush1.msra.mxu1 %v1468_v13  ;;  %v1510_v13 = vld [vmem:[#allocation8 + $0x320] sm:$0xff] }
 0x2a3   :  { %2494 = vmatprep.subr.mxu1 %v1463_v16  ;;  %v1889_v16 = vld [vmem:[#allocation8 + $0xef8] sm:$0xff] }
 0x2a4   :  { %2495 = vmatpush1.msra.mxu1 %v1462_v17  ;;  %v1888_v17 = vld [vmem:[#allocation8 + $0xef0] sm:$0xff] }
 0x2a5   :  { %2496 = vmatprep.subr.mxu1 %v1457_v20  ;;  %v1883_v20 = vld [vmem:[#allocation8 + $0xec8] sm:$0xff] }
 0x2a6   :  { %2497 = vmatpush1.msra.mxu1 %v1456_v51  ;;  %v1882_v51 = vld [vmem:[#allocation8 + $0xec0] sm:$0xff] }
 0x2a7   :  { %2498 = vmatprep.subr.mxu1 %v1451_v2  ;;  %v1877_v2 = vld [vmem:[#allocation8 + $0xe98] sm:$0xff] }
 0x2a8   :  { %2499 = vmatpush1.msra.mxu1 %v1450_v10  ;;  %v1876_v10 = vld [vmem:[#allocation8 + $0xe90] sm:$0xff] }
 0x2a9   :  { %2500 = vmatprep.subr.mxu1 %v1445_v24  ;;  %v1871_v24 = vld [vmem:[#allocation8 + $0xe68] sm:$0xff] }
 0x2aa   :  { %2501 = vmatpush1.msra.mxu1 %v1444_v27  ;;  %v1870_v27 = vld [vmem:[#allocation8 + $0xe60] sm:$0xff] }
 0x2ab   :  { %2502 = vmatprep.subr.mxu1 %v1439_v28  ;;  %v1865_v28 = vld [vmem:[#allocation8 + $0xe38] sm:$0xff] }
 0x2ac   :  { %2503 = vmatpush1.msra.mxu1 %v1438_v31  ;;  %v1859_v31 = vld [vmem:[#allocation8 + $0xe08] sm:$0xff] }
 0x2ad   :  { %2504 = vmatprep.subr.mxu1 %v1433_v32  ;;  %v1853_v32 = vld [vmem:[#allocation8 + $0xdd8] sm:$0xff] }
 0x2ae   :  { %2505 = vmatpush1.msra.mxu1 %v1432_v33  ;;  %v1852_v33 = vld [vmem:[#allocation8 + $0xdd0] sm:$0xff] }
 0x2af   :  { %2506 = vmatprep.subr.mxu1 %v1427_v59  ;;  %v1847_v59 = vld [vmem:[#allocation8 + $0xda8] sm:$0xff] }
 0x2b0   :  { %2507 = vmatpush1.msra.mxu1 %v1426_v34  ;;  %v1841_v34 = vld [vmem:[#allocation8 + $0xd78] sm:$0xff] }
 0x2b1   :  { %2508 = vmatprep.subr.mxu1 %v1421_v35  ;;  %v1840_v35 = vld [vmem:[#allocation8 + $0xd70] sm:$0xff] }
 0x2b2   :  { %2509 = vmatpush1.msra.mxu1 %v1420_v36  ;;  %v1834_v36 = vld [vmem:[#allocation8 + $0xd40] sm:$0xff] }
 0x2b3   :  { %2510 = vmatprep.subr.mxu1 %v1415_v37  ;;  %v1829_v37 = vld [vmem:[#allocation8 + $0xd18] sm:$0xff] }
 0x2b4   :  { %2511 = vmatpush1.msra.mxu1 %v1414_v38  ;;  %v1828_v38 = vld [vmem:[#allocation8 + $0xd10] sm:$0xff] }
 0x2b5   :  { %2512 = vmatprep.subr.mxu1 %v1601_v39  ;;  %v1823_v39 = vld [vmem:[#allocation8 + $0xce8] sm:$0xff] }
 0x2b6   :  { %2513 = vmatpush2.msra.mxu1 %v1600_v40  ;;  %v1822_v40 = vld [vmem:[#allocation8 + $0xce0] sm:$0xff] }
 0x2b7   :  { %2514 = vmatprep.subr.mxu1 %v1595_v9  ;;  %v1817_v9 = vld [vmem:[#allocation8 + $0xcb8] sm:$0xff] }
 0x2b8   :  { %2515 = vmatpush2.msra.mxu1 %v1594_v41  ;;  %v1816_v41 = vld [vmem:[#allocation8 + $0xcb0] sm:$0xff] }
 0x2b9   :  { %2516 = vmatprep.subr.mxu1 %v1589_v11  ;;  %v1811_v11 = vld [vmem:[#allocation8 + $0xc88] sm:$0xff] }
 0x2ba   :  { %2517 = vmatpush2.msra.mxu1 %v1588_v42  ;;  %v1810_v42 = vld [vmem:[#allocation8 + $0xc80] sm:$0xff] }
 0x2bb   :  { %2518 = vmatprep.subr.mxu1 %v1583_v0  ;;  %v1805_v0 = vld [vmem:[#allocation8 + $0xc58] sm:$0xff] }
 0x2bc   :  { %2519 = vmatpush2.msra.mxu1 %v1582_v43  ;;  %v1804_v43 = vld [vmem:[#allocation8 + $0xc50] sm:$0xff] }
 0x2bd   :  { %2520 = vmatprep.subr.mxu1 %v1577_v44  ;;  %v1799_v44 = vld [vmem:[#allocation8 + $0xc28] sm:$0xff] }
 0x2be   :  { %2521 = vmatpush2.msra.mxu1 %v1576_v3  ;;  %v1798_v3 = vld [vmem:[#allocation8 + $0xc20] sm:$0xff] }
 0x2bf   :  { %2522 = vmatprep.subr.mxu1 %v1571_v56  ;;  %v1985_v56 = vld [vmem:[#allocation8 + $0x11f8] sm:$0xff] }
 0x2c0   :  { %2523 = vmatpush2.msra.mxu1 %v1570_v45  ;;  %v1984_v45 = vld [vmem:[#allocation8 + $0x11f0] sm:$0xff] }
 0x2c1   :  { %2524 = vmatprep.subr.mxu1 %v1565_v63  ;;  %v1979_v63 = vld [vmem:[#allocation8 + $0x11c8] sm:$0xff] }
 0x2c2   :  { %2525 = vmatpush2.msra.mxu1 %v1564_v18  ;;  %v1978_v18 = vld [vmem:[#allocation8 + $0x11c0] sm:$0xff] }
 0x2c3   :  { %2526 = vmatprep.subr.mxu1 %v1559_v47  ;;  %v1973_v47 = vld [vmem:[#allocation8 + $0x1198] sm:$0xff] }
 0x2c4   :  { %2527 = vmatpush2.msra.mxu1 %v1558_v48  ;;  %v1972_v48 = vld [vmem:[#allocation8 + $0x1190] sm:$0xff] }
 0x2c5   :  { %2528 = vmatprep.subr.mxu1 %v1553_v52  ;;  %v1967_v52 = vld [vmem:[#allocation8 + $0x1168] sm:$0xff] }
 0x2c6   :  { %2529 = vmatpush2.msra.mxu1 %v1552_v54  ;;  %v1966_v54 = vld [vmem:[#allocation8 + $0x1160] sm:$0xff] }
 0x2c7   :  { %2530 = vmatprep.subr.mxu1 %v1547_v53  ;;  %v1961_v53 = vld [vmem:[#allocation8 + $0x1138] sm:$0xff] }
 0x2c8   :  { %2531 = vmatpush2.msra.mxu1 %v1546_v55  ;;  %v1960_v55 = vld [vmem:[#allocation8 + $0x1130] sm:$0xff] }
 0x2c9   :  { %2532 = vmatprep.subr.mxu1 %v1541_v57  ;;  %v1955_v57 = vld [vmem:[#allocation8 + $0x1108] sm:$0xff] }
 0x2ca   :  { %2533 = vmatpush2.msra.mxu1 %v1540_v58  ;;  %v1954_v58 = vld [vmem:[#allocation8 + $0x1100] sm:$0xff] }
 0x2cb   :  { %2534 = vmatprep.subr.mxu1 %v1535_v62  ;;  %v1949_v62 = vld [vmem:[#allocation8 + $0x10d8] sm:$0xff] }
 0x2cc   :  { %2535 = vmatpush2.msra.mxu1 %v1534_v1  ;;  %v1948_v1 = vld [vmem:[#allocation8 + $0x10d0] sm:$0xff] }
 0x2cd   :  { %2536 = vmatprep.subr.mxu1 %v1529_v4  ;;  %v1943_v4 = vld [vmem:[#allocation8 + $0x10a8] sm:$0xff] }
 0x2ce   :  { %2537 = vmatpush2.msra.mxu1 %v1528_v5  ;;  %v1942_v5 = vld [vmem:[#allocation8 + $0x10a0] sm:$0xff] }
 0x2cf   :  { %2538 = vmatprep.subr.mxu1 %v1523_v6  ;;  %v1937_v6 = vld [vmem:[#allocation8 + $0x1078] sm:$0xff] }
 0x2d0   :  { %2539 = vmatpush2.msra.mxu1 %v1522_v12  ;;  %v1936_v12 = vld [vmem:[#allocation8 + $0x1070] sm:$0xff] }
 0x2d1   :  { %2540 = vmatprep.subr.mxu1 %v1517_v14  ;;  %v2084_v14 = vpop.f32.mrf.mxu1 }
 0x2d2   :  { %2541 = vmatpush2.msra.mxu1 %v1516_v21  ;;  %v1931_v21 = vld [vmem:[#allocation8 + $0x1048] sm:$0xff] }
 0x2d3   :  { %2542 = vmatprep.subr.mxu1 %v1511_v15  ;;  %v1930_v15 = vld [vmem:[#allocation8 + $0x1040] sm:$0xff] }
 0x2d4   :  { %2543 = vmatpush2.msra.mxu1 %v1510_v13  ;;  %v1925_v13 = vld [vmem:[#allocation8 + $0x1018] sm:$0xff] }
 0x2d5   :  { %2545 = vmatmul.mubr.f32.vlgmr.msra.gmra.mxu1 %v3027_v22  ;;  %2634 = vmatprep.subr.mxu1 %v1889_v16  ;;  %v1864_v22 = vld [vmem:[#allocation8 + $0xe30] sm:$0xff] }
 0x2d6   :  { %2550 = vmatprep.mubr.f32.mxu1 %v3025_v19  ;;  %2635 = vmatpush1.msra.mxu1 %v1888_v17  ;;  %v1858_v19 = vld [vmem:[#allocation8 + $0xe00] sm:$0xff]  ;;  %v1924_v16 = vld [vmem:[#allocation8 + $0x1010] sm:$0xff] }
 0x2d7   :  { %2636 = vmatprep.subr.mxu1 %v1883_v20  ;;  %v3093_v17 = vld [vmem:[#allocation10] sm:$0x3f]  ;;  %v2086_v20 = vpop.f32.mrf.mxu1 }
 0x2d8   :  { %2637 = vmatpush1.msra.mxu1 %v1882_v51  ;;  %v1919_v51 = vld [vmem:[#allocation8 + $0xfe8] sm:$0xff] }
 0x2d9   :  { %2551 = vmatmul.mubr.f32.gmra.mxu1 %v3031_v30  ;;  %2638 = vmatprep.subr.mxu1 %v1877_v2  ;;  %v1846_v30 = vld [vmem:[#allocation8 + $0xda0] sm:$0xff]  ;;  %v2161_v2 = vpop.f32.mrf.mxu0 }
 0x2da   :  { %2639 = vmatpush1.msra.mxu1 %v1876_v10  ;;  %2698 = vmatprep.mubr.f32.mxu1 %v3064_v7  ;;  %v1835_v7 = vld [vmem:[#allocation8 + $0xd48] sm:$0xff]  ;;  %v1918_v10 = vld [vmem:[#allocation8 + $0xfe0] sm:$0xff] }
 0x2db   :  { %2640 = vmatprep.subr.mxu1 %v1871_v24  ;;  %v1913_v24 = vld [vmem:[#allocation8 + $0xfb8] sm:$0xff] }
 0x2dc   :  { %2641 = vmatpush1.msra.mxu1 %v1870_v27  ;;  %v1991_v27 = vrot.slane %v3093_v17, %v677_v25  ;;  %v1895_v25 = vld [vmem:[#allocation8 + $0xf28] sm:$0xff] }
 0x2dd   :  { %2642 = vmatprep.subr.mxu1 %v1865_v28  ;;  %v1912_v28 = vld [vmem:[#allocation8 + $0xfb0] sm:$0xff] }
 0x2de   :  { %2643 = vmatpush1.msra.mxu1 %v1864_v22  ;;  %v2090_v22 = vpop.f32.mrf.mxu1 }
 0x2df   :  { %2644 = vmatprep.subr.mxu1 %v1859_v31  ;;  %v1907_v31 = vld [vmem:[#allocation8 + $0xf88] sm:$0xff] }
 0x2e0   :  { %2645 = vmatpush1.msra.mxu1 %v1858_v19  ;;  %v1995_v19 = vrot.slane %v3093_v17, %v681_v61 }
 0x2e1   :  { %2646 = vmatprep.subr.mxu1 %v1853_v32  ;;  %v2163_v32 = vpop.f32.mrf.mxu0 }
 0x2e2   :  { %2647 = vmatpush1.msra.mxu1 %v1852_v33  ;;  %v1906_v33 = vld [vmem:[#allocation8 + $0xf80] sm:$0xff] }
 0x2e3   :  { %2648 = vmatprep.subr.mxu1 %v1847_v59  ;;  %v1901_v59 = vld [vmem:[#allocation8 + $0xf58] sm:$0xff] }
 0x2e4   :  { %2649 = vmatpush1.msra.mxu1 %v1846_v30  ;;  %v2085_v30 = vadd.f32 %v2084_v14, %v1991_v27 }
 0x2e5   :  { %2650 = vmatprep.subr.mxu1 %v1841_v34  ;;  %v1900_v34 = vld [vmem:[#allocation8 + $0xf50] sm:$0xff] }
 0x2e6   :  { %2651 = vmatpush1.msra.mxu1 %v1840_v35  ;;  %v2092_v35 = vpop.f32.mrf.mxu1 }
 0x2e7   :  { %2652 = vmatprep.subr.mxu1 %v1835_v7  ;;  %v2087_v7 = vadd.f32 %v2086_v20, %v1995_v19 }
 0x2e8   :  { %2653 = vmatpush1.msra.mxu1 %v1834_v36  ;;  %v2162_v36 = vadd.f32 %v2161_v2, %v2085_v30 }
 0x2e9   :  { %2654 = vmatprep.subr.mxu1 %v1829_v37  ;;  %v2167_v37 = vpop.f32.mrf.mxu0 }
 0x2ea   :  { %2655 = vmatpush1.msra.mxu1 %v1828_v38  ;;  %v1894_v38 = vld [vmem:[#allocation8 + $0xf20] sm:$0xff] }
 0x2eb   :  { %2656 = vmatprep.subr.mxu1 %v1823_v39 }
 0x2ec   :  { %2657 = vmatpush1.msra.mxu1 %v1822_v40  ;;  %v2164_v40 = vadd.f32 %v2163_v32, %v2087_v7 }
 0x2ed   :  { %2658 = vmatprep.subr.mxu1 %v1817_v9  ;;  %v2091_v9 = vadd.f32 %v2090_v22, %v1991_v27  ;;  %v2011_v27 = vrot.slane %v3093_v17, %v697_v60 }
 0x2ee   :  { %2659 = vmatpush1.msra.mxu1 %v1816_v41 }
 0x2ef   :  { %2660 = vmatprep.subr.mxu1 %v1811_v11  ;;  %v2169_v11 = vpop.f32.mrf.mxu0 }
 0x2f0   :  { %2661 = vmatpush1.msra.mxu1 %v1810_v42 }
 0x2f1   :  { %2662 = vmatprep.subr.mxu1 %v1805_v0  ;;  %v2093_v0 = vadd.f32 %v2092_v35, %v1995_v19 }
 0x2f2   :  { %2663 = vmatpush1.msra.mxu1 %v1804_v43  ;;  %v2168_v43 = vadd.f32 %v2167_v37, %v2091_v9 }
 0x2f3   :  { %2664 = vmatprep.subr.mxu1 %v1799_v44 }
 0x2f4   :  { %2665 = vmatpush1.msra.mxu1 %v1798_v3  ;;  %v2170_v3 = vadd.f32 %v2169_v11, %v2093_v0 }
 0x2f5   :  { %2666 = vmatprep.subr.mxu1 %v1985_v56 }
 0x2f6   :  { %2667 = vmatpush2.msra.mxu1 %v1984_v45 }
 0x2f7   :  { %2668 = vmatprep.subr.mxu1 %v1979_v63 }
 0x2f8   :  { %2669 = vmatpush2.msra.mxu1 %v1978_v18  ;;  %v2315_v18 = vpop.f32.mrf.mxu0 }
 0x2f9   :  { %2670 = vmatprep.subr.mxu1 %v1973_v47 }
 0x2fa   :  { %2671 = vmatpush2.msra.mxu1 %v1972_v48  ;;  %v2317_v47 = vpop.f32.mrf.mxu0 }
 0x2fb   :  { %2672 = vmatprep.subr.mxu1 %v1967_v52 }
 0x2fc   :  { %2673 = vmatpush2.msra.mxu1 %v1966_v54  ;;  %v2321_v48 = vpop.f32.mrf.mxu0 }
 0x2fd   :  { %2674 = vmatprep.subr.mxu1 %v1961_v53 }
 0x2fe   :  { %2675 = vmatpush2.msra.mxu1 %v1960_v55  ;;  %v2323_v52 = vpop.f32.mrf.mxu0 }
 0x2ff   :  { %2676 = vmatprep.subr.mxu1 %v1955_v57 }
 0x300   :  { %2677 = vmatpush2.msra.mxu1 %v1954_v58 }
 0x301   :  { %2678 = vmatprep.subr.mxu1 %v1949_v62 }
 0x302   :  { %2679 = vmatpush2.msra.mxu1 %v1948_v1 }
 0x303   :  { %2680 = vmatprep.subr.mxu1 %v1943_v4 }
 0x304   :  { %2681 = vmatpush2.msra.mxu1 %v1942_v5 }
 0x305   :  { %2682 = vmatprep.subr.mxu1 %v1937_v6 }
 0x306   :  { %2683 = vmatpush2.msra.mxu1 %v1936_v12 }
 0x307   :  { %2684 = vmatprep.subr.mxu1 %v1931_v21 }
 0x308   :  { %2685 = vmatpush2.msra.mxu1 %v1930_v15 }
 0x309   :  { %2686 = vmatprep.subr.mxu1 %v1925_v13 }
 0x30a   :  { %2687 = vmatpush2.msra.mxu1 %v1924_v16 }
 0x30b   :  { %2688 = vmatprep.subr.mxu1 %v1919_v51 }
 0x30c   :  { %2689 = vmatpush2.msra.mxu1 %v1918_v10  ;;  %v2007_v10 = vrot.slane %v3093_v17, %v693_v23 }
 0x30d   :  { %2690 = vmatprep.subr.mxu1 %v1913_v24 }
 0x30e   :  { %2691 = vmatpush2.msra.mxu1 %v1912_v28 }
 0x30f   :  { %2692 = vmatprep.subr.mxu1 %v1907_v31 }
 0x310   :  { %2693 = vmatpush2.msra.mxu1 %v1906_v33 }
 0x311   :  { %2694 = vmatprep.subr.mxu1 %v1901_v59 }
 0x312   :  { %2695 = vmatpush2.msra.mxu1 %v1900_v34  ;;  %v2238_v39 = vpop.f32.mrf.mxu1  ;;  %v2469_v54 = vpop.f32.mrf.mxu0 }
 0x313   :  { %2696 = vmatprep.subr.mxu1 %v1895_v25  ;;  %v2239_v61 = vadd.f32 %v2238_v39, %v2162_v36 }
 0x314   :  { %2697 = vmatpush2.msra.mxu1 %v1894_v38  ;;  %v2240_v41 = vpop.f32.mrf.mxu1  ;;  %v2471_v57 = vpop.f32.mrf.mxu0 }
 0x315   :  { %2699 = vmatmul.mubr.f32.vlgmr.msra.gmra.mxu1 %v3066_v8  ;;  %2711 = vst [vmem:[#allocation11] sm:$0xff] %v2239_v61  ;;  %v2241_v42 = vadd.f32 %v2240_v41, %v2164_v40  ;;  %v1999_v8 = vrot.slane %v3093_v17, %v685_v46 }
 0x316   :  { %2704 = vmatprep.mubr.f32.mxu1 %v3072_v26  ;;  %v2003_v26 = vrot.slane %v3093_v17, %v689_v50 }
 0x317   :  { %2712 = vst [vmem:[#allocation11 + $0x8] sm:$0xff] %v2241_v42  ;;  %v2244_v44 = vpop.f32.mrf.mxu1  ;;  %v2316_v53 = vadd.f32 %v2315_v18, %v1999_v8  ;;  %v2322_v5 = vadd.f32 %v2321_v48, %v1999_v8 }
 0x318   :  { %v2245_v56 = vadd.f32 %v2244_v44, %v2168_v43  ;;  %v2324_v46 = vadd.f32 %v2323_v52, %v2003_v26 }
 0x319   :  { %2705 = vmatmul.mubr.f32.gmra.mxu1 %v3074_v29  ;;  %v2246_v45 = vpop.f32.mrf.mxu1  ;;  %v2318_v29 = vadd.f32 %v2317_v47, %v2003_v26  ;;  %v2475_v6 = vpop.f32.mrf.mxu0 }
 0x31a   :  { %2717 = vst [vmem:[#allocation11 + $0x30] sm:$0xff] %v2245_v56  ;;  %v2247_v63 = vadd.f32 %v2246_v45, %v2170_v3 }
 0x31b   :  { %v2477_v16 = vpop.f32.mrf.mxu0 }
 0x31c   :  { %2718 = vst [vmem:[#allocation11 + $0x38] sm:$0xff] %v2247_v63 }
 0x354   :  { %v2392_v55 = vpop.f32.mrf.mxu1 }
 0x355   :  { %v2393_v58 = vadd.f32 %v2392_v55, %v2316_v53 }
 0x356   :  { %v2394_v62 = vpop.f32.mrf.mxu1 }
 0x357   :  { %v2470_v1 = vadd.f32 %v2469_v54, %v2393_v58  ;;  %v2395_v4 = vadd.f32 %v2394_v62, %v2318_v29  ;;  %v2623_v24 = vpop.f32.mrf.mxu0 }
 0x359   :  { %2713 = vst [vmem:[#allocation11 + $0x10] sm:$0xff] %v2470_v1  ;;  %v2472_v12 = vadd.f32 %v2471_v57, %v2395_v4  ;;  %v2398_v14 = vpop.f32.mrf.mxu1  ;;  %v2625_v31 = vpop.f32.mrf.mxu0 }
 0x35a   :  { %v2399_v21 = vadd.f32 %v2398_v14, %v2322_v5 }
 0x35b   :  { %2714 = vst [vmem:[#allocation11 + $0x18] sm:$0xff] %v2472_v12  ;;  %v2400_v15 = vpop.f32.mrf.mxu1  ;;  %v2629_v30 = vpop.f32.mrf.mxu0 }
 0x35c   :  { %v2476_v13 = vadd.f32 %v2475_v6, %v2399_v21  ;;  %v2401_v50 = vadd.f32 %v2400_v15, %v2324_v46 }
 0x35d   :  { %v2631_v38 = vpop.f32.mrf.mxu0 }
 0x35e   :  { %2719 = vst [vmem:[#allocation11 + $0x40] sm:$0xff] %v2476_v13  ;;  %v2478_v20 = vadd.f32 %v2477_v16, %v2401_v50 }
 0x360   :  { %2720 = vst [vmem:[#allocation11 + $0x48] sm:$0xff] %v2478_v20 }
 0x395   :  { %v2546_v51 = vpop.f32.mrf.mxu1 }
 0x396   :  { %v2547_v22 = vadd.f32 %v2546_v51, %v2007_v10 }
 0x397   :  { %v2548_v2 = vpop.f32.mrf.mxu1 }
 0x398   :  { %v2549_v19 = vadd.f32 %v2548_v2, %v2011_v27  ;;  %v2624_v59 = vadd.f32 %v2623_v24, %v2547_v22 }
 0x399   :  { %v2552_v28 = vpop.f32.mrf.mxu1 }
 0x39a   :  { %v2553_v33 = vadd.f32 %v2552_v28, %v2007_v10  ;;  %v2626_v7 = vadd.f32 %v2625_v31, %v2549_v19 }
 0x39b   :  { %v2554_v32 = vpop.f32.mrf.mxu1 }
 0x39c   :  { %v2555_v35 = vadd.f32 %v2554_v32, %v2011_v27  ;;  %v2630_v37 = vadd.f32 %v2629_v30, %v2553_v33 }
 0x39e   :  { %v2632_v17 = vadd.f32 %v2631_v38, %v2555_v35 }
 0x3d5   :  { %v2700_v34 = vpop.f32.mrf.mxu1 }
 0x3d6   :  { %v2701_v25 = vadd.f32 %v2700_v34, %v2624_v59 }
 0x3d7   :  { %v2702_v36 = vpop.f32.mrf.mxu1 }
 0x3d8   :  { %2715 = vst [vmem:[#allocation11 + $0x20] sm:$0xff] %v2701_v25  ;;  %v2703_v23 = vadd.f32 %v2702_v36, %v2626_v7 }
 0x3d9   :  { %v2706_v49 = vpop.f32.mrf.mxu1 }
 0x3da   :  { %2716 = vst [vmem:[#allocation11 + $0x28] sm:$0xff] %v2703_v23  ;;  %v2707_v60 = vadd.f32 %v2706_v49, %v2630_v37 }
 0x3db   :  { %v2708_v39 = vpop.f32.mrf.mxu1 }
 0x3dc   :  { %2721 = vst [vmem:[#allocation11 + $0x50] sm:$0xff] %v2707_v60  ;;  %v2709_v40 = vadd.f32 %v2708_v39, %v2632_v17 }
 0x3de   :  { %2722 = vst [vmem:[#allocation11 + $0x58] sm:$0xff] %v2709_v40 }
 0x3df   :  { %2874 = shalt.err (!%p2871_p1)
}
 0x3e0   :  { %2734 = dma.vmem_to_hbm [thread:$0]  %s2729_s4, 1536, %s3127_s5, [#allocation4], %s2893_s23, %s2893_s23, %s2894_s24  }
 0x3e1   :  { %2889 = dma.done.wait [#allocation4], 1536  }
 0x3e2   :  { %2890 = vsyncadd [#allocation4], 4294965760 }
 0x3e3   :  { %2738 = vsyncpa [#allocation3], 1 }
 0x3e4   :  { %2739 = vsyncpa [#allocation6], 1 }
 0x3e5   :  { %2740 = vsyncpa [#allocation9], 1 }
 0x3e6   :  { %2741 = vsyncpa [#allocation4], 1 }

</bundles_post_ra>
